<compile_context>
chip_gen: v5e
topology: v5e:2x2
jax: 0.10.0
libtpu: 0.0.40
codegen_flags: <defaults>
</compile_context>

<pallas_src>
import functools

import jax
import jax.numpy as jnp
from jax.experimental import pallas as pl
from jax.experimental.pallas import tpu as pltpu

_EPS = 1e-5


def _round_up(x, m):
    return -(-x // m) * m


def _pick_bt(B, L, target_rows=512, min_rows=128):
    """Batch elements per grid step: aim for M = Bt*L in the 128..512 range."""
    bt = max(1, min(B, max(1, target_rows // max(L, 1))))
    while B % bt:
        bt -= 1
    # Prefer >=2 grid steps (v7x: 2 TensorCores) if each step keeps M >= min_rows.
    if B // bt < 2:
        for cand in range(bt - 1, 0, -1):
            if B % cand == 0 and cand * L >= min_rows:
                bt = cand
                break
    return bt


def _conv1d_bn_relu_kernel(x_ref, w_ref, scale_ref, shift_ref, o_ref, *scratch,
                           L, K, pad, relu, bt):
    # x_ref:     (Bt, L, Cin)       bf16 activations (unpadded)
    # w_ref:     (K*Cin, CoutP)     bf16 weights, k-major rows
    # scale_ref: (1, CoutP) f32     gamma / sqrt(var + eps)           (1 if no BN)
    # shift_ref: (1, CoutP) f32     (conv_bias - mean)*scale + beta   (bias if no BN)
    # o_ref:     (Bt, L, CoutP)
    # scratch:   [(Bt, L + 2*pad, Cin) VMEM] when pad > 0
    cin = x_ref.shape[-1]
    if pad > 0:
        xp_ref = scratch[0]
        zeros = jnp.zeros((bt, pad, cin), x_ref.dtype)
        xp_ref[:, :pad, :] = zeros                    # zero halo lives only in VMEM
        xp_ref[:, pad + L:, :] = zeros
        xp_ref[:, pad:pad + L, :] = x_ref[...]
        xp = xp_ref[...]                              # (Bt, L + 2*pad, Cin)
    else:
        xp = x_ref[...]

    # im2col: K shifted views stacked on the lane axis -> contraction = K*Cin.
    parts = [xp[:, k:k + L, :] for k in range(K)]
    slab = parts[0] if K == 1 else jnp.concatenate(parts, axis=-1)   # (Bt, L, K*Cin)

    m = bt * L
    acc = jnp.dot(slab.reshape(m, K * cin), w_ref[...],
                  preferred_element_type=jnp.float32)  # one MXU matmul, (M, CoutP) f32

    y = acc * scale_ref[...] + shift_ref[...]          # f32 epilogue (v5e has no bf16 VPU)
    if relu:
        y = jnp.maximum(y, 0.0)
    o_ref[...] = y.reshape(bt, L, -1).astype(o_ref.dtype)


def conv1d_bn_relu(x_nlc, w2, scale, shift, *, K, pad, relu, out_dtype):
    """Fused Conv1d ('same' zero pad, stride 1) + per-channel affine + optional ReLU."""
    B, L, Cin = x_nlc.shape
    KC, CoutP = w2.shape
    assert KC == K * Cin
    # TODO(synk): only odd K with pad=(K-1)/2 ('same' length) is supported.
    assert 2 * pad == K - 1, "padding must give 'same' output length"

    bt = _pick_bt(B, L)
    grid = (B // bt,)
    scratch = [pltpu.VMEM((bt, L + 2 * pad, Cin), x_nlc.dtype)] if pad > 0 else []
    kern = functools.partial(_conv1d_bn_relu_kernel,
                             L=L, K=K, pad=pad, relu=relu, bt=bt)
    return pl.pallas_call(
        kern,
        out_shape=jax.ShapeDtypeStruct((B, L, CoutP), out_dtype),
        grid_spec=pltpu.PrefetchScalarGridSpec(
            num_scalar_prefetch=0,
            grid=grid,
            in_specs=[
                pl.BlockSpec((bt, L, Cin), lambda b: (b, 0, 0)),
                pl.BlockSpec((KC, CoutP), lambda b: (0, 0)),
                pl.BlockSpec((1, CoutP), lambda b: (0, 0)),
                pl.BlockSpec((1, CoutP), lambda b: (0, 0)),
            ],
            out_specs=pl.BlockSpec((bt, L, CoutP), lambda b: (b, 0, 0)),
            scratch_shapes=scratch,
        ),
        compiler_params=pltpu.CompilerParams(
            dimension_semantics=("parallel",),
            # Blocks are sized well under the 64 MiB/TC budget of v7x; raise the
            # default scoped limit (16/32 MiB on v5e/v6e) so larger batch/L
            # tiles still fit when shapes grow.
            vmem_limit_bytes=48 * 1024 * 1024,
        ),
    )(x_nlc, w2, scale.reshape(1, CoutP), shift.reshape(1, CoutP))


def init_cnn3_params(key, input_channels, output_channels, hidden_channels=None):
    # (cin, cout, kernel_size, padding, has_bn_and_relu) — mirrors CNN3.__init__
    # (hidden_channels is unused, exactly like in the PyTorch module).
    del hidden_channels
    layer_cfg = [
        (input_channels, 512, 11, 5, True),
        (512, 256, 9, 4, True),
        (256, 128, 5, 2, True),
        (128, 128, 1, 0, True),
        (128, output_channels, 7, 3, False),
    ]
    params = []
    for cin, cout, k, pad, has_bn in layer_cfg:
        key, kw, kb = jax.random.split(key, 3)
        bound = 1.0 / (cin * k) ** 0.5                # PyTorch Conv1d default init range
        w = jax.random.uniform(kw, (cout, cin, k), jnp.float32, -bound, bound)
        b = jax.random.uniform(kb, (cout,), jnp.float32, -bound, bound)
        params.append(dict(
            w=w, b=b, k=k, pad=pad, has_bn=has_bn,
            gamma=jnp.ones((cout,), jnp.float32),     # BatchNorm1d default init
            beta=jnp.zeros((cout,), jnp.float32),
            mean=jnp.zeros((cout,), jnp.float32),
            var=jnp.ones((cout,), jnp.float32),
        ))
    return params


def _fold_layer(p, cin_padded):
    """Host-side weight prep: (Cout,Cin,K) -> (K*Cin_pad, CoutP) bf16 + f32 affine.

    Cheap relative to activations; hoist/precompute if calling the forward often.
    """
    cout, cin, K = p["w"].shape
    cout_p = _round_up(cout, 128)                       # lane-dense output columns
    w_kio = jnp.transpose(p["w"], (2, 1, 0))            # (K, Cin, Cout)
    w_kio = jnp.pad(w_kio, ((0, 0), (0, cin_padded - cin), (0, cout_p - cout)))
    w2 = w_kio.reshape(K * cin_padded, cout_p).astype(jnp.bfloat16)
    if p["has_bn"]:
        scale = p["gamma"] / jnp.sqrt(p["var"] + _EPS)
        shift = (p["b"] - p["mean"]) * scale + p["beta"]
        relu = True
    else:
        scale = jnp.ones((cout,), jnp.float32)
        shift = p["b"]
        relu = False
    scale = jnp.pad(scale, (0, cout_p - cout)).astype(jnp.float32)
    shift = jnp.pad(shift, (0, cout_p - cout)).astype(jnp.float32)
    return w2, scale, shift, relu, cout, cout_p


def cnn3_forward(params, x_ncw):
    # TODO(synk): BatchNorm uses eval-mode running statistics; PyTorch
    # train-mode batch statistics are not implemented.
    # NCW -> NLC once at the boundary (touches only the small C_in end);
    # the whole pipeline stays NLC + bf16 between the Pallas layers.
    x = jnp.transpose(x_ncw, (0, 2, 1)).astype(jnp.bfloat16)
    cur_c = x.shape[-1]
    real_c = cur_c
    n = len(params)
    for i, p in enumerate(params):
        w2, scale, shift, relu, cout, cout_p = _fold_layer(p, cur_c)
        out_dtype = jnp.float32 if i == n - 1 else jnp.bfloat16
        x = conv1d_bn_relu(x, w2, scale, shift, K=p["k"], pad=p["pad"],
                           relu=relu, out_dtype=out_dtype)
        cur_c, real_c = cout_p, cout
    return jnp.transpose(x[..., :real_c], (0, 2, 1))    # drop lane padding, NLC -> NCW


def _reference_forward(params, x_ncw):
    # Pure-JAX reference with the same bf16-operand / f32-accumulate numerics.
    x = jnp.transpose(x_ncw, (0, 2, 1)).astype(jnp.bfloat16)
    n = len(params)
    for i, p in enumerate(params):
        w_kio = jnp.transpose(p["w"], (2, 1, 0)).astype(jnp.bfloat16)  # (K,Cin,Cout)
        K, _, Cout = w_kio.shape
        B, L, _ = x.shape
        xp = jnp.pad(x, ((0, 0), (p["pad"], p["pad"]), (0, 0)))
        out = jnp.zeros((B, L, Cout), jnp.float32)
        for k in range(K):
            out = out + jnp.einsum("blc,co->blo", xp[:, k:k + L, :], w_kio[k],
                                   preferred_element_type=jnp.float32)
        if p["has_bn"]:
            scale = p["gamma"] / jnp.sqrt(p["var"] + _EPS)
            out = out * scale + (p["b"] - p["mean"]) * scale + p["beta"]
            out = jnp.maximum(out, 0.0)
        else:
            out = out + p["b"]
        x = out.astype(jnp.float32 if i == n - 1 else jnp.bfloat16)
    return jnp.transpose(x, (0, 2, 1))


if __name__ == "__main__":
    key = jax.random.PRNGKey(0)
    key, kx, kp = jax.random.split(key, 3)

    B, C_in, L = 2, 4, 16
    C_out = 8
    x = jax.random.normal(kx, (B, C_in, L), jnp.float32)       # PyTorch NCW input

    params = init_cnn3_params(kp, input_channels=C_in, output_channels=C_out,
                              hidden_channels=64)

    fwd = jax.jit(lambda inp: cnn3_forward(params, inp))
    y = jax.block_until_ready(fwd(x))

    y_ref = _reference_forward(params, x)
    assert y.shape == (B, C_out, L), y.shape
    err = float(jnp.max(jnp.abs(y - y_ref)))
    assert jnp.allclose(y, y_ref, atol=2e-2, rtol=2e-2), err

    print("KERNEL_OK")
</pallas_src>

<mosaic_0001>
module attributes {stable_mosaic.version = 11 : i64} {
  func.func @_conv1d_bn_relu_kernel(%arg0: i32, %arg1: memref<2x16x4xbf16, #tpu.memory_space<vmem>>, %arg2: memref<44x512xbf16, #tpu.memory_space<vmem>>, %arg3: memref<1x512xf32, #tpu.memory_space<vmem>>, %arg4: memref<1x512xf32, #tpu.memory_space<vmem>>, %arg5: memref<2x16x512xbf16, #tpu.memory_space<vmem>>, %arg6: memref<2x26x4xbf16, #tpu.memory_space<vmem>>) attributes {dimension_semantics = [#tpu.dimension_semantics<parallel>], iteration_bounds = array<i64: 1>, scalar_prefetch = 0 : i64, scratch_operands = 1 : i64, tpu.core_type = #tpu.core_type<tc>, window_params = [{transform_indices = @transform_0, window_bounds = array<i64: 2, 16, 4>}, {pipeline_mode = #tpu.pipeline_mode<synchronous>, transform_indices = @transform_1, window_bounds = array<i64: 44, 512>}, {pipeline_mode = #tpu.pipeline_mode<synchronous>, transform_indices = @transform_2, window_bounds = array<i64: 1, 512>}, {pipeline_mode = #tpu.pipeline_mode<synchronous>, transform_indices = @transform_3, window_bounds = array<i64: 1, 512>}, {transform_indices = @transform_4, window_bounds = array<i64: 2, 16, 512>}]} {
    %cst = arith.constant 0.000000e+00 : bf16
    %0 = vector.broadcast %cst : bf16 to vector<2x5x4xbf16>
    %c0 = arith.constant 0 : index
    %c0_0 = arith.constant 0 : index
    %c0_1 = arith.constant 0 : index
    %1 = vector.load %arg6[%c0, %c0_0, %c0_1] : memref<2x26x4xbf16, #tpu.memory_space<vmem>>, vector<2x5x4xbf16>
    tpu.vector_store %arg6[%c0, %c0_0, %c0_1], %0 {strides = array<i32>} : memref<2x26x4xbf16, #tpu.memory_space<vmem>>, vector<2x5x4xbf16>,
    %c0_2 = arith.constant 0 : index
    %c21 = arith.constant 21 : index
    %c0_3 = arith.constant 0 : index
    %2 = vector.load %arg6[%c0_2, %c21, %c0_3] : memref<2x26x4xbf16, #tpu.memory_space<vmem>>, vector<2x5x4xbf16>
    tpu.vector_store %arg6[%c0_2, %c21, %c0_3], %0 {strides = array<i32>} : memref<2x26x4xbf16, #tpu.memory_space<vmem>>, vector<2x5x4xbf16>,
    %c0_4 = arith.constant 0 : index
    %c0_5 = arith.constant 0 : index
    %c0_6 = arith.constant 0 : index
    %3 = vector.load %arg1[%c0_4, %c0_5, %c0_6] : memref<2x16x4xbf16, #tpu.memory_space<vmem>>, vector<2x16x4xbf16>
    %c0_7 = arith.constant 0 : index
    %c5 = arith.constant 5 : index
    %c0_8 = arith.constant 0 : index
    %4 = vector.load %arg6[%c0_7, %c5, %c0_8] : memref<2x26x4xbf16, #tpu.memory_space<vmem>>, vector<2x16x4xbf16>
    tpu.vector_store %arg6[%c0_7, %c5, %c0_8], %3 {strides = array<i32>} : memref<2x26x4xbf16, #tpu.memory_space<vmem>>, vector<2x16x4xbf16>,
    %c0_9 = arith.constant 0 : index
    %c0_10 = arith.constant 0 : index
    %c0_11 = arith.constant 0 : index
    %5 = vector.load %arg6[%c0_9, %c0_10, %c0_11] : memref<2x26x4xbf16, #tpu.memory_space<vmem>>, vector<2x26x4xbf16>
    %6 = vector.extract_strided_slice %5 {offsets = [0, 0, 0], sizes = [2, 16, 4], strides = [1, 1, 1]} : vector<2x26x4xbf16> to vector<2x16x4xbf16>
    %7 = vector.extract_strided_slice %5 {offsets = [0, 1, 0], sizes = [2, 16, 4], strides = [1, 1, 1]} : vector<2x26x4xbf16> to vector<2x16x4xbf16>
    %8 = vector.extract_strided_slice %5 {offsets = [0, 2, 0], sizes = [2, 16, 4], strides = [1, 1, 1]} : vector<2x26x4xbf16> to vector<2x16x4xbf16>
    %9 = vector.extract_strided_slice %5 {offsets = [0, 3, 0], sizes = [2, 16, 4], strides = [1, 1, 1]} : vector<2x26x4xbf16> to vector<2x16x4xbf16>
    %10 = vector.extract_strided_slice %5 {offsets = [0, 4, 0], sizes = [2, 16, 4], strides = [1, 1, 1]} : vector<2x26x4xbf16> to vector<2x16x4xbf16>
    %11 = vector.extract_strided_slice %5 {offsets = [0, 5, 0], sizes = [2, 16, 4], strides = [1, 1, 1]} : vector<2x26x4xbf16> to vector<2x16x4xbf16>
    %12 = vector.extract_strided_slice %5 {offsets = [0, 6, 0], sizes = [2, 16, 4], strides = [1, 1, 1]} : vector<2x26x4xbf16> to vector<2x16x4xbf16>
    %13 = vector.extract_strided_slice %5 {offsets = [0, 7, 0], sizes = [2, 16, 4], strides = [1, 1, 1]} : vector<2x26x4xbf16> to vector<2x16x4xbf16>
    %14 = vector.extract_strided_slice %5 {offsets = [0, 8, 0], sizes = [2, 16, 4], strides = [1, 1, 1]} : vector<2x26x4xbf16> to vector<2x16x4xbf16>
    %15 = vector.extract_strided_slice %5 {offsets = [0, 9, 0], sizes = [2, 16, 4], strides = [1, 1, 1]} : vector<2x26x4xbf16> to vector<2x16x4xbf16>
    %16 = vector.extract_strided_slice %5 {offsets = [0, 10, 0], sizes = [2, 16, 4], strides = [1, 1, 1]} : vector<2x26x4xbf16> to vector<2x16x4xbf16>
    %17 = tpu.concatenate %6, %7, %8, %9, %10, %11, %12, %13, %14, %15, %16 in 2 : vector<2x16x4xbf16>, vector<2x16x4xbf16>, vector<2x16x4xbf16>, vector<2x16x4xbf16>, vector<2x16x4xbf16>, vector<2x16x4xbf16>, vector<2x16x4xbf16>, vector<2x16x4xbf16>, vector<2x16x4xbf16>, vector<2x16x4xbf16>, vector<2x16x4xbf16> -> vector<2x16x44xbf16>
    %18 = vector.shape_cast %17 : vector<2x16x44xbf16> to vector<32x44xbf16>
    %c0_12 = arith.constant 0 : index
    %c0_13 = arith.constant 0 : index
    %19 = vector.load %arg2[%c0_12, %c0_13] : memref<44x512xbf16, #tpu.memory_space<vmem>>, vector<44x512xbf16>
    %cst_14 = arith.constant dense<0.000000e+00> : vector<32x512xf32>
    %20 = tpu.matmul %18, %19, %cst_14 {dimension_numbers = #tpu.dot_dimension_numbers<[1], [0], [0], [1], [0, 0, 1, 1], [], []>} : vector<32x44xbf16>, vector<44x512xbf16>, vector<32x512xf32> -> vector<32x512xf32>
    %c0_15 = arith.constant 0 : index
    %c0_16 = arith.constant 0 : index
    %21 = vector.load %arg3[%c0_15, %c0_16] : memref<1x512xf32, #tpu.memory_space<vmem>>, vector<1x512xf32>
    %22 = vector.broadcast %21 : vector<1x512xf32> to vector<32x512xf32>
    %23 = arith.mulf %20, %22 : vector<32x512xf32>
    %c0_17 = arith.constant 0 : index
    %c0_18 = arith.constant 0 : index
    %24 = vector.load %arg4[%c0_17, %c0_18] : memref<1x512xf32, #tpu.memory_space<vmem>>, vector<1x512xf32>
    %25 = vector.broadcast %24 : vector<1x512xf32> to vector<32x512xf32>
    %26 = arith.addf %23, %25 : vector<32x512xf32>
    %cst_19 = arith.constant 0.000000e+00 : f32
    %27 = vector.broadcast %cst_19 : f32 to vector<32x512xf32>
    %28 = arith.maximumf %26, %27 : vector<32x512xf32>
    %29 = vector.shape_cast %28 : vector<32x512xf32> to vector<2x16x512xf32>
    %30 = arith.truncf %29 : vector<2x16x512xf32> to vector<2x16x512xbf16>
    %c0_20 = arith.constant 0 : index
    %c0_21 = arith.constant 0 : index
    %c0_22 = arith.constant 0 : index
    %31 = vector.load %arg5[%c0_20, %c0_21, %c0_22] : memref<2x16x512xbf16, #tpu.memory_space<vmem>>, vector<2x16x512xbf16>
    tpu.vector_store %arg5[%c0_20, %c0_21, %c0_22], %30 {strides = array<i32>} : memref<2x16x512xbf16, #tpu.memory_space<vmem>>, vector<2x16x512xbf16>,
    return
  }
  func.func @transform_0(%arg0: i32) -> (i32, i32, i32) {
    %c0_i32 = arith.constant 0 : i32
    %c0_i32_0 = arith.constant 0 : i32
    %c0_i32_1 = arith.constant 0 : i32
    return %arg0, %c0_i32, %c0_i32_0 : i32, i32, i32
  }
  func.func @transform_1(%arg0: i32) -> (i32, i32) {
    %c0_i32 = arith.constant 0 : i32
    %c0_i32_0 = arith.constant 0 : i32
    %c0_i32_1 = arith.constant 0 : i32
    return %c0_i32, %c0_i32_0 : i32, i32
  }
  func.func @transform_2(%arg0: i32) -> (i32, i32) {
    %c0_i32 = arith.constant 0 : i32
    %c0_i32_0 = arith.constant 0 : i32
    %c0_i32_1 = arith.constant 0 : i32
    return %c0_i32, %c0_i32_0 : i32, i32
  }
  func.func @transform_3(%arg0: i32) -> (i32, i32) {
    %c0_i32 = arith.constant 0 : i32
    %c0_i32_0 = arith.constant 0 : i32
    %c0_i32_1 = arith.constant 0 : i32
    return %c0_i32, %c0_i32_0 : i32, i32
  }
  func.func @transform_4(%arg0: i32) -> (i32, i32, i32) {
    %c0_i32 = arith.constant 0 : i32
    %c0_i32_0 = arith.constant 0 : i32
    %c0_i32_1 = arith.constant 0 : i32
    return %arg0, %c0_i32, %c0_i32_0 : i32, i32, i32
  }
}

module attributes {stable_mosaic.version = 11 : i64} {
  func.func @_conv1d_bn_relu_kernel(%arg0: i32, %arg1: memref<2x16x256xbf16, #tpu.memory_space<vmem>>, %arg2: memref<1280x128xbf16, #tpu.memory_space<vmem>>, %arg3: memref<1x128xf32, #tpu.memory_space<vmem>>, %arg4: memref<1x128xf32, #tpu.memory_space<vmem>>, %arg5: memref<2x16x128xbf16, #tpu.memory_space<vmem>>, %arg6: memref<2x20x256xbf16, #tpu.memory_space<vmem>>) attributes {dimension_semantics = [#tpu.dimension_semantics<parallel>], iteration_bounds = array<i64: 1>, scalar_prefetch = 0 : i64, scratch_operands = 1 : i64, tpu.core_type = #tpu.core_type<tc>, window_params = [{transform_indices = @transform_0, window_bounds = array<i64: 2, 16, 256>}, {pipeline_mode = #tpu.pipeline_mode<synchronous>, transform_indices = @transform_1, window_bounds = array<i64: 1280, 128>}, {pipeline_mode = #tpu.pipeline_mode<synchronous>, transform_indices = @transform_2, window_bounds = array<i64: 1, 128>}, {pipeline_mode = #tpu.pipeline_mode<synchronous>, transform_indices = @transform_3, window_bounds = array<i64: 1, 128>}, {transform_indices = @transform_4, window_bounds = array<i64: 2, 16, 128>}]} {
    %cst = arith.constant 0.000000e+00 : bf16
    %0 = vector.broadcast %cst : bf16 to vector<2x2x256xbf16>
    %c0 = arith.constant 0 : index
    %c0_0 = arith.constant 0 : index
    %c0_1 = arith.constant 0 : index
    %1 = vector.load %arg6[%c0, %c0_0, %c0_1] : memref<2x20x256xbf16, #tpu.memory_space<vmem>>, vector<2x2x256xbf16>
    tpu.vector_store %arg6[%c0, %c0_0, %c0_1], %0 {strides = array<i32>} : memref<2x20x256xbf16, #tpu.memory_space<vmem>>, vector<2x2x256xbf16>,
    %c0_2 = arith.constant 0 : index
    %c18 = arith.constant 18 : index
    %c0_3 = arith.constant 0 : index
    %2 = vector.load %arg6[%c0_2, %c18, %c0_3] : memref<2x20x256xbf16, #tpu.memory_space<vmem>>, vector<2x2x256xbf16>
    tpu.vector_store %arg6[%c0_2, %c18, %c0_3], %0 {strides = array<i32>} : memref<2x20x256xbf16, #tpu.memory_space<vmem>>, vector<2x2x256xbf16>,
    %c0_4 = arith.constant 0 : index
    %c0_5 = arith.constant 0 : index
    %c0_6 = arith.constant 0 : index
    %3 = vector.load %arg1[%c0_4, %c0_5, %c0_6] : memref<2x16x256xbf16, #tpu.memory_space<vmem>>, vector<2x16x256xbf16>
    %c0_7 = arith.constant 0 : index
    %c2 = arith.constant 2 : index
    %c0_8 = arith.constant 0 : index
    %4 = vector.load %arg6[%c0_7, %c2, %c0_8] : memref<2x20x256xbf16, #tpu.memory_space<vmem>>, vector<2x16x256xbf16>
    tpu.vector_store %arg6[%c0_7, %c2, %c0_8], %3 {strides = array<i32>} : memref<2x20x256xbf16, #tpu.memory_space<vmem>>, vector<2x16x256xbf16>,
    %c0_9 = arith.constant 0 : index
    %c0_10 = arith.constant 0 : index
    %c0_11 = arith.constant 0 : index
    %5 = vector.load %arg6[%c0_9, %c0_10, %c0_11] : memref<2x20x256xbf16, #tpu.memory_space<vmem>>, vector<2x20x256xbf16>
    %6 = vector.extract_strided_slice %5 {offsets = [0, 0, 0], sizes = [2, 16, 256], strides = [1, 1, 1]} : vector<2x20x256xbf16> to vector<2x16x256xbf16>
    %7 = vector.extract_strided_slice %5 {offsets = [0, 1, 0], sizes = [2, 16, 256], strides = [1, 1, 1]} : vector<2x20x256xbf16> to vector<2x16x256xbf16>
    %8 = vector.extract_strided_slice %5 {offsets = [0, 2, 0], sizes = [2, 16, 256], strides = [1, 1, 1]} : vector<2x20x256xbf16> to vector<2x16x256xbf16>
    %9 = vector.extract_strided_slice %5 {offsets = [0, 3, 0], sizes = [2, 16, 256], strides = [1, 1, 1]} : vector<2x20x256xbf16> to vector<2x16x256xbf16>
    %10 = vector.extract_strided_slice %5 {offsets = [0, 4, 0], sizes = [2, 16, 256], strides = [1, 1, 1]} : vector<2x20x256xbf16> to vector<2x16x256xbf16>
    %11 = tpu.concatenate %6, %7, %8, %9, %10 in 2 : vector<2x16x256xbf16>, vector<2x16x256xbf16>, vector<2x16x256xbf16>, vector<2x16x256xbf16>, vector<2x16x256xbf16> -> vector<2x16x1280xbf16>
    %12 = vector.shape_cast %11 : vector<2x16x1280xbf16> to vector<32x1280xbf16>
    %c0_12 = arith.constant 0 : index
    %c0_13 = arith.constant 0 : index
    %13 = vector.load %arg2[%c0_12, %c0_13] : memref<1280x128xbf16, #tpu.memory_space<vmem>>, vector<1280x128xbf16>
    %cst_14 = arith.constant dense<0.000000e+00> : vector<32x128xf32>
    %14 = tpu.matmul %12, %13, %cst_14 {dimension_numbers = #tpu.dot_dimension_numbers<[1], [0], [0], [1], [0, 0, 1, 1], [], []>} : vector<32x1280xbf16>, vector<1280x128xbf16>, vector<32x128xf32> -> vector<32x128xf32>
    %c0_15 = arith.constant 0 : index
    %c0_16 = arith.constant 0 : index
    %15 = vector.load %arg3[%c0_15, %c0_16] : memref<1x128xf32, #tpu.memory_space<vmem>>, vector<1x128xf32>
    %16 = vector.broadcast %15 : vector<1x128xf32> to vector<32x128xf32>
    %17 = arith.mulf %14, %16 : vector<32x128xf32>
    %c0_17 = arith.constant 0 : index
    %c0_18 = arith.constant 0 : index
    %18 = vector.load %arg4[%c0_17, %c0_18] : memref<1x128xf32, #tpu.memory_space<vmem>>, vector<1x128xf32>
    %19 = vector.broadcast %18 : vector<1x128xf32> to vector<32x128xf32>
    %20 = arith.addf %17, %19 : vector<32x128xf32>
    %cst_19 = arith.constant 0.000000e+00 : f32
    %21 = vector.broadcast %cst_19 : f32 to vector<32x128xf32>
    %22 = arith.maximumf %20, %21 : vector<32x128xf32>
    %23 = vector.shape_cast %22 : vector<32x128xf32> to vector<2x16x128xf32>
    %24 = arith.truncf %23 : vector<2x16x128xf32> to vector<2x16x128xbf16>
    %c0_20 = arith.constant 0 : index
    %c0_21 = arith.constant 0 : index
    %c0_22 = arith.constant 0 : index
    %25 = vector.load %arg5[%c0_20, %c0_21, %c0_22] : memref<2x16x128xbf16, #tpu.memory_space<vmem>>, vector<2x16x128xbf16>
    tpu.vector_store %arg5[%c0_20, %c0_21, %c0_22], %24 {strides = array<i32>} : memref<2x16x128xbf16, #tpu.memory_space<vmem>>, vector<2x16x128xbf16>,
    return
  }
  func.func @transform_0(%arg0: i32) -> (i32, i32, i32) {
    %c0_i32 = arith.constant 0 : i32
    %c0_i32_0 = arith.constant 0 : i32
    %c0_i32_1 = arith.constant 0 : i32
    return %arg0, %c0_i32, %c0_i32_0 : i32, i32, i32
  }
  func.func @transform_1(%arg0: i32) -> (i32, i32) {
    %c0_i32 = arith.constant 0 : i32
    %c0_i32_0 = arith.constant 0 : i32
    %c0_i32_1 = arith.constant 0 : i32
    return %c0_i32, %c0_i32_0 : i32, i32
  }
  func.func @transform_2(%arg0: i32) -> (i32, i32) {
    %c0_i32 = arith.constant 0 : i32
    %c0_i32_0 = arith.constant 0 : i32
    %c0_i32_1 = arith.constant 0 : i32
    return %c0_i32, %c0_i32_0 : i32, i32
  }
  func.func @transform_3(%arg0: i32) -> (i32, i32) {
    %c0_i32 = arith.constant 0 : i32
    %c0_i32_0 = arith.constant 0 : i32
    %c0_i32_1 = arith.constant 0 : i32
    return %c0_i32, %c0_i32_0 : i32, i32
  }
  func.func @transform_4(%arg0: i32) -> (i32, i32, i32) {
    %c0_i32 = arith.constant 0 : i32
    %c0_i32_0 = arith.constant 0 : i32
    %c0_i32_1 = arith.constant 0 : i32
    return %arg0, %c0_i32, %c0_i32_0 : i32, i32, i32
  }
}

module attributes {stable_mosaic.version = 11 : i64} {
  func.func @_conv1d_bn_relu_kernel(%arg0: i32, %arg1: memref<2x16x128xbf16, #tpu.memory_space<vmem>>, %arg2: memref<128x128xbf16, #tpu.memory_space<vmem>>, %arg3: memref<1x128xf32, #tpu.memory_space<vmem>>, %arg4: memref<1x128xf32, #tpu.memory_space<vmem>>, %arg5: memref<2x16x128xbf16, #tpu.memory_space<vmem>>) attributes {dimension_semantics = [#tpu.dimension_semantics<parallel>], iteration_bounds = array<i64: 1>, scalar_prefetch = 0 : i64, scratch_operands = 0 : i64, tpu.core_type = #tpu.core_type<tc>, window_params = [{transform_indices = @transform_0, window_bounds = array<i64: 2, 16, 128>}, {pipeline_mode = #tpu.pipeline_mode<synchronous>, transform_indices = @transform_1, window_bounds = array<i64: 128, 128>}, {pipeline_mode = #tpu.pipeline_mode<synchronous>, transform_indices = @transform_2, window_bounds = array<i64: 1, 128>}, {pipeline_mode = #tpu.pipeline_mode<synchronous>, transform_indices = @transform_3, window_bounds = array<i64: 1, 128>}, {transform_indices = @transform_4, window_bounds = array<i64: 2, 16, 128>}]} {
    %c0 = arith.constant 0 : index
    %c0_0 = arith.constant 0 : index
    %c0_1 = arith.constant 0 : index
    %0 = vector.load %arg1[%c0, %c0_0, %c0_1] : memref<2x16x128xbf16, #tpu.memory_space<vmem>>, vector<2x16x128xbf16>
    %1 = vector.shape_cast %0 : vector<2x16x128xbf16> to vector<32x128xbf16>
    %c0_2 = arith.constant 0 : index
    %c0_3 = arith.constant 0 : index
    %2 = vector.load %arg2[%c0_2, %c0_3] : memref<128x128xbf16, #tpu.memory_space<vmem>>, vector<128x128xbf16>
    %cst = arith.constant dense<0.000000e+00> : vector<32x128xf32>
    %3 = tpu.matmul %1, %2, %cst {dimension_numbers = #tpu.dot_dimension_numbers<[1], [0], [0], [1], [0, 0, 1, 1], [], []>} : vector<32x128xbf16>, vector<128x128xbf16>, vector<32x128xf32> -> vector<32x128xf32>
    %c0_4 = arith.constant 0 : index
    %c0_5 = arith.constant 0 : index
    %4 = vector.load %arg3[%c0_4, %c0_5] : memref<1x128xf32, #tpu.memory_space<vmem>>, vector<1x128xf32>
    %5 = vector.broadcast %4 : vector<1x128xf32> to vector<32x128xf32>
    %6 = arith.mulf %3, %5 : vector<32x128xf32>
    %c0_6 = arith.constant 0 : index
    %c0_7 = arith.constant 0 : index
    %7 = vector.load %arg4[%c0_6, %c0_7] : memref<1x128xf32, #tpu.memory_space<vmem>>, vector<1x128xf32>
    %8 = vector.broadcast %7 : vector<1x128xf32> to vector<32x128xf32>
    %9 = arith.addf %6, %8 : vector<32x128xf32>
    %cst_8 = arith.constant 0.000000e+00 : f32
    %10 = vector.broadcast %cst_8 : f32 to vector<32x128xf32>
    %11 = arith.maximumf %9, %10 : vector<32x128xf32>
    %12 = vector.shape_cast %11 : vector<32x128xf32> to vector<2x16x128xf32>
    %13 = arith.truncf %12 : vector<2x16x128xf32> to vector<2x16x128xbf16>
    %c0_9 = arith.constant 0 : index
    %c0_10 = arith.constant 0 : index
    %c0_11 = arith.constant 0 : index
    %14 = vector.load %arg5[%c0_9, %c0_10, %c0_11] : memref<2x16x128xbf16, #tpu.memory_space<vmem>>, vector<2x16x128xbf16>
    tpu.vector_store %arg5[%c0_9, %c0_10, %c0_11], %13 {strides = array<i32>} : memref<2x16x128xbf16, #tpu.memory_space<vmem>>, vector<2x16x128xbf16>,
    return
  }
  func.func @transform_0(%arg0: i32) -> (i32, i32, i32) {
    %c0_i32 = arith.constant 0 : i32
    %c0_i32_0 = arith.constant 0 : i32
    %c0_i32_1 = arith.constant 0 : i32
    return %arg0, %c0_i32, %c0_i32_0 : i32, i32, i32
  }
  func.func @transform_1(%arg0: i32) -> (i32, i32) {
    %c0_i32 = arith.constant 0 : i32
    %c0_i32_0 = arith.constant 0 : i32
    %c0_i32_1 = arith.constant 0 : i32
    return %c0_i32, %c0_i32_0 : i32, i32
  }
  func.func @transform_2(%arg0: i32) -> (i32, i32) {
    %c0_i32 = arith.constant 0 : i32
    %c0_i32_0 = arith.constant 0 : i32
    %c0_i32_1 = arith.constant 0 : i32
    return %c0_i32, %c0_i32_0 : i32, i32
  }
  func.func @transform_3(%arg0: i32) -> (i32, i32) {
    %c0_i32 = arith.constant 0 : i32
    %c0_i32_0 = arith.constant 0 : i32
    %c0_i32_1 = arith.constant 0 : i32
    return %c0_i32, %c0_i32_0 : i32, i32
  }
  func.func @transform_4(%arg0: i32) -> (i32, i32, i32) {
    %c0_i32 = arith.constant 0 : i32
    %c0_i32_0 = arith.constant 0 : i32
    %c0_i32_1 = arith.constant 0 : i32
    return %arg0, %c0_i32, %c0_i32_0 : i32, i32, i32
  }
}

module attributes {stable_mosaic.version = 11 : i64} {
  func.func @_conv1d_bn_relu_kernel(%arg0: i32, %arg1: memref<2x16x512xbf16, #tpu.memory_space<vmem>>, %arg2: memref<4608x256xbf16, #tpu.memory_space<vmem>>, %arg3: memref<1x256xf32, #tpu.memory_space<vmem>>, %arg4: memref<1x256xf32, #tpu.memory_space<vmem>>, %arg5: memref<2x16x256xbf16, #tpu.memory_space<vmem>>, %arg6: memref<2x24x512xbf16, #tpu.memory_space<vmem>>) attributes {dimension_semantics = [#tpu.dimension_semantics<parallel>], iteration_bounds = array<i64: 1>, scalar_prefetch = 0 : i64, scratch_operands = 1 : i64, tpu.core_type = #tpu.core_type<tc>, window_params = [{transform_indices = @transform_0, window_bounds = array<i64: 2, 16, 512>}, {pipeline_mode = #tpu.pipeline_mode<synchronous>, transform_indices = @transform_1, window_bounds = array<i64: 4608, 256>}, {pipeline_mode = #tpu.pipeline_mode<synchronous>, transform_indices = @transform_2, window_bounds = array<i64: 1, 256>}, {pipeline_mode = #tpu.pipeline_mode<synchronous>, transform_indices = @transform_3, window_bounds = array<i64: 1, 256>}, {transform_indices = @transform_4, window_bounds = array<i64: 2, 16, 256>}]} {
    %cst = arith.constant 0.000000e+00 : bf16
    %0 = vector.broadcast %cst : bf16 to vector<2x4x512xbf16>
    %c0 = arith.constant 0 : index
    %c0_0 = arith.constant 0 : index
    %c0_1 = arith.constant 0 : index
    %1 = vector.load %arg6[%c0, %c0_0, %c0_1] : memref<2x24x512xbf16, #tpu.memory_space<vmem>>, vector<2x4x512xbf16>
    tpu.vector_store %arg6[%c0, %c0_0, %c0_1], %0 {strides = array<i32>} : memref<2x24x512xbf16, #tpu.memory_space<vmem>>, vector<2x4x512xbf16>,
    %c0_2 = arith.constant 0 : index
    %c20 = arith.constant 20 : index
    %c0_3 = arith.constant 0 : index
    %2 = vector.load %arg6[%c0_2, %c20, %c0_3] : memref<2x24x512xbf16, #tpu.memory_space<vmem>>, vector<2x4x512xbf16>
    tpu.vector_store %arg6[%c0_2, %c20, %c0_3], %0 {strides = array<i32>} : memref<2x24x512xbf16, #tpu.memory_space<vmem>>, vector<2x4x512xbf16>,
    %c0_4 = arith.constant 0 : index
    %c0_5 = arith.constant 0 : index
    %c0_6 = arith.constant 0 : index
    %3 = vector.load %arg1[%c0_4, %c0_5, %c0_6] : memref<2x16x512xbf16, #tpu.memory_space<vmem>>, vector<2x16x512xbf16>
    %c0_7 = arith.constant 0 : index
    %c4 = arith.constant 4 : index
    %c0_8 = arith.constant 0 : index
    %4 = vector.load %arg6[%c0_7, %c4, %c0_8] : memref<2x24x512xbf16, #tpu.memory_space<vmem>>, vector<2x16x512xbf16>
    tpu.vector_store %arg6[%c0_7, %c4, %c0_8], %3 {strides = array<i32>} : memref<2x24x512xbf16, #tpu.memory_space<vmem>>, vector<2x16x512xbf16>,
    %c0_9 = arith.constant 0 : index
    %c0_10 = arith.constant 0 : index
    %c0_11 = arith.constant 0 : index
    %5 = vector.load %arg6[%c0_9, %c0_10, %c0_11] : memref<2x24x512xbf16, #tpu.memory_space<vmem>>, vector<2x24x512xbf16>
    %6 = vector.extract_strided_slice %5 {offsets = [0, 0, 0], sizes = [2, 16, 512], strides = [1, 1, 1]} : vector<2x24x512xbf16> to vector<2x16x512xbf16>
    %7 = vector.extract_strided_slice %5 {offsets = [0, 1, 0], sizes = [2, 16, 512], strides = [1, 1, 1]} : vector<2x24x512xbf16> to vector<2x16x512xbf16>
    %8 = vector.extract_strided_slice %5 {offsets = [0, 2, 0], sizes = [2, 16, 512], strides = [1, 1, 1]} : vector<2x24x512xbf16> to vector<2x16x512xbf16>
    %9 = vector.extract_strided_slice %5 {offsets = [0, 3, 0], sizes = [2, 16, 512], strides = [1, 1, 1]} : vector<2x24x512xbf16> to vector<2x16x512xbf16>
    %10 = vector.extract_strided_slice %5 {offsets = [0, 4, 0], sizes = [2, 16, 512], strides = [1, 1, 1]} : vector<2x24x512xbf16> to vector<2x16x512xbf16>
    %11 = vector.extract_strided_slice %5 {offsets = [0, 5, 0], sizes = [2, 16, 512], strides = [1, 1, 1]} : vector<2x24x512xbf16> to vector<2x16x512xbf16>
    %12 = vector.extract_strided_slice %5 {offsets = [0, 6, 0], sizes = [2, 16, 512], strides = [1, 1, 1]} : vector<2x24x512xbf16> to vector<2x16x512xbf16>
    %13 = vector.extract_strided_slice %5 {offsets = [0, 7, 0], sizes = [2, 16, 512], strides = [1, 1, 1]} : vector<2x24x512xbf16> to vector<2x16x512xbf16>
    %14 = vector.extract_strided_slice %5 {offsets = [0, 8, 0], sizes = [2, 16, 512], strides = [1, 1, 1]} : vector<2x24x512xbf16> to vector<2x16x512xbf16>
    %15 = tpu.concatenate %6, %7, %8, %9, %10, %11, %12, %13, %14 in 2 : vector<2x16x512xbf16>, vector<2x16x512xbf16>, vector<2x16x512xbf16>, vector<2x16x512xbf16>, vector<2x16x512xbf16>, vector<2x16x512xbf16>, vector<2x16x512xbf16>, vector<2x16x512xbf16>, vector<2x16x512xbf16> -> vector<2x16x4608xbf16>
    %16 = vector.shape_cast %15 : vector<2x16x4608xbf16> to vector<32x4608xbf16>
    %c0_12 = arith.constant 0 : index
    %c0_13 = arith.constant 0 : index
    %17 = vector.load %arg2[%c0_12, %c0_13] : memref<4608x256xbf16, #tpu.memory_space<vmem>>, vector<4608x256xbf16>
    %cst_14 = arith.constant dense<0.000000e+00> : vector<32x256xf32>
    %18 = tpu.matmul %16, %17, %cst_14 {dimension_numbers = #tpu.dot_dimension_numbers<[1], [0], [0], [1], [0, 0, 1, 1], [], []>} : vector<32x4608xbf16>, vector<4608x256xbf16>, vector<32x256xf32> -> vector<32x256xf32>
    %c0_15 = arith.constant 0 : index
    %c0_16 = arith.constant 0 : index
    %19 = vector.load %arg3[%c0_15, %c0_16] : memref<1x256xf32, #tpu.memory_space<vmem>>, vector<1x256xf32>
    %20 = vector.broadcast %19 : vector<1x256xf32> to vector<32x256xf32>
    %21 = arith.mulf %18, %20 : vector<32x256xf32>
    %c0_17 = arith.constant 0 : index
    %c0_18 = arith.constant 0 : index
    %22 = vector.load %arg4[%c0_17, %c0_18] : memref<1x256xf32, #tpu.memory_space<vmem>>, vector<1x256xf32>
    %23 = vector.broadcast %22 : vector<1x256xf32> to vector<32x256xf32>
    %24 = arith.addf %21, %23 : vector<32x256xf32>
    %cst_19 = arith.constant 0.000000e+00 : f32
    %25 = vector.broadcast %cst_19 : f32 to vector<32x256xf32>
    %26 = arith.maximumf %24, %25 : vector<32x256xf32>
    %27 = vector.shape_cast %26 : vector<32x256xf32> to vector<2x16x256xf32>
    %28 = arith.truncf %27 : vector<2x16x256xf32> to vector<2x16x256xbf16>
    %c0_20 = arith.constant 0 : index
    %c0_21 = arith.constant 0 : index
    %c0_22 = arith.constant 0 : index
    %29 = vector.load %arg5[%c0_20, %c0_21, %c0_22] : memref<2x16x256xbf16, #tpu.memory_space<vmem>>, vector<2x16x256xbf16>
    tpu.vector_store %arg5[%c0_20, %c0_21, %c0_22], %28 {strides = array<i32>} : memref<2x16x256xbf16, #tpu.memory_space<vmem>>, vector<2x16x256xbf16>,
    return
  }
  func.func @transform_0(%arg0: i32) -> (i32, i32, i32) {
    %c0_i32 = arith.constant 0 : i32
    %c0_i32_0 = arith.constant 0 : i32
    %c0_i32_1 = arith.constant 0 : i32
    return %arg0, %c0_i32, %c0_i32_0 : i32, i32, i32
  }
  func.func @transform_1(%arg0: i32) -> (i32, i32) {
    %c0_i32 = arith.constant 0 : i32
    %c0_i32_0 = arith.constant 0 : i32
    %c0_i32_1 = arith.constant 0 : i32
    return %c0_i32, %c0_i32_0 : i32, i32
  }
  func.func @transform_2(%arg0: i32) -> (i32, i32) {
    %c0_i32 = arith.constant 0 : i32
    %c0_i32_0 = arith.constant 0 : i32
    %c0_i32_1 = arith.constant 0 : i32
    return %c0_i32, %c0_i32_0 : i32, i32
  }
  func.func @transform_3(%arg0: i32) -> (i32, i32) {
    %c0_i32 = arith.constant 0 : i32
    %c0_i32_0 = arith.constant 0 : i32
    %c0_i32_1 = arith.constant 0 : i32
    return %c0_i32, %c0_i32_0 : i32, i32
  }
  func.func @transform_4(%arg0: i32) -> (i32, i32, i32) {
    %c0_i32 = arith.constant 0 : i32
    %c0_i32_0 = arith.constant 0 : i32
    %c0_i32_1 = arith.constant 0 : i32
    return %arg0, %c0_i32, %c0_i32_0 : i32, i32, i32
  }
}

module attributes {stable_mosaic.version = 11 : i64} {
  func.func @_conv1d_bn_relu_kernel(%arg0: i32, %arg1: memref<2x16x128xbf16, #tpu.memory_space<vmem>>, %arg2: memref<896x128xbf16, #tpu.memory_space<vmem>>, %arg3: memref<1x128xf32, #tpu.memory_space<vmem>>, %arg4: memref<1x128xf32, #tpu.memory_space<vmem>>, %arg5: memref<2x16x128xf32, #tpu.memory_space<vmem>>, %arg6: memref<2x22x128xbf16, #tpu.memory_space<vmem>>) attributes {dimension_semantics = [#tpu.dimension_semantics<parallel>], iteration_bounds = array<i64: 1>, scalar_prefetch = 0 : i64, scratch_operands = 1 : i64, tpu.core_type = #tpu.core_type<tc>, window_params = [{transform_indices = @transform_0, window_bounds = array<i64: 2, 16, 128>}, {pipeline_mode = #tpu.pipeline_mode<synchronous>, transform_indices = @transform_1, window_bounds = array<i64: 896, 128>}, {pipeline_mode = #tpu.pipeline_mode<synchronous>, transform_indices = @transform_2, window_bounds = array<i64: 1, 128>}, {pipeline_mode = #tpu.pipeline_mode<synchronous>, transform_indices = @transform_3, window_bounds = array<i64: 1, 128>}, {transform_indices = @transform_4, window_bounds = array<i64: 2, 16, 128>}]} {
    %cst = arith.constant 0.000000e+00 : bf16
    %0 = vector.broadcast %cst : bf16 to vector<2x3x128xbf16>
    %c0 = arith.constant 0 : index
    %c0_0 = arith.constant 0 : index
    %c0_1 = arith.constant 0 : index
    %1 = vector.load %arg6[%c0, %c0_0, %c0_1] : memref<2x22x128xbf16, #tpu.memory_space<vmem>>, vector<2x3x128xbf16>
    tpu.vector_store %arg6[%c0, %c0_0, %c0_1], %0 {strides = array<i32>} : memref<2x22x128xbf16, #tpu.memory_space<vmem>>, vector<2x3x128xbf16>,
    %c0_2 = arith.constant 0 : index
    %c19 = arith.constant 19 : index
    %c0_3 = arith.constant 0 : index
    %2 = vector.load %arg6[%c0_2, %c19, %c0_3] : memref<2x22x128xbf16, #tpu.memory_space<vmem>>, vector<2x3x128xbf16>
    tpu.vector_store %arg6[%c0_2, %c19, %c0_3], %0 {strides = array<i32>} : memref<2x22x128xbf16, #tpu.memory_space<vmem>>, vector<2x3x128xbf16>,
    %c0_4 = arith.constant 0 : index
    %c0_5 = arith.constant 0 : index
    %c0_6 = arith.constant 0 : index
    %3 = vector.load %arg1[%c0_4, %c0_5, %c0_6] : memref<2x16x128xbf16, #tpu.memory_space<vmem>>, vector<2x16x128xbf16>
    %c0_7 = arith.constant 0 : index
    %c3 = arith.constant 3 : index
    %c0_8 = arith.constant 0 : index
    %4 = vector.load %arg6[%c0_7, %c3, %c0_8] : memref<2x22x128xbf16, #tpu.memory_space<vmem>>, vector<2x16x128xbf16>
    tpu.vector_store %arg6[%c0_7, %c3, %c0_8], %3 {strides = array<i32>} : memref<2x22x128xbf16, #tpu.memory_space<vmem>>, vector<2x16x128xbf16>,
    %c0_9 = arith.constant 0 : index
    %c0_10 = arith.constant 0 : index
    %c0_11 = arith.constant 0 : index
    %5 = vector.load %arg6[%c0_9, %c0_10, %c0_11] : memref<2x22x128xbf16, #tpu.memory_space<vmem>>, vector<2x22x128xbf16>
    %6 = vector.extract_strided_slice %5 {offsets = [0, 0, 0], sizes = [2, 16, 128], strides = [1, 1, 1]} : vector<2x22x128xbf16> to vector<2x16x128xbf16>
    %7 = vector.extract_strided_slice %5 {offsets = [0, 1, 0], sizes = [2, 16, 128], strides = [1, 1, 1]} : vector<2x22x128xbf16> to vector<2x16x128xbf16>
    %8 = vector.extract_strided_slice %5 {offsets = [0, 2, 0], sizes = [2, 16, 128], strides = [1, 1, 1]} : vector<2x22x128xbf16> to vector<2x16x128xbf16>
    %9 = vector.extract_strided_slice %5 {offsets = [0, 3, 0], sizes = [2, 16, 128], strides = [1, 1, 1]} : vector<2x22x128xbf16> to vector<2x16x128xbf16>
    %10 = vector.extract_strided_slice %5 {offsets = [0, 4, 0], sizes = [2, 16, 128], strides = [1, 1, 1]} : vector<2x22x128xbf16> to vector<2x16x128xbf16>
    %11 = vector.extract_strided_slice %5 {offsets = [0, 5, 0], sizes = [2, 16, 128], strides = [1, 1, 1]} : vector<2x22x128xbf16> to vector<2x16x128xbf16>
    %12 = vector.extract_strided_slice %5 {offsets = [0, 6, 0], sizes = [2, 16, 128], strides = [1, 1, 1]} : vector<2x22x128xbf16> to vector<2x16x128xbf16>
    %13 = tpu.concatenate %6, %7, %8, %9, %10, %11, %12 in 2 : vector<2x16x128xbf16>, vector<2x16x128xbf16>, vector<2x16x128xbf16>, vector<2x16x128xbf16>, vector<2x16x128xbf16>, vector<2x16x128xbf16>, vector<2x16x128xbf16> -> vector<2x16x896xbf16>
    %14 = vector.shape_cast %13 : vector<2x16x896xbf16> to vector<32x896xbf16>
    %c0_12 = arith.constant 0 : index
    %c0_13 = arith.constant 0 : index
    %15 = vector.load %arg2[%c0_12, %c0_13] : memref<896x128xbf16, #tpu.memory_space<vmem>>, vector<896x128xbf16>
    %cst_14 = arith.constant dense<0.000000e+00> : vector<32x128xf32>
    %16 = tpu.matmul %14, %15, %cst_14 {dimension_numbers = #tpu.dot_dimension_numbers<[1], [0], [0], [1], [0, 0, 1, 1], [], []>} : vector<32x896xbf16>, vector<896x128xbf16>, vector<32x128xf32> -> vector<32x128xf32>
    %c0_15 = arith.constant 0 : index
    %c0_16 = arith.constant 0 : index
    %17 = vector.load %arg3[%c0_15, %c0_16] : memref<1x128xf32, #tpu.memory_space<vmem>>, vector<1x128xf32>
    %18 = vector.broadcast %17 : vector<1x128xf32> to vector<32x128xf32>
    %19 = arith.mulf %16, %18 : vector<32x128xf32>
    %c0_17 = arith.constant 0 : index
    %c0_18 = arith.constant 0 : index
    %20 = vector.load %arg4[%c0_17, %c0_18] : memref<1x128xf32, #tpu.memory_space<vmem>>, vector<1x128xf32>
    %21 = vector.broadcast %20 : vector<1x128xf32> to vector<32x128xf32>
    %22 = arith.addf %19, %21 : vector<32x128xf32>
    %23 = vector.shape_cast %22 : vector<32x128xf32> to vector<2x16x128xf32>
    %c0_19 = arith.constant 0 : index
    %c0_20 = arith.constant 0 : index
    %c0_21 = arith.constant 0 : index
    %24 = vector.load %arg5[%c0_19, %c0_20, %c0_21] : memref<2x16x128xf32, #tpu.memory_space<vmem>>, vector<2x16x128xf32>
    tpu.vector_store %arg5[%c0_19, %c0_20, %c0_21], %23 {strides = array<i32>} : memref<2x16x128xf32, #tpu.memory_space<vmem>>, vector<2x16x128xf32>,
    return
  }
  func.func @transform_0(%arg0: i32) -> (i32, i32, i32) {
    %c0_i32 = arith.constant 0 : i32
    %c0_i32_0 = arith.constant 0 : i32
    %c0_i32_1 = arith.constant 0 : i32
    return %arg0, %c0_i32, %c0_i32_0 : i32, i32, i32
  }
  func.func @transform_1(%arg0: i32) -> (i32, i32) {
    %c0_i32 = arith.constant 0 : i32
    %c0_i32_0 = arith.constant 0 : i32
    %c0_i32_1 = arith.constant 0 : i32
    return %c0_i32, %c0_i32_0 : i32, i32
  }
  func.func @transform_2(%arg0: i32) -> (i32, i32) {
    %c0_i32 = arith.constant 0 : i32
    %c0_i32_0 = arith.constant 0 : i32
    %c0_i32_1 = arith.constant 0 : i32
    return %c0_i32, %c0_i32_0 : i32, i32
  }
  func.func @transform_3(%arg0: i32) -> (i32, i32) {
    %c0_i32 = arith.constant 0 : i32
    %c0_i32_0 = arith.constant 0 : i32
    %c0_i32_1 = arith.constant 0 : i32
    return %c0_i32, %c0_i32_0 : i32, i32
  }
  func.func @transform_4(%arg0: i32) -> (i32, i32, i32) {
    %c0_i32 = arith.constant 0 : i32
    %c0_i32_0 = arith.constant 0 : i32
    %c0_i32_1 = arith.constant 0 : i32
    return %arg0, %c0_i32, %c0_i32_0 : i32, i32, i32
  }
}

</mosaic_0001>

<bundles_post_ra>
// kernel: _lambda_.8
= control target key start
LH: loop header
LB: loop body
LE: loop exit
PB: predicated region body
PF: predicated region fallthrough
CT: control target
= control target key end

     0   :  { %9 = vsyncpa [#allocation3], 0  ;;  %s357_s0 = inlined_call_operand.vmem [shape: bf16[2,16,128], index: 0, kind: input, shape index: {}]   ;;  %s358_s1 = inlined_call_operand.hbm [shape: bf16[128,128], index: 1, kind: input, shape index: {}]   ;;  %s359_s2 = inlined_call_operand.vmem [shape: f32[1,128], index: 2, kind: input, shape index: {}]   ;;  %s360_s3 = inlined_call_operand.hbm [shape: f32[1,128], index: 3, kind: input, shape index: {}]   ;;  %s361_s4 = inlined_call_operand.vmem [shape: bf16[2,16,128], index: 4, kind: output, shape index: {}]  }
   0x1   :  { %s17_s17 = sshll.u32 %s358_s1, 4  ;;  %s18_s17 = int_to_ptr.hbm [resolvable:$true] %s17_s17 }
   0x2   :  { %10 = vsyncpa [#allocation5], 0  ;;  %s307_s18 = smov [#allocation2]   ;;  %s33_s22 = sshll.u32 %s360_s3, 4  ;;  %s34_s22 = int_to_ptr.hbm [resolvable:$true] %s33_s22 }
   0x3   :  { %s19_s19 = sshll.u32 %s307_s18, 4  ;;  %s308_s23 = smov 64   ;;  %s20_s19 = int_to_ptr.vmem [resolvable:$true] %s19_s19 }
   0x4   :  { %s309_s24 = smov 4   ;;  %s310_s25 = smov [#allocation4]  }
   0x5   :  { %25 = dma.hbm_to_vmem [thread:$0]  %s18_s17, 1024, %s20_s19, [#allocation3], %s308_s23, %s308_s23, %s309_s24  }
   0x6   :  { %s35_s26 = sshll.u32 %s310_s25, 4  ;;  %s36_s26 = int_to_ptr.vmem [resolvable:$true] %s35_s26 }
   0x7   :  { %38 = dma.hbm_to_vmem [thread:$0]  %s34_s22, 16, %s36_s26, [#allocation5]  }
   0x8   :  { %303 = dma.done.wait [#allocation3], 1024  }
   0x9   :  { %304 = vsyncadd [#allocation3], 4294966272 }
   0xa   :  { %305 = dma.done.wait [#allocation5], 16  }
   0xb   :  { %306 = vsyncadd [#allocation5], 4294967280  ;;  %v229_v0 = vld [vmem:[#allocation2 + $0x38] sm:$0xff]  ;;  %v228_v1 = vld [vmem:[#allocation2 + $0x30] sm:$0xff] }
   0xc   :  { %127 = vmatpush.bf16.msra.mxu0 %v229_v0  ;;  %241 = vmatpush.bf16.msra.mxu1 %v229_v0  ;;  %v227_v2 = vld [vmem:[#allocation2 + $0x28] sm:$0xff]  ;;  %v226_v3 = vld [vmem:[#allocation2 + $0x20] sm:$0xff]  ;;  %v225_v4 = vld [vmem:[#allocation2 + $0x18] sm:$0xff] }
   0xd   :  { %v224_v5 = vld [vmem:[#allocation2 + $0x10] sm:$0xff]  ;;  %v223_v6 = vld [vmem:[#allocation2 + $0x8] sm:$0xff]  ;;  %v222_v7 = vld [vmem:[#allocation2] sm:$0xff] }
   0xe   :  { %v220_v8 = vld [vmem:[%s357_s0] sm:$0xff]  ;;  %v221_v9 = vld [vmem:[%s357_s0 + $0x8] sm:$0xff] }
   0xf   :  { %v253_v12 = vld [vmem:[%s359_s2] ss:$0 sm:$0xff] }
  0x10   :  { %128 = vmatpush.bf16.msra.mxu0 %v228_v1  ;;  %242 = vmatpush.bf16.msra.mxu1 %v228_v1  ;;  %v254_v14 = vld [vmem:[#allocation4] ss:$0 sm:$0xff] }
  0x14   :  { %129 = vmatpush.bf16.msra.mxu0 %v227_v2  ;;  %243 = vmatpush.bf16.msra.mxu1 %v227_v2 }
  0x18   :  { %130 = vmatpush.bf16.msra.mxu0 %v226_v3  ;;  %244 = vmatpush.bf16.msra.mxu1 %v226_v3 }
  0x1c   :  { %131 = vmatpush.bf16.msra.mxu0 %v225_v4  ;;  %245 = vmatpush.bf16.msra.mxu1 %v225_v4 }
  0x20   :  { %132 = vmatpush.bf16.msra.mxu0 %v224_v5  ;;  %246 = vmatpush.bf16.msra.mxu1 %v224_v5 }
  0x24   :  { %133 = vmatpush.bf16.msra.mxu0 %v223_v6  ;;  %247 = vmatpush.bf16.msra.mxu1 %v223_v6 }
  0x28   :  { %134 = vmatpush.bf16.msra.mxu0 %v222_v7  ;;  %248 = vmatpush.bf16.msra.mxu1 %v222_v7 }
  0x2b   :  { %135 = vmatmul.bf16.vlgmr.msra.gmra.mxu0 %v220_v8  ;;  %140 = vmatmul.bf16.vlgmr.msra.gmra.mxu1 %v221_v9 }
  0xa8   :  { %v136_v10 = vpop.f32.mrf.mxu0  ;;  %v141_v11 = vpop.f32.mrf.mxu1 }
  0xa9   :  { %v150_v13 = vmul.f32 %v253_v12, %v136_v10  ;;  %v152_v15 = vmul.f32 %v253_v12, %v141_v11 }
  0xab   :  { %v158_v18 = vadd.f32 %v254_v14, %v150_v13  ;;  %v160_v19 = vadd.f32 %v254_v14, %v152_v15 }
  0xad   :  { %v162_v24 = vmax.f32 %v158_v18, 0.0  ;;  %v164_v25 = vmax.f32 %v160_v19, 0.0 }
  0xb0   :  { %v138_v16 = vpop.f32.mrf.mxu0  ;;  %v143_v17 = vpop.f32.mrf.mxu1 }
  0xb1   :  { %v151_v20 = vmul.f32 %v253_v12, %v138_v16  ;;  %v153_v21 = vmul.f32 %v253_v12, %v143_v17 }
  0xb3   :  { %v159_v22 = vadd.f32 %v254_v14, %v151_v20  ;;  %v161_v23 = vadd.f32 %v254_v14, %v153_v21 }
  0xb5   :  { %v163_v26 = vmax.f32 %v159_v22, 0.0  ;;  %v165_v27 = vmax.f32 %v161_v23, 0.0 }
  0xb7   :  { %v233_v28 = vpack.c.bf16 %v163_v26, %v162_v24  ;;  %v238_v29 = vpack.c.bf16 %v165_v27, %v164_v25 }
  0xb9   :  { %234 = vst [vmem:[%s361_s4] sm:$0xff] %v233_v28  }
  0xba   :  { %240 = vst [vmem:[%s361_s4 + $0x8] sm:$0xff] %v238_v29  }
  0xbb   :  { %178 = vsyncpa [#allocation3], 1 }
  0xbc   :  { %179 = vsyncpa [#allocation5], 1 }

// kernel: _lambda_.5
= control target key start
LH: loop header
LB: loop body
LE: loop exit
PB: predicated region body
PF: predicated region fallthrough
CT: control target
= control target key end

     0   :  { %9 = vsyncpa [#allocation4], 0  ;;  %s1072_s0 = inlined_call_operand.vmem [shape: bf16[2,16,4], index: 0, kind: input, shape index: {}]   ;;  %s1073_s1 = inlined_call_operand.hbm [shape: bf16[44,512], index: 1, kind: input, shape index: {}]   ;;  %s1074_s2 = inlined_call_operand.vmem [shape: f32[1,512], index: 2, kind: input, shape index: {}]   ;;  %s1075_s3 = inlined_call_operand.hbm [shape: f32[1,512], index: 3, kind: input, shape index: {}]   ;;  %s1076_s4 = inlined_call_operand.vmem [shape: bf16[2,16,512], index: 4, kind: output, shape index: {}]  }
   0x1   :  { %s17_s17 = sshll.u32 %s1073_s1, 4  ;;  %s18_s17 = int_to_ptr.hbm [resolvable:$true] %s17_s17 }
   0x2   :  { %10 = vsyncpa [#allocation6], 0  ;;  %s776_s18 = smov [#allocation3]   ;;  %s33_s22 = sshll.u32 %s1075_s3, 4  ;;  %s34_s22 = int_to_ptr.hbm [resolvable:$true] %s33_s22 }
   0x3   :  { %s19_s19 = sshll.u32 %s776_s18, 4  ;;  %s777_s23 = smov 256   ;;  %s20_s19 = int_to_ptr.vmem [resolvable:$true] %s19_s19 }
   0x4   :  { %s778_s24 = smov 16   ;;  %s779_s25 = smov [#allocation5]  }
   0x5   :  { %25 = dma.hbm_to_vmem [thread:$0]  %s18_s17, 1536, %s20_s19, [#allocation4], %s777_s23, %s777_s23, %s778_s24  }
   0x6   :  { %s35_s26 = sshll.u32 %s779_s25, 4  ;;  %s36_s26 = int_to_ptr.vmem [resolvable:$true] %s35_s26 }
   0x7   :  { %38 = dma.hbm_to_vmem [thread:$0]  %s34_s22, 64, %s36_s26, [#allocation6]  }
   0x8   :  { %772 = dma.done.wait [#allocation4], 1536  }
   0x9   :  { %773 = vsyncadd [#allocation4], 4294965760 }
   0xa   :  { %774 = dma.done.wait [#allocation6], 64  }
   0xb   :  { %775 = vsyncadd [#allocation6], 4294967232  ;;  %vm48_vm0 = vcmask 26624   ;;  %vm49_vm1 = vsmask.f32 2304  ;;  %vm57_vm2 = vcmask 27650  }
   0xc   :  { %vm58_vm3 = vsmask.f32 7946  ;;  %vm63_vm4 = vcmask 24576   ;;  %v780_v0 = vmov 0   ;;  %vm823_vm5 = vmand %vm48_vm0, %vm49_vm1  ;;  %vm73_vm7 = vsmask.f32 6416 }
   0xd   :  { %64 = vst.msk [vmem:[#allocation2 + $0xc] sm:$0x1] %vm63_vm4, %v780_v0  ;;  %vm827_vm6 = vmand %vm57_vm2, %vm58_vm3  ;;  %v51_v3 = vld [vmem:[#allocation2] sm:$0x7]  ;;  %v54_v4 = vld [vmem:[#allocation2 + $0x10] sm:$0x7] }
   0xe   :  { %68 = vst.msk [vmem:[#allocation2 + $0x1c] sm:$0x1] %vm63_vm4, %v780_v0  ;;  %v60_v5 = vld [vmem:[#allocation2 + $0x8] sm:$0xc]  ;;  %v52_v6 = vsel %vm823_vm5, 0, %v51_v3  ;;  %v55_v7 = vsel %vm823_vm5, 0, %v54_v4  ;;  %vm853_vm8 = vmor %vm49_vm1, %vm73_vm7 }
   0xf   :  { %v61_v8 = vsel %vm827_vm6, 0, %v60_v5  ;;  %v65_v9 = vld [vmem:[#allocation2 + $0x18] sm:$0xc]  ;;  %53 = vst [vmem:[#allocation2] sm:$0x7] %v52_v6  ;;  %vm122_vm9 = vcmask 27648  }
  0x10   :  { %v66_v10 = vsel %vm827_vm6, 0, %v65_v9  ;;  %v69_v11 = vld [vmem:[%s1072_s0] sm:$0xf]  ;;  %56 = vst [vmem:[#allocation2 + $0x10] sm:$0x7] %v55_v7  ;;  %vm187_vm10 = vcmask 1046528  }
  0x11   :  { %v70_v12 = vld [vmem:[%s1072_s0 + $0x4] sm:$0xf]  ;;  %v71_v13 = vld [vmem:[%s1072_s0 + $0x8] sm:$0xf]  ;;  %62 = vst [vmem:[#allocation2 + $0x8] sm:$0xc] %v61_v8 }
  0x12   :  { %v72_v14 = vld [vmem:[%s1072_s0 + $0xc] sm:$0xf]  ;;  %v76_v15 = vshrl.u32 %v69_v11, 16  ;;  %v79_v16 = vshll.u32 %v69_v11, 16  ;;  %67 = vst [vmem:[#allocation2 + $0x18] sm:$0xc] %v66_v10 }
  0x13   :  { %v85_v17 = vshrl.u32 %v70_v12, 16  ;;  %v88_v18 = vshll.u32 %v70_v12, 16  ;;  %v95_v19 = vshrl.u32 %v71_v13, 16  ;;  %v98_v20 = vshll.u32 %v71_v13, 16  ;;  %s781_s0 = smov 32   ;;  %s782_s7 = smov 8  }
  0x14   :  { %v78_v21 = vrot.slane %v76_v15, 5  ;;  %v81_v22 = vrot.slane %v79_v16, 6  ;;  %v104_v23 = vshrl.u32 %v72_v14, 16  ;;  %v107_v24 = vshll.u32 %v72_v14, 16  ;;  %v137_v50 = vld [vmem:[#allocation2 + $0xc] sm:$0x1] }
  0x15   :  { %v87_v25 = vrot.slane %v85_v17, 5  ;;  %v90_v26 = vrot.slane %v88_v18, 6  ;;  %v97_v27 = vrot.slane %v95_v19, 5  ;;  %v100_v28 = vrot.slane %v98_v20, 6  ;;  %s783_s8 = smov 24   ;;  %s784_s9 = smov 40  }
  0x16   :  { %v82_v29 = vor.u32 %v81_v22, %v78_v21  ;;  %v106_v30 = vrot.slane %v104_v23, 5  ;;  %v109_v31 = vrot.slane %v107_v24, 6  ;;  %v119_v35 = vld [vmem:[#allocation2] sm:$0xc]  ;;  %v289_v55 = vunpack.c.l.b16 %v137_v50  ;;  %s785_s10 = smov 4   ;;  %s786_s11 = smov 20  }
  0x17   :  { %v91_v33 = vor.u32 %v90_v26, %v87_v25  ;;  %v101_v34 = vor.u32 %v100_v28, %v97_v27  ;;  %v127_v39 = vld [vmem:[#allocation2 + $0x10] sm:$0xc]  ;;  %vm221_vm11 = vcmask 1045504   ;;  %vm251_vm12 = vcmask 1044480   ;;  %s787_s12 = smov 12   ;;  %s788_s13 = smov 28  }
  0x18   :  { %v83_v36 = vrot.slane %v82_v29, 4  ;;  %v110_v37 = vor.u32 %v109_v31, %v106_v30  ;;  %v120_v38 = vsel %vm827_vm6, %v82_v29, %v119_v35  ;;  %v124_v42 = vld [vmem:[#allocation2 + $0x8] sm:$0x7]  ;;  %v883_v63 = vpack.c.b16 %v289_v55, %v289_v55  ;;  %s789_s14 = smov 36  }
  0x19   :  { %v93_v40 = vrot.slane %v91_v33, 4  ;;  %v102_v41 = vrot.slane %v101_v34, 4  ;;  %121 = vst [vmem:[#allocation2] sm:$0xc] %v120_v38  ;;  %v128_v43 = vsel %vm827_vm6, %v101_v34, %v127_v39  ;;  %v131_v46 = vld [vmem:[#allocation2 + $0x18] sm:$0x7] }
  0x1a   :  { %v92_v44 = vsel %vm853_vm8, %v83_v36, %v91_v33  ;;  %v112_v45 = vrot.slane %v110_v37, 4  ;;  %129 = vst [vmem:[#allocation2 + $0x10] sm:$0xc] %v128_v43  ;;  %v322_v8 = vrot.slane %v883_v63, 1  ;;  %vm158_vm13 = vsmask.f32 7424 }
  0x1b   :  { %v111_v47 = vsel %vm853_vm8, %v102_v41, %v110_v37  ;;  %123 = vst.msk [vmem:[#allocation2 + $0x4] sm:$0xf] %vm122_vm9, %v92_v44  ;;  %v125_v48 = vsel %vm823_vm5, %v93_v40, %v124_v42  ;;  %vm232_vm14 = vsmask.f32 5376  ;;  %vm198_vm15 = vsmask.f32 6400 }
  0x1c   :  { %126 = vst [vmem:[#allocation2 + $0x8] sm:$0x7] %v125_v48  ;;  %v132_v49 = vsel %vm823_vm5, %v112_v45, %v131_v46  ;;  %vm262_vm0 = vsmask.f32 4352  ;;  %vm331_vm1 = vcmask 31744   ;;  %vm341_vm2 = vcmask 97280  }
  0x1d   :  { %130 = vst.msk [vmem:[#allocation2 + $0x14] sm:$0xf] %vm122_vm9, %v111_v47  ;;  %vm336_vm3 = vcmask 64512   ;;  %vm346_vm4 = vcmask 130048   ;;  %vm351_vm5 = vcmask 162816   ;;  %vm356_vm6 = vcmask 195584  }
  0x1e   :  { %133 = vst [vmem:[#allocation2 + $0x18] sm:$0x7] %v132_v49  ;;  %vm361_vm7 = vcmask 228352   ;;  %vm366_vm8 = vcmask 261120   ;;  %vm371_vm9 = vcmask 293888  }
  0x22   :  { %v871_v51 = vld [vmem:[#allocation2] sm:$0xff]  }
  0x23   :  { %v704_v52 = vunpack.c.h.b16 %v871_v51  ;;  %v136_v53 = vld [vmem:[#allocation2 + $0x8] sm:$0xf]  ;;  %v188_v59 = vrot.slane %v871_v51, 1  ;;  %v222_v0 = vrot.slane %v871_v51, 2  ;;  %v252_v5 = vrot.slane %v871_v51, 3 }
  0x24   :  { %v154_v54 = vunpack.c.l.b16 %v136_v53  ;;  %v877_v60 = vld [vmem:[#allocation2 + $0x10] sm:$0xff]   ;;  %v162_v6 = vshll.u32 %v871_v51, 16  ;;  %v160_v15 = vshrl.u32 %v871_v51, 16  ;;  %v301_v53 = vshll.u32 %v883_v63, 16 }
  0x25   :  { %v140_v56 = vld [vmem:[#allocation2 + $0x18] sm:$0xf]  ;;  %v891_v3 = vshll.u32 %v877_v60, 16  ;;  %v901_v11 = vshrl.u32 %v877_v60, 16  ;;  %v191_v19 = vrot.slane %v877_v60, 1 }
  0x26   :  { %v156_v57 = vpack.c.b16 %v154_v54, %v154_v54  ;;  %v874_v58 = vpack.c.b16 %v154_v54, %v704_v52  ;;  %v879_v61 = vunpack.c.l.b16 %v140_v56  ;;  %v164_v16 = vrot.slane %v162_v6, 1 }
  0x27   :  { %v176_v12 = vrot.slane %v891_v3, 1  ;;  %v199_v26 = vrot.slane %v160_v15, 1  ;;  %v200_v27 = vrot.slane %v162_v6, 2  ;;  %v233_v30 = vrot.slane %v160_v15, 2 }
  0x28   :  { %283 = vrot.lane.b32.xlu1 %v874_v58, %s781_s0  ;;  %v189_v62 = vrot.slane %v156_v57, 1  ;;  %v223_v1 = vrot.slane %v156_v57, 2  ;;  %v888_v2 = vpack.c.b16 %v879_v61, %v879_v61  ;;  %v321_v7 = vrot.slane %v874_v58, 1 }
  0x29   :  { %v253_v9 = vrot.slane %v156_v57, 3  ;;  %v167_v17 = vshll.u32 %v156_v57, 16  ;;  %v177_v21 = vor.u32 %v176_v12, %v901_v11  ;;  %v202_v23 = vshrl.u32 %v156_v57, 16 }
  0x2a   :  { %v190_v4 = vsel %vm187_vm10, %v188_v59, %v189_v62  ;;  %v224_v10 = vsel %vm221_vm11, %v222_v0, %v223_v1  ;;  %v905_v13 = vshll.u32 %v888_v2, 16  ;;  %v323_v18 = vsel %vm187_vm10, %v321_v7, %v322_v8 }
  0x2b   :  { %194 = vrot.lane.b32.xlu0 %v190_v4, %s782_s7  ;;  %v254_v14 = vsel %vm251_vm12, %v252_v5, %v253_v9  ;;  %v192_v20 = vrot.slane %v888_v2, 1  ;;  %v165_v24 = vor.u32 %v164_v16, %v160_v15  ;;  %v169_v25 = vrot.slane %v167_v17, 1 }
  0x2c   :  { %258 = vrot.lane.b32.xlu2 %v254_v14, %s783_s8  ;;  %v181_v22 = vrot.slane %v905_v13, 1  ;;  %v205_v28 = vrot.slane %v167_v17, 2  ;;  %v234_v31 = vrot.slane %v162_v6, 3  ;;  %v204_v33 = vrot.slane %v202_v23, 1 }
  0x2d   :  { %v193_v29 = vsel %vm187_vm10, %v191_v19, %v192_v20  ;;  %v236_v34 = vrot.slane %v202_v23, 2  ;;  %v237_v35 = vrot.slane %v167_v17, 3  ;;  %v263_v36 = vrot.slane %v160_v15, 3  ;;  %v141_v19 = vld [vmem:[#allocation2 + $0x1c] sm:$0x1] }
  0x2e   :  { %v182_v32 = vsel %vm158_vm13, %v177_v21, %v181_v22  ;;  %v264_v37 = vrot.slane %v162_v6, 4  ;;  %v266_v38 = vrot.slane %v202_v23, 3  ;;  %v267_v39 = vrot.slane %v167_v17, 4 }
  0x2f   :  { %v170_v40 = vsel %vm158_vm13, %v165_v24, %v169_v25  ;;  %v235_v41 = vor.u32 %v234_v31, %v233_v30  ;;  %v238_v42 = vor.u32 %v237_v35, %v236_v34  ;;  %v296_v43 = vshll.u32 %v874_v58, 16 }
  0x30   :  { %228 = vrot.lane.b32.xlu1 %v224_v10, %s778_s24  ;;  %v201_v44 = vor.u32 %v200_v27, %v199_v26  ;;  %v206_v45 = vor.u32 %v205_v28, %v204_v33  ;;  %v265_v46 = vor.u32 %v264_v37, %v263_v36  ;;  %v268_v47 = vor.u32 %v267_v39, %v266_v38  ;;  %v667_v38 = vld [vmem:[#allocation3 + $0x40] sm:$0xf]  ;;  %v699_v39 = vld [vmem:[#allocation3 + $0x4c] sm:$0x30] }
  0x31   :  { %v211_v48 = vshrl.u32 %v888_v2, 16  ;;  %v239_v49 = vsel %vm232_vm14, %v235_v41, %v238_v42  ;;  %v294_v50 = vshrl.u32 %v874_v58, 16  ;;  %v298_v52 = vrot.slane %v296_v43, 1  ;;  %v669_v42 = vld [vmem:[#allocation3 + $0x50] sm:$0x30] }
  0x32   :  { %v207_v54 = vsel %vm198_vm15, %v201_v44, %v206_v45  ;;  %v208_v55 = vrot.slane %v901_v11, 1  ;;  %v209_v56 = vrot.slane %v891_v3, 2  ;;  %v214_v59 = vrot.slane %v905_v13, 2  ;;  %v675_v43 = vld [vmem:[#allocation3 + $0x48] sm:$0xf] }
  0x33   :  { %327 = vrot.lane.b32.xlu0 %v323_v18, %s784_s9  ;;  %v213_v57 = vrot.slane %v211_v48, 1  ;;  %v225_v62 = vrot.slane %v877_v60, 2  ;;  %v226_v0 = vrot.slane %v888_v2, 2  ;;  %v269_v58 = vsel %vm262_vm0, %v265_v46, %v268_v47  ;;  %v700_v44 = vld [vmem:[#allocation3 + $0x54] sm:$0x30] }
  0x34   :  { %196 = vrot.lane.b32.xlu2 %v193_v29, %s782_s7  ;;  %v299_v63 = vor.u32 %v298_v52, %v294_v50  ;;  %v303_v1 = vrot.slane %v301_v53, 1  ;;  %v210_v4 = vor.u32 %v209_v56, %v208_v55  ;;  %v708_v7 = vunpack.c.h.b16 %v877_v60  ;;  %v698_v47 = vld [vmem:[#allocation3 + $0x4c] sm:$0xf]  ;;  %v651_v55 = vld [vmem:[#allocation3 + $0x20] sm:$0xf] }
  0x35   :  { %v215_v5 = vor.u32 %v214_v59, %v213_v57  ;;  %v227_v6 = vsel %vm221_vm11, %v225_v62, %v226_v0  ;;  %v240_v8 = vrot.slane %v901_v11, 2  ;;  %v241_v10 = vrot.slane %v891_v3, 3  ;;  %v695_v56 = vld [vmem:[#allocation3 + $0x2c] sm:$0xf0]  ;;  %v693_v59 = vld [vmem:[#allocation3 + $0x24] sm:$0xf] }
  0x36   :  { %v304_v9 = vsel %vm158_vm13, %v299_v63, %v303_v1  ;;  %v243_v12 = vrot.slane %v211_v48, 2  ;;  %v244_v14 = vrot.slane %v905_v13, 3  ;;  %v270_v15 = vrot.slane %v901_v11, 3  ;;  %v653_v62 = vld [vmem:[#allocation3 + $0x30] sm:$0xf0] }
  0x37   :  { %v271_v16 = vrot.slane %v891_v3, 4  ;;  %v273_v17 = vrot.slane %v211_v48, 3  ;;  %v274_v18 = vrot.slane %v905_v13, 4  ;;  %v216_v20 = vsel %vm198_vm15, %v210_v4, %v215_v5  ;;  %v677_v48 = vld [vmem:[#allocation3 + $0x58] sm:$0x30] }
  0x38   :  { %185 = vrot.lane.b32.xlu1 %v182_v32, %s785_s10  ;;  %v282_v21 = vpack.c.b16 %v879_v61, %v708_v7  ;;  %v290_v22 = vunpack.c.l.b16 %v141_v19  ;;  %v242_v23 = vor.u32 %v241_v10, %v240_v8  ;;  %v245_v24 = vor.u32 %v244_v14, %v243_v12  ;;  %v659_v0 = vld [vmem:[#allocation3 + $0x28] sm:$0xf]  ;;  %v696_v63 = vld [vmem:[#allocation3 + $0x34] sm:$0xf0]  ;;  %v694_v1 = vld [vmem:[#allocation3 + $0x2c] sm:$0xf] }
  0x39   :  { %v272_v25 = vor.u32 %v271_v16, %v270_v15  ;;  %v275_v11 = vor.u32 %v274_v18, %v273_v17  ;;  %v255_v3 = vrot.slane %v877_v60, 3  ;;  %v256_v13 = vrot.slane %v888_v2, 3  ;;  %v661_v4 = vld [vmem:[#allocation3 + $0x38] sm:$0xf0]  ;;  %v635_v7 = vld [vmem:[#allocation3] sm:$0xf] }
  0x3a   :  { %v292_v26 = vpack.c.b16 %v290_v22, %v290_v22  ;;  %v308_v27 = vshll.u32 %v282_v21, 16  ;;  %v246_v28 = vsel %vm232_vm14, %v242_v23, %v245_v24  ;;  %v306_v30 = vshrl.u32 %v282_v21, 16  ;;  %v691_v8 = vld [vmem:[#allocation3 + $0xc] sm:$0xf0]  ;;  %v689_v10 = vld [vmem:[#allocation3 + $0x4] sm:$0xf] }
  0x3b   :  { %183 = vrot.lane.b32.xlu0 %v170_v40, %s785_s10  ;;  %v276_v29 = vsel %vm262_vm0, %v272_v25, %v275_v11  ;;  %v257_v61 = vsel %vm251_vm12, %v255_v3, %v256_v13  ;;  %v324_v33 = vrot.slane %v282_v21, 1  ;;  %v697_v40 = vld [vmem:[#allocation3 + $0x44] sm:$0xf]  ;;  %v668_v41 = vor.u32 %v699_v39, %v667_v38  ;;  %v637_v12 = vld [vmem:[#allocation3 + $0x10] sm:$0xf0] }
  0x3c   :  { %247 = vrot.lane.b32.xlu2 %v239_v49, %s786_s11  ;;  %v310_v31 = vrot.slane %v308_v27, 1  ;;  %v313_v32 = vshll.u32 %v292_v26, 16  ;;  %v325_v34 = vrot.slane %v292_v26, 1  ;;  %v672_v45 = vor.u32 %v697_v40, %v669_v42  ;;  %v643_v15 = vld [vmem:[#allocation3 + $0x8] sm:$0xf] }
  0x3d   :  { %v676_v46 = vor.u32 %v700_v44, %v675_v43  ;;  %v456_v49 = vsel %vm221_vm11, %v668_v41, 0  ;;  %v680_v50 = vor.u32 %v698_v47, %v677_v48  ;;  %v652_v57 = vor.u32 %v695_v56, %v651_v55  ;;  %v692_v16 = vld [vmem:[#allocation3 + $0x14] sm:$0xf0]  ;;  %v690_v19 = vld [vmem:[#allocation3 + $0xc] sm:$0xf] }
  0x3e   :  { %v311_v2 = vor.u32 %v310_v31, %v306_v30  ;;  %v315_v35 = vrot.slane %v313_v32, 1  ;;  %v326_v36 = vsel %vm187_vm10, %v324_v33, %v325_v34  ;;  %472 = vmatpush.bf16.msra.mxu0 %v456_v49  ;;  %v459_v52 = vsel %vm221_vm11, %v672_v45, 0  ;;  %v543_v55 = vld [vmem:[%s1074_s2] sm:$0xf] }
  0x3f   :  { %v462_v53 = vsel %vm221_vm11, %v676_v46, 0  ;;  %491 = vmatpush.bf16.msra.mxu1 %v459_v52  ;;  %v660_v5 = vor.u32 %v696_v63, %v659_v0  ;;  %v640_v14 = vor.u32 %v689_v10, %v637_v12  ;;  %v644_v18 = vor.u32 %v692_v16, %v643_v15  ;;  %v569_v56 = vld [vmem:[#allocation5] sm:$0xf] }
  0x40   :  { %217 = vrot.lane.b32.xlu1 %v207_v54, %s787_s12  ;;  %v316_v37 = vsel %vm158_vm13, %v311_v2, %v315_v35  ;;  %510 = vmatpush.bf16.msra.mxu2 %v462_v53  ;;  %v465_v54 = vsel %vm221_vm11, %v680_v50, 0  ;;  %vm376_vm10 = vcmask 326656   ;;  %vm449_vm11 = vcmask 359424  }
  0x41   :  { %529 = vmatpush.bf16.msra.mxu3 %v465_v54  ;;  %v1006_v0 = vperm.slane %v569_v56, 1  ;;  %v1016_v12 = vperm.slane %v569_v56, 2 }
  0x42   :  { %473 = vmatpush.bf16.msra.mxu0 %v652_v57  ;;  %v1000_v57 = vperm.slane %v543_v55, 0 }
  0x43   :  { %277 = vrot.lane.b32.xlu0 %v269_v58, %s788_s13  ;;  %v656_v58 = vor.u32 %v693_v59, %v653_v62  ;;  %v1002_v59 = vperm.slane %v543_v55, 1  ;;  %v1004_v62 = vperm.slane %v569_v56, 0 }
  0x44   :  { %317 = vrot.lane.b32.xlu2 %v304_v9, %s789_s14  ;;  %511 = vmatpush.bf16.msra.mxu2 %v660_v5  ;;  %v636_v9 = vor.u32 %v691_v8, %v635_v7  ;;  %v1012_v7 = vperm.slane %v543_v55, 2  ;;  %v1014_v8 = vperm.slane %v543_v55, 3 }
  0x45   :  { %492 = vmatpush.bf16.msra.mxu1 %v656_v58 }
  0x46   :  { %474 = vmatpush.bf16.msra.mxu0 %v636_v9 }
  0x48   :  { %230 = vrot.lane.b32.xlu1 %v227_v6, %s778_s24  ;;  %v664_v6 = vor.u32 %v694_v1, %v661_v4  ;;  %512 = vmatpush.bf16.msra.mxu2 %v644_v18 }
  0x49   :  { %493 = vmatpush.bf16.msra.mxu1 %v640_v14  ;;  %v1018_v14 = vperm.slane %v569_v56, 3 }
  0x4a   :  { %530 = vmatpush.bf16.msra.mxu3 %v664_v6 }
  0x4b   :  { %219 = vrot.lane.b32.xlu0 %v216_v20, %s787_s12  ;;  %v645_v20 = vld [vmem:[#allocation3 + $0x18] sm:$0xf0] }
  0x4c   :  { %249 = vrot.lane.b32.xlu2 %v246_v28, %s786_s11 }
  0x50   :  { %279 = vrot.lane.b32.xlu1 %v276_v29, %s788_s13 }
  0x53   :  { %260 = vrot.lane.b32.xlu0 %v257_v61, %s783_s8 }
  0x54   :  { %285 = vrot.lane.b32.xlu2 %v282_v21, %s781_s0  ;;  %v648_v21 = vor.u32 %v690_v19, %v645_v20 }
  0x56   :  { %531 = vmatpush.bf16.msra.mxu3 %v648_v21 }
  0x58   :  { %329 = vrot.lane.b32.xlu1 %v326_v36, %s784_s9 }
  0x5b   :  { %319 = vrot.lane.b32.xlu0 %v316_v37, %s789_s14 }
  0x86   :  { %v259_v17 = vpop.permute.xlu2 %258 }
  0x8e   :  { %v197_v25 = vpop.permute.xlu2 %196 }
  0x96   :  { %v248_v13 = vpop.permute.xlu2 %247 }
  0x9a   :  { %v284_v22 = vpop.permute.xlu1 %283 }
  0x9d   :  { %v195_v23 = vpop.permute.xlu0 %194 }
  0xa2   :  { %v229_v24 = vpop.permute.xlu1 %228 }
  0xa5   :  { %v328_v11 = vpop.permute.xlu0 %327 }
  0xaa   :  { %v186_v3 = vpop.permute.xlu1 %185 }
  0xab   :  { %v335_v38 = vsel %vm331_vm1, %v877_v60, %v186_v3 }
  0xac   :  { %v340_v40 = vsel %vm336_vm3, %v335_v38, %v197_v25 }
  0xad   :  { %v184_v26 = vpop.permute.xlu0 %183 }
  0xae   :  { %v333_v27 = vsel %vm331_vm1, %v871_v51, %v184_v26  ;;  %v318_v51 = vpop.permute.xlu2 %317 }
  0xaf   :  { %v338_v29 = vsel %vm336_vm3, %v333_v27, %v195_v23 }
  0xb2   :  { %v218_v28 = vpop.permute.xlu1 %217 }
  0xb3   :  { %v343_v61 = vsel %vm341_vm2, %v338_v29, %v218_v28 }
  0xb4   :  { %v348_v30 = vsel %vm346_vm4, %v343_v61, %v229_v24 }
  0xb5   :  { %v353_v31 = vsel %vm351_vm5, %v348_v30, %v248_v13  ;;  %v278_v32 = vpop.permute.xlu0 %277 }
  0xb6   :  { %v358_v33 = vsel %vm356_vm6, %v353_v31, %v259_v17  ;;  %v250_v42 = vpop.permute.xlu2 %249 }
  0xb7   :  { %v363_v34 = vsel %vm361_vm7, %v358_v33, %v278_v32 }
  0xb8   :  { %v368_v2 = vsel %vm366_vm8, %v363_v34, %v284_v22 }
  0xb9   :  { %v373_v35 = vsel %vm371_vm9, %v368_v2, %v318_v51 }
  0xba   :  { %v378_v36 = vsel %vm376_vm10, %v373_v35, %v328_v11  ;;  %v231_v37 = vpop.permute.xlu1 %230 }
  0xbb   :  { %681 = vmatmul.msk.bf16.vlgmr.msra.gmra.mxu0 %vm449_vm11, %v378_v36  ;;  %683 = vmatmul.msk.bf16.vlgmr.msra.gmra.mxu1 %vm449_vm11, %v378_v36 }
  0xbc   :  { %685 = vmatmul.msk.bf16.vlgmr.msra.gmra.mxu2 %vm449_vm11, %v378_v36  ;;  %687 = vmatmul.msk.bf16.vlgmr.msra.gmra.mxu3 %vm449_vm11, %v378_v36 }
  0xbd   :  { %v220_v39 = vpop.permute.xlu0 %219 }
  0xbe   :  { %v345_v41 = vsel %vm341_vm2, %v340_v40, %v220_v39  ;;  %v286_v48 = vpop.permute.xlu2 %285 }
  0xbf   :  { %v350_v44 = vsel %vm346_vm4, %v345_v41, %v231_v37 }
  0xc0   :  { %v355_v46 = vsel %vm351_vm5, %v350_v44, %v250_v42 }
  0xc2   :  { %v280_v43 = vpop.permute.xlu1 %279 }
  0xc5   :  { %v261_v45 = vpop.permute.xlu0 %260 }
  0xc6   :  { %v360_v47 = vsel %vm356_vm6, %v355_v46, %v261_v45 }
  0xc7   :  { %v365_v60 = vsel %vm361_vm7, %v360_v47, %v280_v43 }
  0xc8   :  { %v370_v50 = vsel %vm366_vm8, %v365_v60, %v286_v48 }
  0xca   :  { %v330_v49 = vpop.permute.xlu1 %329 }
  0xcd   :  { %v320_v52 = vpop.permute.xlu0 %319 }
  0xce   :  { %v375_v53 = vsel %vm371_vm9, %v370_v50, %v320_v52 }
  0xcf   :  { %v380_v54 = vsel %vm376_vm10, %v375_v53, %v330_v49 }
  0xd0   :  { %682 = vmatmul.msk.bf16.gmra.mxu0 %vm449_vm11, %v380_v54  ;;  %684 = vmatmul.msk.bf16.gmra.mxu1 %vm449_vm11, %v380_v54 }
  0xd1   :  { %686 = vmatmul.msk.bf16.gmra.mxu2 %vm449_vm11, %v380_v54  ;;  %688 = vmatmul.msk.bf16.gmra.mxu3 %vm449_vm11, %v380_v54 }
 0x138   :  { %v476_v58 = vpop.f32.mrf.mxu0  ;;  %v495_v63 = vpop.f32.mrf.mxu1 }
 0x139   :  { %v553_v1 = vmul.f32 %v1000_v57, %v476_v58  ;;  %v554_v4 = vmul.f32 %v1002_v59, %v495_v63 }
 0x13b   :  { %v579_v5 = vadd.f32 %v1004_v62, %v553_v1  ;;  %v580_v6 = vadd.f32 %v1006_v0, %v554_v4 }
 0x13d   :  { %v595_v9 = vmax.f32 %v579_v5, 0.0  ;;  %v596_v10 = vmax.f32 %v580_v6, 0.0 }
 0x13f   :  { %v611_v15 = vpack.c.bf16 %v596_v10, %v595_v9  ;;  %v514_v16 = vpop.f32.mrf.mxu2  ;;  %v533_v17 = vpop.f32.mrf.mxu3 }
 0x140   :  { %v555_v18 = vmul.f32 %v1012_v7, %v514_v16  ;;  %v556_v19 = vmul.f32 %v1014_v8, %v533_v17  ;;  %v478_v20 = vpop.f32.mrf.mxu0  ;;  %v497_v21 = vpop.f32.mrf.mxu1 }
 0x141   :  { %619 = vst [vmem:[%s1076_s4] sm:$0xff] %v611_v15  ;;  %v557_v22 = vmul.f32 %v1000_v57, %v478_v20  ;;  %v558_v23 = vmul.f32 %v1002_v59, %v497_v21 }
 0x142   :  { %v581_v24 = vadd.f32 %v1016_v12, %v555_v18  ;;  %v582_v25 = vadd.f32 %v1018_v14, %v556_v19 }
 0x143   :  { %v583_v11 = vadd.f32 %v1004_v62, %v557_v22  ;;  %v584_v3 = vadd.f32 %v1006_v0, %v558_v23 }
 0x144   :  { %v597_v13 = vmax.f32 %v581_v24, 0.0  ;;  %v598_v26 = vmax.f32 %v582_v25, 0.0 }
 0x145   :  { %v599_v27 = vmax.f32 %v583_v11, 0.0  ;;  %v600_v28 = vmax.f32 %v584_v3, 0.0 }
 0x146   :  { %v612_v29 = vpack.c.bf16 %v598_v26, %v597_v13 }
 0x147   :  { %v613_v61 = vpack.c.bf16 %v600_v28, %v599_v27  ;;  %v516_v30 = vpop.f32.mrf.mxu2  ;;  %v535_v31 = vpop.f32.mrf.mxu3 }
 0x148   :  { %620 = vst [vmem:[%s1076_s4 + $0x8] sm:$0xff] %v612_v29  ;;  %v559_v32 = vmul.f32 %v1012_v7, %v516_v30  ;;  %v560_v33 = vmul.f32 %v1014_v8, %v535_v31 }
 0x149   :  { %621 = vst [vmem:[%s1076_s4 + $0x10] sm:$0xff] %v613_v61 }
 0x14a   :  { %v585_v51 = vadd.f32 %v1016_v12, %v559_v32  ;;  %v586_v34 = vadd.f32 %v1018_v14, %v560_v33 }
 0x14c   :  { %v601_v2 = vmax.f32 %v585_v51, 0.0  ;;  %v602_v35 = vmax.f32 %v586_v34, 0.0 }
 0x14d   :  { %v481_v36 = vpop.f32.mrf.mxu0  ;;  %v500_v37 = vpop.f32.mrf.mxu1 }
 0x14e   :  { %v614_v38 = vpack.c.bf16 %v602_v35, %v601_v2  ;;  %v561_v39 = vmul.f32 %v1000_v57, %v481_v36  ;;  %v562_v40 = vmul.f32 %v1002_v59, %v500_v37 }
 0x150   :  { %622 = vst [vmem:[%s1076_s4 + $0x18] sm:$0xff] %v614_v38  ;;  %v587_v41 = vadd.f32 %v1004_v62, %v561_v39  ;;  %v588_v42 = vadd.f32 %v1006_v0, %v562_v40 }
 0x152   :  { %v603_v43 = vmax.f32 %v587_v41, 0.0  ;;  %v604_v44 = vmax.f32 %v588_v42, 0.0 }
 0x154   :  { %v615_v45 = vpack.c.bf16 %v604_v44, %v603_v43  ;;  %v519_v46 = vpop.f32.mrf.mxu2  ;;  %v538_v47 = vpop.f32.mrf.mxu3 }
 0x155   :  { %v563_v60 = vmul.f32 %v1012_v7, %v519_v46  ;;  %v564_v48 = vmul.f32 %v1014_v8, %v538_v47  ;;  %v483_v49 = vpop.f32.mrf.mxu0  ;;  %v502_v50 = vpop.f32.mrf.mxu1 }
 0x156   :  { %623 = vst [vmem:[%s1076_s4 + $0x20] sm:$0xff] %v615_v45  ;;  %v565_v52 = vmul.f32 %v1000_v57, %v483_v49  ;;  %v566_v53 = vmul.f32 %v1002_v59, %v502_v50 }
 0x157   :  { %v589_v54 = vadd.f32 %v1016_v12, %v563_v60  ;;  %v590_v55 = vadd.f32 %v1018_v14, %v564_v48 }
 0x158   :  { %v591_v56 = vadd.f32 %v1004_v62, %v565_v52  ;;  %v592_v58 = vadd.f32 %v1006_v0, %v566_v53 }
 0x159   :  { %v605_v63 = vmax.f32 %v589_v54, 0.0  ;;  %v606_v1 = vmax.f32 %v590_v55, 0.0 }
 0x15a   :  { %v607_v4 = vmax.f32 %v591_v56, 0.0  ;;  %v608_v5 = vmax.f32 %v592_v58, 0.0 }
 0x15b   :  { %v616_v6 = vpack.c.bf16 %v606_v1, %v605_v63 }
 0x15c   :  { %v617_v9 = vpack.c.bf16 %v608_v5, %v607_v4  ;;  %v521_v10 = vpop.f32.mrf.mxu2  ;;  %v540_v15 = vpop.f32.mrf.mxu3 }
 0x15d   :  { %624 = vst [vmem:[%s1076_s4 + $0x28] sm:$0xff] %v616_v6  ;;  %v567_v57 = vmul.f32 %v1012_v7, %v521_v10  ;;  %v568_v59 = vmul.f32 %v1014_v8, %v540_v15 }
 0x15e   :  { %625 = vst [vmem:[%s1076_s4 + $0x30] sm:$0xff] %v617_v9 }
 0x15f   :  { %v593_v62 = vadd.f32 %v1016_v12, %v567_v57  ;;  %v594_v0 = vadd.f32 %v1018_v14, %v568_v59 }
 0x161   :  { %v609_v16 = vmax.f32 %v593_v62, 0.0  ;;  %v610_v17 = vmax.f32 %v594_v0, 0.0 }
 0x163   :  { %v618_v18 = vpack.c.bf16 %v610_v17, %v609_v16 }
 0x165   :  { %626 = vst [vmem:[%s1076_s4 + $0x38] sm:$0xff] %v618_v18 }
 0x166   :  { %631 = vsyncpa [#allocation4], 1 }
 0x167   :  { %632 = vsyncpa [#allocation6], 1 }

// kernel: _lambda_.7
= control target key start
LH: loop header
LB: loop body
LE: loop exit
PB: predicated region body
PF: predicated region fallthrough
CT: control target
= control target key end

     0   :  { %9 = vsyncpa [#allocation4], 0  ;;  %s1806_s0 = inlined_call_operand.vmem [shape: bf16[2,16,256], index: 0, kind: input, shape index: {}]   ;;  %s1807_s1 = inlined_call_operand.hbm [shape: bf16[1280,128], index: 1, kind: input, shape index: {}]   ;;  %s1808_s2 = inlined_call_operand.vmem [shape: f32[1,128], index: 2, kind: input, shape index: {}]   ;;  %s1809_s3 = inlined_call_operand.hbm [shape: f32[1,128], index: 3, kind: input, shape index: {}]   ;;  %s1810_s4 = inlined_call_operand.vmem [shape: bf16[2,16,128], index: 4, kind: output, shape index: {}]  }
   0x1   :  { %s17_s17 = sshll.u32 %s1807_s1, 4  ;;  %s18_s17 = int_to_ptr.hbm [resolvable:$true] %s17_s17 }
   0x2   :  { %10 = vsyncpa [#allocation6], 0  ;;  %s1619_s18 = smov [#allocation3]   ;;  %s33_s22 = sshll.u32 %s1809_s3, 4  ;;  %s34_s22 = int_to_ptr.hbm [resolvable:$true] %s33_s22 }
   0x3   :  { %s19_s19 = sshll.u32 %s1619_s18, 4  ;;  %s1620_s23 = smov 64   ;;  %s20_s19 = int_to_ptr.vmem [resolvable:$true] %s19_s19 }
   0x4   :  { %s1621_s24 = smov 4   ;;  %s1622_s25 = smov [#allocation5]  }
   0x5   :  { %25 = dma.hbm_to_vmem [thread:$0]  %s18_s17, 10240, %s20_s19, [#allocation4], %s1620_s23, %s1620_s23, %s1621_s24  }
   0x6   :  { %s35_s26 = sshll.u32 %s1622_s25, 4  ;;  %s36_s26 = int_to_ptr.vmem [resolvable:$true] %s35_s26 }
   0x7   :  { %38 = dma.hbm_to_vmem [thread:$0]  %s34_s22, 16, %s36_s26, [#allocation6]  }
   0x8   :  { %1615 = dma.done.wait [#allocation4], 10240  }
   0x9   :  { %1616 = vsyncadd [#allocation4], 4294957056 }
   0xa   :  { %1617 = dma.done.wait [#allocation6], 16  }
   0xb   :  { %1618 = vsyncadd [#allocation6], 4294967280  ;;  %v1623_v0 = vmov 0   ;;  %v1460_v1 = vld [vmem:[#allocation3 + $0x38] sm:$0xff]  ;;  %v1459_v5 = vld [vmem:[#allocation3 + $0x30] sm:$0xff]  ;;  %vm60_vm0 = vcmask 1040384  }
   0xc   :  { %48 = vst [vmem:[#allocation2] sm:$0x11] %v1623_v0  ;;  %v1468_v2 = vld [vmem:[#allocation3 + $0x78] sm:$0xff]  ;;  %889 = vmatpush.bf16.msra.mxu0 %v1460_v1  ;;  %v1467_v6 = vld [vmem:[#allocation3 + $0x70] sm:$0xff]  ;;  %v1458_v9 = vld [vmem:[#allocation3 + $0x28] sm:$0xff]  ;;  %vm61_vm1 = vcmask 1044484  }
   0xd   :  { %49 = vst [vmem:[#allocation2 + $0x18] sm:$0x11] %v1623_v0  ;;  %v1476_v3 = vld [vmem:[#allocation3 + $0xb8] sm:$0xff]  ;;  %908 = vmatpush.bf16.msra.mxu1 %v1468_v2  ;;  %v1475_v7 = vld [vmem:[#allocation3 + $0xb0] sm:$0xff]  ;;  %v1466_v10 = vld [vmem:[#allocation3 + $0x68] sm:$0xff]  ;;  %vm174_vm4 = vcmask 1046528  }
   0xe   :  { %50 = vst [vmem:[#allocation2 + $0x10] sm:$0x22] %v1623_v0  ;;  %v1484_v4 = vld [vmem:[#allocation3 + $0xf8] sm:$0xff]  ;;  %927 = vmatpush.bf16.msra.mxu2 %v1476_v3  ;;  %v1483_v8 = vld [vmem:[#allocation3 + $0xf0] sm:$0xff]  ;;  %v1474_v11 = vld [vmem:[#allocation3 + $0xa8] sm:$0xff]  ;;  %vm232_vm6 = vcmask 1045504  }
   0xf   :  { %51 = vst [vmem:[#allocation2 + $0x28] sm:$0x22] %v1623_v0  ;;  %946 = vmatpush.bf16.msra.mxu3 %v1484_v4  ;;  %v1482_v12 = vld [vmem:[#allocation3 + $0xe8] sm:$0xff]  ;;  %v1457_v13 = vld [vmem:[#allocation3 + $0x20] sm:$0xff]  ;;  %v52_v15 = vld [vmem:[%s1806_s0] sm:$0xff] }
  0x10   :  { %890 = vmatpush.bf16.msra.mxu0 %v1459_v5  ;;  %v1465_v14 = vld [vmem:[#allocation3 + $0x60] sm:$0xff]  ;;  %v53_v18 = vld [vmem:[%s1806_s0 + $0x8] sm:$0xff]  ;;  %v63_v19 = vrot.slane %v52_v15, 7  ;;  %vm1661_vm2 = vmor %vm60_vm0, %vm61_vm1  ;;  %vm121_vm3 = vsmask.f32 7424 }
  0x11   :  { %909 = vmatpush.bf16.msra.mxu1 %v1467_v6  ;;  %v1473_v16 = vld [vmem:[#allocation3 + $0xa0] sm:$0xff]  ;;  %v65_v21 = vrot.slane %v53_v18, 7  ;;  %v1456_v23 = vld [vmem:[#allocation3 + $0x18] sm:$0xff]  ;;  %v1455_v30 = vld [vmem:[#allocation3 + $0x10] sm:$0xff]  ;;  %vm191_vm5 = vsmask.f32 6400 }
  0x12   :  { %928 = vmatpush.bf16.msra.mxu2 %v1475_v7  ;;  %v1481_v17 = vld [vmem:[#allocation3 + $0xe0] sm:$0xff]  ;;  %v64_v22 = vrot.slane %v63_v19, 4  ;;  %79 = vst [vmem:[#allocation2] sm:$0xee] %v63_v19  ;;  %v1464_v24 = vld [vmem:[#allocation3 + $0x58] sm:$0xff]  ;;  %v55_v31 = vld [vmem:[%s1806_s0 + $0x18] sm:$0xff] }
  0x13   :  { %947 = vmatpush.bf16.msra.mxu3 %v1483_v8  ;;  %v67_v25 = vrot.slane %v65_v21, 4  ;;  %v1472_v26 = vld [vmem:[#allocation3 + $0x98] sm:$0xff]  ;;  %v54_v29 = vld [vmem:[%s1806_s0 + $0x10] sm:$0xff]  ;;  %v1463_v33 = vld [vmem:[#allocation3 + $0x50] sm:$0xff]  ;;  %v70_v35 = vrot.slane %v55_v31, 7 }
  0x14   :  { %891 = vmatpush.bf16.msra.mxu0 %v1458_v9  ;;  %v1480_v27 = vld [vmem:[#allocation3 + $0xd8] sm:$0xff]  ;;  %v66_v28 = vsel %vm1661_vm2, %v64_v22, %v65_v21  ;;  %v68_v32 = vrot.slane %v54_v29, 7  ;;  %v1471_v34 = vld [vmem:[#allocation3 + $0x90] sm:$0xff]  ;;  %v1454_v39 = vld [vmem:[#allocation3 + $0x8] sm:$0xff] }
  0x15   :  { %910 = vmatpush.bf16.msra.mxu1 %v1466_v10  ;;  %80 = vst [vmem:[#allocation2 + $0x8] sm:$0xff] %v66_v28  ;;  %v1479_v36 = vld [vmem:[#allocation3 + $0xd0] sm:$0xff]  ;;  %v72_v38 = vrot.slane %v70_v35, 4  ;;  %v1462_v43 = vld [vmem:[#allocation3 + $0x48] sm:$0xff]  ;;  %v1453_v53 = vld [vmem:[#allocation3] sm:$0xff] }
  0x16   :  { %929 = vmatpush.bf16.msra.mxu2 %v1474_v11  ;;  %81 = vst [vmem:[#allocation2 + $0x10] sm:$0x11] %v67_v25  ;;  %v69_v37 = vrot.slane %v68_v32, 4  ;;  %v1470_v44 = vld [vmem:[#allocation3 + $0x88] sm:$0xff]  ;;  %v1461_v54 = vld [vmem:[#allocation3 + $0x40] sm:$0xff]  ;;  %v1508_v2 = vld [vmem:[#allocation3 + $0x1b8] sm:$0xff] }
  0x17   :  { %948 = vmatpush.bf16.msra.mxu3 %v1482_v12  ;;  %82 = vst [vmem:[#allocation2 + $0x18] sm:$0xee] %v68_v32  ;;  %v1478_v45 = vld [vmem:[#allocation3 + $0xc8] sm:$0xff]  ;;  %v1469_v59 = vld [vmem:[#allocation3 + $0x80] sm:$0xff]  ;;  %v1492_v3 = vld [vmem:[#allocation3 + $0x138] sm:$0xff] }
  0x18   :  { %892 = vmatpush.bf16.msra.mxu0 %v1457_v13  ;;  %v71_v42 = vsel %vm1661_vm2, %v69_v37, %v70_v35  ;;  %84 = vst [vmem:[#allocation2 + $0x28] sm:$0x11] %v72_v38  ;;  %v1477_v60 = vld [vmem:[#allocation3 + $0xc0] sm:$0xff]  ;;  %v1500_v15 = vld [vmem:[#allocation3 + $0x178] sm:$0xff]  ;;  %v1507_v19 = vld [vmem:[#allocation3 + $0x1b0] sm:$0xff] }
  0x19   :  { %911 = vmatpush.bf16.msra.mxu1 %v1465_v14  ;;  %v1115_v40 = vld [vmem:[#allocation2] sm:$0xf]  ;;  %v1449_v41 = vld [vmem:[#allocation2 + $0x4] sm:$0xf]  ;;  %83 = vst [vmem:[#allocation2 + $0x20] sm:$0xff] %v71_v42  ;;  %v1490_v31 = vld [vmem:[#allocation3 + $0x128] sm:$0xff] }
  0x1a   :  { %930 = vmatpush.bf16.msra.mxu2 %v1473_v16  ;;  %v1516_v16 = vld [vmem:[#allocation3 + $0x1f8] sm:$0xff]  ;;  %v1491_v20 = vld [vmem:[#allocation3 + $0x130] sm:$0xff]  ;;  %v1514_v35 = vld [vmem:[#allocation3 + $0x1e8] sm:$0xff] }
  0x1b   :  { %949 = vmatpush.bf16.msra.mxu3 %v1481_v17  ;;  %v1515_v25 = vld [vmem:[#allocation3 + $0x1f0] sm:$0xff]  ;;  %v1497_v42 = vld [vmem:[#allocation3 + $0x160] sm:$0xff] }
  0x1c   :  { %893 = vmatpush.bf16.msra.mxu0 %v1456_v23  ;;  %v1450_v46 = vld [vmem:[#allocation2 + $0x4] sm:$0xf0]  ;;  %v1117_v47 = vld [vmem:[#allocation2 + $0x8] sm:$0xf0] }
  0x1d   :  { %912 = vmatpush.bf16.msra.mxu1 %v1464_v24  ;;  %v1675_v48 = vor.u32 %v1450_v46, %v1115_v40  ;;  %v1677_v49 = vor.u32 %v1449_v41, %v1117_v47  ;;  %v87_v50 = vld [vmem:[#allocation2 + $0x10] sm:$0x33]  ;;  %v1499_v24 = vld [vmem:[#allocation3 + $0x170] sm:$0xff] }
  0x1e   :  { %931 = vmatpush.bf16.msra.mxu2 %v1472_v26  ;;  %v113_v51 = vunpack.c.l.b16 %v87_v50  ;;  %v114_v52 = vunpack.c.h.b16 %v87_v50  ;;  %v1123_v63 = vld [vmem:[#allocation2 + $0x18] sm:$0xf]  ;;  %v1451_v4 = vld [vmem:[#allocation2 + $0x1c] sm:$0xf]  ;;  %v1505_v40 = vld [vmem:[#allocation3 + $0x1a0] sm:$0xff] }
  0x1f   :  { %950 = vmatpush.bf16.msra.mxu3 %v1480_v27  ;;  %v123_v55 = vshrl.u32 %v1675_v48, 16  ;;  %v125_v56 = vshll.u32 %v1675_v48, 16  ;;  %v135_v57 = vshrl.u32 %v1677_v49, 16  ;;  %v137_v58 = vshll.u32 %v1677_v49, 16  ;;  %v90_v12 = vld [vmem:[#allocation2 + $0x28] sm:$0x33] }
  0x20   :  { %894 = vmatpush.bf16.msra.mxu0 %v1455_v30  ;;  %v1683_v61 = vpack.c.b16 %v113_v51, %v113_v51  ;;  %v1685_v62 = vpack.c.b16 %v114_v52, %v114_v52  ;;  %v1452_v7 = vld [vmem:[#allocation2 + $0x1c] sm:$0xf0]  ;;  %v1125_v8 = vld [vmem:[#allocation2 + $0x20] sm:$0xf0]  ;;  %v115_v18 = vunpack.c.l.b16 %v90_v12  ;;  %v116_v21 = vunpack.c.h.b16 %v90_v12  ;;  %v1506_v30 = vld [vmem:[#allocation3 + $0x1a8] sm:$0xff] }
  0x21   :  { %913 = vmatpush.bf16.msra.mxu1 %v1463_v33  ;;  %v127_v0 = vrot.slane %v125_v56, 1  ;;  %v139_v1 = vrot.slane %v137_v58, 1  ;;  %v1697_v11 = vor.u32 %v1452_v7, %v1123_v63  ;;  %v1703_v17 = vor.u32 %v1451_v4, %v1125_v8  ;;  %v1489_v41 = vld [vmem:[#allocation3 + $0x120] sm:$0xff]  ;;  %v1504_v50 = vld [vmem:[#allocation3 + $0x198] sm:$0xff]  ;;  %v1487_v63 = vld [vmem:[#allocation3 + $0x110] sm:$0xff] }
  0x22   :  { %932 = vmatpush.bf16.msra.mxu2 %v1471_v34  ;;  %v130_v5 = vshll.u32 %v1683_v61, 16  ;;  %v142_v6 = vshll.u32 %v1685_v62, 16  ;;  %v1709_v26 = vpack.c.b16 %v115_v18, %v115_v18  ;;  %v1712_v28 = vpack.c.b16 %v116_v21, %v116_v21  ;;  %v1498_v34 = vld [vmem:[#allocation3 + $0x168] sm:$0xff]  ;;  %v1488_v51 = vld [vmem:[#allocation3 + $0x118] sm:$0xff]  ;;  %v1485_v18 = vld [vmem:[#allocation3 + $0x100] sm:$0xff] }
  0x23   :  { %951 = vmatpush.bf16.msra.mxu3 %v1479_v36  ;;  %v128_v9 = vor.u32 %v127_v0, %v123_v55  ;;  %v140_v10 = vor.u32 %v139_v1, %v135_v57  ;;  %v149_v27 = vshll.u32 %v1697_v11, 16  ;;  %v161_v29 = vshll.u32 %v1703_v17, 16  ;;  %v1495_v0 = vld [vmem:[#allocation3 + $0x150] sm:$0xff]  ;;  %v1486_v4 = vld [vmem:[#allocation3 + $0x108] sm:$0xff] }
  0x24   :  { %895 = vmatpush.bf16.msra.mxu0 %v1454_v39  ;;  %v132_v13 = vrot.slane %v130_v5, 1  ;;  %v144_v14 = vrot.slane %v142_v6, 1  ;;  %v147_v32 = vshrl.u32 %v1697_v11, 16  ;;  %v159_v33 = vshrl.u32 %v1703_v17, 16  ;;  %v1511_v1 = vld [vmem:[#allocation3 + $0x1d0] sm:$0xff]  ;;  %v1510_v12 = vld [vmem:[#allocation3 + $0x1c8] sm:$0xff] }
  0x25   :  { %914 = vmatpush.bf16.msra.mxu1 %v1462_v43  ;;  %v151_v36 = vrot.slane %v149_v27, 1  ;;  %v154_v37 = vshll.u32 %v1709_v26, 16  ;;  %v163_v38 = vrot.slane %v161_v29, 1  ;;  %v166_v39 = vshll.u32 %v1712_v28, 16  ;;  %v1513_v43 = vld [vmem:[#allocation3 + $0x1e0] sm:$0xff] }
  0x26   :  { %933 = vmatpush.bf16.msra.mxu2 %v1470_v44  ;;  %v133_v22 = vsel %vm121_vm3, %v128_v9, %v132_v13  ;;  %v145_v23 = vsel %vm121_vm3, %v140_v10, %v144_v14  ;;  %v204_v7 = vshrl.u32 %v1685_v62, 16  ;;  %v192_v8 = vrot.slane %v123_v55, 1  ;;  %v1494_v10 = vld [vmem:[#allocation3 + $0x148] sm:$0xff]  ;;  %v1501_v55 = vld [vmem:[#allocation3 + $0x180] sm:$0xff] }
  0x27   :  { %952 = vmatpush.bf16.msra.mxu3 %v1478_v45  ;;  %v152_v44 = vor.u32 %v151_v36, %v147_v32  ;;  %v156_v45 = vrot.slane %v154_v37, 1  ;;  %v164_v46 = vor.u32 %v163_v38, %v159_v33  ;;  %v168_v47 = vrot.slane %v166_v39, 1  ;;  %v1523_v36 = vld [vmem:[#allocation3 + $0x230] sm:$0xff] }
  0x28   :  { %896 = vmatpush.bf16.msra.mxu0 %v1453_v53  ;;  %v193_v9 = vrot.slane %v125_v56, 2  ;;  %v198_v14 = vrot.slane %v130_v5, 2  ;;  %v207_v56 = vrot.slane %v142_v6, 2  ;;  %v175_v21 = vrot.slane %v1675_v48, 1 }
  0x29   :  { %915 = vmatpush.bf16.msra.mxu1 %v1461_v54  ;;  %v157_v52 = vsel %vm121_vm3, %v152_v44, %v156_v45  ;;  %v169_v53 = vsel %vm121_vm3, %v164_v46, %v168_v47  ;;  %v1496_v54 = vld [vmem:[#allocation3 + $0x158] sm:$0xff]  ;;  %v176_v5 = vrot.slane %v1683_v61, 1  ;;  %v237_v44 = vrot.slane %v1685_v62, 2  ;;  %v1522_v45 = vld [vmem:[#allocation3 + $0x228] sm:$0xff] }
  0x2a   :  { %934 = vmatpush.bf16.msra.mxu2 %v1469_v59  ;;  %v1512_v59 = vld [vmem:[#allocation3 + $0x1d8] sm:$0xff]  ;;  %v213_v47 = vshrl.u32 %v1709_v26, 16 }
  0x2b   :  { %953 = vmatpush.bf16.msra.mxu3 %v1477_v60  ;;  %897 = vmatmul.bf16.vlgmr.msra.gmra.mxu0 %v1675_v48  ;;  %v1503_v60 = vld [vmem:[#allocation3 + $0x190] sm:$0xff]  ;;  %v177_v38 = vsel %vm174_vm4, %v175_v21, %v176_v5  ;;  %v243_v21 = vrot.slane %v1712_v28, 2 }
  0x2c   :  { %965 = vmatpush.bf16.msrb.mxu0 %v1492_v3  ;;  %916 = vmatmul.bf16.vlgmr.msra.gmra.mxu1 %v1677_v49  ;;  %v1502_v3 = vld [vmem:[#allocation3 + $0x188] sm:$0xff] }
  0x2d   :  { %935 = vmatmul.bf16.vlgmr.msra.gmra.mxu2 %v133_v22  ;;  %984 = vmatpush.bf16.msrb.mxu1 %v1500_v15  ;;  %v201_v15 = vrot.slane %v135_v57, 1  ;;  %v178_v22 = vrot.slane %v1677_v49, 1  ;;  %v179_v57 = vrot.slane %v1685_v62, 1  ;;  %v210_v62 = vrot.slane %v147_v32, 1 }
  0x2e   :  { %1003 = vmatpush.bf16.msrb.mxu2 %v1508_v2  ;;  %954 = vmatmul.bf16.vlgmr.msra.gmra.mxu3 %v145_v23  ;;  %v195_v2 = vshrl.u32 %v1683_v61, 16  ;;  %v1509_v23 = vld [vmem:[#allocation3 + $0x1c0] sm:$0xff]  ;;  %v225_v32 = vrot.slane %v166_v39, 2  ;;  %v1519_v39 = vld [vmem:[#allocation3 + $0x210] sm:$0xff] }
  0x2f   :  { %1022 = vmatpush.bf16.msrb.mxu3 %v1516_v16  ;;  %v202_v16 = vrot.slane %v137_v58, 2  ;;  %v1493_v58 = vld [vmem:[#allocation3 + $0x140] sm:$0xff] }
  0x30   :  { %966 = vmatpush.bf16.msrb.mxu0 %v1491_v20  ;;  %v197_v13 = vrot.slane %v195_v2, 1  ;;  %v1524_v20 = vld [vmem:[#allocation3 + $0x238] sm:$0xff]  ;;  %v182_v2 = vrot.slane %v1709_v26, 1 }
  0x31   :  { %985 = vmatpush.bf16.msrb.mxu1 %v1499_v24  ;;  %v194_v24 = vor.u32 %v193_v9, %v192_v8  ;;  %v1528_v8 = vld [vmem:[#allocation3 + $0x258] sm:$0xff] }
  0x32   :  { %1004 = vmatpush.bf16.msrb.mxu2 %v1507_v19  ;;  %v206_v19 = vrot.slane %v204_v7, 1 }
  0x33   :  { %1023 = vmatpush.bf16.msrb.mxu3 %v1515_v25  ;;  %v199_v25 = vor.u32 %v198_v14, %v197_v13  ;;  %v1527_v14 = vld [vmem:[#allocation3 + $0x250] sm:$0xff] }
  0x34   :  { %967 = vmatpush.bf16.msrb.mxu0 %v1490_v31  ;;  %v208_v6 = vor.u32 %v207_v56, %v206_v19  ;;  %v1532_v31 = vld [vmem:[#allocation3 + $0x278] sm:$0xff]  ;;  %v239_v19 = vrot.slane %v1697_v11, 2  ;;  %v240_v56 = vrot.slane %v1709_v26, 2 }
  0x35   :  { %986 = vmatpush.bf16.msrb.mxu1 %v1498_v34  ;;  %v233_v34 = vrot.slane %v1675_v48, 2  ;;  %v1531_v48 = vld [vmem:[#allocation3 + $0x270] sm:$0xff] }
  0x36   :  { %1005 = vmatpush.bf16.msrb.mxu2 %v1506_v30  ;;  %v203_v30 = vor.u32 %v202_v16, %v201_v15  ;;  %v1518_v15 = vld [vmem:[#allocation3 + $0x208] sm:$0xff]  ;;  %v241_v5 = vsel %vm232_vm6, %v239_v19, %v240_v56  ;;  %v1565_v56 = vld [vmem:[%s1808_s2] ss:$0 sm:$0xff] }
  0x37   :  { %1024 = vmatpush.bf16.msrb.mxu3 %v1514_v35  ;;  %v234_v35 = vrot.slane %v1683_v61, 2  ;;  %v236_v61 = vrot.slane %v1677_v49, 2  ;;  %v1521_v49 = vld [vmem:[#allocation3 + $0x220] sm:$0xff]  ;;  %v1526_v16 = vld [vmem:[#allocation3 + $0x248] sm:$0xff] }
  0x38   :  { %968 = vmatpush.bf16.msrb.mxu0 %v1489_v41  ;;  %v180_v41 = vsel %vm174_vm4, %v178_v22, %v179_v57 }
  0x39   :  { %987 = vmatpush.bf16.msrb.mxu1 %v1497_v42  ;;  %v200_v42 = vsel %vm191_vm5, %v194_v24, %v199_v25  ;;  %v1765_v46 = vsel %vm232_vm6, %v236_v61, %v237_v44 }
  0x3a   :  { %1006 = vmatpush.bf16.msrb.mxu2 %v1505_v40  ;;  %v1757_v40 = vsel %vm232_vm6, %v233_v34, %v234_v35 }
  0x3b   :  { %1025 = vmatpush.bf16.msrb.mxu3 %v1513_v43  ;;  %902 = vmatmul.bf16.gmra.mxu0 %v1697_v11  ;;  %v209_v43 = vsel %vm191_vm5, %v203_v30, %v208_v6 }
  0x3c   :  { %969 = vmatpush.bf16.msrb.mxu0 %v1488_v51  ;;  %921 = vmatmul.bf16.gmra.mxu1 %v1703_v17  ;;  %v222_v51 = vshrl.u32 %v1712_v28, 16 }
  0x3d   :  { %940 = vmatmul.bf16.gmra.mxu2 %v157_v52  ;;  %988 = vmatpush.bf16.msrb.mxu1 %v1496_v54  ;;  %v211_v52 = vrot.slane %v149_v27, 2  ;;  %v216_v54 = vrot.slane %v154_v37, 2  ;;  %v181_v27 = vrot.slane %v1697_v11, 1  ;;  %v184_v37 = vrot.slane %v1703_v17, 1 }
  0x3e   :  { %1007 = vmatpush.bf16.msrb.mxu2 %v1504_v50  ;;  %959 = vmatmul.bf16.gmra.mxu3 %v169_v53  ;;  %v1530_v50 = vld [vmem:[#allocation3 + $0x268] sm:$0xff]  ;;  %v215_v53 = vrot.slane %v213_v47, 1 }
  0x3f   :  { %1026 = vmatpush.bf16.msrb.mxu3 %v1512_v59  ;;  %v1529_v59 = vld [vmem:[#allocation3 + $0x260] sm:$0xff]  ;;  %v183_v9 = vsel %vm174_vm4, %v181_v27, %v182_v2 }
  0x40   :  { %970 = vmatpush.bf16.msrb.mxu0 %v1487_v63  ;;  %v220_v63 = vrot.slane %v161_v29, 2 }
  0x41   :  { %989 = vmatpush.bf16.msrb.mxu1 %v1495_v0  ;;  %v224_v0 = vrot.slane %v222_v51, 1 }
  0x42   :  { %1008 = vmatpush.bf16.msrb.mxu2 %v1503_v60  ;;  %v219_v60 = vrot.slane %v159_v33, 1  ;;  %v217_v33 = vor.u32 %v216_v54, %v215_v53 }
  0x43   :  { %1027 = vmatpush.bf16.msrb.mxu3 %v1511_v1  ;;  %v1520_v1 = vld [vmem:[#allocation3 + $0x218] sm:$0xff]  ;;  %v226_v7 = vor.u32 %v225_v32, %v224_v0 }
  0x44   :  { %971 = vmatpush.bf16.msrb.mxu0 %v1486_v4  ;;  %v212_v4 = vor.u32 %v211_v52, %v210_v62  ;;  %v221_v29 = vor.u32 %v220_v63, %v219_v60 }
  0x45   :  { %990 = vmatpush.bf16.msrb.mxu1 %v1494_v10 }
  0x46   :  { %1009 = vmatpush.bf16.msrb.mxu2 %v1502_v3  ;;  %v185_v3 = vrot.slane %v1712_v28, 1  ;;  %v227_v13 = vsel %vm191_vm5, %v221_v29, %v226_v7 }
  0x47   :  { %1028 = vmatpush.bf16.msrb.mxu3 %v1510_v12  ;;  %v218_v12 = vsel %vm191_vm5, %v212_v4, %v217_v33 }
  0x48   :  { %972 = vmatpush.bf16.msrb.mxu0 %v1485_v18  ;;  %v186_v10 = vsel %vm174_vm4, %v184_v37, %v185_v3  ;;  %v1525_v18 = vld [vmem:[#allocation3 + $0x240] sm:$0xff] }
  0x49   :  { %991 = vmatpush.bf16.msrb.mxu1 %v1493_v58 }
  0x4a   :  { %1010 = vmatpush.bf16.msrb.mxu2 %v1501_v55  ;;  %v1517_v55 = vld [vmem:[#allocation3 + $0x200] sm:$0xff] }
  0x4b   :  { %1029 = vmatpush.bf16.msrb.mxu3 %v1509_v23  ;;  %973 = vmatmul.bf16.vlgmr.msrb.gmra.mxu0 %v177_v38 }
  0x4c   :  { %1041 = vmatpush.bf16.msra.mxu0 %v1524_v20  ;;  %992 = vmatmul.bf16.vlgmr.msrb.gmra.mxu1 %v180_v41 }
  0x4d   :  { %1060 = vmatpush.bf16.msra.mxu1 %v1532_v31  ;;  %1011 = vmatmul.bf16.vlgmr.msrb.gmra.mxu2 %v200_v42 }
  0x4e   :  { %1544 = vmatpush.bf16.msra.mxu2 %v1524_v20  ;;  %1030 = vmatmul.bf16.vlgmr.msrb.gmra.mxu3 %v209_v43  ;;  %v242_v20 = vrot.slane %v1703_v17, 2 }
  0x4f   :  { %1552 = vmatpush.bf16.msra.mxu3 %v1532_v31 }
  0x50   :  { %1042 = vmatpush.bf16.msra.mxu0 %v1523_v36  ;;  %v244_v22 = vsel %vm232_vm6, %v242_v20, %v243_v21 }
  0x51   :  { %1061 = vmatpush.bf16.msra.mxu1 %v1531_v48 }
  0x52   :  { %1545 = vmatpush.bf16.msra.mxu2 %v1523_v36 }
  0x53   :  { %1553 = vmatpush.bf16.msra.mxu3 %v1531_v48 }
  0x54   :  { %1043 = vmatpush.bf16.msra.mxu0 %v1522_v45 }
  0x55   :  { %1062 = vmatpush.bf16.msra.mxu1 %v1530_v50 }
  0x56   :  { %1546 = vmatpush.bf16.msra.mxu2 %v1522_v45 }
  0x57   :  { %1554 = vmatpush.bf16.msra.mxu3 %v1530_v50 }
  0x58   :  { %1044 = vmatpush.bf16.msra.mxu0 %v1521_v49 }
  0x59   :  { %1063 = vmatpush.bf16.msra.mxu1 %v1529_v59 }
  0x5a   :  { %1547 = vmatpush.bf16.msra.mxu2 %v1521_v49 }
  0x5b   :  { %1555 = vmatpush.bf16.msra.mxu3 %v1529_v59  ;;  %978 = vmatmul.bf16.gmra.mxu0 %v183_v9 }
  0x5c   :  { %1045 = vmatpush.bf16.msra.mxu0 %v1520_v1  ;;  %997 = vmatmul.bf16.gmra.mxu1 %v186_v10 }
  0x5d   :  { %1064 = vmatpush.bf16.msra.mxu1 %v1528_v8  ;;  %1016 = vmatmul.bf16.gmra.mxu2 %v218_v12 }
  0x5e   :  { %1548 = vmatpush.bf16.msra.mxu2 %v1520_v1  ;;  %1035 = vmatmul.bf16.gmra.mxu3 %v227_v13 }
  0x5f   :  { %1556 = vmatpush.bf16.msra.mxu3 %v1528_v8 }
  0x60   :  { %1046 = vmatpush.bf16.msra.mxu0 %v1519_v39 }
  0x61   :  { %1065 = vmatpush.bf16.msra.mxu1 %v1527_v14 }
  0x62   :  { %1549 = vmatpush.bf16.msra.mxu2 %v1519_v39 }
  0x63   :  { %1557 = vmatpush.bf16.msra.mxu3 %v1527_v14 }
  0x64   :  { %1047 = vmatpush.bf16.msra.mxu0 %v1518_v15 }
  0x65   :  { %1066 = vmatpush.bf16.msra.mxu1 %v1526_v16 }
  0x66   :  { %1550 = vmatpush.bf16.msra.mxu2 %v1518_v15 }
  0x67   :  { %1558 = vmatpush.bf16.msra.mxu3 %v1526_v16 }
  0x68   :  { %1048 = vmatpush.bf16.msra.mxu0 %v1517_v55 }
  0x69   :  { %1067 = vmatpush.bf16.msra.mxu1 %v1525_v18 }
  0x6a   :  { %1551 = vmatpush.bf16.msra.mxu2 %v1517_v55 }
  0x6b   :  { %1559 = vmatpush.bf16.msra.mxu3 %v1525_v18  ;;  %1049 = vmatmul.bf16.vlgmr.msra.gmra.mxu0 %v1757_v40 }
  0x6c   :  { %1068 = vmatmul.bf16.vlgmr.msra.gmra.mxu1 %v1765_v46 }
  0x6d   :  { %1054 = vmatmul.bf16.vlgmr.msra.gmra.mxu2 %v241_v5 }
  0x6e   :  { %1073 = vmatmul.bf16.vlgmr.msra.gmra.mxu3 %v244_v22 }
  0xa8   :  { %v898_v57 = vpop.f32.mrf.mxu0 }
  0xa9   :  { %v917_v11 = vpop.f32.mrf.mxu1 }
  0xaa   :  { %v918_v44 = vadd.f32 %v917_v11, %v898_v57 }
  0xb0   :  { %v936_v58 = vpop.f32.mrf.mxu2  ;;  %v900_v23 = vpop.f32.mrf.mxu0 }
  0xb1   :  { %v955_v26 = vpop.f32.mrf.mxu3  ;;  %v919_v24 = vpop.f32.mrf.mxu1  ;;  %v937_v45 = vadd.f32 %v936_v58, %v918_v44 }
  0xb2   :  { %v920_v52 = vadd.f32 %v919_v24, %v900_v23  ;;  %v1566_v23 = vld [vmem:[#allocation5] ss:$0 sm:$0xff] }
  0xb3   :  { %v956_v62 = vadd.f32 %v955_v26, %v937_v45 }
  0xb8   :  { %v938_v25 = vpop.f32.mrf.mxu2  ;;  %v903_v30 = vpop.f32.mrf.mxu0 }
  0xb9   :  { %v957_v17 = vpop.f32.mrf.mxu3  ;;  %v922_v28 = vpop.f32.mrf.mxu1  ;;  %v939_v59 = vadd.f32 %v938_v25, %v920_v52 }
  0xba   :  { %v923_v49 = vadd.f32 %v922_v28, %v903_v30 }
  0xbb   :  { %v958_v2 = vadd.f32 %v957_v17, %v939_v59 }
  0xc0   :  { %v941_v6 = vpop.f32.mrf.mxu2  ;;  %v905_v34 = vpop.f32.mrf.mxu0 }
  0xc1   :  { %v960_v31 = vpop.f32.mrf.mxu3  ;;  %v924_v35 = vpop.f32.mrf.mxu1  ;;  %v942_v54 = vadd.f32 %v941_v6, %v923_v49 }
  0xc2   :  { %v925_v3 = vadd.f32 %v924_v35, %v905_v34 }
  0xc3   :  { %v961_v27 = vadd.f32 %v960_v31, %v942_v54 }
  0xc8   :  { %v943_v36 = vpop.f32.mrf.mxu2  ;;  %v974_v40 = vpop.f32.mrf.mxu0 }
  0xc9   :  { %v962_v38 = vpop.f32.mrf.mxu3  ;;  %v993_v41 = vpop.f32.mrf.mxu1  ;;  %v975_v53 = vadd.f32 %v974_v40, %v956_v62  ;;  %v944_v29 = vadd.f32 %v943_v36, %v925_v3 }
  0xcb   :  { %v994_v32 = vadd.f32 %v993_v41, %v975_v53  ;;  %v963_v15 = vadd.f32 %v962_v38, %v944_v29 }
  0xd0   :  { %v1012_v42 = vpop.f32.mrf.mxu2  ;;  %v976_v48 = vpop.f32.mrf.mxu0 }
  0xd1   :  { %v1031_v43 = vpop.f32.mrf.mxu3  ;;  %v995_v61 = vpop.f32.mrf.mxu1  ;;  %v1013_v37 = vadd.f32 %v1012_v42, %v994_v32  ;;  %v977_v33 = vadd.f32 %v976_v48, %v958_v2 }
  0xd3   :  { %v1032_v7 = vadd.f32 %v1031_v43, %v1013_v37  ;;  %v996_v12 = vadd.f32 %v995_v61, %v977_v33 }
  0xd8   :  { %v1014_v46 = vpop.f32.mrf.mxu2  ;;  %v979_v50 = vpop.f32.mrf.mxu0 }
  0xd9   :  { %v1033_v47 = vpop.f32.mrf.mxu3  ;;  %v998_v51 = vpop.f32.mrf.mxu1  ;;  %v980_v4 = vadd.f32 %v979_v50, %v961_v27  ;;  %v1015_v55 = vadd.f32 %v1014_v46, %v996_v12 }
  0xdb   :  { %v999_v39 = vadd.f32 %v998_v51, %v980_v4  ;;  %v1034_v21 = vadd.f32 %v1033_v47, %v1015_v55 }
  0xe0   :  { %v1017_v60 = vpop.f32.mrf.mxu2  ;;  %v981_v0 = vpop.f32.mrf.mxu0 }
  0xe1   :  { %v1036_v63 = vpop.f32.mrf.mxu3  ;;  %v1000_v1 = vpop.f32.mrf.mxu1  ;;  %v1018_v16 = vadd.f32 %v1017_v60, %v999_v39  ;;  %v982_v18 = vadd.f32 %v981_v0, %v963_v15 }
  0xe3   :  { %v1037_v20 = vadd.f32 %v1036_v63, %v1018_v16  ;;  %v1001_v22 = vadd.f32 %v1000_v1, %v982_v18 }
  0xe8   :  { %v1019_v8 = vpop.f32.mrf.mxu2  ;;  %v1050_v10 = vpop.f32.mrf.mxu0 }
  0xe9   :  { %v1038_v9 = vpop.f32.mrf.mxu3  ;;  %v1051_v13 = vadd.f32 %v1050_v10, %v1032_v7  ;;  %v1069_v14 = vpop.f32.mrf.mxu1  ;;  %v1020_v25 = vadd.f32 %v1019_v8, %v1001_v22 }
  0xeb   :  { %v1070_v19 = vadd.f32 %v1069_v14, %v1051_v13  ;;  %v1039_v34 = vadd.f32 %v1038_v9, %v1020_v25 }
  0xed   :  { %v1083_v26 = vmul.f32 %v1565_v56, %v1070_v19 }
  0xef   :  { %v1091_v6 = vadd.f32 %v1566_v23, %v1083_v26 }
  0xf0   :  { %v1055_v5 = vpop.f32.mrf.mxu2  ;;  %v1052_v58 = vpop.f32.mrf.mxu0 }
  0xf1   :  { %v1056_v57 = vadd.f32 %v1055_v5, %v1037_v20  ;;  %v1074_v11 = vpop.f32.mrf.mxu3  ;;  %v1053_v24 = vadd.f32 %v1052_v58, %v1034_v21  ;;  %v1071_v17 = vpop.f32.mrf.mxu1  ;;  %v1095_v41 = vmax.f32 %v1091_v6, 0.0 }
  0xf3   :  { %v1072_v30 = vadd.f32 %v1071_v17, %v1053_v24  ;;  %v1075_v28 = vadd.f32 %v1074_v11, %v1056_v57 }
  0xf5   :  { %v1084_v31 = vmul.f32 %v1565_v56, %v1072_v30  ;;  %v1085_v38 = vmul.f32 %v1565_v56, %v1075_v28 }
  0xf7   :  { %v1092_v35 = vadd.f32 %v1566_v23, %v1084_v31  ;;  %v1093_v44 = vadd.f32 %v1566_v23, %v1085_v38 }
  0xf8   :  { %v1057_v36 = vpop.f32.mrf.mxu2 }
  0xf9   :  { %v1058_v40 = vadd.f32 %v1057_v36, %v1039_v34  ;;  %v1096_v42 = vmax.f32 %v1092_v35, 0.0  ;;  %v1076_v43 = vpop.f32.mrf.mxu3  ;;  %v1097_v47 = vmax.f32 %v1093_v44, 0.0 }
  0xfb   :  { %v1077_v48 = vadd.f32 %v1076_v43, %v1058_v40  ;;  %v1536_v61 = vpack.c.bf16 %v1096_v42, %v1095_v41 }
  0xfd   :  { %v1086_v45 = vmul.f32 %v1565_v56, %v1077_v48  ;;  %1537 = vst [vmem:[%s1810_s4] sm:$0xff] %v1536_v61  }
  0xff   :  { %v1094_v46 = vadd.f32 %v1566_v23, %v1086_v45 }
 0x101   :  { %v1098_v50 = vmax.f32 %v1094_v46, 0.0 }
 0x103   :  { %v1541_v51 = vpack.c.bf16 %v1098_v50, %v1097_v47 }
 0x105   :  { %1543 = vst [vmem:[%s1810_s4 + $0x8] sm:$0xff] %v1541_v51  }
 0x106   :  { %1111 = vsyncpa [#allocation4], 1 }
 0x107   :  { %1112 = vsyncpa [#allocation6], 1 }

// kernel: _lambda_.9
= control target key start
LH: loop header
LB: loop body
LE: loop exit
PB: predicated region body
PF: predicated region fallthrough
CT: control target
= control target key end

     0   :  { %9 = vsyncpa [#allocation4], 0  ;;  %s1396_s0 = inlined_call_operand.vmem [shape: bf16[2,16,128], index: 0, kind: input, shape index: {}]   ;;  %s1397_s1 = inlined_call_operand.hbm [shape: bf16[896,128], index: 1, kind: input, shape index: {}]   ;;  %s1398_s2 = inlined_call_operand.vmem [shape: f32[1,128], index: 2, kind: input, shape index: {}]   ;;  %s1399_s3 = inlined_call_operand.hbm [shape: f32[1,128], index: 3, kind: input, shape index: {}]   ;;  %s1400_s4 = inlined_call_operand.vmem [shape: f32[2,16,128], index: 4, kind: output, shape index: {}]  }
   0x1   :  { %s17_s17 = sshll.u32 %s1397_s1, 4  ;;  %s18_s17 = int_to_ptr.hbm [resolvable:$true] %s17_s17 }
   0x2   :  { %10 = vsyncpa [#allocation6], 0  ;;  %s1211_s18 = smov [#allocation3]   ;;  %s33_s22 = sshll.u32 %s1399_s3, 4  ;;  %s34_s22 = int_to_ptr.hbm [resolvable:$true] %s33_s22 }
   0x3   :  { %s19_s19 = sshll.u32 %s1211_s18, 4  ;;  %s1212_s23 = smov 64   ;;  %s20_s19 = int_to_ptr.vmem [resolvable:$true] %s19_s19 }
   0x4   :  { %s1213_s24 = smov 4   ;;  %s1214_s25 = smov [#allocation5]  }
   0x5   :  { %25 = dma.hbm_to_vmem [thread:$0]  %s18_s17, 7168, %s20_s19, [#allocation4], %s1212_s23, %s1212_s23, %s1213_s24  }
   0x6   :  { %s35_s26 = sshll.u32 %s1214_s25, 4  ;;  %s36_s26 = int_to_ptr.vmem [resolvable:$true] %s35_s26 }
   0x7   :  { %38 = dma.hbm_to_vmem [thread:$0]  %s34_s22, 16, %s36_s26, [#allocation6]  }
   0x8   :  { %1207 = dma.done.wait [#allocation4], 7168  }
   0x9   :  { %1208 = vsyncadd [#allocation4], 4294960128 }
   0xa   :  { %1209 = dma.done.wait [#allocation6], 16  }
   0xb   :  { %1210 = vsyncadd [#allocation6], 4294967280  ;;  %v1096_v0 = vld [vmem:[#allocation3 + $0x38] sm:$0xff]  ;;  %v1095_v4 = vld [vmem:[#allocation3 + $0x30] sm:$0xff]  ;;  %vm48_vm0 = vcmask 1041408   ;;  %vm57_vm4 = vcmask 1042433  }
   0xc   :  { %v1104_v1 = vld [vmem:[#allocation3 + $0x78] sm:$0xff]  ;;  %696 = vmatpush.bf16.msra.mxu0 %v1096_v0  ;;  %v1103_v5 = vld [vmem:[#allocation3 + $0x70] sm:$0xff]  ;;  %vm49_vm1 = vsmask.f32 1280  ;;  %v1094_v8 = vld [vmem:[#allocation3 + $0x28] sm:$0xff]  ;;  %vm116_vm7 = vcmask 1043457  }
   0xd   :  { %v1112_v2 = vld [vmem:[#allocation3 + $0xb8] sm:$0xff]  ;;  %715 = vmatpush.bf16.msra.mxu1 %v1104_v1  ;;  %v1111_v6 = vld [vmem:[#allocation3 + $0xb0] sm:$0xff]  ;;  %v1102_v9 = vld [vmem:[#allocation3 + $0x68] sm:$0xff]  ;;  %vm58_vm3 = vsmask.f32 7942  ;;  %vm183_vm10 = vcmask 1046528  }
   0xe   :  { %v1120_v3 = vld [vmem:[#allocation3 + $0xf8] sm:$0xff]  ;;  %734 = vmatpush.bf16.msra.mxu2 %v1112_v2  ;;  %v1119_v7 = vld [vmem:[#allocation3 + $0xf0] sm:$0xff]  ;;  %v1110_v10 = vld [vmem:[#allocation3 + $0xa8] sm:$0xff]  ;;  %vm70_vm5 = vsmask.f32 5392  ;;  %vm213_vm13 = vcmask 1045504  }
   0xf   :  { %753 = vmatpush.bf16.msra.mxu3 %v1120_v3  ;;  %v1118_v11 = vld [vmem:[#allocation3 + $0xe8] sm:$0xff]  ;;  %vm1247_vm2 = vmand %vm48_vm0, %vm49_vm1  ;;  %v1093_v13 = vld [vmem:[#allocation3 + $0x20] sm:$0xff]  ;;  %vm156_vm11 = vsmask.f32 7424  ;;  %vm192_vm12 = vsmask.f32 6400 }
  0x10   :  { %697 = vmatpush.bf16.msra.mxu0 %v1095_v4  ;;  %v1101_v14 = vld [vmem:[#allocation3 + $0x60] sm:$0xff]  ;;  %v51_v16 = vld [vmem:[#allocation2] sm:$0x3]  ;;  %v67_v20 = vld [vmem:[%s1396_s0 + $0x4] sm:$0xf]  ;;  %vm239_vm14 = vcmask 1044480  }
  0x11   :  { %716 = vmatpush.bf16.msra.mxu1 %v1103_v5  ;;  %v1109_v15 = vld [vmem:[#allocation3 + $0xa0] sm:$0xff]  ;;  %v52_v18 = vsel %vm1247_vm2, 0, %v51_v16  ;;  %v66_v19 = vld [vmem:[%s1396_s0] sm:$0xf]  ;;  %v82_v23 = vshrl.u32 %v67_v20, 16  ;;  %v85_v24 = vshll.u32 %v67_v20, 16  ;;  %vm1261_vm6 = vmand %vm57_vm4, %vm58_vm3 }
  0x12   :  { %735 = vmatpush.bf16.msra.mxu2 %v1111_v6  ;;  %v1117_v17 = vld [vmem:[#allocation3 + $0xe0] sm:$0xff]  ;;  %53 = vst [vmem:[#allocation2] sm:$0x3] %v52_v18  ;;  %v73_v21 = vshrl.u32 %v66_v19, 16  ;;  %v76_v22 = vshll.u32 %v66_v19, 16  ;;  %v1092_v27 = vld [vmem:[#allocation3 + $0x18] sm:$0xff]  ;;  %vm1267_vm8 = vmor %vm49_vm1, %vm70_vm5 }
  0x13   :  { %754 = vmatpush.bf16.msra.mxu3 %v1119_v7  ;;  %v60_v26 = vld [vmem:[#allocation2 + $0x8] sm:$0x6]  ;;  %v1100_v28 = vld [vmem:[#allocation3 + $0x58] sm:$0xff]  ;;  %v84_v31 = vrot.slane %v82_v23, 6  ;;  %v87_v32 = vrot.slane %v85_v24, 7  ;;  %vm1275_vm9 = vmand %vm116_vm7, %vm58_vm3 }
  0x14   :  { %698 = vmatpush.bf16.msra.mxu0 %v1094_v8  ;;  %v75_v29 = vrot.slane %v73_v21, 6  ;;  %v78_v30 = vrot.slane %v76_v22, 7  ;;  %v1108_v33 = vld [vmem:[#allocation3 + $0x98] sm:$0xff]  ;;  %v61_v36 = vsel %vm1261_vm6, 0, %v60_v26  ;;  %v1091_v37 = vld [vmem:[#allocation3 + $0x10] sm:$0xff]  ;;  %v1090_v59 = vld [vmem:[#allocation3 + $0x8] sm:$0xff] }
  0x15   :  { %717 = vmatpush.bf16.msra.mxu1 %v1102_v9  ;;  %v1116_v34 = vld [vmem:[#allocation3 + $0xd8] sm:$0xff]  ;;  %v1099_v38 = vld [vmem:[#allocation3 + $0x50] sm:$0xff]  ;;  %v88_v40 = vor.u32 %v87_v32, %v84_v31  ;;  %62 = vst [vmem:[#allocation2 + $0x8] sm:$0x6] %v61_v36  ;;  %v1098_v63 = vld [vmem:[#allocation3 + $0x48] sm:$0xff] }
  0x16   :  { %736 = vmatpush.bf16.msra.mxu2 %v1110_v10  ;;  %v79_v39 = vor.u32 %v78_v30, %v75_v29  ;;  %v1107_v42 = vld [vmem:[#allocation3 + $0x90] sm:$0xff]  ;;  %v63_v58 = vld [vmem:[#allocation2 + $0x14] sm:$0x6]  ;;  %v1106_v1 = vld [vmem:[#allocation3 + $0x88] sm:$0xff]  ;;  %vm222_vm15 = vsmask.f32 5376 }
  0x17   :  { %755 = vmatpush.bf16.msra.mxu3 %v1118_v11  ;;  %v1115_v43 = vld [vmem:[#allocation3 + $0xd0] sm:$0xff]  ;;  %v90_v47 = vrot.slane %v88_v40, 4  ;;  %v64_v62 = vsel %vm1261_vm6, 0, %v63_v58  ;;  %v1114_v2 = vld [vmem:[#allocation3 + $0xc8] sm:$0xff]  ;;  %v1089_v8 = vld [vmem:[#allocation3] sm:$0xff] }
  0x18   :  { %699 = vmatpush.bf16.msra.mxu0 %v1093_v13  ;;  %v54_v44 = vld [vmem:[#allocation2 + $0xc] sm:$0x3]  ;;  %v68_v45 = vld [vmem:[%s1396_s0 + $0x8] sm:$0xf]  ;;  %v80_v46 = vrot.slane %v79_v39, 4  ;;  %v1097_v9 = vld [vmem:[#allocation3 + $0x40] sm:$0xff] }
  0x19   :  { %718 = vmatpush.bf16.msra.mxu1 %v1101_v14  ;;  %v55_v48 = vsel %vm1247_vm2, 0, %v54_v44  ;;  %v69_v49 = vld [vmem:[%s1396_s0 + $0xc] sm:$0xf]  ;;  %v92_v50 = vshrl.u32 %v68_v45, 16  ;;  %v118_v51 = vld [vmem:[#allocation2] sm:$0xe] }
  0x1a   :  { %737 = vmatpush.bf16.msra.mxu2 %v1109_v15  ;;  %56 = vst [vmem:[#allocation2 + $0xc] sm:$0x3] %v55_v48  ;;  %v95_v52 = vshll.u32 %v68_v45, 16  ;;  %v101_v53 = vshrl.u32 %v69_v49, 16  ;;  %v89_v54 = vsel %vm1267_vm8, %v80_v46, %v88_v40  ;;  %v119_v55 = vsel %vm1275_vm9, %v79_v39, %v118_v51  ;;  %v1105_v11 = vld [vmem:[#allocation3 + $0x80] sm:$0xff]  ;;  %v1128_v18 = vld [vmem:[#allocation3 + $0x138] sm:$0xff] }
  0x1b   :  { %756 = vmatpush.bf16.msra.mxu3 %v1117_v17  ;;  %v94_v56 = vrot.slane %v92_v50, 6  ;;  %v104_v57 = vshll.u32 %v69_v49, 16  ;;  %120 = vst [vmem:[#allocation2] sm:$0xe] %v119_v55  ;;  %v1113_v13 = vld [vmem:[#allocation3 + $0xc0] sm:$0xff]  ;;  %v1144_v17 = vld [vmem:[#allocation3 + $0x1b8] sm:$0xff] }
  0x1c   :  { %700 = vmatpush.bf16.msra.mxu0 %v1092_v27  ;;  %v97_v60 = vrot.slane %v95_v52, 7  ;;  %v103_v61 = vrot.slane %v101_v53, 6  ;;  %121 = vst [vmem:[#allocation2 + $0x4] sm:$0xf] %v89_v54  ;;  %v122_v3 = vld [vmem:[#allocation2 + $0x8] sm:$0x3] }
  0x1d   :  { %719 = vmatpush.bf16.msra.mxu1 %v1100_v28  ;;  %v106_v0 = vrot.slane %v104_v57, 7  ;;  %65 = vst [vmem:[#allocation2 + $0x14] sm:$0x6] %v64_v62  ;;  %v123_v5 = vsel %vm1247_vm2, %v90_v47, %v122_v3  ;;  %v1136_v20 = vld [vmem:[#allocation3 + $0x178] sm:$0xff]  ;;  %v1143_v26 = vld [vmem:[#allocation3 + $0x1b0] sm:$0xff]  ;;  %v1142_v39 = vld [vmem:[#allocation3 + $0x1a8] sm:$0xff] }
  0x1e   :  { %738 = vmatpush.bf16.msra.mxu2 %v1108_v33  ;;  %v98_v4 = vor.u32 %v97_v60, %v94_v56  ;;  %124 = vst [vmem:[#allocation2 + $0x8] sm:$0x3] %v123_v5  ;;  %v1127_v27 = vld [vmem:[#allocation3 + $0x130] sm:$0xff]  ;;  %v1134_v41 = vld [vmem:[#allocation3 + $0x168] sm:$0xff]  ;;  %v1125_v48 = vld [vmem:[#allocation3 + $0x120] sm:$0xff] }
  0x1f   :  { %757 = vmatpush.bf16.msra.mxu3 %v1116_v34  ;;  %v107_v6 = vor.u32 %v106_v0, %v103_v61  ;;  %v1135_v32 = vld [vmem:[#allocation3 + $0x170] sm:$0xff]  ;;  %v1126_v34 = vld [vmem:[#allocation3 + $0x128] sm:$0xff]  ;;  %v1141_v52 = vld [vmem:[#allocation3 + $0x1a0] sm:$0xff] }
  0x20   :  { %701 = vmatpush.bf16.msra.mxu0 %v1091_v37  ;;  %v99_v7 = vrot.slane %v98_v4, 4  ;;  %v1133_v55 = vld [vmem:[#allocation3 + $0x160] sm:$0xff]  ;;  %v1124_v58 = vld [vmem:[#allocation3 + $0x118] sm:$0xff] }
  0x21   :  { %720 = vmatpush.bf16.msra.mxu1 %v1099_v38  ;;  %v125_v10 = vld [vmem:[#allocation2 + $0xc] sm:$0xe]  ;;  %v109_v15 = vrot.slane %v107_v6, 4  ;;  %v1140_v61 = vld [vmem:[#allocation3 + $0x198] sm:$0xff] }
  0x22   :  { %739 = vmatpush.bf16.msra.mxu2 %v1107_v42  ;;  %v108_v14 = vsel %vm1267_vm8, %v99_v7, %v107_v6  ;;  %v126_v16 = vsel %vm1275_vm9, %v98_v4, %v125_v10  ;;  %v1139_v7 = vld [vmem:[#allocation3 + $0x190] sm:$0xff] }
  0x23   :  { %758 = vmatpush.bf16.msra.mxu3 %v1115_v43  ;;  %127 = vst [vmem:[#allocation2 + $0xc] sm:$0xe] %v126_v16  ;;  %v1299_v19 = vld [vmem:[#allocation2] sm:$0xff]  ;;  %v1131_v10 = vld [vmem:[#allocation3 + $0x150] sm:$0xff] }
  0x24   :  { %702 = vmatpush.bf16.msra.mxu0 %v1090_v59  ;;  %128 = vst [vmem:[#allocation2 + $0x10] sm:$0xf] %v108_v14  ;;  %v129_v21 = vld [vmem:[#allocation2 + $0x14] sm:$0x3]  ;;  %v1302_v22 = vshrl.u32 %v1299_v19, 16  ;;  %v1305_v23 = vshll.u32 %v1299_v19, 16 }
  0x25   :  { %721 = vmatpush.bf16.msra.mxu1 %v1098_v63  ;;  %v130_v24 = vsel %vm1247_vm2, %v109_v15, %v129_v21  ;;  %v134_v25 = vld [vmem:[#allocation2 + $0x8] sm:$0x7]  ;;  %v184_v33 = vrot.slane %v1299_v19, 1  ;;  %v1132_v63 = vld [vmem:[#allocation3 + $0x158] sm:$0xff]  ;;  %v1138_v16 = vld [vmem:[#allocation3 + $0x188] sm:$0xff] }
  0x26   :  { %740 = vmatpush.bf16.msra.mxu2 %v1106_v1  ;;  %131 = vst [vmem:[#allocation2 + $0x14] sm:$0x3] %v130_v24  ;;  %v152_v28 = vunpack.c.l.b16 %v134_v25  ;;  %v162_v29 = vrot.slane %v1305_v23, 1  ;;  %v193_v30 = vrot.slane %v1302_v22, 1  ;;  %v194_v31 = vrot.slane %v1305_v23, 2  ;;  %v1137_v24 = vld [vmem:[#allocation3 + $0x180] sm:$0xff] }
  0x27   :  { %759 = vmatpush.bf16.msra.mxu3 %v1114_v2  ;;  %v1123_v2 = vld [vmem:[#allocation3 + $0x110] sm:$0xff]  ;;  %v214_v25 = vrot.slane %v1299_v19, 2 }
  0x28   :  { %703 = vmatpush.bf16.msra.mxu0 %v1089_v8  ;;  %v1313_v12 = vpack.c.b16 %v152_v28, %v152_v28  ;;  %v163_v35 = vor.u32 %v162_v29, %v1302_v22  ;;  %v195_v40 = vor.u32 %v194_v31, %v193_v30  ;;  %v223_v29 = vrot.slane %v1302_v22, 2 }
  0x29   :  { %722 = vmatpush.bf16.msra.mxu1 %v1097_v9  ;;  %v224_v30 = vrot.slane %v1305_v23, 3 }
  0x2a   :  { %741 = vmatpush.bf16.msra.mxu2 %v1105_v11  ;;  %v1318_v36 = vshll.u32 %v1313_v12, 16  ;;  %v185_v37 = vrot.slane %v1313_v12, 1  ;;  %v196_v38 = vshrl.u32 %v1313_v12, 16  ;;  %v1122_v11 = vld [vmem:[#allocation3 + $0x108] sm:$0xff] }
  0x2b   :  { %760 = vmatpush.bf16.msra.mxu3 %v1113_v13  ;;  %704 = vmatmul.bf16.vlgmr.msra.gmra.mxu0 %v1299_v19  ;;  %v1327_v46 = vld [vmem:[#allocation2 + $0xc] sm:$0xff] }
  0x2c   :  { %772 = vmatpush.bf16.msrb.mxu0 %v1128_v18  ;;  %v167_v42 = vrot.slane %v1318_v36, 1  ;;  %v186_v43 = vsel %vm183_vm10, %v184_v33, %v185_v37  ;;  %v198_v44 = vrot.slane %v196_v38, 1  ;;  %v199_v45 = vrot.slane %v1318_v36, 2 }
  0x2d   :  { %791 = vmatpush.bf16.msrb.mxu1 %v1136_v20  ;;  %v137_v47 = vld [vmem:[#allocation2 + $0x14] sm:$0x7]  ;;  %742 = vmatmul.bf16.vlgmr.msra.gmra.mxu2 %v186_v43  ;;  %v1334_v56 = vshll.u32 %v1327_v46, 16  ;;  %v1337_v57 = vshrl.u32 %v1327_v46, 16  ;;  %v187_v0 = vrot.slane %v1327_v46, 1  ;;  %v1121_v20 = vld [vmem:[#allocation3 + $0x100] sm:$0xff] }
  0x2e   :  { %810 = vmatpush.bf16.msrb.mxu2 %v1144_v17  ;;  %v153_v49 = vunpack.c.l.b16 %v137_v47  ;;  %v168_v50 = vsel %vm156_vm11, %v163_v35, %v167_v42  ;;  %v200_v51 = vor.u32 %v199_v45, %v198_v44  ;;  %v226_v31 = vrot.slane %v196_v38, 2 }
  0x2f   :  { %1145 = vmatpush.bf16.msrb.mxu3 %v1128_v18  ;;  %723 = vmatmul.bf16.vlgmr.msra.gmra.mxu1 %v168_v50  ;;  %v174_v62 = vrot.slane %v1334_v56, 1  ;;  %v202_v1 = vrot.slane %v1337_v57, 1  ;;  %v203_v4 = vrot.slane %v1334_v56, 2  ;;  %v1130_v18 = vld [vmem:[#allocation3 + $0x148] sm:$0xff]  ;;  %v240_v33 = vrot.slane %v1299_v19, 3 }
  0x30   :  { %773 = vmatpush.bf16.msrb.mxu0 %v1127_v27  ;;  %v1330_v53 = vpack.c.b16 %v153_v49, %v153_v49  ;;  %v201_v54 = vsel %vm192_vm12, %v195_v40, %v200_v51  ;;  %v225_v35 = vor.u32 %v224_v30, %v223_v29  ;;  %v230_v19 = vrot.slane %v1337_v57, 2 }
  0x31   :  { %792 = vmatpush.bf16.msrb.mxu1 %v1135_v32  ;;  %761 = vmatmul.bf16.vlgmr.msra.gmra.mxu3 %v201_v54  ;;  %v175_v8 = vor.u32 %v174_v62, %v1337_v57  ;;  %v204_v14 = vor.u32 %v203_v4, %v202_v1  ;;  %v227_v32 = vrot.slane %v1318_v36, 3  ;;  %v243_v42 = vrot.slane %v1327_v46, 3 }
  0x32   :  { %811 = vmatpush.bf16.msrb.mxu2 %v1143_v26  ;;  %v1340_v59 = vshll.u32 %v1330_v53, 16  ;;  %v205_v60 = vshrl.u32 %v1330_v53, 16  ;;  %v188_v3 = vrot.slane %v1330_v53, 1  ;;  %v215_v26 = vrot.slane %v1313_v12, 2 }
  0x33   :  { %1146 = vmatpush.bf16.msrb.mxu3 %v1127_v27  ;;  %v1129_v27 = vld [vmem:[#allocation3 + $0x140] sm:$0xff]  ;;  %v228_v37 = vor.u32 %v227_v32, %v226_v31  ;;  %v218_v22 = vrot.slane %v1330_v53, 2  ;;  %v244_v43 = vrot.slane %v1330_v53, 3 }
  0x34   :  { %774 = vmatpush.bf16.msrb.mxu0 %v1126_v34  ;;  %v207_v5 = vrot.slane %v205_v60, 1  ;;  %v208_v6 = vrot.slane %v1340_v59, 2  ;;  %v179_v9 = vrot.slane %v1340_v59, 1  ;;  %v189_v13 = vsel %vm183_vm10, %v187_v0, %v188_v3 }
  0x35   :  { %793 = vmatpush.bf16.msrb.mxu1 %v1134_v41  ;;  %v216_v28 = vsel %vm213_vm13, %v214_v25, %v215_v26  ;;  %v229_v40 = vsel %vm222_vm15, %v225_v35, %v228_v37  ;;  %v233_v38 = vrot.slane %v205_v60, 2  ;;  %v234_v41 = vrot.slane %v1340_v59, 3 }
  0x36   :  { %812 = vmatpush.bf16.msrb.mxu2 %v1142_v39  ;;  %v209_v15 = vor.u32 %v208_v6, %v207_v5  ;;  %v180_v17 = vsel %vm156_vm11, %v175_v8, %v179_v9  ;;  %v217_v39 = vrot.slane %v1327_v46, 2  ;;  %v245_v47 = vsel %vm239_vm14, %v243_v42, %v244_v43  ;;  %v1157_v9 = vld [vmem:[%s1398_s2] ss:$0 sm:$0xff] }
  0x37   :  { %1147 = vmatpush.bf16.msrb.mxu3 %v1126_v34  ;;  %v241_v34 = vrot.slane %v1313_v12, 3  ;;  %v231_v12 = vrot.slane %v1334_v56, 3  ;;  %v235_v45 = vor.u32 %v234_v41, %v233_v38 }
  0x38   :  { %775 = vmatpush.bf16.msrb.mxu0 %v1125_v48  ;;  %v210_v21 = vsel %vm192_vm12, %v204_v14, %v209_v15  ;;  %v219_v36 = vsel %vm213_vm13, %v217_v39, %v218_v22  ;;  %v1158_v15 = vld [vmem:[#allocation5] ss:$0 sm:$0xff] }
  0x39   :  { %794 = vmatpush.bf16.msrb.mxu1 %v1133_v55  ;;  %v242_v23 = vsel %vm239_vm14, %v240_v33, %v241_v34  ;;  %v232_v44 = vor.u32 %v231_v12, %v230_v19 }
  0x3a   :  { %813 = vmatpush.bf16.msrb.mxu2 %v1141_v52 }
  0x3b   :  { %1148 = vmatpush.bf16.msrb.mxu3 %v1125_v48  ;;  %709 = vmatmul.bf16.gmra.mxu0 %v1327_v46  ;;  %v236_v48 = vsel %vm222_vm15, %v232_v44, %v235_v45 }
  0x3c   :  { %776 = vmatpush.bf16.msrb.mxu0 %v1124_v58 }
  0x3d   :  { %795 = vmatpush.bf16.msrb.mxu1 %v1132_v63  ;;  %747 = vmatmul.bf16.gmra.mxu2 %v189_v13 }
  0x3e   :  { %814 = vmatpush.bf16.msrb.mxu2 %v1140_v61 }
  0x3f   :  { %1149 = vmatpush.bf16.msrb.mxu3 %v1124_v58  ;;  %728 = vmatmul.bf16.gmra.mxu1 %v180_v17 }
  0x40   :  { %777 = vmatpush.bf16.msrb.mxu0 %v1123_v2 }
  0x41   :  { %796 = vmatpush.bf16.msrb.mxu1 %v1131_v10  ;;  %766 = vmatmul.bf16.gmra.mxu3 %v210_v21 }
  0x42   :  { %815 = vmatpush.bf16.msrb.mxu2 %v1139_v7 }
  0x43   :  { %1150 = vmatpush.bf16.msrb.mxu3 %v1123_v2 }
  0x44   :  { %778 = vmatpush.bf16.msrb.mxu0 %v1122_v11 }
  0x45   :  { %797 = vmatpush.bf16.msrb.mxu1 %v1130_v18 }
  0x46   :  { %816 = vmatpush.bf16.msrb.mxu2 %v1138_v16 }
  0x47   :  { %1151 = vmatpush.bf16.msrb.mxu3 %v1122_v11 }
  0x48   :  { %779 = vmatpush.bf16.msrb.mxu0 %v1121_v20 }
  0x49   :  { %798 = vmatpush.bf16.msrb.mxu1 %v1129_v27 }
  0x4a   :  { %817 = vmatpush.bf16.msrb.mxu2 %v1137_v24 }
  0x4b   :  { %1152 = vmatpush.bf16.msrb.mxu3 %v1121_v20  ;;  %780 = vmatmul.bf16.vlgmr.msrb.gmra.mxu0 %v216_v28 }
  0x4d   :  { %818 = vmatmul.bf16.vlgmr.msrb.gmra.mxu2 %v242_v23 }
  0x4f   :  { %799 = vmatmul.bf16.vlgmr.msrb.gmra.mxu1 %v229_v40 }
  0x51   :  { %785 = vmatmul.bf16.vlgmr.msrb.gmra.mxu3 %v219_v36 }
  0x5d   :  { %823 = vmatmul.bf16.gmra.mxu2 %v245_v47 }
  0x5f   :  { %804 = vmatmul.bf16.gmra.mxu1 %v236_v48 }
  0xa8   :  { %v705_v49 = vpop.f32.mrf.mxu0 }
  0xac   :  { %v724_v51 = vpop.f32.mrf.mxu1 }
  0xad   :  { %v725_v60 = vadd.f32 %v724_v51, %v705_v49 }
  0xb0   :  { %v707_v50 = vpop.f32.mrf.mxu0  ;;  %v743_v52 = vpop.f32.mrf.mxu2 }
  0xb1   :  { %v744_v63 = vadd.f32 %v743_v52, %v725_v60 }
  0xb4   :  { %v762_v55 = vpop.f32.mrf.mxu3  ;;  %v726_v56 = vpop.f32.mrf.mxu1 }
  0xb5   :  { %v763_v2 = vadd.f32 %v762_v55, %v744_v63  ;;  %v727_v3 = vadd.f32 %v726_v56, %v707_v50 }
  0xb8   :  { %v710_v54 = vpop.f32.mrf.mxu0  ;;  %v745_v57 = vpop.f32.mrf.mxu2 }
  0xb9   :  { %v746_v6 = vadd.f32 %v745_v57, %v727_v3 }
  0xbc   :  { %v764_v46 = vpop.f32.mrf.mxu3  ;;  %v729_v59 = vpop.f32.mrf.mxu1 }
  0xbd   :  { %v765_v13 = vadd.f32 %v764_v46, %v746_v6  ;;  %v730_v16 = vadd.f32 %v729_v59, %v710_v54 }
  0xc0   :  { %v712_v58 = vpop.f32.mrf.mxu0  ;;  %v748_v53 = vpop.f32.mrf.mxu2 }
  0xc1   :  { %v749_v24 = vadd.f32 %v748_v53, %v730_v16 }
  0xc4   :  { %v767_v61 = vpop.f32.mrf.mxu3  ;;  %v731_v62 = vpop.f32.mrf.mxu1 }
  0xc5   :  { %v768_v29 = vadd.f32 %v767_v61, %v749_v24  ;;  %v732_v32 = vadd.f32 %v731_v62, %v712_v58 }
  0xc8   :  { %v781_v0 = vpop.f32.mrf.mxu0  ;;  %v750_v1 = vpop.f32.mrf.mxu2 }
  0xc9   :  { %v782_v4 = vadd.f32 %v781_v0, %v763_v2  ;;  %v751_v35 = vadd.f32 %v750_v1, %v732_v32 }
  0xcc   :  { %v800_v5 = vpop.f32.mrf.mxu1  ;;  %v769_v7 = vpop.f32.mrf.mxu3 }
  0xcd   :  { %v801_v8 = vadd.f32 %v800_v5, %v782_v4  ;;  %v770_v40 = vadd.f32 %v769_v7, %v751_v35 }
  0xd0   :  { %v819_v10 = vpop.f32.mrf.mxu2  ;;  %v783_v11 = vpop.f32.mrf.mxu0 }
  0xd1   :  { %v820_v14 = vadd.f32 %v819_v10, %v801_v8  ;;  %v784_v18 = vadd.f32 %v783_v11, %v765_v13 }
  0xd3   :  { %v833_v17 = vmul.f32 %v1157_v9, %v820_v14 }
  0xd4   :  { %v802_v20 = vpop.f32.mrf.mxu1  ;;  %v786_v26 = vpop.f32.mrf.mxu3 }
  0xd5   :  { %v841_v21 = vadd.f32 %v1158_v15, %v833_v17  ;;  %v803_v25 = vadd.f32 %v802_v20, %v784_v18  ;;  %v787_v33 = vadd.f32 %v786_v26, %v768_v29 }
  0xd7   :  { %845 = vst [vmem:[%s1400_s4] sm:$0xff] %v841_v21 }
  0xd8   :  { %v821_v27 = vpop.f32.mrf.mxu2 }
  0xd9   :  { %v822_v28 = vadd.f32 %v821_v27, %v803_v25 }
  0xdb   :  { %v834_v30 = vmul.f32 %v1157_v9, %v822_v28 }
  0xdc   :  { %v805_v31 = vpop.f32.mrf.mxu1  ;;  %v788_v23 = vpop.f32.mrf.mxu3 }
  0xdd   :  { %v842_v34 = vadd.f32 %v1158_v15, %v834_v30  ;;  %v806_v37 = vadd.f32 %v805_v31, %v787_v33  ;;  %v789_v12 = vadd.f32 %v788_v23, %v770_v40 }
  0xdf   :  { %846 = vst [vmem:[%s1400_s4 + $0x8] sm:$0xff] %v842_v34 }
  0xe0   :  { %v824_v39 = vpop.f32.mrf.mxu2 }
  0xe1   :  { %v825_v22 = vadd.f32 %v824_v39, %v806_v37 }
  0xe3   :  { %v835_v36 = vmul.f32 %v1157_v9, %v825_v22 }
  0xe4   :  { %v807_v19 = vpop.f32.mrf.mxu1 }
  0xe5   :  { %v843_v38 = vadd.f32 %v1158_v15, %v835_v36  ;;  %v808_v41 = vadd.f32 %v807_v19, %v789_v12 }
  0xe7   :  { %847 = vst [vmem:[%s1400_s4 + $0x10] sm:$0xff] %v843_v38 }
  0xe8   :  { %v826_v42 = vpop.f32.mrf.mxu2 }
  0xe9   :  { %v827_v43 = vadd.f32 %v826_v42, %v808_v41 }
  0xeb   :  { %v836_v44 = vmul.f32 %v1157_v9, %v827_v43 }
  0xed   :  { %v844_v45 = vadd.f32 %v1158_v15, %v836_v44 }
  0xef   :  { %848 = vst [vmem:[%s1400_s4 + $0x18] sm:$0xff] %v844_v45 }
  0xf0   :  { %853 = vsyncpa [#allocation4], 1 }
  0xf1   :  { %854 = vsyncpa [#allocation6], 1 }

// kernel: _lambda_.6
= control target key start
LH: loop header
LB: loop body
LE: loop exit
PB: predicated region body
PF: predicated region fallthrough
CT: control target
= control target key end

     0   :  { %9 = vsyncpa [#allocation4], 0  ;;  %s9513_s0 = inlined_call_operand.vmem [shape: bf16[2,16,512], index: 0, kind: input, shape index: {}]   ;;  %s9514_s1 = inlined_call_operand.hbm [shape: bf16[4608,256], index: 1, kind: input, shape index: {}]   ;;  %s9515_s2 = inlined_call_operand.vmem [shape: f32[1,256], index: 2, kind: input, shape index: {}]   ;;  %s9516_s3 = inlined_call_operand.hbm [shape: f32[1,256], index: 3, kind: input, shape index: {}]   ;;  %s9517_s4 = inlined_call_operand.vmem [shape: bf16[2,16,256], index: 4, kind: output, shape index: {}]  }
   0x1   :  { %s17_s17 = sshll.u32 %s9514_s1, 4  ;;  %s18_s17 = int_to_ptr.hbm [resolvable:$true] %s17_s17 }
   0x2   :  { %10 = vsyncpa [#allocation6], 0  ;;  %s8433_s18 = smov [#allocation3]   ;;  %s33_s22 = sshll.u32 %s9516_s3, 4  ;;  %s34_s22 = int_to_ptr.hbm [resolvable:$true] %s33_s22 }
   0x3   :  { %s19_s19 = sshll.u32 %s8433_s18, 4  ;;  %s8434_s23 = smov 128   ;;  %s20_s19 = int_to_ptr.vmem [resolvable:$true] %s19_s19 }
   0x4   :  { %s8435_s24 = smov 8   ;;  %s8436_s25 = smov [#allocation5]  }
   0x5   :  { %25 = dma.hbm_to_vmem [thread:$0]  %s18_s17, 73728, %s20_s19, [#allocation4], %s8434_s23, %s8434_s23, %s8435_s24  }
   0x6   :  { %s35_s26 = sshll.u32 %s8436_s25, 4  ;;  %s36_s26 = int_to_ptr.vmem [resolvable:$true] %s35_s26 }
   0x7   :  { %38 = dma.hbm_to_vmem [thread:$0]  %s34_s22, 32, %s36_s26, [#allocation6]  }
   0x8   :  { %8429 = dma.done.wait [#allocation4], 73728  }
   0x9   :  { %8430 = vsyncadd [#allocation4], 4294893568 }
   0xa   :  { %8431 = dma.done.wait [#allocation6], 32  }
   0xb   :  { %8432 = vsyncadd [#allocation6], 4294967264  ;;  %v8437_v0 = vmov 0   ;;  %v5554_v1 = vld [vmem:[#allocation3 + $0x70] sm:$0xf]  ;;  %vm72_vm0 = vcmask 1041408  }
   0xc   :  { %48 = vst [vmem:[#allocation2 + $0x50] sm:$0x33] %v8437_v0  ;;  %v7815_v2 = vld [vmem:[#allocation3 + $0x74] sm:$0xf0]  ;;  %v5618_v3 = vld [vmem:[#allocation3 + $0xf0] sm:$0xf] }
   0xd   :  { %49 = vst [vmem:[#allocation2] sm:$0x33] %v8437_v0  ;;  %v5555_v4 = vor.u32 %v7815_v2, %v5554_v1  ;;  %v7831_v5 = vld [vmem:[#allocation3 + $0xf4] sm:$0xf0]  ;;  %v5682_v6 = vld [vmem:[#allocation3 + $0x170] sm:$0xf] }
   0xe   :  { %50 = vst [vmem:[#allocation2 + $0x48] sm:$0x33] %v8437_v0  ;;  %v7847_v7 = vld [vmem:[#allocation3 + $0x174] sm:$0xf0]  ;;  %v5619_v8 = vor.u32 %v7831_v5, %v5618_v3  ;;  %v5746_v10 = vld [vmem:[#allocation3 + $0x1f0] sm:$0xf] }
   0xf   :  { %51 = vst [vmem:[#allocation2 + $0x38] sm:$0x33] %v8437_v0  ;;  %v5683_v9 = vor.u32 %v7847_v7, %v5682_v6  ;;  %v7863_v11 = vld [vmem:[#allocation3 + $0x1f4] sm:$0xf0]  ;;  %v5546_v12 = vld [vmem:[#allocation3 + $0x60] sm:$0xf]  ;;  %4078 = vmatpush.bf16.msra.mxu0 %v5555_v4 }
  0x10   :  { %52 = vst [vmem:[#allocation2 + $0x40] sm:$0xcc] %v8437_v0  ;;  %v5747_v13 = vor.u32 %v7863_v11, %v5746_v10  ;;  %v7813_v14 = vld [vmem:[#allocation3 + $0x64] sm:$0xf0]  ;;  %v5610_v15 = vld [vmem:[#allocation3 + $0xe0] sm:$0xf]  ;;  %4097 = vmatpush.bf16.msra.mxu1 %v5619_v8 }
  0x11   :  { %53 = vst [vmem:[#allocation2 + $0x20] sm:$0xcc] %v8437_v0  ;;  %v7829_v16 = vld [vmem:[#allocation3 + $0xe4] sm:$0xf0]  ;;  %4116 = vmatpush.bf16.msra.mxu2 %v5683_v9  ;;  %v5547_v17 = vor.u32 %v7813_v14, %v5546_v12  ;;  %v5674_v19 = vld [vmem:[#allocation3 + $0x160] sm:$0xf] }
  0x12   :  { %v5611_v18 = vor.u32 %v7829_v16, %v5610_v15  ;;  %v7845_v20 = vld [vmem:[#allocation3 + $0x164] sm:$0xf0]  ;;  %v5738_v21 = vld [vmem:[#allocation3 + $0x1e0] sm:$0xf]  ;;  %4135 = vmatpush.bf16.msra.mxu3 %v5747_v13  ;;  %v5538_v24 = vld [vmem:[#allocation3 + $0x50] sm:$0xf] }
  0x13   :  { %v5675_v22 = vor.u32 %v7845_v20, %v5674_v19  ;;  %v7861_v23 = vld [vmem:[#allocation3 + $0x1e4] sm:$0xf0]  ;;  %v7811_v25 = vld [vmem:[#allocation3 + $0x54] sm:$0xf0]  ;;  %v5602_v27 = vld [vmem:[#allocation3 + $0xd0] sm:$0xf]  ;;  %4079 = vmatpush.bf16.msra.mxu0 %v5547_v17 }
  0x14   :  { %v5739_v26 = vor.u32 %v7861_v23, %v5738_v21  ;;  %v7827_v28 = vld [vmem:[#allocation3 + $0xd4] sm:$0xf0]  ;;  %v5666_v29 = vld [vmem:[#allocation3 + $0x150] sm:$0xf]  ;;  %v5539_v30 = vor.u32 %v7811_v25, %v5538_v24  ;;  %4098 = vmatpush.bf16.msra.mxu1 %v5611_v18  ;;  %v5530_v36 = vld [vmem:[#allocation3 + $0x40] sm:$0xf] }
  0x15   :  { %v7843_v31 = vld [vmem:[#allocation3 + $0x154] sm:$0xf0]  ;;  %v5730_v32 = vld [vmem:[#allocation3 + $0x1d0] sm:$0xf]  ;;  %4117 = vmatpush.bf16.msra.mxu2 %v5675_v22  ;;  %v5603_v34 = vor.u32 %v7827_v28, %v5602_v27  ;;  %v7809_v37 = vld [vmem:[#allocation3 + $0x44] sm:$0xf0] }
  0x16   :  { %v7859_v33 = vld [vmem:[#allocation3 + $0x1d4] sm:$0xf0]  ;;  %v5667_v35 = vor.u32 %v7843_v31, %v5666_v29  ;;  %v5594_v38 = vld [vmem:[#allocation3 + $0xc0] sm:$0xf]  ;;  %4136 = vmatpush.bf16.msra.mxu3 %v5739_v26  ;;  %v7825_v40 = vld [vmem:[#allocation3 + $0xc4] sm:$0xf0]  ;;  %v5531_v45 = vor.u32 %v7809_v37, %v5530_v36 }
  0x17   :  { %v5731_v39 = vor.u32 %v7859_v33, %v5730_v32  ;;  %v5658_v41 = vld [vmem:[#allocation3 + $0x140] sm:$0xf]  ;;  %v7841_v42 = vld [vmem:[#allocation3 + $0x144] sm:$0xf0]  ;;  %4080 = vmatpush.bf16.msra.mxu0 %v5539_v30  ;;  %v5595_v46 = vor.u32 %v7825_v40, %v5594_v38  ;;  %v5522_v48 = vld [vmem:[#allocation3 + $0x30] sm:$0xf] }
  0x18   :  { %v5722_v43 = vld [vmem:[#allocation3 + $0x1c0] sm:$0xf]  ;;  %v7857_v44 = vld [vmem:[#allocation3 + $0x1c4] sm:$0xf0]  ;;  %4099 = vmatpush.bf16.msra.mxu1 %v5603_v34  ;;  %v5659_v47 = vor.u32 %v7841_v42, %v5658_v41  ;;  %v7807_v49 = vld [vmem:[#allocation3 + $0x34] sm:$0xf0] }
  0x19   :  { %4118 = vmatpush.bf16.msra.mxu2 %v5667_v35  ;;  %v5586_v50 = vld [vmem:[#allocation3 + $0xb0] sm:$0xf]  ;;  %v5723_v51 = vor.u32 %v7857_v44, %v5722_v43  ;;  %v7823_v52 = vld [vmem:[#allocation3 + $0xb4] sm:$0xf0]  ;;  %v5523_v57 = vor.u32 %v7807_v49, %v5522_v48  ;;  %vm73_vm1 = vcmask 1045508   ;;  %v56_v18 = vld [vmem:[%s9513_s0] sm:$0xff] }
  0x1a   :  { %4137 = vmatpush.bf16.msra.mxu3 %v5731_v39  ;;  %v5650_v53 = vld [vmem:[#allocation3 + $0x130] sm:$0xf]  ;;  %v7839_v54 = vld [vmem:[#allocation3 + $0x134] sm:$0xf0]  ;;  %v5587_v58 = vor.u32 %v7823_v52, %v5586_v50  ;;  %v5514_v60 = vld [vmem:[#allocation3 + $0x20] sm:$0xf] }
  0x1b   :  { %v5714_v55 = vld [vmem:[#allocation3 + $0x1b0] sm:$0xf]  ;;  %v7855_v56 = vld [vmem:[#allocation3 + $0x1b4] sm:$0xf0]  ;;  %4081 = vmatpush.bf16.msra.mxu0 %v5531_v45  ;;  %v5651_v59 = vor.u32 %v7839_v54, %v5650_v53  ;;  %v7805_v61 = vld [vmem:[#allocation3 + $0x24] sm:$0xf0] }
  0x1c   :  { %4100 = vmatpush.bf16.msra.mxu1 %v5595_v46  ;;  %v5578_v62 = vld [vmem:[#allocation3 + $0xa0] sm:$0xf]  ;;  %v5715_v63 = vor.u32 %v7855_v56, %v5714_v55  ;;  %v7821_v1 = vld [vmem:[#allocation3 + $0xa4] sm:$0xf0]  ;;  %v5506_v6 = vld [vmem:[#allocation3 + $0x10] sm:$0xf]  ;;  %v5515_v7 = vor.u32 %v7805_v61, %v5514_v60 }
  0x1d   :  { %4119 = vmatpush.bf16.msra.mxu2 %v5659_v47  ;;  %v5642_v2 = vld [vmem:[#allocation3 + $0x120] sm:$0xf]  ;;  %v7837_v3 = vld [vmem:[#allocation3 + $0x124] sm:$0xf0]  ;;  %v7803_v8 = vld [vmem:[#allocation3 + $0x14] sm:$0xf0]  ;;  %v5579_v11 = vor.u32 %v7821_v1, %v5578_v62 }
  0x1e   :  { %4138 = vmatpush.bf16.msra.mxu3 %v5723_v51  ;;  %v5706_v4 = vld [vmem:[#allocation3 + $0x1a0] sm:$0xf]  ;;  %v7853_v5 = vld [vmem:[#allocation3 + $0x1a4] sm:$0xf0]  ;;  %v5570_v9 = vld [vmem:[#allocation3 + $0x90] sm:$0xf]  ;;  %v5643_v12 = vor.u32 %v7837_v3, %v5642_v2  ;;  %v5507_v26 = vor.u32 %v7803_v8, %v5506_v6 }
  0x1f   :  { %4082 = vmatpush.bf16.msra.mxu0 %v5523_v57  ;;  %v7819_v10 = vld [vmem:[#allocation3 + $0x94] sm:$0xf0]  ;;  %v5634_v13 = vld [vmem:[#allocation3 + $0x110] sm:$0xf]  ;;  %v5707_v16 = vor.u32 %v7853_v5, %v5706_v4  ;;  %54 = vst [vmem:[#allocation2 + $0x8] sm:$0xcc] %v8437_v0  ;;  %vm8496_vm2 = vmor %vm72_vm0, %vm73_vm1 }
  0x20   :  { %4101 = vmatpush.bf16.msra.mxu1 %v5587_v58  ;;  %v7835_v14 = vld [vmem:[#allocation3 + $0x114] sm:$0xf0]  ;;  %v5698_v15 = vld [vmem:[#allocation3 + $0x190] sm:$0xf]  ;;  %v5498_v20 = vld [vmem:[#allocation3] sm:$0xf]  ;;  %v5571_v33 = vor.u32 %v7819_v10, %v5570_v9 }
  0x21   :  { %4120 = vmatpush.bf16.msra.mxu2 %v5651_v59  ;;  %v7851_v17 = vld [vmem:[#allocation3 + $0x194] sm:$0xf0]  ;;  %v8481_v19 = vld [vmem:[%s9513_s0 + $0x10] sm:$0xff]  ;;  %v7801_v21 = vld [vmem:[#allocation3 + $0x4] sm:$0xf0]  ;;  %v75_v22 = vrot.slane %v56_v18, 6  ;;  %v5635_v34 = vor.u32 %v7835_v14, %v5634_v13 }
  0x22   :  { %4139 = vmatpush.bf16.msra.mxu3 %v5715_v63  ;;  %v78_v23 = vrot.slane %v8481_v19, 6  ;;  %55 = vst [vmem:[#allocation2 + $0x58] sm:$0xcc] %v8437_v0  ;;  %v57_v24 = vld [vmem:[%s9513_s0 + $0x8] sm:$0xff]  ;;  %v8492_v25 = vld [vmem:[%s9513_s0 + $0x18] sm:$0xff]  ;;  %v5699_v38 = vor.u32 %v7851_v17, %v5698_v15  ;;  %v5499_v45 = vor.u32 %v7801_v21, %v5498_v20  ;;  %v8516_v49 = vld [vmem:[%s9513_s0 + $0x20] sm:$0xff] }
  0x23   :  { %4083 = vmatpush.bf16.msra.mxu0 %v5515_v7  ;;  %v5562_v27 = vld [vmem:[#allocation3 + $0x80] sm:$0xf]  ;;  %v7817_v28 = vld [vmem:[#allocation3 + $0x84] sm:$0xf0]  ;;  %v76_v0 = vrot.slane %v57_v24, 6  ;;  %v81_v32 = vrot.slane %v8492_v25, 6 }
  0x24   :  { %v5626_v29 = vld [vmem:[#allocation3 + $0x100] sm:$0xf]  ;;  %v7833_v30 = vld [vmem:[#allocation3 + $0x104] sm:$0xf0]  ;;  %4102 = vmatpush.bf16.msra.mxu1 %v5579_v11  ;;  %v77_v37 = vrot.slane %v75_v22, 4  ;;  %v5563_v50 = vor.u32 %v7817_v28, %v5562_v27  ;;  %v8521_v54 = vld [vmem:[%s9513_s0 + $0x30] sm:$0xff] }
  0x25   :  { %4121 = vmatpush.bf16.msra.mxu2 %v5643_v12  ;;  %v5690_v35 = vld [vmem:[#allocation3 + $0x180] sm:$0xf]  ;;  %v7849_v36 = vld [vmem:[#allocation3 + $0x184] sm:$0xf0]  ;;  %107 = vst [vmem:[#allocation2 + $0x50] sm:$0xcc] %v75_v22  ;;  %v5627_v51 = vor.u32 %v7833_v30, %v5626_v29 }
  0x26   :  { %4140 = vmatpush.bf16.msra.mxu3 %v5707_v16  ;;  %v80_v39 = vrot.slane %v76_v0, 4  ;;  %108 = vst [vmem:[#allocation2] sm:$0xcc] %v76_v0  ;;  %v5938_v40 = vld [vmem:[#allocation3 + $0x370] sm:$0xf]  ;;  %v8505_v41 = vsel %vm8496_vm2, %v77_v37, %v78_v23  ;;  %v5691_v55 = vor.u32 %v7849_v36, %v5690_v35  ;;  %v85_v3 = vrot.slane %v8516_v49, 6 }
  0x27   :  { %9652 = vst [vmem:[#allocation9_spill] sm:$0xff] %v8505_v41  ;;  %v7911_v42 = vld [vmem:[#allocation3 + $0x374] sm:$0xf0]  ;;  %v5810_v43 = vld [vmem:[#allocation3 + $0x270] sm:$0xf]  ;;  %4084 = vmatpush.bf16.msra.mxu0 %v5507_v26  ;;  %v9525_v61 = vunpack.c.l.b16 %v8505_v41  ;;  %v9524_v62 = vunpack.c.h.b16 %v8505_v41  ;;  %v88_v15 = vrot.slane %v8521_v54, 6 }
  0x28   :  { %v7879_v44 = vld [vmem:[#allocation3 + $0x274] sm:$0xf0]  ;;  %v8511_v46 = vsel %vm8496_vm2, %v80_v39, %v81_v32  ;;  %v5874_v47 = vld [vmem:[#allocation3 + $0x2f0] sm:$0xf]  ;;  %4103 = vmatpush.bf16.msra.mxu1 %v5571_v33  ;;  %v5939_v56 = vor.u32 %v7911_v42, %v5938_v40  ;;  %v5930_v58 = vld [vmem:[#allocation3 + $0x360] sm:$0xf] }
  0x29   :  { %9653 = vst [vmem:[#allocation10_spill] sm:$0xff] %v8511_v46  ;;  %v7895_v48 = vld [vmem:[#allocation3 + $0x2f4] sm:$0xf0]  ;;  %4122 = vmatpush.bf16.msra.mxu2 %v5635_v34  ;;  %v6002_v52 = vld [vmem:[#allocation3 + $0x3f0] sm:$0xf]  ;;  %v5811_v57 = vor.u32 %v7879_v44, %v5810_v43  ;;  %v9523_v5 = vunpack.c.l.b16 %v8511_v46  ;;  %v9522_v6 = vunpack.c.h.b16 %v8511_v46  ;;  %v87_v14 = vrot.slane %v85_v3, 4 }
  0x2a   :  { %v7927_v53 = vld [vmem:[#allocation3 + $0x3f4] sm:$0xf0]  ;;  %4141 = vmatpush.bf16.msra.mxu3 %v5699_v38  ;;  %v7909_v59 = vld [vmem:[#allocation3 + $0x364] sm:$0xf0]  ;;  %v5802_v60 = vld [vmem:[#allocation3 + $0x260] sm:$0xf]  ;;  %v5875_v63 = vor.u32 %v7895_v48, %v5874_v47 }
  0x2b   :  { %v7877_v1 = vld [vmem:[#allocation3 + $0x264] sm:$0xf0]  ;;  %v5866_v2 = vld [vmem:[#allocation3 + $0x2e0] sm:$0xf]  ;;  %4085 = vmatpush.bf16.msra.mxu0 %v5499_v45  ;;  %v6003_v7 = vor.u32 %v7927_v53, %v6002_v52  ;;  %v5931_v18 = vor.u32 %v7909_v59, %v5930_v58  ;;  %v5922_v26 = vld [vmem:[#allocation3 + $0x350] sm:$0xf]  ;;  %v8554_v39 = vsel %vm8496_vm2, %v87_v14, %v88_v15 }
  0x2c   :  { %v119_v4 = vld [vmem:[#allocation2 + $0x50] sm:$0xff]  ;;  %v7893_v8 = vld [vmem:[#allocation3 + $0x2e4] sm:$0xf0]  ;;  %v5994_v9 = vld [vmem:[#allocation3 + $0x3e0] sm:$0xf]  ;;  %4104 = vmatpush.bf16.msra.mxu1 %v5563_v50  ;;  %v5803_v24 = vor.u32 %v7877_v1, %v5802_v60  ;;  %9654 = vst [vmem:[#allocation11_spill] sm:$0xff] %v8554_v39 }
  0x2d   :  { %4123 = vmatpush.bf16.msra.mxu2 %v5627_v51  ;;  %v139_v10 = vunpack.c.l.b16 %v119_v4  ;;  %v140_v11 = vunpack.c.h.b16 %v119_v4  ;;  %v120_v12 = vld [vmem:[#allocation2] sm:$0xff]  ;;  %v7925_v13 = vld [vmem:[#allocation3 + $0x3e4] sm:$0xf0]  ;;  %v7907_v27 = vld [vmem:[#allocation3 + $0x354] sm:$0xf0]  ;;  %v5867_v0 = vor.u32 %v7893_v8, %v5866_v2  ;;  %vm296_vm4 = vcmask 1046528  }
  0x2e   :  { %4142 = vmatpush.bf16.msra.mxu3 %v5691_v55  ;;  %v141_v16 = vunpack.c.l.b16 %v120_v12  ;;  %v142_v17 = vunpack.c.h.b16 %v120_v12  ;;  %v61_v20 = vld [vmem:[%s9513_s0 + $0x28] sm:$0xff]  ;;  %v5794_v28 = vld [vmem:[#allocation3 + $0x250] sm:$0xf]  ;;  %v5995_v33 = vor.u32 %v7925_v13, %v5994_v9  ;;  %v7875_v34 = vld [vmem:[#allocation3 + $0x254] sm:$0xf0]  ;;  %v5923_v45 = vor.u32 %v7907_v27, %v5922_v26 }
  0x2f   :  { %v8534_v21 = vpack.c.b16 %v9525_v61, %v139_v10  ;;  %v8538_v22 = vpack.c.b16 %v9524_v62, %v140_v11  ;;  %4154 = vmatpush.bf16.msrb.mxu0 %v5811_v57  ;;  %v5858_v35 = vld [vmem:[#allocation3 + $0x2d0] sm:$0xf]  ;;  %v7891_v36 = vld [vmem:[#allocation3 + $0x2d4] sm:$0xf0]  ;;  %113 = vst [vmem:[#allocation2 + $0x48] sm:$0xcc] %v85_v3  ;;  %v5795_v47 = vor.u32 %v7875_v34, %v5794_v28  ;;  %v9521_v12 = vunpack.c.l.b16 %v8554_v39 }
  0x30   :  { %4173 = vmatpush.bf16.msrb.mxu1 %v5875_v63  ;;  %v8542_v29 = vpack.c.b16 %v9523_v5, %v141_v16  ;;  %v8546_v30 = vpack.c.b16 %v9522_v6, %v142_v17  ;;  %v5986_v37 = vld [vmem:[#allocation3 + $0x3d0] sm:$0xf]  ;;  %v7923_v38 = vld [vmem:[#allocation3 + $0x3d4] sm:$0xf0]  ;;  %v5914_v40 = vld [vmem:[#allocation3 + $0x340] sm:$0xf]  ;;  %v5859_v51 = vor.u32 %v7891_v36, %v5858_v35  ;;  %v9520_v13 = vunpack.c.h.b16 %v8554_v39 }
  0x31   :  { %4192 = vmatpush.bf16.msrb.mxu2 %v5939_v56  ;;  %4086 = vmatmul.bf16.vlgmr.msra.gmra.mxu0 %v8534_v21  ;;  %v7905_v42 = vld [vmem:[#allocation3 + $0x344] sm:$0xf0]  ;;  %v8561_v43 = vld [vmem:[%s9513_s0 + $0x38] sm:$0xff]  ;;  %v86_v44 = vrot.slane %v61_v20, 6  ;;  %v5786_v48 = vld [vmem:[#allocation3 + $0x240] sm:$0xf]  ;;  %v5987_v52 = vor.u32 %v7923_v38, %v5986_v37 }
  0x32   :  { %4211 = vmatpush.bf16.msrb.mxu3 %v6003_v7  ;;  %4105 = vmatmul.bf16.vlgmr.msra.gmra.mxu1 %v8538_v22  ;;  %v7873_v49 = vld [vmem:[#allocation3 + $0x244] sm:$0xf0]  ;;  %v91_v50 = vrot.slane %v8561_v43, 6  ;;  %v5850_v53 = vld [vmem:[#allocation3 + $0x2c0] sm:$0xf]  ;;  %v5915_v63 = vor.u32 %v7905_v42, %v5914_v40  ;;  %v83_v34 = vrot.slane %v78_v23, 4 }
  0x33   :  { %4124 = vmatmul.bf16.vlgmr.msra.gmra.mxu2 %v8542_v29  ;;  %4143 = vmatmul.bf16.vlgmr.msra.gmra.mxu3 %v8546_v30  ;;  %v90_v55 = vrot.slane %v86_v44, 4  ;;  %114 = vst [vmem:[#allocation2 + $0x38] sm:$0xcc] %v86_v44  ;;  %v7889_v56 = vld [vmem:[#allocation3 + $0x2c4] sm:$0xf0]  ;;  %v5787_v1 = vor.u32 %v7873_v49, %v5786_v48  ;;  %v8585_v23 = vshll.u32 %v8534_v21, 16 }
  0x34   :  { %4155 = vmatpush.bf16.msrb.mxu0 %v5803_v24  ;;  %4174 = vmatpush.bf16.msrb.mxu1 %v5867_v0  ;;  %v5978_v57 = vld [vmem:[#allocation3 + $0x3c0] sm:$0xf]  ;;  %v7921_v58 = vld [vmem:[#allocation3 + $0x3c4] sm:$0xf0]  ;;  %v5906_v60 = vld [vmem:[#allocation3 + $0x330] sm:$0xf]  ;;  %v5851_v4 = vor.u32 %v7889_v56, %v5850_v53 }
  0x35   :  { %4193 = vmatpush.bf16.msrb.mxu2 %v5931_v18  ;;  %v8568_v59 = vsel %vm8496_vm2, %v90_v55, %v91_v50  ;;  %v7903_v2 = vld [vmem:[#allocation3 + $0x334] sm:$0xf0]  ;;  %v5778_v3 = vld [vmem:[#allocation3 + $0x230] sm:$0xf]  ;;  %v5979_v7 = vor.u32 %v7921_v58, %v5978_v57  ;;  %v5898_v24 = vld [vmem:[#allocation3 + $0x320] sm:$0xf] }
  0x36   :  { %4212 = vmatpush.bf16.msrb.mxu3 %v5995_v33  ;;  %9655 = vst [vmem:[#allocation12_spill] sm:$0xff] %v8568_v59  ;;  %v125_v8 = vld [vmem:[#allocation2 + $0x48] sm:$0xff]  ;;  %v7871_v9 = vld [vmem:[#allocation3 + $0x234] sm:$0xf0]  ;;  %v5842_v10 = vld [vmem:[#allocation3 + $0x2b0] sm:$0xf]  ;;  %v9519_v18 = vunpack.c.l.b16 %v8568_v59  ;;  %v9518_v20 = vunpack.c.h.b16 %v8568_v59  ;;  %v5907_v27 = vor.u32 %v7903_v2, %v5906_v60 }
  0x37   :  { %v147_v11 = vunpack.c.l.b16 %v125_v8  ;;  %v148_v31 = vunpack.c.h.b16 %v125_v8  ;;  %v7887_v14 = vld [vmem:[#allocation3 + $0x2b4] sm:$0xf0]  ;;  %v5970_v16 = vld [vmem:[#allocation3 + $0x3b0] sm:$0xf]  ;;  %v5779_v28 = vor.u32 %v7871_v9, %v5778_v3  ;;  %v7901_v0 = vld [vmem:[#allocation3 + $0x324] sm:$0xf0] }
  0x38   :  { %4156 = vmatpush.bf16.msrb.mxu0 %v5795_v47  ;;  %4175 = vmatpush.bf16.msrb.mxu1 %v5859_v51  ;;  %v7919_v17 = vld [vmem:[#allocation3 + $0x3b4] sm:$0xf0]  ;;  %v5770_v33 = vld [vmem:[#allocation3 + $0x220] sm:$0xf]  ;;  %v5843_v37 = vor.u32 %v7887_v14, %v5842_v10  ;;  %v7869_v40 = vld [vmem:[#allocation3 + $0x224] sm:$0xf0]  ;;  %v5899_v57 = vor.u32 %v7901_v0, %v5898_v24 }
  0x39   :  { %4194 = vmatpush.bf16.msrb.mxu2 %v5923_v45  ;;  %v5971_v38 = vor.u32 %v7919_v17, %v5970_v16  ;;  %v5834_v42 = vld [vmem:[#allocation3 + $0x2a0] sm:$0xf]  ;;  %v7885_v44 = vld [vmem:[#allocation3 + $0x2a4] sm:$0xf0]  ;;  %v8578_v45 = vpack.c.b16 %v9521_v12, %v147_v11  ;;  %v8582_v47 = vpack.c.b16 %v9520_v13, %v148_v31  ;;  %9656 = vst [vmem:[#allocation13_spill] sm:$0xff] %v8585_v23  ;;  %v84_v8 = vrot.slane %v81_v32, 4 }
  0x3a   :  { %4213 = vmatpush.bf16.msrb.mxu3 %v5987_v52  ;;  %v126_v26 = vld [vmem:[#allocation2 + $0x38] sm:$0xff]  ;;  %v5962_v48 = vld [vmem:[#allocation3 + $0x3a0] sm:$0xf]  ;;  %v7917_v19 = vld [vmem:[#allocation3 + $0x3a4] sm:$0xf0]  ;;  %v5771_v58 = vor.u32 %v7869_v40, %v5770_v33  ;;  %v197_v16 = vrot.slane %v8585_v23, 1 }
  0x3b   :  { %v149_v35 = vunpack.c.l.b16 %v126_v26  ;;  %v150_v36 = vunpack.c.h.b16 %v126_v26  ;;  %v5890_v52 = vld [vmem:[#allocation3 + $0x310] sm:$0xf]  ;;  %v7899_v53 = vld [vmem:[#allocation3 + $0x314] sm:$0xf0]  ;;  %111 = vst [vmem:[#allocation2 + $0x40] sm:$0x33] %v83_v34  ;;  %v5963_v2 = vor.u32 %v7917_v19, %v5962_v48 }
  0x3c   :  { %4157 = vmatpush.bf16.msrb.mxu0 %v5787_v1  ;;  %4176 = vmatpush.bf16.msrb.mxu1 %v5851_v4  ;;  %v5762_v55 = vld [vmem:[#allocation3 + $0x210] sm:$0xf]  ;;  %v7867_v56 = vld [vmem:[#allocation3 + $0x214] sm:$0xf0]  ;;  %v5835_v1 = vor.u32 %v7885_v44, %v5834_v42  ;;  %v5882_v9 = vld [vmem:[#allocation3 + $0x300] sm:$0xf]  ;;  %v5891_v25 = vor.u32 %v7899_v53, %v5890_v52 }
  0x3d   :  { %4195 = vmatpush.bf16.msrb.mxu2 %v5915_v63  ;;  %v8589_v49 = vpack.c.b16 %v9519_v18, %v149_v35  ;;  %v8593_v51 = vpack.c.b16 %v9518_v20, %v150_v36  ;;  %v5826_v60 = vld [vmem:[#allocation3 + $0x290] sm:$0xf]  ;;  %v7883_v63 = vld [vmem:[#allocation3 + $0x294] sm:$0xf0]  ;;  %v7897_v10 = vld [vmem:[#allocation3 + $0x304] sm:$0xf0]  ;;  %v5763_v32 = vor.u32 %v7867_v56, %v5762_v55 }
  0x3e   :  { %4214 = vmatpush.bf16.msrb.mxu3 %v5979_v7  ;;  %v5954_v3 = vld [vmem:[#allocation3 + $0x390] sm:$0xf]  ;;  %v7915_v4 = vld [vmem:[#allocation3 + $0x394] sm:$0xf0]  ;;  %v8596_v7 = vshrl.u32 %v8534_v21, 16  ;;  %v8608_v17 = vshll.u32 %v8538_v22, 16  ;;  %v5827_v24 = vor.u32 %v7883_v63, %v5826_v60  ;;  %v5883_v42 = vor.u32 %v7897_v10, %v5882_v9 }
  0x3f   :  { %9657 = vst [vmem:[#allocation14_spill] sm:$0xff] %v8589_v49  ;;  %v5754_v11 = vld [vmem:[#allocation3 + $0x200] sm:$0xf]  ;;  %v7865_v31 = vld [vmem:[#allocation3 + $0x204] sm:$0xf0]  ;;  %v5955_v0 = vor.u32 %v7915_v4, %v5954_v3  ;;  %v8611_v33 = vshrl.u32 %v8538_v22, 16 }
  0x40   :  { %9658 = vst [vmem:[#allocation15_spill] sm:$0xff] %v8593_v51  ;;  %4158 = vmatpush.bf16.msrb.mxu0 %v5779_v28  ;;  %4177 = vmatpush.bf16.msrb.mxu1 %v5843_v37  ;;  %v8604_v14 = vld [vmem:[#allocation3 + $0x280] sm:$0xf]  ;;  %v7881_v26 = vld [vmem:[#allocation3 + $0x284] sm:$0xf0]  ;;  %v8614_v34 = vshll.u32 %v8542_v29, 16  ;;  %v5755_v44 = vor.u32 %v7865_v31, %v5754_v11 }
  0x41   :  { %4196 = vmatpush.bf16.msrb.mxu2 %v5907_v27  ;;  %9659 = vst [vmem:[#allocation16_spill] sm:$0xff] %v8596_v7  ;;  %4091 = vmatmul.bf16.gmra.mxu0 %v8578_v45  ;;  %v5946_v27 = vld [vmem:[#allocation3 + $0x380] sm:$0xf]  ;;  %v7913_v28 = vld [vmem:[#allocation3 + $0x384] sm:$0xf0]  ;;  %v8617_v36 = vshrl.u32 %v8542_v29, 16  ;;  %v5819_v55 = vor.u32 %v7881_v26, %v8604_v14 }
  0x42   :  { %4215 = vmatpush.bf16.msrb.mxu3 %v5971_v38  ;;  %4110 = vmatmul.bf16.gmra.mxu1 %v8582_v47  ;;  %9660 = vst [vmem:[#allocation17_spill] sm:$0xff] %v8608_v17  ;;  %vm191_vm3 = vsmask.f32 7424  ;;  %v6194_v35 = vld [vmem:[#allocation3 + $0x570] sm:$0xf]  ;;  %v8620_v37 = vshll.u32 %v8546_v30, 16  ;;  %v5947_v56 = vor.u32 %v7913_v28, %v5946_v27  ;;  %v198_v28 = vor.u32 %v197_v16, %v8596_v7 }
  0x43   :  { %4129 = vmatmul.bf16.gmra.mxu2 %v8589_v49  ;;  %4148 = vmatmul.bf16.gmra.mxu3 %v8593_v51  ;;  %112 = vst [vmem:[#allocation2 + $0x20] sm:$0x33] %v84_v8  ;;  %v7975_v38 = vld [vmem:[#allocation3 + $0x574] sm:$0xf0]  ;;  %v6066_v40 = vld [vmem:[#allocation3 + $0x470] sm:$0xf] }
  0x44   :  { %4159 = vmatpush.bf16.msrb.mxu0 %v5771_v58  ;;  %4178 = vmatpush.bf16.msrb.mxu1 %v5835_v1  ;;  %9661 = vst [vmem:[#allocation18_spill] sm:$0xff] %v8611_v33  ;;  %v123_v48 = vld [vmem:[#allocation2 + $0x40] sm:$0xff]  ;;  %v209_v19 = vrot.slane %v8608_v17, 1  ;;  %v7943_v52 = vld [vmem:[#allocation3 + $0x474] sm:$0xf0]  ;;  %v8630_v3 = vshrl.u32 %v8546_v30, 16  ;;  %v6195_v4 = vor.u32 %v7975_v38, %v6194_v35 }
  0x45   :  { %4197 = vmatpush.bf16.msrb.mxu2 %v5899_v57  ;;  %9662 = vst [vmem:[#allocation19_spill] sm:$0xff] %v8614_v34  ;;  %v6130_v53 = vld [vmem:[#allocation3 + $0x4f0] sm:$0xf]  ;;  %v8624_v57 = vunpack.c.l.b16 %v123_v48  ;;  %v8626_v58 = vunpack.c.h.b16 %v123_v48  ;;  %v7959_v60 = vld [vmem:[#allocation3 + $0x4f4] sm:$0xf0]  ;;  %v93_v8 = vrot.slane %v88_v15, 4  ;;  %v6067_v14 = vor.u32 %v7943_v52, %v6066_v40 }
  0x46   :  { %4216 = vmatpush.bf16.msrb.mxu3 %v5963_v2  ;;  %9663 = vst [vmem:[#allocation20_spill] sm:$0xff] %v8617_v36  ;;  %v6258_v63 = vld [vmem:[#allocation3 + $0x5f0] sm:$0xf]  ;;  %v7991_v1 = vld [vmem:[#allocation3 + $0x5f4] sm:$0xf0]  ;;  %v221_v2 = vrot.slane %v8614_v34, 1  ;;  %v210_v35 = vor.u32 %v209_v19, %v8611_v33 }
  0x47   :  { %9664 = vst [vmem:[#allocation21_spill] sm:$0xff] %v8620_v37  ;;  %v8636_v9 = vpack.c.b16 %v8624_v57, %v8624_v57  ;;  %v8640_v10 = vpack.c.b16 %v8626_v58, %v8626_v58  ;;  %v233_v31 = vrot.slane %v8620_v37, 1  ;;  %v6259_v26 = vor.u32 %v7991_v1, %v6258_v63  ;;  %v6186_v54 = vld [vmem:[#allocation3 + $0x560] sm:$0xf]  ;;  %v7973_v15 = vld [vmem:[#allocation3 + $0x564] sm:$0xf0] }
  0x48   :  { %4160 = vmatpush.bf16.msrb.mxu0 %v5763_v32  ;;  %9665 = vst [vmem:[#allocation22_spill] sm:$0xff] %v8624_v57  ;;  %4179 = vmatpush.bf16.msrb.mxu1 %v5827_v24  ;;  %v6131_v24 = vor.u32 %v7959_v60, %v6130_v53  ;;  %v6058_v27 = vld [vmem:[#allocation3 + $0x460] sm:$0xf]  ;;  %v7941_v40 = vld [vmem:[#allocation3 + $0x464] sm:$0xf0]  ;;  %v222_v63 = vor.u32 %v221_v2, %v8617_v36  ;;  %vm410_vm6 = vcmask 1045504  }
  0x49   :  { %4198 = vmatpush.bf16.msrb.mxu2 %v5891_v25  ;;  %9666 = vst [vmem:[#allocation23_spill] sm:$0xff] %v8626_v58  ;;  %v8653_v38 = vshll.u32 %v8640_v10, 16  ;;  %v6122_v48 = vld [vmem:[#allocation3 + $0x4e0] sm:$0xf]  ;;  %v7957_v16 = vld [vmem:[#allocation3 + $0x4e4] sm:$0xf0]  ;;  %v6187_v18 = vor.u32 %v7973_v15, %v6186_v54  ;;  %v6059_v13 = vor.u32 %v7941_v40, %v6058_v27 }
  0x4a   :  { %4217 = vmatpush.bf16.msrb.mxu3 %v5955_v0  ;;  %9667 = vst [vmem:[#allocation24_spill] sm:$0xff] %v8630_v3  ;;  %v124_v11 = vld [vmem:[#allocation2 + $0x20] sm:$0xff]  ;;  %v8649_v0 = vshll.u32 %v8636_v9, 16  ;;  %v7989_v53 = vld [vmem:[#allocation3 + $0x5e4] sm:$0xf0]  ;;  %v6123_v61 = vor.u32 %v7957_v16, %v6122_v48  ;;  %vm508_vm8 = vcmask 1044480  }
  0x4b   :  { %v8643_v25 = vunpack.c.l.b16 %v124_v11  ;;  %v8645_v32 = vunpack.c.h.b16 %v124_v11  ;;  %9671 = vst [vmem:[#allocation28_spill] sm:$0xff] %v8653_v38  ;;  %v214_v60 = vrot.slane %v8653_v38, 1  ;;  %v7971_v1 = vld [vmem:[#allocation3 + $0x554] sm:$0xf0]  ;;  %v6050_v12 = vld [vmem:[#allocation3 + $0x450] sm:$0xf] }
  0x4c   :  { %4161 = vmatpush.bf16.msrb.mxu0 %v5755_v44  ;;  %9670 = vst [vmem:[#allocation27_spill] sm:$0xff] %v8649_v0  ;;  %4180 = vmatpush.bf16.msrb.mxu1 %v5819_v55  ;;  %v6250_v44 = vld [vmem:[#allocation3 + $0x5e0] sm:$0xf]  ;;  %v202_v19 = vrot.slane %v8649_v0, 1  ;;  %v234_v55 = vor.u32 %v233_v31, %v8630_v3  ;;  %v7939_v31 = vld [vmem:[#allocation3 + $0x454] sm:$0xf0] }
  0x4d   :  { %9668 = vst [vmem:[#allocation25_spill] sm:$0xff] %v8643_v25  ;;  %4199 = vmatpush.bf16.msrb.mxu2 %v5883_v42  ;;  %v8657_v52 = vpack.c.b16 %v8643_v25, %v8643_v25  ;;  %v8661_v42 = vpack.c.b16 %v8645_v32, %v8645_v32  ;;  %v7955_v6 = vld [vmem:[#allocation3 + $0x4d4] sm:$0xf0]  ;;  %v6170_v15 = vld [vmem:[#allocation3 + $0x540] sm:$0xf]  ;;  %v6051_v16 = vor.u32 %v7939_v31, %v6050_v12 }
  0x4e   :  { %9669 = vst [vmem:[#allocation26_spill] sm:$0xff] %v8645_v32  ;;  %4218 = vmatpush.bf16.msrb.mxu3 %v5947_v56  ;;  %v6178_v56 = vld [vmem:[#allocation3 + $0x550] sm:$0xf]  ;;  %v8674_v2 = vsel %vm191_vm3, %v198_v28, %v202_v19  ;;  %v7987_v54 = vld [vmem:[#allocation3 + $0x5d4] sm:$0xf0]  ;;  %v8684_v28 = vshll.u32 %v8578_v45, 16 }
  0x4f   :  { %v8668_v11 = vshll.u32 %v8657_v52, 16  ;;  %v8671_v20 = vshll.u32 %v8661_v42, 16  ;;  %117 = vst [vmem:[#allocation2 + $0x8] sm:$0x33] %v93_v8  ;;  %v6179_v8 = vor.u32 %v7971_v1, %v6178_v56  ;;  %v7969_v27 = vld [vmem:[#allocation3 + $0x544] sm:$0xf0] }
  0x50   :  { %4230 = vmatpush.bf16.msra.mxu0 %v6067_v14  ;;  %4249 = vmatpush.bf16.msra.mxu1 %v6131_v24  ;;  %9674 = vst [vmem:[#allocation31_spill] sm:$0xff] %v8674_v2  ;;  %v6114_v14 = vld [vmem:[#allocation3 + $0x4d0] sm:$0xf]  ;;  %v6251_v24 = vor.u32 %v7989_v53, %v6250_v44  ;;  %v6042_v44 = vld [vmem:[#allocation3 + $0x440] sm:$0xf]  ;;  %v8695_v19 = vshll.u32 %v8582_v47, 16 }
  0x51   :  { %4268 = vmatpush.bf16.msra.mxu2 %v6195_v4  ;;  %9672 = vst [vmem:[#allocation29_spill] sm:$0xff] %v8668_v11  ;;  %v8677_v4 = vsel %vm191_vm3, %v210_v35, %v214_v60  ;;  %v226_v5 = vrot.slane %v8668_v11, 1  ;;  %v238_v62 = vrot.slane %v8671_v20, 1  ;;  %4162 = vmatmul.bf16.vlgmr.msrb.gmra.mxu0 %v8674_v2  ;;  %v94_v35 = vrot.slane %v91_v50, 4  ;;  %v7937_v53 = vld [vmem:[#allocation3 + $0x444] sm:$0xf0] }
  0x52   :  { %9673 = vst [vmem:[#allocation30_spill] sm:$0xff] %v8671_v20  ;;  %4287 = vmatpush.bf16.msra.mxu3 %v6259_v26  ;;  %v6242_v26 = vld [vmem:[#allocation3 + $0x5d0] sm:$0xf]  ;;  %4181 = vmatmul.bf16.vlgmr.msrb.gmra.mxu1 %v8677_v4  ;;  %v6106_v43 = vld [vmem:[#allocation3 + $0x4c0] sm:$0xf]  ;;  %v6043_v12 = vor.u32 %v7937_v53, %v6042_v44  ;;  %v245_v56 = vrot.slane %v8684_v28, 1 }
  0x53   :  { %9675 = vst [vmem:[#allocation32_spill] sm:$0xff] %v8677_v4  ;;  %v8689_v40 = vsel %vm191_vm3, %v222_v63, %v226_v5  ;;  %v8692_v48 = vsel %vm191_vm3, %v234_v55, %v238_v62  ;;  %v6115_v5 = vor.u32 %v7955_v6, %v6114_v14  ;;  %v6243_v50 = vor.u32 %v7987_v54, %v6242_v26  ;;  %v7953_v62 = vld [vmem:[#allocation3 + $0x4c4] sm:$0xf0]  ;;  %v6234_v60 = vld [vmem:[#allocation3 + $0x5c0] sm:$0xf] }
  0x54   :  { %9676 = vst [vmem:[#allocation33_spill] sm:$0xff] %v8689_v40  ;;  %4231 = vmatpush.bf16.msra.mxu0 %v6059_v13  ;;  %4200 = vmatmul.bf16.vlgmr.msrb.gmra.mxu2 %v8689_v40  ;;  %v6171_v13 = vor.u32 %v7969_v27, %v6170_v15  ;;  %v8700_v55 = vshrl.u32 %v8578_v45, 16  ;;  %v257_v6 = vrot.slane %v8695_v19, 1  ;;  %v6162_v14 = vld [vmem:[#allocation3 + $0x530] sm:$0xf]  ;;  %v6107_v26 = vor.u32 %v7953_v62, %v6106_v43 }
  0x55   :  { %9677 = vst [vmem:[#allocation34_spill] sm:$0xff] %v8692_v48  ;;  %4269 = vmatpush.bf16.msra.mxu2 %v6187_v18  ;;  %4219 = vmatmul.bf16.vlgmr.msrb.gmra.mxu3 %v8692_v48  ;;  %v7985_v18 = vld [vmem:[#allocation3 + $0x5c4] sm:$0xf0]  ;;  %v8712_v15 = vshll.u32 %v8589_v49, 16  ;;  %v8715_v27 = vshll.u32 %v8593_v51, 16  ;;  %v8726_v53 = vshrl.u32 %v8589_v49, 16 }
  0x56   :  { %9678 = vst [vmem:[#allocation35_spill] sm:$0xff] %v8695_v19  ;;  %4250 = vmatpush.bf16.msra.mxu1 %v6123_v61  ;;  %4288 = vmatpush.bf16.msra.mxu3 %v6251_v24  ;;  %v129_v63 = vld [vmem:[#allocation2 + $0x8] sm:$0xff]  ;;  %v8708_v61 = vshrl.u32 %v8582_v47, 16  ;;  %v7967_v24 = vld [vmem:[#allocation3 + $0x534] sm:$0xf0]  ;;  %v6235_v54 = vor.u32 %v7985_v18, %v6234_v60  ;;  %v8729_v43 = vshrl.u32 %v8593_v51, 16  ;;  %v246_v18 = vor.u32 %v245_v56, %v8700_v55 }
  0x57   :  { %118 = vst [vmem:[#allocation2 + $0x58] sm:$0x33] %v94_v35  ;;  %v8703_v1 = vunpack.c.l.b16 %v129_v63  ;;  %v8705_v31 = vunpack.c.h.b16 %v129_v63  ;;  %v7935_v35 = vld [vmem:[#allocation3 + $0x434] sm:$0xf0]  ;;  %v6098_v62 = vld [vmem:[#allocation3 + $0x4b0] sm:$0xf] }
  0x58   :  { %4232 = vmatpush.bf16.msra.mxu0 %v6051_v16  ;;  %9681 = vst [vmem:[#allocation38_spill] sm:$0xff] %v8708_v61  ;;  %v7951_v60 = vld [vmem:[#allocation3 + $0x4b4] sm:$0xf0]  ;;  %v6154_v48 = vld [vmem:[#allocation3 + $0x520] sm:$0xf]  ;;  %v258_v4 = vor.u32 %v257_v6, %v8708_v61  ;;  %v269_v56 = vrot.slane %v8712_v15, 1 }
  0x59   :  { %4270 = vmatpush.bf16.msra.mxu2 %v6179_v8  ;;  %9679 = vst [vmem:[#allocation36_spill] sm:$0xff] %v8703_v1  ;;  %v6034_v8 = vld [vmem:[#allocation3 + $0x430] sm:$0xf]  ;;  %v8719_v16 = vpack.c.b16 %v8703_v1, %v8703_v1  ;;  %v8723_v44 = vpack.c.b16 %v8705_v31, %v8705_v31  ;;  %v7983_v63 = vld [vmem:[#allocation3 + $0x5b4] sm:$0xf0]  ;;  %v6099_v25 = vor.u32 %v7951_v60, %v6098_v62 }
  0x5a   :  { %9680 = vst [vmem:[#allocation37_spill] sm:$0xff] %v8705_v31  ;;  %4251 = vmatpush.bf16.msra.mxu1 %v6115_v5  ;;  %4289 = vmatpush.bf16.msra.mxu3 %v6243_v50  ;;  %v6163_v5 = vor.u32 %v7967_v24, %v6162_v14  ;;  %v6226_v50 = vld [vmem:[#allocation3 + $0x5b0] sm:$0xf]  ;;  %v6035_v31 = vor.u32 %v7935_v35, %v6034_v8  ;;  %v7965_v1 = vld [vmem:[#allocation3 + $0x524] sm:$0xf0] }
  0x5b   :  { %9682 = vst [vmem:[#allocation39_spill] sm:$0xff] %v8712_v15  ;;  %v8733_v40 = vshll.u32 %v8719_v16, 16  ;;  %v8737_v2 = vshll.u32 %v8723_v44, 16  ;;  %v7933_v24 = vld [vmem:[#allocation3 + $0x424] sm:$0xf0]  ;;  %v6227_v46 = vor.u32 %v7983_v63, %v6226_v50  ;;  %v6155_v35 = vor.u32 %v7965_v1, %v6154_v48 }
  0x5c   :  { %9683 = vst [vmem:[#allocation40_spill] sm:$0xff] %v8715_v27  ;;  %4233 = vmatpush.bf16.msra.mxu0 %v6043_v12  ;;  %v6026_v12 = vld [vmem:[#allocation3 + $0x420] sm:$0xf]  ;;  %v7949_v57 = vld [vmem:[#allocation3 + $0x4a4] sm:$0xf0] }
  0x5d   :  { %9684 = vst [vmem:[#allocation41_spill] sm:$0xff] %v8726_v53  ;;  %4271 = vmatpush.bf16.msra.mxu2 %v6171_v13  ;;  %v281_v13 = vrot.slane %v8715_v27, 1  ;;  %v250_v6 = vrot.slane %v8733_v40, 1  ;;  %v262_v32 = vrot.slane %v8737_v2, 1  ;;  %v6090_v58 = vld [vmem:[#allocation3 + $0x4a0] sm:$0xf]  ;;  %v6027_v62 = vor.u32 %v7933_v24, %v6026_v12 }
  0x5e   :  { %9685 = vst [vmem:[#allocation42_spill] sm:$0xff] %v8729_v43  ;;  %v130_v59 = vld [vmem:[#allocation2 + $0x58] sm:$0xff]  ;;  %4252 = vmatpush.bf16.msra.mxu1 %v6107_v26  ;;  %4290 = vmatpush.bf16.msra.mxu3 %v6235_v54  ;;  %v6218_v41 = vld [vmem:[#allocation3 + $0x5a0] sm:$0xf]  ;;  %v7981_v60 = vld [vmem:[#allocation3 + $0x5a4] sm:$0xf0] }
  0x5f   :  { %9686 = vst [vmem:[#allocation43_spill] sm:$0xff] %v8737_v2  ;;  %v8739_v39 = vunpack.c.l.b16 %v130_v59  ;;  %v8742_v14 = vunpack.c.h.b16 %v130_v59  ;;  %v8756_v26 = vsel %vm191_vm3, %v246_v18, %v250_v6  ;;  %v8759_v54 = vsel %vm191_vm3, %v258_v4, %v262_v32  ;;  %v6146_v50 = vld [vmem:[#allocation3 + $0x510] sm:$0xf]  ;;  %v7963_v63 = vld [vmem:[#allocation3 + $0x514] sm:$0xf0] }
  0x60   :  { %9691 = vst [vmem:[#allocation48_spill] sm:$0xff] %v8756_v26  ;;  %4234 = vmatpush.bf16.msra.mxu0 %v6035_v31  ;;  %v282_v48 = vor.u32 %v281_v13, %v8729_v43  ;;  %v6018_v18 = vld [vmem:[#allocation3 + $0x410] sm:$0xf]  ;;  %v7931_v6 = vld [vmem:[#allocation3 + $0x414] sm:$0xf0]  ;;  %v6219_v12 = vor.u32 %v7981_v60, %v6218_v41  ;;  %v6147_v27 = vor.u32 %v7963_v63, %v6146_v50 }
  0x61   :  { %9687 = vst [vmem:[#allocation44_spill] sm:$0xff] %v8739_v39  ;;  %v8749_v8 = vpack.c.b16 %v8739_v39, %v8739_v39  ;;  %v8753_v59 = vpack.c.b16 %v8742_v14, %v8742_v14  ;;  %4272 = vmatpush.bf16.msra.mxu2 %v6163_v5  ;;  %v270_v39 = vor.u32 %v269_v56, %v8726_v53  ;;  %v6082_v32 = vld [vmem:[#allocation3 + $0x490] sm:$0xf]  ;;  %v7947_v4 = vld [vmem:[#allocation3 + $0x494] sm:$0xf0] }
  0x62   :  { %9688 = vst [vmem:[#allocation45_spill] sm:$0xff] %v8742_v14  ;;  %4253 = vmatpush.bf16.msra.mxu1 %v6099_v25  ;;  %4291 = vmatpush.bf16.msra.mxu3 %v6227_v46  ;;  %v6091_v56 = vor.u32 %v7949_v57, %v6090_v58  ;;  %v6210_v13 = vld [vmem:[#allocation3 + $0x590] sm:$0xf]  ;;  %v7979_v24 = vld [vmem:[#allocation3 + $0x594] sm:$0xf0]  ;;  %v6019_v43 = vor.u32 %v7931_v6, %v6018_v18 }
  0x63   :  { %9689 = vst [vmem:[#allocation46_spill] sm:$0xff] %v8749_v8  ;;  %v8763_v14 = vshll.u32 %v8749_v8, 16  ;;  %v8767_v1 = vshll.u32 %v8753_v59, 16  ;;  %4167 = vmatmul.bf16.gmra.mxu0 %v8756_v26  ;;  %4186 = vmatmul.bf16.gmra.mxu1 %v8759_v54  ;;  %v6138_v25 = vld [vmem:[#allocation3 + $0x500] sm:$0xf] }
  0x64   :  { %9690 = vst [vmem:[#allocation47_spill] sm:$0xff] %v8753_v59  ;;  %4235 = vmatpush.bf16.msra.mxu0 %v6027_v62  ;;  %v7961_v46 = vld [vmem:[#allocation3 + $0x504] sm:$0xf0]  ;;  %v6010_v15 = vld [vmem:[#allocation3 + $0x400] sm:$0xf]  ;;  %v6211_v62 = vor.u32 %v7979_v24, %v6210_v13 }
  0x65   :  { %9692 = vst [vmem:[#allocation49_spill] sm:$0xff] %v8759_v54  ;;  %v274_v31 = vrot.slane %v8763_v14, 1  ;;  %v286_v5 = vrot.slane %v8767_v1, 1  ;;  %4273 = vmatpush.bf16.msra.mxu2 %v6155_v35  ;;  %v7929_v26 = vld [vmem:[#allocation3 + $0x404] sm:$0xf0]  ;;  %v6083_v35 = vor.u32 %v7947_v4, %v6082_v32  ;;  %v6139_v63 = vor.u32 %v7961_v46, %v6138_v25 }
  0x66   :  { %9693 = vst [vmem:[#allocation50_spill] sm:$0xff] %v8763_v14  ;;  %v6074_v14 = vld [vmem:[#allocation3 + $0x480] sm:$0xf]  ;;  %v8039_v41 = vld [vmem:[#allocation3 + $0x774] sm:$0xf0]  ;;  %4254 = vmatpush.bf16.msra.mxu1 %v6091_v56  ;;  %4292 = vmatpush.bf16.msra.mxu3 %v6219_v12 }
  0x67   :  { %9694 = vst [vmem:[#allocation51_spill] sm:$0xff] %v8767_v1  ;;  %v8774_v53 = vsel %vm191_vm3, %v270_v39, %v274_v31  ;;  %v8777_v54 = vsel %vm191_vm3, %v282_v48, %v286_v5  ;;  %v6450_v1 = vld [vmem:[#allocation3 + $0x770] sm:$0xf]  ;;  %v8007_v58 = vld [vmem:[#allocation3 + $0x674] sm:$0xf0]  ;;  %v6011_v48 = vor.u32 %v7929_v26, %v6010_v15  ;;  %v300_v15 = vrot.slane %v8538_v22, 1 }
  0x68   :  { %9695 = vst [vmem:[#allocation52_spill] sm:$0xff] %v8774_v53  ;;  %4205 = vmatmul.bf16.gmra.mxu2 %v8774_v53  ;;  %4224 = vmatmul.bf16.gmra.mxu3 %v8777_v54  ;;  %v6322_v57 = vld [vmem:[#allocation3 + $0x670] sm:$0xf]  ;;  %v7945_v60 = vld [vmem:[#allocation3 + $0x484] sm:$0xf0]  ;;  %v6451_v31 = vor.u32 %v8039_v41, %v6450_v1  ;;  %v301_v26 = vrot.slane %v8640_v10, 1 }
  0x69   :  { %9696 = vst [vmem:[#allocation53_spill] sm:$0xff] %v8777_v54  ;;  %v6202_v39 = vld [vmem:[#allocation3 + $0x580] sm:$0xf]  ;;  %v7977_v50 = vld [vmem:[#allocation3 + $0x584] sm:$0xf0]  ;;  %4274 = vmatpush.bf16.msra.mxu2 %v6147_v27  ;;  %4236 = vmatpush.bf16.msra.mxu0 %v6019_v43  ;;  %v6323_v5 = vor.u32 %v8007_v58, %v6322_v57  ;;  %v6075_v19 = vor.u32 %v7945_v60, %v6074_v14  ;;  %v297_v27 = vrot.slane %v8534_v21, 1 }
  0x6a   :  { %v6386_v18 = vld [vmem:[#allocation3 + $0x6f0] sm:$0xf]  ;;  %v8023_v6 = vld [vmem:[#allocation3 + $0x6f4] sm:$0xf0]  ;;  %v6442_v2 = vld [vmem:[#allocation3 + $0x760] sm:$0xf]  ;;  %4255 = vmatpush.bf16.msra.mxu1 %v6083_v35  ;;  %4293 = vmatpush.bf16.msra.mxu3 %v6211_v62  ;;  %v6203_v4 = vor.u32 %v7977_v50, %v6202_v39 }
  0x6b   :  { %v6514_v54 = vld [vmem:[#allocation3 + $0x7f0] sm:$0xf]  ;;  %v8055_v53 = vld [vmem:[#allocation3 + $0x7f4] sm:$0xf0]  ;;  %v8037_v56 = vld [vmem:[#allocation3 + $0x764] sm:$0xf0]  ;;  %v6387_v13 = vor.u32 %v8023_v6, %v6386_v18 }
  0x6c   :  { %v6314_v12 = vld [vmem:[#allocation3 + $0x660] sm:$0xf]  ;;  %v8005_v32 = vld [vmem:[#allocation3 + $0x664] sm:$0xf0]  ;;  %v298_v43 = vrot.slane %v8636_v9, 1  ;;  %v303_v1 = vrot.slane %v8542_v29, 1  ;;  %v6515_v14 = vor.u32 %v8055_v53, %v6514_v54  ;;  %v6443_v46 = vor.u32 %v8037_v56, %v6442_v2 }
  0x6d   :  { %4275 = vmatpush.bf16.msra.mxu2 %v6139_v63  ;;  %4237 = vmatpush.bf16.msra.mxu0 %v6011_v48  ;;  %v6378_v24 = vld [vmem:[#allocation3 + $0x6e0] sm:$0xf]  ;;  %v8021_v25 = vld [vmem:[#allocation3 + $0x6e4] sm:$0xf0]  ;;  %v6315_v41 = vor.u32 %v8005_v32, %v6314_v12  ;;  %v6434_v35 = vld [vmem:[#allocation3 + $0x750] sm:$0xf]  ;;  %v8793_v2 = vsel %vm296_vm4, %v300_v15, %v301_v26 }
  0x6e   :  { %v6506_v57 = vld [vmem:[#allocation3 + $0x7e0] sm:$0xf]  ;;  %v8053_v58 = vld [vmem:[#allocation3 + $0x7e4] sm:$0xf0]  ;;  %v8035_v62 = vld [vmem:[#allocation3 + $0x754] sm:$0xf0]  ;;  %4256 = vmatpush.bf16.msra.mxu1 %v6075_v19  ;;  %4294 = vmatpush.bf16.msra.mxu3 %v6203_v4  ;;  %v8787_v50 = vsel %vm296_vm4, %v297_v27, %v298_v43  ;;  %v6379_v48 = vor.u32 %v8021_v25, %v6378_v24 }
  0x6f   :  { %v6306_v60 = vld [vmem:[#allocation3 + $0x650] sm:$0xf]  ;;  %v8003_v39 = vld [vmem:[#allocation3 + $0x654] sm:$0xf0]  ;;  %9697 = vst [vmem:[#allocation54_spill] sm:$0xff] %v8787_v50  ;;  %v304_v63 = vrot.slane %v8657_v52, 1  ;;  %v6507_v18 = vor.u32 %v8053_v58, %v6506_v57  ;;  %v6435_v19 = vor.u32 %v8035_v62, %v6434_v35 }
  0x70   :  { %v306_v53 = vrot.slane %v8546_v30, 1  ;;  %v307_v54 = vrot.slane %v8661_v42, 1  ;;  %9698 = vst [vmem:[#allocation55_spill] sm:$0xff] %v8793_v2  ;;  %v6370_v6 = vld [vmem:[#allocation3 + $0x6d0] sm:$0xf] }
  0x71   :  { %4344 = vmatpush.bf16.msrb.mxu2 %v6451_v31  ;;  %4306 = vmatpush.bf16.msrb.mxu0 %v6323_v5  ;;  %v8019_v31 = vld [vmem:[#allocation3 + $0x6d4] sm:$0xf0]  ;;  %v6307_v5 = vor.u32 %v8003_v39, %v6306_v60  ;;  %v6498_v56 = vld [vmem:[#allocation3 + $0x7d0] sm:$0xf]  ;;  %v6426_v32 = vld [vmem:[#allocation3 + $0x740] sm:$0xf]  ;;  %v8798_v15 = vsel %vm296_vm4, %v303_v1, %v304_v63 }
  0x72   :  { %4325 = vmatpush.bf16.msrb.mxu1 %v6387_v13  ;;  %4363 = vmatpush.bf16.msrb.mxu3 %v6515_v14  ;;  %v8051_v12 = vld [vmem:[#allocation3 + $0x7d4] sm:$0xf0]  ;;  %v8033_v4 = vld [vmem:[#allocation3 + $0x744] sm:$0xf0]  ;;  %v6298_v27 = vld [vmem:[#allocation3 + $0x640] sm:$0xf]  ;;  %v8801_v26 = vsel %vm296_vm4, %v306_v53, %v307_v54  ;;  %v6371_v13 = vor.u32 %v8019_v31, %v6370_v6 }
  0x73   :  { %v8001_v43 = vld [vmem:[#allocation3 + $0x644] sm:$0xf0]  ;;  %4238 = vmatmul.bf16.vlgmr.msra.gmra.mxu0 %v8787_v50  ;;  %4257 = vmatmul.bf16.vlgmr.msra.gmra.mxu1 %v8793_v2  ;;  %9699 = vst [vmem:[#allocation56_spill] sm:$0xff] %v8798_v15  ;;  %v6499_v14 = vor.u32 %v8051_v12, %v6498_v56  ;;  %v6362_v24 = vld [vmem:[#allocation3 + $0x6c0] sm:$0xf]  ;;  %v309_v39 = vrot.slane %v8578_v45, 1 }
  0x74   :  { %9700 = vst [vmem:[#allocation57_spill] sm:$0xff] %v8801_v26  ;;  %v8017_v25 = vld [vmem:[#allocation3 + $0x6c4] sm:$0xf0]  ;;  %v6490_v57 = vld [vmem:[#allocation3 + $0x7c0] sm:$0xf]  ;;  %v310_v63 = vrot.slane %v8719_v16, 1 }
  0x75   :  { %4345 = vmatpush.bf16.msrb.mxu2 %v6443_v46  ;;  %4307 = vmatpush.bf16.msrb.mxu0 %v6315_v41  ;;  %v6427_v46 = vor.u32 %v8033_v4, %v6426_v32  ;;  %v6299_v41 = vor.u32 %v8001_v43, %v6298_v27  ;;  %v8049_v58 = vld [vmem:[#allocation3 + $0x7c4] sm:$0xf0]  ;;  %v6418_v35 = vld [vmem:[#allocation3 + $0x730] sm:$0xf]  ;;  %v8031_v1 = vld [vmem:[#allocation3 + $0x734] sm:$0xf0]  ;;  %v6363_v53 = vor.u32 %v8017_v25, %v6362_v24 }
  0x76   :  { %4326 = vmatpush.bf16.msrb.mxu1 %v6379_v48  ;;  %4364 = vmatpush.bf16.msrb.mxu3 %v6507_v18  ;;  %v6290_v62 = vld [vmem:[#allocation3 + $0x630] sm:$0xf]  ;;  %v7999_v60 = vld [vmem:[#allocation3 + $0x634] sm:$0xf0]  ;;  %v6491_v54 = vor.u32 %v8049_v58, %v6490_v57  ;;  %v312_v48 = vrot.slane %v8582_v47, 1  ;;  %v313_v18 = vrot.slane %v8723_v44, 1 }
  0x77   :  { %v6354_v6 = vld [vmem:[#allocation3 + $0x6b0] sm:$0xf]  ;;  %v8015_v31 = vld [vmem:[#allocation3 + $0x6b4] sm:$0xf0]  ;;  %v6410_v32 = vld [vmem:[#allocation3 + $0x720] sm:$0xf] }
  0x78   :  { %4276 = vmatmul.bf16.vlgmr.msra.gmra.mxu2 %v8798_v15  ;;  %4295 = vmatmul.bf16.vlgmr.msra.gmra.mxu3 %v8801_v26  ;;  %v6482_v56 = vld [vmem:[#allocation3 + $0x7b0] sm:$0xf]  ;;  %v8047_v12 = vld [vmem:[#allocation3 + $0x7b4] sm:$0xf0]  ;;  %v8029_v4 = vld [vmem:[#allocation3 + $0x724] sm:$0xf0] }
  0x79   :  { %4346 = vmatpush.bf16.msrb.mxu2 %v6435_v19  ;;  %4308 = vmatpush.bf16.msrb.mxu0 %v6307_v5  ;;  %v6419_v19 = vor.u32 %v8031_v1, %v6418_v35  ;;  %v6291_v5 = vor.u32 %v7999_v60, %v6290_v62  ;;  %v6282_v27 = vld [vmem:[#allocation3 + $0x620] sm:$0xf]  ;;  %v7997_v43 = vld [vmem:[#allocation3 + $0x624] sm:$0xf0]  ;;  %v318_v24 = vrot.slane %v8593_v51, 1  ;;  %v319_v25 = vrot.slane %v8753_v59, 1 }
  0x7a   :  { %4327 = vmatpush.bf16.msrb.mxu1 %v6371_v13  ;;  %4365 = vmatpush.bf16.msrb.mxu3 %v6499_v14  ;;  %v315_v13 = vrot.slane %v8589_v49, 1  ;;  %v316_v14 = vrot.slane %v8749_v8, 1  ;;  %v6346_v57 = vld [vmem:[#allocation3 + $0x6a0] sm:$0xf]  ;;  %v8013_v58 = vld [vmem:[#allocation3 + $0x6a4] sm:$0xf0]  ;;  %v6411_v1 = vor.u32 %v8029_v4, %v6410_v32  ;;  %v6283_v62 = vor.u32 %v7997_v43, %v6282_v27 }
  0x7b   :  { %v6474_v35 = vld [vmem:[#allocation3 + $0x7a0] sm:$0xf]  ;;  %v8045_v60 = vld [vmem:[#allocation3 + $0x7a4] sm:$0xf0]  ;;  %v6402_v26 = vld [vmem:[#allocation3 + $0x710] sm:$0xf]  ;;  %v8816_v51 = vsel %vm296_vm4, %v309_v39, %v310_v63  ;;  %v8832_v63 = vsel %vm296_vm4, %v318_v24, %v319_v25 }
  0x7c   :  { %v8027_v15 = vld [vmem:[#allocation3 + $0x714] sm:$0xf0]  ;;  %v6274_v2 = vld [vmem:[#allocation3 + $0x610] sm:$0xf]  ;;  %9701 = vst [vmem:[#allocation58_spill] sm:$0xff] %v8816_v51  ;;  %v8829_v39 = vshrl.u32 %v8636_v9, 16 }
  0x7d   :  { %4347 = vmatpush.bf16.msrb.mxu2 %v6427_v46  ;;  %4309 = vmatpush.bf16.msrb.mxu0 %v6299_v41  ;;  %v6355_v46 = vor.u32 %v8015_v31, %v6354_v6  ;;  %v6483_v41 = vor.u32 %v8047_v12, %v6482_v56  ;;  %v7995_v50 = vld [vmem:[#allocation3 + $0x614] sm:$0xf0]  ;;  %v8813_v49 = vld [vmem:[#allocation3 + $0x690] sm:$0xf]  ;;  %v6475_v56 = vor.u32 %v8045_v60, %v6474_v35  ;;  %v6394_v12 = vld [vmem:[#allocation3 + $0x700] sm:$0xf] }
  0x7e   :  { %4328 = vmatpush.bf16.msrb.mxu1 %v6363_v53  ;;  %4366 = vmatpush.bf16.msrb.mxu3 %v6491_v54  ;;  %v8819_v53 = vsel %vm296_vm4, %v312_v48, %v313_v18  ;;  %v8821_v54 = vld [vmem:[#allocation3 + $0x694] sm:$0xf0]  ;;  %v8823_v6 = vld [vmem:[#allocation3 + $0x790] sm:$0xf]  ;;  %v8025_v32 = vld [vmem:[#allocation3 + $0x704] sm:$0xf0]  ;;  %v6403_v48 = vor.u32 %v8027_v15, %v6402_v26  ;;  %v6275_v18 = vor.u32 %v7995_v50, %v6274_v2 }
  0x7f   :  { %9702 = vst [vmem:[#allocation59_spill] sm:$0xff] %v8819_v53  ;;  %v8043_v31 = vld [vmem:[#allocation3 + $0x794] sm:$0xf0]  ;;  %v6266_v4 = vld [vmem:[#allocation3 + $0x600] sm:$0xf]  ;;  %v8835_v43 = vshrl.u32 %v8640_v10, 16  ;;  %v6339_v2 = vor.u32 %v8821_v54, %v8813_v49  ;;  %v6395_v49 = vor.u32 %v8025_v32, %v6394_v12 }
  0x80   :  { %9704 = vst [vmem:[#allocation61_spill] sm:$0xff] %v8829_v39  ;;  %v7993_v27 = vld [vmem:[#allocation3 + $0x604] sm:$0xf0]  ;;  %v331_v24 = vrot.slane %v8585_v23, 2  ;;  %v336_v25 = vrot.slane %v8649_v0, 2  ;;  %v339_v15 = vrot.slane %v8611_v33, 1  ;;  %v6467_v26 = vor.u32 %v8043_v31, %v8823_v6 }
  0x81   :  { %4348 = vmatpush.bf16.msrb.mxu2 %v6419_v19  ;;  %4310 = vmatpush.bf16.msrb.mxu0 %v6291_v5  ;;  %v8826_v19 = vsel %vm296_vm4, %v315_v13, %v316_v14  ;;  %v6347_v5 = vor.u32 %v8013_v58, %v6346_v57  ;;  %9705 = vst [vmem:[#allocation62_spill] sm:$0xff] %v8832_v63  ;;  %v6706_v13 = vld [vmem:[#allocation3 + $0x970] sm:$0xf]  ;;  %v8837_v14 = vld [vmem:[#allocation3 + $0x680] sm:$0xf]  ;;  %v330_v57 = vrot.slane %v8596_v7, 1 }
  0x82   :  { %9703 = vst [vmem:[#allocation60_spill] sm:$0xff] %v8826_v19  ;;  %4329 = vmatpush.bf16.msrb.mxu1 %v6355_v46  ;;  %4367 = vmatpush.bf16.msrb.mxu3 %v6483_v41  ;;  %v8839_v46 = vld [vmem:[#allocation3 + $0x684] sm:$0xf0]  ;;  %v8841_v41 = vld [vmem:[#allocation3 + $0x780] sm:$0xf]  ;;  %v340_v58 = vrot.slane %v8608_v17, 2  ;;  %v6267_v54 = vor.u32 %v7993_v27, %v6266_v4 }
  0x83   :  { %9706 = vst [vmem:[#allocation63_spill] sm:$0xff] %v8835_v43  ;;  %v8103_v50 = vld [vmem:[#allocation3 + $0x974] sm:$0xf0]  ;;  %4243 = vmatmul.bf16.gmra.mxu0 %v8816_v51  ;;  %4262 = vmatmul.bf16.gmra.mxu1 %v8819_v53  ;;  %v345_v35 = vrot.slane %v8653_v38, 2  ;;  %v8041_v60 = vld [vmem:[#allocation3 + $0x784] sm:$0xf0]  ;;  %v6331_v12 = vor.u32 %v8839_v46, %v8837_v14 }
  0x84   :  { %v335_v33 = vrot.slane %v8829_v39, 1  ;;  %v348_v51 = vrot.slane %v8617_v36, 1  ;;  %v349_v53 = vrot.slane %v8614_v34, 2  ;;  %v8858_v0 = vshrl.u32 %v8657_v52, 16  ;;  %v6770_v38 = vld [vmem:[#allocation3 + $0x9f0] sm:$0xf] }
  0x85   :  { %4349 = vmatpush.bf16.msrb.mxu2 %v6411_v1  ;;  %4311 = vmatpush.bf16.msrb.mxu0 %v6283_v62  ;;  %v6578_v1 = vld [vmem:[#allocation3 + $0x870] sm:$0xf]  ;;  %v8071_v62 = vld [vmem:[#allocation3 + $0x874] sm:$0xf0]  ;;  %v344_v6 = vrot.slane %v8835_v43, 1  ;;  %v8862_v31 = vshrl.u32 %v8661_v42, 16  ;;  %v6707_v36 = vor.u32 %v8103_v50, %v6706_v13  ;;  %v6459_v32 = vor.u32 %v8041_v60, %v8841_v41 }
  0x86   :  { %4330 = vmatpush.bf16.msrb.mxu1 %v6347_v5  ;;  %4368 = vmatpush.bf16.msrb.mxu3 %v6475_v56  ;;  %9707 = vst [vmem:[#allocation64_spill] sm:$0xff] %v8858_v0  ;;  %v6642_v5 = vld [vmem:[#allocation3 + $0x8f0] sm:$0xf]  ;;  %v8087_v56 = vld [vmem:[#allocation3 + $0x8f4] sm:$0xf0]  ;;  %v6579_v34 = vor.u32 %v8071_v62, %v6578_v1  ;;  %v353_v27 = vrot.slane %v8858_v0, 1  ;;  %v337_v43 = vor.u32 %v336_v25, %v335_v33 }
  0x87   :  { %9708 = vst [vmem:[#allocation65_spill] sm:$0xff] %v8862_v31  ;;  %v8119_v17 = vld [vmem:[#allocation3 + $0x9f4] sm:$0xf0]  ;;  %v6698_v39 = vld [vmem:[#allocation3 + $0x960] sm:$0xf]  ;;  %v357_v13 = vrot.slane %v8630_v3, 1  ;;  %v6643_v46 = vor.u32 %v8087_v56, %v6642_v5  ;;  %v332_v3 = vor.u32 %v331_v24, %v330_v57 }
  0x88   :  { %4281 = vmatmul.bf16.gmra.mxu2 %v8826_v19  ;;  %4300 = vmatmul.bf16.gmra.mxu3 %v8832_v63  ;;  %v8101_v4 = vld [vmem:[#allocation3 + $0x964] sm:$0xf0]  ;;  %v354_v19 = vrot.slane %v8668_v11, 2  ;;  %v358_v50 = vrot.slane %v8620_v37, 2  ;;  %v362_v1 = vrot.slane %v8862_v31, 1  ;;  %v363_v14 = vrot.slane %v8671_v20, 2 }
  0x89   :  { %4350 = vmatpush.bf16.msrb.mxu2 %v6403_v48  ;;  %4312 = vmatpush.bf16.msrb.mxu0 %v6275_v18  ;;  %v6570_v48 = vld [vmem:[#allocation3 + $0x860] sm:$0xf]  ;;  %v8069_v18 = vld [vmem:[#allocation3 + $0x864] sm:$0xf0]  ;;  %v6771_v41 = vor.u32 %v8119_v17, %v6770_v38  ;;  %v6690_v0 = vld [vmem:[#allocation3 + $0x950] sm:$0xf]  ;;  %v341_v37 = vor.u32 %v340_v58, %v339_v15  ;;  %v346_v17 = vor.u32 %v345_v35, %v344_v6 }
  0x8a   :  { %4331 = vmatpush.bf16.msrb.mxu1 %v6339_v2  ;;  %4369 = vmatpush.bf16.msrb.mxu3 %v6467_v26  ;;  %v6634_v62 = vld [vmem:[#allocation3 + $0x8e0] sm:$0xf]  ;;  %v8085_v60 = vld [vmem:[#allocation3 + $0x8e4] sm:$0xf0]  ;;  %v6699_v2 = vor.u32 %v8101_v4, %v6698_v39  ;;  %v6571_v26 = vor.u32 %v8069_v18, %v6570_v48  ;;  %v6562_v23 = vld [vmem:[#allocation3 + $0x850] sm:$0xf]  ;;  %v355_v38 = vor.u32 %v354_v19, %v353_v27 }
  0x8b   :  { %v6762_v63 = vld [vmem:[#allocation3 + $0x9e0] sm:$0xf]  ;;  %v8117_v11 = vld [vmem:[#allocation3 + $0x9e4] sm:$0xf0]  ;;  %v8067_v31 = vld [vmem:[#allocation3 + $0x854] sm:$0xf0]  ;;  %v359_v5 = vor.u32 %v358_v50, %v357_v13  ;;  %v6635_v39 = vor.u32 %v8085_v60, %v6634_v62 }
  0x8c   :  { %vm329_vm5 = vsmask.f32 6400  ;;  %v6763_v56 = vor.u32 %v8117_v11, %v6762_v63  ;;  %v8083_v4 = vld [vmem:[#allocation3 + $0x8d4] sm:$0xf0]  ;;  %v6754_v57 = vld [vmem:[#allocation3 + $0x9d0] sm:$0xf] }
  0x8d   :  { %4351 = vmatpush.bf16.msrb.mxu2 %v6395_v49  ;;  %4313 = vmatpush.bf16.msrb.mxu0 %v6267_v54  ;;  %v350_v49 = vor.u32 %v349_v53, %v348_v51  ;;  %v8099_v54 = vld [vmem:[#allocation3 + $0x954] sm:$0xf0]  ;;  %v6563_v53 = vor.u32 %v8067_v31, %v6562_v23  ;;  %v6682_v24 = vld [vmem:[#allocation3 + $0x940] sm:$0xf]  ;;  %v8097_v25 = vld [vmem:[#allocation3 + $0x944] sm:$0xf0]  ;;  %v8876_v6 = vsel %vm329_vm5, %v332_v3, %v337_v43 }
  0x8e   :  { %4332 = vmatpush.bf16.msrb.mxu1 %v6331_v12  ;;  %4370 = vmatpush.bf16.msrb.mxu3 %v6459_v32  ;;  %v8115_v33 = vld [vmem:[#allocation3 + $0x9d4] sm:$0xf0]  ;;  %v6691_v51 = vor.u32 %v8099_v54, %v6690_v0  ;;  %v6554_v15 = vld [vmem:[#allocation3 + $0x840] sm:$0xf]  ;;  %v8065_v58 = vld [vmem:[#allocation3 + $0x844] sm:$0xf0]  ;;  %v8879_v12 = vsel %vm329_vm5, %v341_v37, %v346_v17  ;;  %v6683_v37 = vor.u32 %v8097_v25, %v6682_v24 }
  0x8f   :  { %v6618_v35 = vld [vmem:[#allocation3 + $0x8c0] sm:$0xf]  ;;  %v8081_v19 = vld [vmem:[#allocation3 + $0x8c4] sm:$0xf0]  ;;  %9709 = vst [vmem:[#allocation66_spill] sm:$0xff] %v8876_v6  ;;  %v8882_v11 = vsel %vm329_vm5, %v350_v49, %v355_v38  ;;  %v8885_v0 = vshrl.u32 %v8719_v16, 16  ;;  %v6755_v48 = vor.u32 %v8115_v33, %v6754_v57  ;;  %v6555_v43 = vor.u32 %v8065_v58, %v6554_v15 }
  0x90   :  { %9710 = vst [vmem:[#allocation67_spill] sm:$0xff] %v8879_v12  ;;  %v6746_v63 = vld [vmem:[#allocation3 + $0x9c0] sm:$0xf]  ;;  %v8113_v32 = vld [vmem:[#allocation3 + $0x9c4] sm:$0xf0]  ;;  %v8891_v3 = vshrl.u32 %v8723_v44, 16  ;;  %v6619_v50 = vor.u32 %v8081_v19, %v6618_v35 }
  0x91   :  { %4420 = vmatpush.bf16.msra.mxu2 %v6707_v36  ;;  %4382 = vmatpush.bf16.msra.mxu0 %v6579_v34  ;;  %v6626_v36 = vld [vmem:[#allocation3 + $0x8d0] sm:$0xf]  ;;  %v364_v34 = vor.u32 %v363_v14, %v362_v1  ;;  %9711 = vst [vmem:[#allocation68_spill] sm:$0xff] %v8882_v11  ;;  %v366_v18 = vrot.slane %v8700_v55, 1  ;;  %v367_v27 = vrot.slane %v8684_v28, 2  ;;  %v6747_v1 = vor.u32 %v8113_v32, %v6746_v63  ;;  %v9716_v17 = vld [vmem:[#allocation41_spill] sm:$0xff] }
  0x92   :  { %4401 = vmatpush.bf16.msra.mxu1 %v6643_v46  ;;  %4439 = vmatpush.bf16.msra.mxu3 %v6771_v41  ;;  %v6627_v31 = vor.u32 %v8083_v4, %v6626_v36  ;;  %9713 = vst [vmem:[#allocation70_spill] sm:$0xff] %v8891_v3  ;;  %v6674_v13 = vld [vmem:[#allocation3 + $0x930] sm:$0xf]  ;;  %v372_v14 = vrot.slane %v8733_v40, 2  ;;  %v375_v46 = vrot.slane %v8708_v61, 1  ;;  %v371_v60 = vrot.slane %v8885_v0, 1 }
  0x93   :  { %v8888_v23 = vsel %vm329_vm5, %v359_v5, %v364_v34  ;;  %4314 = vmatmul.bf16.vlgmr.msrb.gmra.mxu0 %v8876_v6  ;;  %4333 = vmatmul.bf16.vlgmr.msrb.gmra.mxu1 %v8879_v12  ;;  %v8095_v41 = vld [vmem:[#allocation3 + $0x934] sm:$0xf0]  ;;  %v6546_v62 = vld [vmem:[#allocation3 + $0x830] sm:$0xf]  ;;  %v384_v38 = vrot.slane %v9716_v17, 1  ;;  %v380_v36 = vrot.slane %v8891_v3, 1 }
  0x94   :  { %9712 = vst [vmem:[#allocation69_spill] sm:$0xff] %v8888_v23  ;;  %v9715_v49 = vld [vmem:[#allocation43_spill] sm:$0xff]  ;;  %v9719_v4 = vld [vmem:[#allocation50_spill] sm:$0xff]  ;;  %v8913_v58 = vshrl.u32 %v8753_v59, 16  ;;  %v6675_v35 = vor.u32 %v8095_v41, %v6674_v13  ;;  %v6666_v63 = vld [vmem:[#allocation3 + $0x920] sm:$0xf] }
  0x95   :  { %4421 = vmatpush.bf16.msra.mxu2 %v6699_v2  ;;  %4383 = vmatpush.bf16.msra.mxu0 %v6571_v26  ;;  %v9714_v2 = vld [vmem:[#allocation35_spill] sm:$0xff]  ;;  %v381_v54 = vrot.slane %v9715_v49, 2  ;;  %v390_v57 = vrot.slane %v9719_v4, 2  ;;  %v9720_v25 = vld [vmem:[#allocation42_spill] sm:$0xff]  ;;  %vm443_vm7 = vsmask.f32 5376 }
  0x96   :  { %4402 = vmatpush.bf16.msra.mxu1 %v6635_v39  ;;  %4440 = vmatpush.bf16.msra.mxu3 %v6763_v56  ;;  %v376_v26 = vrot.slane %v9714_v2, 2  ;;  %v8063_v5 = vld [vmem:[#allocation3 + $0x834] sm:$0xf0]  ;;  %v8906_v56 = vshrl.u32 %v8749_v8, 16  ;;  %v6610_v33 = vld [vmem:[#allocation3 + $0x8b0] sm:$0xf] }
  0x97   :  { %v9717_v34 = vld [vmem:[#allocation39_spill] sm:$0xff]  ;;  %v393_v15 = vrot.slane %v9720_v25, 1  ;;  %9721 = vst [vmem:[#allocation72_spill] sm:$0xff] %v8913_v58  ;;  %v6547_v19 = vor.u32 %v8063_v5, %v6546_v62  ;;  %v8093_v32 = vld [vmem:[#allocation3 + $0x924] sm:$0xf0]  ;;  %v398_v17 = vrot.slane %v8913_v58, 1 }
  0x98   :  { %v385_v39 = vrot.slane %v9717_v34, 2  ;;  %9718 = vst [vmem:[#allocation71_spill] sm:$0xff] %v8906_v56  ;;  %4352 = vmatmul.bf16.vlgmr.msrb.gmra.mxu2 %v8882_v11  ;;  %4371 = vmatmul.bf16.vlgmr.msrb.gmra.mxu3 %v8888_v23  ;;  %v8111_v24 = vld [vmem:[#allocation3 + $0x9b4] sm:$0xf0]  ;;  %v389_v23 = vrot.slane %v8906_v56, 1  ;;  %v6667_v62 = vor.u32 %v8093_v32, %v6666_v63  ;;  %v377_v49 = vor.u32 %v376_v26, %v375_v46 }
  0x99   :  { %4422 = vmatpush.bf16.msra.mxu2 %v6691_v51  ;;  %4384 = vmatpush.bf16.msra.mxu0 %v6563_v53  ;;  %v8079_v51 = vld [vmem:[#allocation3 + $0x8b4] sm:$0xf0]  ;;  %v6738_v53 = vld [vmem:[#allocation3 + $0x9b0] sm:$0xf]  ;;  %v8077_v4 = vld [vmem:[#allocation3 + $0x8a4] sm:$0xf0]  ;;  %v382_v56 = vor.u32 %v381_v54, %v380_v36 }
  0x9a   :  { %4403 = vmatpush.bf16.msra.mxu1 %v6627_v31  ;;  %4441 = vmatpush.bf16.msra.mxu3 %v6755_v48  ;;  %v6538_v31 = vld [vmem:[#allocation3 + $0x820] sm:$0xf]  ;;  %v8061_v48 = vld [vmem:[#allocation3 + $0x824] sm:$0xf0]  ;;  %v6611_v6 = vor.u32 %v8079_v51, %v6610_v33  ;;  %v9723_v13 = vld [vmem:[#allocation51_spill] sm:$0xff]  ;;  %v386_v58 = vor.u32 %v385_v39, %v384_v38 }
  0x9b   :  { %v9722_v11 = vld [vmem:[#allocation40_spill] sm:$0xff]  ;;  %v8109_v34 = vld [vmem:[#allocation3 + $0x9a4] sm:$0xf0]  ;;  %v399_v41 = vrot.slane %v9723_v13, 2  ;;  %v6539_v5 = vor.u32 %v8061_v48, %v6538_v31  ;;  %v6658_v3 = vld [vmem:[#allocation3 + $0x910] sm:$0xf] }
  0x9c   :  { %v394_v12 = vrot.slane %v9722_v11, 2  ;;  %v6730_v25 = vld [vmem:[#allocation3 + $0x9a0] sm:$0xf]  ;;  %v8091_v11 = vld [vmem:[#allocation3 + $0x914] sm:$0xf0] }
  0x9d   :  { %4423 = vmatpush.bf16.msra.mxu2 %v6683_v37  ;;  %4385 = vmatpush.bf16.msra.mxu0 %v6555_v43  ;;  %v6739_v37 = vor.u32 %v8111_v24, %v6738_v53  ;;  %v6602_v43 = vld [vmem:[#allocation3 + $0x8a0] sm:$0xf]  ;;  %v6731_v51 = vor.u32 %v8109_v34, %v6730_v25  ;;  %v6530_v53 = vld [vmem:[#allocation3 + $0x810] sm:$0xf]  ;;  %v8059_v24 = vld [vmem:[#allocation3 + $0x814] sm:$0xf0]  ;;  %v400_v32 = vor.u32 %v399_v41, %v398_v17 }
  0x9e   :  { %4404 = vmatpush.bf16.msra.mxu1 %v6619_v50  ;;  %4442 = vmatpush.bf16.msra.mxu3 %v6747_v1  ;;  %v368_v50 = vor.u32 %v367_v27, %v366_v18  ;;  %v373_v1 = vor.u32 %v372_v14, %v371_v60  ;;  %v6603_v33 = vor.u32 %v8077_v4, %v6602_v43  ;;  %v6594_v2 = vld [vmem:[#allocation3 + $0x890] sm:$0xf]  ;;  %v8075_v61 = vld [vmem:[#allocation3 + $0x894] sm:$0xf0]  ;;  %v6650_v18 = vld [vmem:[#allocation3 + $0x900] sm:$0xf] }
  0x9f   :  { %v6722_v13 = vld [vmem:[#allocation3 + $0x990] sm:$0xf]  ;;  %v395_v63 = vor.u32 %v394_v12, %v393_v15  ;;  %v6659_v14 = vor.u32 %v8091_v11, %v6658_v3  ;;  %v6531_v46 = vor.u32 %v8059_v24, %v6530_v53  ;;  %v8089_v60 = vld [vmem:[#allocation3 + $0x904] sm:$0xf0]  ;;  %v6522_v26 = vld [vmem:[#allocation3 + $0x800] sm:$0xf]  ;;  %v6595_v38 = vor.u32 %v8075_v61, %v6594_v2 }
  0xa0   :  { %v8920_v27 = vsel %vm329_vm5, %v368_v50, %v373_v1  ;;  %v8057_v54 = vld [vmem:[#allocation3 + $0x804] sm:$0xf0]  ;;  %v6586_v12 = vld [vmem:[#allocation3 + $0x880] sm:$0xf]  ;;  %v6962_v39 = vld [vmem:[#allocation3 + $0xb70] sm:$0xf]  ;;  %v6651_v2 = vor.u32 %v8089_v60, %v6650_v18 }
  0xa1   :  { %4424 = vmatpush.bf16.msra.mxu2 %v6675_v35  ;;  %4386 = vmatpush.bf16.msra.mxu0 %v6547_v19  ;;  %v8107_v35 = vld [vmem:[#allocation3 + $0x994] sm:$0xf0]  ;;  %v391_v19 = vor.u32 %v390_v57, %v389_v23  ;;  %9724 = vst [vmem:[#allocation73_spill] sm:$0xff] %v8920_v27  ;;  %v8073_v17 = vld [vmem:[#allocation3 + $0x884] sm:$0xf0]  ;;  %v8931_v3 = vsel %vm329_vm5, %v395_v63, %v400_v32 }
  0xa2   :  { %4405 = vmatpush.bf16.msra.mxu1 %v6611_v6  ;;  %4443 = vmatpush.bf16.msra.mxu3 %v6739_v37  ;;  %v8923_v6 = vsel %vm329_vm5, %v377_v49, %v382_v56  ;;  %v6723_v23 = vor.u32 %v8107_v35, %v6722_v13  ;;  %v6714_v36 = vld [vmem:[#allocation3 + $0x980] sm:$0xf]  ;;  %v8105_v34 = vld [vmem:[#allocation3 + $0x984] sm:$0xf0]  ;;  %v8167_v4 = vld [vmem:[#allocation3 + $0xb74] sm:$0xf0]  ;;  %v6523_v57 = vor.u32 %v8057_v54, %v6522_v26 }
  0xa3   :  { %9725 = vst [vmem:[#allocation74_spill] sm:$0xff] %v8923_v6  ;;  %4319 = vmatmul.bf16.gmra.mxu0 %v8920_v27  ;;  %4338 = vmatmul.bf16.gmra.mxu1 %v8923_v6  ;;  %v8928_v11 = vsel %vm329_vm5, %v386_v58, %v391_v19  ;;  %v6834_v49 = vld [vmem:[#allocation3 + $0xa70] sm:$0xf]  ;;  %v8135_v56 = vld [vmem:[#allocation3 + $0xa74] sm:$0xf0]  ;;  %v6587_v48 = vor.u32 %v8073_v17, %v6586_v12  ;;  %v411_v26 = vrot.slane %v8534_v21, 2 }
  0xa4   :  { %9726 = vst [vmem:[#allocation75_spill] sm:$0xff] %v8928_v11  ;;  %v6898_v61 = vld [vmem:[#allocation3 + $0xaf0] sm:$0xf]  ;;  %v8151_v25 = vld [vmem:[#allocation3 + $0xaf4] sm:$0xf0]  ;;  %v6715_v37 = vor.u32 %v8105_v34, %v6714_v36  ;;  %v6963_v58 = vor.u32 %v8167_v4, %v6962_v39  ;;  %v6835_v43 = vor.u32 %v8135_v56, %v6834_v49  ;;  %v412_v54 = vrot.slane %v8636_v9, 2 }
  0xa5   :  { %4425 = vmatpush.bf16.msra.mxu2 %v6667_v62  ;;  %4387 = vmatpush.bf16.msra.mxu0 %v6539_v5  ;;  %9727 = vst [vmem:[#allocation76_spill] sm:$0xff] %v8931_v3  ;;  %v7026_v15 = vld [vmem:[#allocation3 + $0xbf0] sm:$0xf]  ;;  %v8183_v31 = vld [vmem:[#allocation3 + $0xbf4] sm:$0xf0]  ;;  %v6899_v62 = vor.u32 %v8151_v25, %v6898_v61  ;;  %v417_v39 = vrot.slane %v8542_v29, 2 }
  0xa6   :  { %4406 = vmatpush.bf16.msra.mxu1 %v6603_v33  ;;  %4444 = vmatpush.bf16.msra.mxu3 %v6731_v51  ;;  %v6954_v13 = vld [vmem:[#allocation3 + $0xb60] sm:$0xf]  ;;  %v8165_v41 = vld [vmem:[#allocation3 + $0xb64] sm:$0xf0]  ;;  %v7027_v5 = vor.u32 %v8183_v31, %v7026_v15  ;;  %v6946_v63 = vld [vmem:[#allocation3 + $0xb50] sm:$0xf] }
  0xa7   :  { %v6826_v50 = vld [vmem:[#allocation3 + $0xa60] sm:$0xf]  ;;  %v8133_v1 = vld [vmem:[#allocation3 + $0xa64] sm:$0xf0]  ;;  %v6955_v35 = vor.u32 %v8165_v41, %v6954_v13  ;;  %v8131_v60 = vld [vmem:[#allocation3 + $0xa54] sm:$0xf0] }
  0xa8   :  { %4357 = vmatmul.bf16.gmra.mxu2 %v8928_v11  ;;  %4376 = vmatmul.bf16.gmra.mxu3 %v8931_v3  ;;  %v6890_v33 = vld [vmem:[#allocation3 + $0xae0] sm:$0xf]  ;;  %v8149_v51 = vld [vmem:[#allocation3 + $0xae4] sm:$0xf0]  ;;  %v6827_v19 = vor.u32 %v8133_v1, %v6826_v50  ;;  %v6882_v12 = vld [vmem:[#allocation3 + $0xad0] sm:$0xf] }
  0xa9   :  { %4426 = vmatpush.bf16.msra.mxu2 %v6659_v14  ;;  %4388 = vmatpush.bf16.msra.mxu0 %v6531_v46  ;;  %v7018_v53 = vld [vmem:[#allocation3 + $0xbe0] sm:$0xf]  ;;  %v8181_v24 = vld [vmem:[#allocation3 + $0xbe4] sm:$0xf0]  ;;  %v6891_v32 = vor.u32 %v8149_v51, %v6890_v33  ;;  %v8163_v14 = vld [vmem:[#allocation3 + $0xb54] sm:$0xf0] }
  0xaa   :  { %4407 = vmatpush.bf16.msra.mxu1 %v6595_v38  ;;  %4445 = vmatpush.bf16.msra.mxu3 %v6723_v23  ;;  %v7019_v18 = vor.u32 %v8181_v24, %v7018_v53  ;;  %v6818_v46 = vld [vmem:[#allocation3 + $0xa50] sm:$0xf]  ;;  %v414_v38 = vrot.slane %v8538_v22, 2  ;;  %v415_v23 = vrot.slane %v8640_v10, 2  ;;  %v8147_v17 = vld [vmem:[#allocation3 + $0xad4] sm:$0xf0]  ;;  %v6947_v49 = vor.u32 %v8163_v14, %v6946_v63 }
  0xab   :  { %v7010_v36 = vld [vmem:[#allocation3 + $0xbd0] sm:$0xf]  ;;  %v8179_v34 = vld [vmem:[#allocation3 + $0xbd4] sm:$0xf0]  ;;  %v418_v4 = vrot.slane %v8657_v52, 2  ;;  %v6819_v56 = vor.u32 %v8131_v60, %v6818_v46  ;;  %v420_v61 = vrot.slane %v8546_v30, 2 }
  0xac   :  { %v8161_v25 = vld [vmem:[#allocation3 + $0xb44] sm:$0xf0]  ;;  %v6810_v13 = vld [vmem:[#allocation3 + $0xa40] sm:$0xf]  ;;  %v8159_v63 = vld [vmem:[#allocation3 + $0xb34] sm:$0xf0] }
  0xad   :  { %4427 = vmatpush.bf16.msra.mxu2 %v6651_v2  ;;  %4389 = vmatpush.bf16.msra.mxu0 %v6523_v57  ;;  %v421_v2 = vrot.slane %v8661_v42, 2  ;;  %v6938_v57 = vld [vmem:[#allocation3 + $0xb40] sm:$0xf]  ;;  %v8129_v41 = vld [vmem:[#allocation3 + $0xa44] sm:$0xf0]  ;;  %v8950_v51 = vsel %vm410_vm6, %v417_v39, %v418_v4  ;;  %v427_v39 = vrot.slane %v8723_v44, 2 }
  0xae   :  { %4408 = vmatpush.bf16.msra.mxu1 %v6587_v48  ;;  %4446 = vmatpush.bf16.msra.mxu3 %v6715_v37  ;;  %v4087_v15 = vpop.f32.mrf.mxu0  ;;  %v8944_v48 = vsel %vm410_vm6, %v411_v26, %v412_v54  ;;  %v8947_v37 = vsel %vm410_vm6, %v414_v38, %v415_v23  ;;  %v8145_v50 = vld [vmem:[#allocation3 + $0xac4] sm:$0xf0]  ;;  %v7002_v1 = vld [vmem:[#allocation3 + $0xbc0] sm:$0xf]  ;;  %9730 = vst [vmem:[#allocation79_spill] sm:$0xff] %v8950_v51  ;;  %v423_v23 = vrot.slane %v8578_v45, 2 }
  0xaf   :  { %v4106_v31 = vpop.f32.mrf.mxu1  ;;  %9728 = vst [vmem:[#allocation77_spill] sm:$0xff] %v8944_v48  ;;  %v8177_v33 = vld [vmem:[#allocation3 + $0xbc4] sm:$0xf0]  ;;  %v8955_v53 = vsel %vm410_vm6, %v420_v61, %v421_v2  ;;  %v6939_v24 = vor.u32 %v8161_v25, %v6938_v57  ;;  %v6802_v14 = vld [vmem:[#allocation3 + $0xa30] sm:$0xf]  ;;  %v9744_v6 = vld [vmem:[#allocation20_spill] sm:$0xff] }
  0xb0   :  { %9729 = vst [vmem:[#allocation78_spill] sm:$0xff] %v8947_v37  ;;  %v8127_v46 = vld [vmem:[#allocation3 + $0xa34] sm:$0xf0]  ;;  %v6866_v60 = vld [vmem:[#allocation3 + $0xab0] sm:$0xf]  ;;  %v458_v27 = vrot.slane %v9744_v6, 2 }
  0xb1   :  { %4496 = vmatpush.bf16.msrb.mxu2 %v6963_v58  ;;  %4458 = vmatpush.bf16.msrb.mxu0 %v6835_v43  ;;  %v6883_v58 = vor.u32 %v8147_v17, %v6882_v12  ;;  %v7011_v43 = vor.u32 %v8179_v34, %v7010_v36  ;;  %9731 = vst [vmem:[#allocation80_spill] sm:$0xff] %v8955_v53  ;;  %v8143_v26 = vld [vmem:[#allocation3 + $0xab4] sm:$0xf0]  ;;  %v6994_v54 = vld [vmem:[#allocation3 + $0xbb0] sm:$0xf]  ;;  %v424_v12 = vrot.slane %v8719_v16, 2 }
  0xb2   :  { %4477 = vmatpush.bf16.msrb.mxu1 %v6899_v62  ;;  %4515 = vmatpush.bf16.msrb.mxu3 %v7027_v5  ;;  %v6874_v62 = vld [vmem:[#allocation3 + $0xac0] sm:$0xf]  ;;  %v4107_v5 = vadd.f32 %v4106_v31, %v4087_v15  ;;  %v8175_v38 = vld [vmem:[#allocation3 + $0xbb4] sm:$0xf0]  ;;  %v426_v34 = vrot.slane %v8582_v47, 2  ;;  %v6867_v15 = vor.u32 %v8143_v26, %v6866_v60 }
  0xb3   :  { %4390 = vmatmul.bf16.vlgmr.msra.gmra.mxu0 %v8944_v48  ;;  %4409 = vmatmul.bf16.vlgmr.msra.gmra.mxu1 %v8947_v37  ;;  %v8157_v61 = vld [vmem:[#allocation3 + $0xb24] sm:$0xf0]  ;;  %v6995_v31 = vor.u32 %v8175_v38, %v6994_v54  ;;  %v8971_v60 = vld [vmem:[#allocation3 + $0xa90] sm:$0xf]  ;;  %v8139_v38 = vld [vmem:[#allocation3 + $0xa94] sm:$0xf0] }
  0xb4   :  { %v9741_v37 = vld [vmem:[#allocation17_spill] sm:$0xff]  ;;  %v9742_v3 = vld [vmem:[#allocation63_spill] sm:$0xff]  ;;  %vm541_vm9 = vsmask.f32 4352 }
  0xb5   :  { %4497 = vmatpush.bf16.msrb.mxu2 %v6955_v35  ;;  %4459 = vmatpush.bf16.msrb.mxu0 %v6827_v19  ;;  %v6811_v35 = vor.u32 %v8129_v41, %v6810_v13  ;;  %v6930_v19 = vld [vmem:[#allocation3 + $0xb30] sm:$0xf]  ;;  %v6858_v13 = vld [vmem:[#allocation3 + $0xaa0] sm:$0xf]  ;;  %v452_v48 = vrot.slane %v9741_v37, 3  ;;  %v454_v11 = vrot.slane %v9742_v3, 2 }
  0xb6   :  { %4478 = vmatpush.bf16.msrb.mxu1 %v6891_v32  ;;  %4516 = vmatpush.bf16.msrb.mxu3 %v7019_v18  ;;  %v6875_v32 = vor.u32 %v8145_v50, %v6874_v62  ;;  %v7003_v18 = vor.u32 %v8177_v33, %v7002_v1  ;;  %v4125_v17 = vpop.f32.mrf.mxu2  ;;  %v4144_v36 = vpop.f32.mrf.mxu3  ;;  %v6931_v4 = vor.u32 %v8159_v63, %v6930_v19  ;;  %v8141_v62 = vld [vmem:[#allocation3 + $0xaa4] sm:$0xf0]  ;;  %v6986_v50 = vld [vmem:[#allocation3 + $0xba0] sm:$0xf]  ;;  %v430_v19 = vrot.slane %v8749_v8, 2 }
  0xb7   :  { %v4126_v2 = vadd.f32 %v4125_v17, %v4107_v5  ;;  %v4089_v57 = vpop.f32.mrf.mxu0  ;;  %v4108_v25 = vpop.f32.mrf.mxu1  ;;  %v8173_v1 = vld [vmem:[#allocation3 + $0xba4] sm:$0xf0]  ;;  %v8967_v5 = vld [vmem:[#allocation3 + $0xb10] sm:$0xf]  ;;  %v8969_v63 = vld [vmem:[#allocation3 + $0xb14] sm:$0xf0]  ;;  %v6859_v26 = vor.u32 %v8141_v62, %v6858_v13 }
  0xb8   :  { %4428 = vmatmul.bf16.vlgmr.msra.gmra.mxu2 %v8950_v51  ;;  %4447 = vmatmul.bf16.vlgmr.msra.gmra.mxu3 %v8955_v53  ;;  %v4109_v41 = vadd.f32 %v4108_v25, %v4089_v57  ;;  %v6987_v54 = vor.u32 %v8173_v1, %v6986_v50  ;;  %v6978_v17 = vld [vmem:[#allocation3 + $0xb90] sm:$0xf]  ;;  %v433_v25 = vrot.slane %v8753_v59, 2  ;;  %v8995_v62 = vld [vmem:[#allocation3 + $0xa80] sm:$0xf] }
  0xb9   :  { %4498 = vmatpush.bf16.msrb.mxu2 %v6947_v49  ;;  %4460 = vmatpush.bf16.msrb.mxu0 %v6819_v56  ;;  %v6803_v49 = vor.u32 %v8127_v46, %v6802_v14  ;;  %v6922_v56 = vld [vmem:[#allocation3 + $0xb20] sm:$0xf]  ;;  %v8963_v33 = vadd.f32 %v4144_v36, %v4126_v2  ;;  %v6786_v14 = vld [vmem:[#allocation3 + $0xa10] sm:$0xf]  ;;  %v8123_v46 = vld [vmem:[#allocation3 + $0xa14] sm:$0xf0] }
  0xba   :  { %4479 = vmatpush.bf16.msrb.mxu1 %v6883_v58  ;;  %4517 = vmatpush.bf16.msrb.mxu3 %v7011_v43  ;;  %v6794_v58 = vld [vmem:[#allocation3 + $0xa20] sm:$0xf]  ;;  %v8125_v43 = vld [vmem:[#allocation3 + $0xa24] sm:$0xf0]  ;;  %v8171_v36 = vld [vmem:[#allocation3 + $0xb94] sm:$0xf0] }
  0xbb   :  { %v9733_v2 = vld [vmem:[#allocation15_spill] sm:$0xff]  ;;  %v8997_v50 = vld [vmem:[#allocation3 + $0xa84] sm:$0xf0]  ;;  %v8999_v1 = vld [vmem:[#allocation3 + $0xb80] sm:$0xf] }
  0xbc   :  { %v432_v57 = vrot.slane %v9733_v2, 2  ;;  %v9002_v53 = vld [vmem:[#allocation3 + $0xb84] sm:$0xf0]  ;;  %v8231_v59 = vld [vmem:[#allocation3 + $0xd74] sm:$0xf0] }
  0xbd   :  { %4499 = vmatpush.bf16.msrb.mxu2 %v6939_v24  ;;  %4461 = vmatpush.bf16.msrb.mxu0 %v6811_v35  ;;  %v9732_v24 = vld [vmem:[#allocation14_spill] sm:$0xff]  ;;  %v8247_v6 = vld [vmem:[#allocation3 + $0xdf4] sm:$0xf0]  ;;  %v7082_v2 = vld [vmem:[#allocation3 + $0xc60] sm:$0xf] }
  0xbe   :  { %4480 = vmatpush.bf16.msrb.mxu1 %v6875_v32  ;;  %4518 = vmatpush.bf16.msrb.mxu3 %v7003_v18  ;;  %v429_v35 = vrot.slane %v9732_v24, 2  ;;  %v6923_v32 = vor.u32 %v8157_v61, %v6922_v56  ;;  %v6795_v18 = vor.u32 %v8125_v43, %v6794_v58  ;;  %v6915_v61 = vor.u32 %v8969_v63, %v8967_v5  ;;  %v8990_v58 = vld [vmem:[#allocation3 + $0xa00] sm:$0xf]  ;;  %v8992_v43 = vld [vmem:[#allocation3 + $0xa04] sm:$0xf0]  ;;  %v4127_v13 = vpop.f32.mrf.mxu2 }
  0xbf   :  { %v4092_v5 = vpop.f32.mrf.mxu0  ;;  %v4111_v63 = vpop.f32.mrf.mxu1  ;;  %v7154_v3 = vld [vmem:[#allocation3 + $0xcf0] sm:$0xf]  ;;  %v9749_v37 = vld [vmem:[#allocation24_spill] sm:$0xff] }
  0xc0   :  { %v8982_v56 = vsel %vm410_vm6, %v429_v35, %v430_v19  ;;  %v444_v35 = vrot.slane %v8596_v7, 2  ;;  %v4128_v19 = vadd.f32 %v4127_v13, %v4109_v41  ;;  %v7218_v41 = vld [vmem:[#allocation3 + $0xd70] sm:$0xf]  ;;  %v7146_v8 = vld [vmem:[#allocation3 + $0xce0] sm:$0xf] }
  0xc1   :  { %4500 = vmatpush.bf16.msrb.mxu2 %v6931_v4  ;;  %4462 = vmatpush.bf16.msrb.mxu0 %v6803_v49  ;;  %v8976_v4 = vsel %vm410_vm6, %v423_v23, %v424_v12  ;;  %v8979_v49 = vsel %vm410_vm6, %v426_v34, %v427_v39  ;;  %9736 = vst [vmem:[#allocation83_spill] sm:$0xff] %v8982_v56  ;;  %v4146_v23 = vpop.f32.mrf.mxu3  ;;  %v9745_v7 = vld [vmem:[#allocation19_spill] sm:$0xff] }
  0xc2   :  { %4481 = vmatpush.bf16.msrb.mxu1 %v6867_v15  ;;  %4519 = vmatpush.bf16.msrb.mxu3 %v6995_v31  ;;  %9734 = vst [vmem:[#allocation81_spill] sm:$0xff] %v8976_v4  ;;  %v8986_v15 = vld [vmem:[#allocation3 + $0xb00] sm:$0xf]  ;;  %v8988_v31 = vld [vmem:[#allocation3 + $0xb04] sm:$0xf0]  ;;  %v6787_v12 = vor.u32 %v8123_v46, %v6786_v14  ;;  %v6851_v34 = vor.u32 %v8139_v38, %v8971_v60  ;;  %v9739_v60 = vld [vmem:[#allocation27_spill] sm:$0xff] }
  0xc3   :  { %9735 = vst [vmem:[#allocation82_spill] sm:$0xff] %v8979_v49  ;;  %v6979_v39 = vor.u32 %v8171_v36, %v6978_v17  ;;  %v9738_v14 = vld [vmem:[#allocation61_spill] sm:$0xff]  ;;  %v448_v38 = vrot.slane %v9739_v60, 3  ;;  %v4112_v17 = vadd.f32 %v4111_v63, %v4092_v5  ;;  %v9740_v36 = vld [vmem:[#allocation18_spill] sm:$0xff]  ;;  %v9010_v13 = vadd.f32 %v4146_v23, %v4128_v19  ;;  %4395 = vmatmul.bf16.gmra.mxu0 %v8976_v4 }
  0xc4   :  { %v447_v46 = vrot.slane %v9738_v14, 2  ;;  %v451_v51 = vrot.slane %v9740_v36, 2  ;;  %4414 = vmatmul.bf16.gmra.mxu1 %v8979_v49  ;;  %v9018_v5 = vsel %vm410_vm6, %v432_v57, %v433_v25  ;;  %v6907_v63 = vor.u32 %v8988_v31, %v8986_v15  ;;  %v7090_v19 = vld [vmem:[#allocation3 + $0xc70] sm:$0xf]  ;;  %v8215_v57 = vld [vmem:[#allocation3 + $0xcf4] sm:$0xf0] }
  0xc5   :  { %4501 = vmatpush.bf16.msrb.mxu2 %v6923_v32  ;;  %4463 = vmatpush.bf16.msrb.mxu0 %v6795_v18  ;;  %v9737_v32 = vld [vmem:[#allocation13_spill] sm:$0xff]  ;;  %9746 = vst [vmem:[#allocation84_spill] sm:$0xff] %v9018_v5  ;;  %v6779_v23 = vor.u32 %v8992_v43, %v8990_v58  ;;  %v6971_v49 = vor.u32 %v9002_v53, %v8999_v1  ;;  %v7282_v25 = vld [vmem:[#allocation3 + $0xdf0] sm:$0xf]  ;;  %v9747_v15 = vld [vmem:[#allocation64_spill] sm:$0xff] }
  0xc6   :  { %4482 = vmatpush.bf16.msrb.mxu1 %v6859_v26  ;;  %4520 = vmatpush.bf16.msrb.mxu3 %v6987_v54  ;;  %v445_v18 = vrot.slane %v9737_v32, 3  ;;  %v9743_v26 = vld [vmem:[#allocation28_spill] sm:$0xff]  ;;  %v459_v32 = vrot.slane %v9745_v7, 3  ;;  %v6843_v7 = vor.u32 %v8997_v50, %v8995_v62  ;;  %v461_v31 = vrot.slane %v9747_v15, 2  ;;  %v9748_v58 = vld [vmem:[#allocation29_spill] sm:$0xff] }
  0xc7   :  { %v455_v54 = vrot.slane %v9743_v26, 3  ;;  %v8199_v26 = vld [vmem:[#allocation3 + $0xc74] sm:$0xf0]  ;;  %v462_v43 = vrot.slane %v9748_v58, 3  ;;  %v9751_v53 = vld [vmem:[#allocation65_spill] sm:$0xff]  ;;  %v469_v50 = vrot.slane %v8671_v20, 3  ;;  %v7219_v1 = vor.u32 %v8231_v59, %v7218_v41  ;;  %v4094_v24 = vpop.f32.mrf.mxu0 }
  0xc8   :  { %v9028_v4 = vor.u32 %v445_v18, %v444_v35  ;;  %4433 = vmatmul.bf16.gmra.mxu2 %v8982_v56  ;;  %4452 = vmatmul.bf16.gmra.mxu3 %v9018_v5  ;;  %v468_v62 = vrot.slane %v9751_v53, 2  ;;  %v7091_v35 = vor.u32 %v8199_v26, %v7090_v19  ;;  %v4130_v18 = vpop.f32.mrf.mxu2  ;;  %v449_v60 = vor.u32 %v448_v38, %v447_v46  ;;  %v4113_v5 = vpop.f32.mrf.mxu1  ;;  %v8213_v59 = vld [vmem:[#allocation3 + $0xce4] sm:$0xf0]  ;;  %v7274_v41 = vld [vmem:[#allocation3 + $0xde0] sm:$0xf] }
  0xc9   :  { %4502 = vmatpush.bf16.msrb.mxu2 %v6915_v61  ;;  %4464 = vmatpush.bf16.msrb.mxu0 %v6787_v12  ;;  %v465_v61 = vrot.slane %v9749_v37, 2  ;;  %v9750_v12 = vld [vmem:[#allocation21_spill] sm:$0xff]  ;;  %v4149_v15 = vpop.f32.mrf.mxu3  ;;  %v453_v58 = vor.u32 %v452_v48, %v451_v51  ;;  %v7155_v14 = vor.u32 %v8215_v57, %v7154_v3  ;;  %v7283_v37 = vor.u32 %v8247_v6, %v7282_v25  ;;  %v7202_v38 = vld [vmem:[#allocation3 + $0xd50] sm:$0xf] }
  0xca   :  { %4483 = vmatpush.bf16.msrb.mxu1 %v6851_v34  ;;  %4521 = vmatpush.bf16.msrb.mxu3 %v6979_v39  ;;  %v466_v36 = vrot.slane %v9750_v12, 3  ;;  %v7210_v34 = vld [vmem:[#allocation3 + $0xd60] sm:$0xf]  ;;  %v8229_v39 = vld [vmem:[#allocation3 + $0xd64] sm:$0xf0]  ;;  %v4131_v56 = vadd.f32 %v4130_v18, %v4112_v17  ;;  %v456_v53 = vor.u32 %v455_v54, %v454_v11  ;;  %v460_v20 = vor.u32 %v459_v32, %v458_v27 }
  0xcb   :  { %v8197_v12 = vld [vmem:[#allocation3 + $0xc64] sm:$0xf0]  ;;  %v4114_v19 = vadd.f32 %v4113_v5, %v4094_v24  ;;  %v463_v46 = vor.u32 %v462_v43, %v461_v31  ;;  %v7211_v6 = vor.u32 %v8229_v39, %v7210_v34  ;;  %v470_v17 = vor.u32 %v469_v50, %v468_v62  ;;  %v8227_v32 = vld [vmem:[#allocation3 + $0xd54] sm:$0xf0]  ;;  %v7074_v54 = vld [vmem:[#allocation3 + $0xc50] sm:$0xf] }
  0xcc   :  { %v8245_v26 = vld [vmem:[#allocation3 + $0xde4] sm:$0xf0]  ;;  %v467_v48 = vor.u32 %v466_v36, %v465_v61  ;;  %v9038_v3 = vadd.f32 %v4149_v15, %v4131_v56  ;;  %v7083_v51 = vor.u32 %v8197_v12, %v7082_v2  ;;  %v7147_v27 = vor.u32 %v8213_v59, %v7146_v8  ;;  %v8195_v24 = vld [vmem:[#allocation3 + $0xc54] sm:$0xf0]  ;;  %v7266_v5 = vld [vmem:[#allocation3 + $0xdd0] sm:$0xf] }
  0xcd   :  { %4503 = vmatpush.bf16.msrb.mxu2 %v6907_v63  ;;  %4465 = vmatpush.bf16.msrb.mxu0 %v6779_v23  ;;  %v7275_v11 = vor.u32 %v8245_v26, %v7274_v41  ;;  %v8243_v36 = vld [vmem:[#allocation3 + $0xdd4] sm:$0xf0]  ;;  %v7194_v56 = vld [vmem:[#allocation3 + $0xd40] sm:$0xf]  ;;  %v8225_v63 = vld [vmem:[#allocation3 + $0xd44] sm:$0xf0]  ;;  %v9042_v23 = vsel %vm443_vm7, %v9028_v4, %v449_v60  ;;  %v7203_v2 = vor.u32 %v8227_v32, %v7202_v38 }
  0xce   :  { %4484 = vmatpush.bf16.msrb.mxu1 %v6843_v7  ;;  %4522 = vmatpush.bf16.msrb.mxu3 %v6971_v49  ;;  %v7138_v7 = vld [vmem:[#allocation3 + $0xcd0] sm:$0xf]  ;;  %v8211_v49 = vld [vmem:[#allocation3 + $0xcd4] sm:$0xf0]  ;;  %9752 = vst [vmem:[#allocation85_spill] sm:$0xff] %v9042_v23  ;;  %v9045_v57 = vsel %vm443_vm7, %v453_v58, %v456_v53  ;;  %v9048_v25 = vsel %vm443_vm7, %v460_v20, %v463_v46  ;;  %v472_v34 = vrot.slane %v8700_v55, 2 }
  0xcf   :  { %9753 = vst [vmem:[#allocation86_spill] sm:$0xff] %v9045_v57  ;;  %v9051_v15 = vsel %vm443_vm7, %v467_v48, %v470_v17  ;;  %v7066_v31 = vld [vmem:[#allocation3 + $0xc40] sm:$0xf]  ;;  %v8193_v4 = vld [vmem:[#allocation3 + $0xc44] sm:$0xf0]  ;;  %v4163_v43 = vpop.f32.mrf.mxu0  ;;  %v7139_v12 = vor.u32 %v8211_v49, %v7138_v7  ;;  %v7267_v62 = vor.u32 %v8243_v36, %v7266_v5  ;;  %v7195_v50 = vor.u32 %v8225_v63, %v7194_v56  ;;  %v9757_v46 = vld [vmem:[#allocation35_spill] sm:$0xff] }
  0xd0   :  { %9754 = vst [vmem:[#allocation87_spill] sm:$0xff] %v9048_v25  ;;  %v4182_v61 = vpop.f32.mrf.mxu1  ;;  %v7258_v58 = vld [vmem:[#allocation3 + $0xdc0] sm:$0xf]  ;;  %v4164_v53 = vadd.f32 %v4163_v43, %v8963_v33  ;;  %v8241_v20 = vld [vmem:[#allocation3 + $0xdc4] sm:$0xf0]  ;;  %v473_v39 = vrot.slane %v8684_v28, 3  ;;  %v7067_v33 = vor.u32 %v8193_v4, %v7066_v31 }
  0xd1   :  { %4572 = vmatpush.bf16.msra.mxu2 %v7219_v1  ;;  %4534 = vmatpush.bf16.msra.mxu0 %v7091_v35  ;;  %v4151_v8 = vpop.f32.mrf.mxu3  ;;  %9755 = vst [vmem:[#allocation88_spill] sm:$0xff] %v9051_v15  ;;  %v7130_v1 = vld [vmem:[#allocation3 + $0xcc0] sm:$0xf]  ;;  %v8209_v35 = vld [vmem:[#allocation3 + $0xcc4] sm:$0xf0]  ;;  %v475_v18 = vrot.slane %v8885_v0, 2 }
  0xd2   :  { %4553 = vmatpush.bf16.msra.mxu1 %v7155_v14  ;;  %4591 = vmatpush.bf16.msra.mxu3 %v7283_v37  ;;  %v7075_v14 = vor.u32 %v8195_v24, %v7074_v54  ;;  %v4132_v37 = vpop.f32.mrf.mxu2  ;;  %v476_v41 = vrot.slane %v8733_v40, 3  ;;  %v9756_v26 = vld [vmem:[#allocation38_spill] sm:$0xff]  ;;  %v480_v48 = vrot.slane %v9757_v46, 3  ;;  %v9759_v17 = vld [vmem:[#allocation43_spill] sm:$0xff]  ;;  %v7131_v54 = vor.u32 %v8209_v35, %v7130_v1 }
  0xd3   :  { %v4133_v60 = vadd.f32 %v4132_v37, %v4114_v19  ;;  %v479_v19 = vrot.slane %v9756_v26, 2  ;;  %4466 = vmatmul.bf16.vlgmr.msrb.gmra.mxu0 %v9042_v23  ;;  %v8223_v32 = vld [vmem:[#allocation3 + $0xd34] sm:$0xf0]  ;;  %v7259_v24 = vor.u32 %v8241_v20, %v7258_v58  ;;  %v7058_v7 = vld [vmem:[#allocation3 + $0xc30] sm:$0xf] }
  0xd4   :  { %4485 = vmatmul.bf16.vlgmr.msrb.gmra.mxu1 %v9045_v57  ;;  %v8191_v49 = vld [vmem:[#allocation3 + $0xc34] sm:$0xf0]  ;;  %v7122_v5 = vld [vmem:[#allocation3 + $0xcb0] sm:$0xf]  ;;  %v8221_v1 = vld [vmem:[#allocation3 + $0xd24] sm:$0xf0] }
  0xd5   :  { %4573 = vmatpush.bf16.msra.mxu2 %v7211_v6  ;;  %4535 = vmatpush.bf16.msra.mxu0 %v7083_v51  ;;  %v9057_v59 = vadd.f32 %v4151_v8, %v4133_v60  ;;  %v4183_v6 = vadd.f32 %v4182_v61, %v4164_v53  ;;  %v9758_v51 = vld [vmem:[#allocation70_spill] sm:$0xff]  ;;  %v8207_v36 = vld [vmem:[#allocation3 + $0xcb4] sm:$0xf0]  ;;  %v474_v53 = vor.u32 %v473_v39, %v472_v34  ;;  %v7114_v23 = vld [vmem:[#allocation3 + $0xca0] sm:$0xf] }
  0xd6   :  { %4554 = vmatpush.bf16.msra.mxu1 %v7147_v27  ;;  %4592 = vmatpush.bf16.msra.mxu3 %v7275_v11  ;;  %v482_v38 = vrot.slane %v9758_v51, 2  ;;  %v483_v27 = vrot.slane %v9759_v17, 3  ;;  %v7186_v11 = vld [vmem:[#allocation3 + $0xd30] sm:$0xf]  ;;  %v8239_v63 = vld [vmem:[#allocation3 + $0xdb4] sm:$0xf0]  ;;  %v7123_v20 = vor.u32 %v8207_v36, %v7122_v5 }
  0xd7   :  { %v7250_v56 = vld [vmem:[#allocation3 + $0xdb0] sm:$0xf]  ;;  %v7187_v61 = vor.u32 %v8223_v32, %v7186_v11  ;;  %v8189_v57 = vld [vmem:[#allocation3 + $0xc24] sm:$0xf0]  ;;  %v7242_v32 = vld [vmem:[#allocation3 + $0xda0] sm:$0xf] }
  0xd8   :  { %4504 = vmatmul.bf16.vlgmr.msrb.gmra.mxu2 %v9048_v25  ;;  %4523 = vmatmul.bf16.vlgmr.msrb.gmra.mxu3 %v9051_v15  ;;  %v9761_v37 = vld [vmem:[#allocation39_spill] sm:$0xff]  ;;  %v9763_v60 = vld [vmem:[#allocation50_spill] sm:$0xff]  ;;  %v7251_v15 = vor.u32 %v8239_v63, %v7250_v56  ;;  %v7050_v25 = vld [vmem:[#allocation3 + $0xc20] sm:$0xf] }
  0xd9   :  { %4574 = vmatpush.bf16.msra.mxu2 %v7203_v2  ;;  %4536 = vmatpush.bf16.msra.mxu0 %v7075_v14  ;;  %v9760_v2 = vld [vmem:[#allocation41_spill] sm:$0xff]  ;;  %v487_v8 = vrot.slane %v9761_v37, 3  ;;  %v9762_v31 = vld [vmem:[#allocation71_spill] sm:$0xff]  ;;  %v490_v43 = vrot.slane %v9763_v60, 3  ;;  %v4220_v58 = vpop.f32.mrf.mxu3  ;;  %v4184_v37 = vpop.f32.mrf.mxu1  ;;  %v484_v60 = vor.u32 %v483_v27, %v482_v38  ;;  %v9764_v17 = vld [vmem:[#allocation42_spill] sm:$0xff] }
  0xda   :  { %4555 = vmatpush.bf16.msra.mxu1 %v7139_v12  ;;  %4593 = vmatpush.bf16.msra.mxu3 %v7267_v62  ;;  %v486_v14 = vrot.slane %v9760_v2, 2  ;;  %v489_v4 = vrot.slane %v9762_v31, 2  ;;  %v7059_v12 = vor.u32 %v8191_v49, %v7058_v7  ;;  %v7178_v62 = vld [vmem:[#allocation3 + $0xd20] sm:$0xf]  ;;  %v4201_v35 = vpop.f32.mrf.mxu2  ;;  %v477_v31 = vor.u32 %v476_v41, %v475_v18  ;;  %v8205_v11 = vld [vmem:[#allocation3 + $0xca4] sm:$0xf0] }
  0xdb   :  { %v481_v2 = vor.u32 %v480_v48, %v479_v19  ;;  %v8237_v7 = vld [vmem:[#allocation3 + $0xda4] sm:$0xf0]  ;;  %v9766_v39 = vld [vmem:[#allocation72_spill] sm:$0xff]  ;;  %v9767_v56 = vld [vmem:[#allocation51_spill] sm:$0xff]  ;;  %v7179_v18 = vor.u32 %v8221_v1, %v7178_v62  ;;  %v7051_v41 = vor.u32 %v8189_v57, %v7050_v25  ;;  %v7115_v48 = vor.u32 %v8205_v11, %v7114_v23 }
  0xdc   :  { %v496_v5 = vrot.slane %v9766_v39, 2  ;;  %v7243_v38 = vor.u32 %v8237_v7, %v7242_v32  ;;  %v8219_v27 = vld [vmem:[#allocation3 + $0xd14] sm:$0xf0]  ;;  %v7042_v63 = vld [vmem:[#allocation3 + $0xc10] sm:$0xf]  ;;  %v9080_v39 = vsel %vm443_vm7, %v474_v53, %v477_v31 }
  0xdd   :  { %4575 = vmatpush.bf16.msra.mxu2 %v7195_v50  ;;  %4537 = vmatpush.bf16.msra.mxu0 %v7067_v33  ;;  %v4202_v50 = vadd.f32 %v4201_v35, %v4183_v6  ;;  %v4165_v33 = vpop.f32.mrf.mxu0  ;;  %v497_v6 = vrot.slane %v9767_v56, 3  ;;  %v8187_v35 = vld [vmem:[#allocation3 + $0xc14] sm:$0xf0]  ;;  %9768 = vst [vmem:[#allocation38_spill] sm:$0xff] %v9080_v39  ;;  %v7234_v56 = vld [vmem:[#allocation3 + $0xd90] sm:$0xf] }
  0xde   :  { %4556 = vmatpush.bf16.msra.mxu1 %v7131_v54  ;;  %4594 = vmatpush.bf16.msra.mxu3 %v7259_v24  ;;  %v4166_v49 = vadd.f32 %v4165_v33, %v9010_v13  ;;  %v493_v54 = vrot.slane %v9764_v17, 2  ;;  %v9765_v24 = vld [vmem:[#allocation40_spill] sm:$0xff]  ;;  %v7170_v13 = vld [vmem:[#allocation3 + $0xd10] sm:$0xf]  ;;  %v7043_v31 = vor.u32 %v8187_v35, %v7042_v63  ;;  %v8217_v53 = vld [vmem:[#allocation3 + $0xd04] sm:$0xf0] }
  0xdf   :  { %v494_v34 = vrot.slane %v9765_v24, 3  ;;  %v9076_v36 = vadd.f32 %v4220_v58, %v4202_v50  ;;  %v7106_v33 = vld [vmem:[#allocation3 + $0xc90] sm:$0xf]  ;;  %v488_v58 = vor.u32 %v487_v8, %v486_v14  ;;  %v8203_v50 = vld [vmem:[#allocation3 + $0xc94] sm:$0xf0]  ;;  %v498_v57 = vor.u32 %v497_v6, %v496_v5 }
  0xe0   :  { %v4185_v19 = vadd.f32 %v4184_v37, %v4166_v49  ;;  %v7162_v25 = vld [vmem:[#allocation3 + $0xd00] sm:$0xf]  ;;  %v9083_v37 = vsel %vm443_vm7, %v481_v2, %v484_v60  ;;  %v7171_v1 = vor.u32 %v8219_v27, %v7170_v13  ;;  %v8185_v8 = vld [vmem:[#allocation3 + $0xc04] sm:$0xf0]  ;;  %v7474_v2 = vld [vmem:[#allocation3 + $0xf70] sm:$0xf] }
  0xe1   :  { %4576 = vmatpush.bf16.msra.mxu2 %v7187_v61  ;;  %4538 = vmatpush.bf16.msra.mxu0 %v7059_v12  ;;  %v8235_v61 = vld [vmem:[#allocation3 + $0xd94] sm:$0xf0]  ;;  %v491_v12 = vor.u32 %v490_v43, %v489_v4  ;;  %v495_v62 = vor.u32 %v494_v34, %v493_v54  ;;  %9769 = vst [vmem:[#allocation35_spill] sm:$0xff] %v9083_v37  ;;  %v7034_v14 = vld [vmem:[#allocation3 + $0xc00] sm:$0xf]  ;;  %v4187_v4 = vpop.f32.mrf.mxu1 }
  0xe2   :  { %4557 = vmatpush.bf16.msra.mxu1 %v7123_v20  ;;  %4595 = vmatpush.bf16.msra.mxu3 %v7251_v15  ;;  %v4203_v23 = vpop.f32.mrf.mxu2  ;;  %v4222_v15 = vpop.f32.mrf.mxu3  ;;  %v7107_v43 = vor.u32 %v8203_v50, %v7106_v33  ;;  %v7235_v32 = vor.u32 %v8235_v61, %v7234_v56  ;;  %v7098_v7 = vld [vmem:[#allocation3 + $0xc80] sm:$0xf]  ;;  %v8201_v49 = vld [vmem:[#allocation3 + $0xc84] sm:$0xf0]  ;;  %v8295_v60 = vld [vmem:[#allocation3 + $0xf74] sm:$0xf0]  ;;  %v7035_v13 = vor.u32 %v8185_v8, %v7034_v14 }
  0xe3   :  { %v4204_v20 = vadd.f32 %v4203_v23, %v4185_v19  ;;  %v7226_v54 = vld [vmem:[#allocation3 + $0xd80] sm:$0xf]  ;;  %v8233_v5 = vld [vmem:[#allocation3 + $0xd84] sm:$0xf0]  ;;  %4471 = vmatmul.bf16.gmra.mxu0 %v9080_v39  ;;  %v7346_v56 = vld [vmem:[#allocation3 + $0xe70] sm:$0xf]  ;;  %v7099_v33 = vor.u32 %v8201_v49, %v7098_v7 }
  0xe4   :  { %4490 = vmatmul.bf16.gmra.mxu1 %v9083_v37  ;;  %v8263_v19 = vld [vmem:[#allocation3 + $0xe74] sm:$0xf0]  ;;  %v7538_v63 = vld [vmem:[#allocation3 + $0xff0] sm:$0xf]  ;;  %v7227_v50 = vor.u32 %v8233_v5, %v7226_v54  ;;  %v8309_v14 = vld [vmem:[#allocation3 + $0xfe4] sm:$0xf0] }
  0xe5   :  { %4577 = vmatpush.bf16.msra.mxu2 %v7179_v18  ;;  %4539 = vmatpush.bf16.msra.mxu0 %v7051_v41  ;;  %v4168_v11 = vpop.f32.mrf.mxu0  ;;  %v9086_v6 = vadd.f32 %v4222_v15, %v4204_v20  ;;  %v9091_v18 = vsel %vm443_vm7, %v488_v58, %v491_v12  ;;  %v9094_v41 = vsel %vm443_vm7, %v495_v62, %v498_v57  ;;  %v8279_v27 = vld [vmem:[#allocation3 + $0xef4] sm:$0xf0]  ;;  %v7466_v12 = vld [vmem:[#allocation3 + $0xf60] sm:$0xf]  ;;  %v8293_v62 = vld [vmem:[#allocation3 + $0xf64] sm:$0xf0] }
  0xe6   :  { %4558 = vmatpush.bf16.msra.mxu1 %v7115_v48  ;;  %4596 = vmatpush.bf16.msra.mxu3 %v7243_v38  ;;  %v4169_v34 = vadd.f32 %v4168_v11, %v9038_v3  ;;  %9770 = vst [vmem:[#allocation70_spill] sm:$0xff] %v9091_v18  ;;  %v7410_v48 = vld [vmem:[#allocation3 + $0xef0] sm:$0xf]  ;;  %v7163_v3 = vor.u32 %v8217_v53, %v7162_v25  ;;  %v8311_v35 = vld [vmem:[#allocation3 + $0xff4] sm:$0xf0]  ;;  %v509_v11 = vrot.slane %v8534_v21, 3 }
  0xe7   :  { %9771 = vst [vmem:[#allocation42_spill] sm:$0xff] %v9094_v41  ;;  %v7475_v58 = vor.u32 %v8295_v60, %v7474_v2  ;;  %v7347_v61 = vor.u32 %v8263_v19, %v7346_v56  ;;  %v7411_v57 = vor.u32 %v8279_v27, %v7410_v48  ;;  %v7539_v23 = vor.u32 %v8311_v35, %v7538_v63  ;;  %v7338_v15 = vld [vmem:[#allocation3 + $0xe60] sm:$0xf]  ;;  %v8261_v25 = vld [vmem:[#allocation3 + $0xe64] sm:$0xf0] }
  0xe8   :  { %v4188_v38 = vadd.f32 %v4187_v4, %v4169_v34  ;;  %4509 = vmatmul.bf16.gmra.mxu2 %v9091_v18  ;;  %4528 = vmatmul.bf16.gmra.mxu3 %v9094_v41  ;;  %v7530_v53 = vld [vmem:[#allocation3 + $0xfe0] sm:$0xf]  ;;  %v510_v4 = vrot.slane %v8636_v9, 3  ;;  %v512_v49 = vrot.slane %v8538_v22, 3  ;;  %v7467_v54 = vor.u32 %v8293_v62, %v7466_v12  ;;  %v7458_v5 = vld [vmem:[#allocation3 + $0xf50] sm:$0xf] }
  0xe9   :  { %4578 = vmatpush.bf16.msra.mxu2 %v7171_v1  ;;  %4540 = vmatpush.bf16.msra.mxu0 %v7043_v31  ;;  %v7402_v1 = vld [vmem:[#allocation3 + $0xee0] sm:$0xf]  ;;  %v8277_v31 = vld [vmem:[#allocation3 + $0xee4] sm:$0xf0]  ;;  %v4189_v7 = vpop.f32.mrf.mxu1  ;;  %v7339_v34 = vor.u32 %v8261_v25, %v7338_v15  ;;  %v7531_v56 = vor.u32 %v8309_v14, %v7530_v53  ;;  %v8291_v19 = vld [vmem:[#allocation3 + $0xf54] sm:$0xf0] }
  0xea   :  { %4559 = vmatpush.bf16.msra.mxu1 %v7107_v43  ;;  %4597 = vmatpush.bf16.msra.mxu3 %v7235_v32  ;;  %v7403_v60 = vor.u32 %v8277_v31, %v7402_v1  ;;  %v7330_v48 = vld [vmem:[#allocation3 + $0xe50] sm:$0xf]  ;;  %v516_v27 = vrot.slane %v8657_v52, 3  ;;  %v7459_v12 = vor.u32 %v8291_v19, %v7458_v5  ;;  %v7322_v1 = vld [vmem:[#allocation3 + $0xe40] sm:$0xf] }
  0xeb   :  { %v4206_v8 = vpop.f32.mrf.mxu2  ;;  %v4225_v20 = vpop.f32.mrf.mxu3  ;;  %v7394_v63 = vld [vmem:[#allocation3 + $0xed0] sm:$0xf]  ;;  %v8257_v31 = vld [vmem:[#allocation3 + $0xe44] sm:$0xf0]  ;;  %v7386_v53 = vld [vmem:[#allocation3 + $0xec0] sm:$0xf] }
  0xec   :  { %v4207_v43 = vadd.f32 %v4206_v8, %v4188_v38  ;;  %v513_v38 = vrot.slane %v8640_v10, 3  ;;  %v7450_v10 = vld [vmem:[#allocation3 + $0xf40] sm:$0xf]  ;;  %v8273_v8 = vld [vmem:[#allocation3 + $0xec4] sm:$0xf0]  ;;  %v7323_v5 = vor.u32 %v8257_v31, %v7322_v1 }
  0xed   :  { %4579 = vmatpush.bf16.msra.mxu2 %v7163_v3  ;;  %4541 = vmatpush.bf16.msra.mxu0 %v7035_v13  ;;  %v4170_v32 = vpop.f32.mrf.mxu0  ;;  %v8259_v3 = vld [vmem:[#allocation3 + $0xe54] sm:$0xf0]  ;;  %v515_v13 = vrot.slane %v8542_v29, 3  ;;  %v7387_v19 = vor.u32 %v8273_v8, %v7386_v53  ;;  %v7306_v31 = vld [vmem:[#allocation3 + $0xe20] sm:$0xf] }
  0xee   :  { %4560 = vmatpush.bf16.msra.mxu1 %v7099_v33  ;;  %4598 = vmatpush.bf16.msra.mxu3 %v7227_v50  ;;  %v4171_v2 = vadd.f32 %v4170_v32, %v9057_v59  ;;  %v9102_v9 = vadd.f32 %v4225_v20, %v4207_v43  ;;  %v8275_v33 = vld [vmem:[#allocation3 + $0xed4] sm:$0xf0]  ;;  %v7522_v50 = vld [vmem:[#allocation3 + $0xfd0] sm:$0xf]  ;;  %v7331_v62 = vor.u32 %v8259_v3, %v7330_v48  ;;  %v7514_v20 = vld [vmem:[#allocation3 + $0xfc0] sm:$0xf] }
  0xef   :  { %v8307_v59 = vld [vmem:[#allocation3 + $0xfd4] sm:$0xf0]  ;;  %v9113_v52 = vsel %vm508_vm8, %v512_v49, %v513_v38  ;;  %v7395_v15 = vor.u32 %v8275_v33, %v7394_v63  ;;  %v8305_v43 = vld [vmem:[#allocation3 + $0xfc4] sm:$0xf0]  ;;  %v7314_v3 = vld [vmem:[#allocation3 + $0xe30] sm:$0xf] }
  0xf0   :  { %v4190_v35 = vadd.f32 %v4189_v7, %v4171_v2  ;;  %9773 = vst [vmem:[#allocation89_spill] sm:$0xff] %v9113_v52  ;;  %v7523_v25 = vor.u32 %v8307_v59, %v7522_v50  ;;  %v7442_v2 = vld [vmem:[#allocation3 + $0xf30] sm:$0xf]  ;;  %v7515_v48 = vor.u32 %v8305_v43, %v7514_v20  ;;  %v8255_v38 = vld [vmem:[#allocation3 + $0xe34] sm:$0xf0]  ;;  %v521_v33 = vrot.slane %v8578_v45, 3 }
  0xf1   :  { %4648 = vmatpush.bf16.msrb.mxu2 %v7475_v58  ;;  %4610 = vmatpush.bf16.msrb.mxu0 %v7347_v61  ;;  %v518_v58 = vrot.slane %v8546_v30, 3  ;;  %v519_v61 = vrot.slane %v8661_v42, 3  ;;  %v8271_v63 = vld [vmem:[#allocation3 + $0xeb4] sm:$0xf0]  ;;  %v522_v50 = vrot.slane %v8719_v16, 3  ;;  %v524_v59 = vrot.slane %v8582_v47, 3 }
  0xf2   :  { %4629 = vmatpush.bf16.msrb.mxu1 %v7411_v57  ;;  %4667 = vmatpush.bf16.msrb.mxu3 %v7539_v23  ;;  %v8289_v57 = vld [vmem:[#allocation3 + $0xf44] sm:$0xf0]  ;;  %v9110_v23 = vsel %vm508_vm8, %v509_v11, %v510_v4  ;;  %v7498_v20 = vld [vmem:[#allocation3 + $0xfa0] sm:$0xf]  ;;  %v7602_v41 = vld [vmem:[#allocation3 + $0x1070] sm:$0xf] }
  0xf3   :  { %9772 = vst [vmem:[#allocation40_spill] sm:$0xff] %v9110_v23  ;;  %v4208_v42 = vpop.f32.mrf.mxu2  ;;  %v4227_v14 = vpop.f32.mrf.mxu3  ;;  %v9119_v11 = vsel %vm508_vm8, %v518_v58, %v519_v61  ;;  %4542 = vmatmul.bf16.vlgmr.msra.gmra.mxu0 %v9110_v23  ;;  %v7451_v49 = vor.u32 %v8289_v57, %v7450_v10  ;;  %v525_v58 = vrot.slane %v8723_v44, 3  ;;  %v9776_v61 = vld [vmem:[#allocation14_spill] sm:$0xff]  ;;  %v7315_v10 = vor.u32 %v8255_v38, %v7314_v3  ;;  %v7434_v57 = vld [vmem:[#allocation3 + $0xf20] sm:$0xf] }
  0xf4   :  { %v4209_v32 = vadd.f32 %v4208_v42, %v4190_v35  ;;  %9775 = vst [vmem:[#allocation91_spill] sm:$0xff] %v9119_v11  ;;  %4561 = vmatmul.bf16.vlgmr.msra.gmra.mxu1 %v9113_v52  ;;  %v8303_v35 = vld [vmem:[#allocation3 + $0xfb4] sm:$0xf0]  ;;  %v8253_v53 = vld [vmem:[#allocation3 + $0xe24] sm:$0xf0] }
  0xf5   :  { %4649 = vmatpush.bf16.msrb.mxu2 %v7467_v54  ;;  %4611 = vmatpush.bf16.msrb.mxu0 %v7339_v34  ;;  %v4239_v7 = vpop.f32.mrf.mxu0  ;;  %v4258_v54 = vpop.f32.mrf.mxu1  ;;  %v9116_v34 = vsel %vm508_vm8, %v515_v13, %v516_v27  ;;  %v7378_v13 = vld [vmem:[#allocation3 + $0xeb0] sm:$0xf]  ;;  %v7370_v42 = vld [vmem:[#allocation3 + $0xea0] sm:$0xf]  ;;  %v8269_v8 = vld [vmem:[#allocation3 + $0xea4] sm:$0xf0]  ;;  %v7307_v3 = vor.u32 %v8253_v53, %v7306_v31 }
  0xf6   :  { %4630 = vmatpush.bf16.msrb.mxu1 %v7403_v60  ;;  %4668 = vmatpush.bf16.msrb.mxu3 %v7531_v56  ;;  %9774 = vst [vmem:[#allocation90_spill] sm:$0xff] %v9116_v34  ;;  %v4240_v4 = vadd.f32 %v4239_v7, %v9076_v36  ;;  %v8287_v60 = vld [vmem:[#allocation3 + $0xf34] sm:$0xf0]  ;;  %v9124_v56 = vadd.f32 %v4227_v14, %v4209_v32  ;;  %v7506_v36 = vld [vmem:[#allocation3 + $0xfb0] sm:$0xf] }
  0xf7   :  { %v7507_v1 = vor.u32 %v8303_v35, %v7506_v36  ;;  %v8301_v43 = vld [vmem:[#allocation3 + $0xfa4] sm:$0xf0]  ;;  %v7426_v38 = vld [vmem:[#allocation3 + $0xf10] sm:$0xf]  ;;  %v8299_v52 = vld [vmem:[#allocation3 + $0xf94] sm:$0xf0] }
  0xf8   :  { %v4259_v27 = vadd.f32 %v4258_v54, %v4240_v4  ;;  %4580 = vmatmul.bf16.vlgmr.msra.gmra.mxu2 %v9116_v34  ;;  %4599 = vmatmul.bf16.vlgmr.msra.gmra.mxu3 %v9119_v11  ;;  %v9777_v54 = vld [vmem:[#allocation46_spill] sm:$0xff]  ;;  %v7499_v35 = vor.u32 %v8301_v43, %v7498_v20  ;;  %v8267_v11 = vld [vmem:[#allocation3 + $0xe94] sm:$0xf0]  ;;  %v9785_v43 = vld [vmem:[#allocation13_spill] sm:$0xff] }
  0xf9   :  { %4650 = vmatpush.bf16.msrb.mxu2 %v7459_v12  ;;  %4612 = vmatpush.bf16.msrb.mxu0 %v7331_v62  ;;  %v527_v12 = vrot.slane %v9776_v61, 3  ;;  %v7443_v62 = vor.u32 %v8287_v60, %v7442_v2  ;;  %v528_v4 = vrot.slane %v9777_v54, 3  ;;  %v9779_v2 = vld [vmem:[#allocation47_spill] sm:$0xff]  ;;  %v9157_v31 = vld [vmem:[#allocation3 + $0xe04] sm:$0xf0] }
  0xfa   :  { %4631 = vmatpush.bf16.msrb.mxu1 %v7395_v15  ;;  %4669 = vmatpush.bf16.msrb.mxu3 %v7523_v25  ;;  %v8285_v15 = vld [vmem:[#allocation3 + $0xf24] sm:$0xf0]  ;;  %v7379_v25 = vor.u32 %v8271_v63, %v7378_v13  ;;  %v531_v60 = vrot.slane %v9779_v2, 3  ;;  %v8283_v13 = vld [vmem:[#allocation3 + $0xf14] sm:$0xf0] }
  0xfb   :  { %v4277_v16 = vpop.f32.mrf.mxu2  ;;  %v4296_v14 = vpop.f32.mrf.mxu3  ;;  %v7298_v63 = vld [vmem:[#allocation3 + $0xe10] sm:$0xf]  ;;  %v7427_v53 = vor.u32 %v8283_v13, %v7426_v38  ;;  %v8359_v23 = vld [vmem:[#allocation3 + $0x1174] sm:$0xf0]  ;;  %v7722_v37 = vld [vmem:[#allocation3 + $0x1160] sm:$0xf] }
  0xfc   :  { %v4278_v32 = vadd.f32 %v4277_v16, %v4259_v27  ;;  %v7371_v27 = vor.u32 %v8269_v8, %v7370_v42  ;;  %v8251_v16 = vld [vmem:[#allocation3 + $0xe14] sm:$0xf0]  ;;  %v7362_v54 = vld [vmem:[#allocation3 + $0xe90] sm:$0xf]  ;;  %v9159_v42 = vld [vmem:[#allocation3 + $0xe80] sm:$0xf] }
  0xfd   :  { %4651 = vmatpush.bf16.msrb.mxu2 %v7451_v49  ;;  %4613 = vmatpush.bf16.msrb.mxu0 %v7323_v5  ;;  %v4241_v44 = vpop.f32.mrf.mxu0  ;;  %v4260_v7 = vpop.f32.mrf.mxu1  ;;  %v9778_v49 = vld [vmem:[#allocation15_spill] sm:$0xff]  ;;  %v9784_v8 = vld [vmem:[#allocation16_spill] sm:$0xff] }
  0xfe   :  { %4632 = vmatpush.bf16.msrb.mxu1 %v7387_v19  ;;  %4670 = vmatpush.bf16.msrb.mxu3 %v7515_v48  ;;  %v530_v5 = vrot.slane %v9778_v49, 3  ;;  %v4242_v19 = vadd.f32 %v4241_v44, %v9086_v6  ;;  %v7435_v48 = vor.u32 %v8285_v15, %v7434_v57  ;;  %v9137_v36 = vadd.f32 %v4296_v14, %v4278_v32  ;;  %v7490_v2 = vld [vmem:[#allocation3 + $0xf90] sm:$0xf]  ;;  %v9139_v6 = vld [vmem:[#allocation3 + $0xf00] sm:$0xf] }
  0xff   :  { %v9148_v57 = vsel %vm508_vm8, %v527_v12, %v528_v4  ;;  %v7491_v12 = vor.u32 %v8299_v52, %v7490_v2  ;;  %v9165_v14 = vld [vmem:[#allocation3 + $0xf84] sm:$0xf0]  ;;  %v542_v20 = vrot.slane %v9784_v8, 3  ;;  %v543_v32 = vrot.slane %v9785_v43, 4  ;;  %v9790_v13 = vld [vmem:[#allocation63_spill] sm:$0xff]  ;;  %v9791_v2 = vld [vmem:[#allocation28_spill] sm:$0xff] }
 0x100   :  { %v4261_v34 = vadd.f32 %v4260_v7, %v4242_v19  ;;  %9782 = vst [vmem:[#allocation92_spill] sm:$0xff] %v9148_v57  ;;  %v9151_v15 = vsel %vm508_vm8, %v530_v5, %v531_v60  ;;  %v9786_v44 = vld [vmem:[#allocation61_spill] sm:$0xff]  ;;  %v9788_v19 = vld [vmem:[#allocation18_spill] sm:$0xff]  ;;  %v553_v8 = vrot.slane %v9791_v2, 4  ;;  %v9792_v43 = vld [vmem:[#allocation20_spill] sm:$0xff] }
 0x101   :  { %4652 = vmatpush.bf16.msrb.mxu2 %v7443_v62  ;;  %4614 = vmatpush.bf16.msrb.mxu0 %v7315_v10  ;;  %v9142_v62 = vsel %vm508_vm8, %v521_v33, %v522_v50  ;;  %v9145_v10 = vsel %vm508_vm8, %v524_v59, %v525_v58  ;;  %9783 = vst [vmem:[#allocation93_spill] sm:$0xff] %v9151_v15  ;;  %v9161_v59 = vld [vmem:[#allocation3 + $0xe84] sm:$0xf0]  ;;  %v9163_v58 = vld [vmem:[#allocation3 + $0xf80] sm:$0xf]  ;;  %v545_v7 = vrot.slane %v9786_v44, 3 }
 0x102   :  { %4633 = vmatpush.bf16.msrb.mxu1 %v7379_v25  ;;  %4671 = vmatpush.bf16.msrb.mxu3 %v7507_v1  ;;  %9780 = vst [vmem:[#allocation46_spill] sm:$0xff] %v9142_v62  ;;  %v9153_v25 = vld [vmem:[#allocation3 + $0xf04] sm:$0xf0]  ;;  %v9155_v1 = vld [vmem:[#allocation3 + $0xe00] sm:$0xf]  ;;  %v7299_v33 = vor.u32 %v8251_v16, %v7298_v63  ;;  %v7363_v50 = vor.u32 %v8267_v11, %v7362_v54  ;;  %v9787_v11 = vld [vmem:[#allocation27_spill] sm:$0xff] }
 0x103   :  { %9781 = vst [vmem:[#allocation47_spill] sm:$0xff] %v9145_v10  ;;  %v4279_v4 = vpop.f32.mrf.mxu2  ;;  %v4298_v5 = vpop.f32.mrf.mxu3  ;;  %v546_v60 = vrot.slane %v9787_v11, 4  ;;  %v552_v63 = vrot.slane %v9790_v13, 3  ;;  %v7419_v54 = vor.u32 %v9153_v25, %v9139_v6  ;;  %v556_v44 = vrot.slane %v9792_v43, 3  ;;  %4547 = vmatmul.bf16.gmra.mxu0 %v9142_v62  ;;  %v8327_v6 = vld [vmem:[#allocation3 + $0x1074] sm:$0xf0] }
 0x104   :  { %v4280_v52 = vadd.f32 %v4279_v4, %v4261_v34  ;;  %4566 = vmatmul.bf16.gmra.mxu1 %v9145_v10  ;;  %v7291_v34 = vor.u32 %v9157_v31, %v9155_v1  ;;  %v9793_v4 = vld [vmem:[#allocation19_spill] sm:$0xff]  ;;  %v9795_v31 = vld [vmem:[#allocation29_spill] sm:$0xff] }
 0x105   :  { %4653 = vmatpush.bf16.msrb.mxu2 %v7435_v48  ;;  %4615 = vmatpush.bf16.msrb.mxu0 %v7307_v3  ;;  %v549_v48 = vrot.slane %v9788_v19, 3  ;;  %v9789_v3 = vld [vmem:[#allocation17_spill] sm:$0xff]  ;;  %v4263_v16 = vpop.f32.mrf.mxu1  ;;  %v557_v19 = vrot.slane %v9793_v4, 4  ;;  %v7666_v25 = vld [vmem:[#allocation3 + $0x10f0] sm:$0xf]  ;;  %v560_v4 = vrot.slane %v9795_v31, 4 }
 0x106   :  { %4634 = vmatpush.bf16.msrb.mxu1 %v7371_v27  ;;  %4672 = vmatpush.bf16.msrb.mxu3 %v7499_v35  ;;  %v550_v38 = vrot.slane %v9789_v3, 4  ;;  %v7730_v27 = vld [vmem:[#allocation3 + $0x1170] sm:$0xf]  ;;  %v4244_v35 = vpop.f32.mrf.mxu0  ;;  %v9794_v3 = vld [vmem:[#allocation64_spill] sm:$0xff]  ;;  %v9185_v2 = vadd.f32 %v4298_v5, %v4280_v52  ;;  %v9797_v5 = vld [vmem:[#allocation21_spill] sm:$0xff] }
 0x107   :  { %v4245_v11 = vadd.f32 %v4244_v35, %v9102_v9  ;;  %v559_v13 = vrot.slane %v9794_v3, 3  ;;  %v7355_v9 = vor.u32 %v9161_v59, %v9159_v42  ;;  %v7483_v35 = vor.u32 %v9165_v14, %v9163_v58  ;;  %v8343_v43 = vld [vmem:[#allocation3 + $0x10f4] sm:$0xf0]  ;;  %v7794_v10 = vld [vmem:[#allocation3 + $0x11f0] sm:$0xf] }
 0x108   :  { %v8375_v62 = vld [vmem:[#allocation3 + $0x11f4] sm:$0xf0]  ;;  %v564_v52 = vrot.slane %v9797_v5, 4  ;;  %4585 = vmatmul.bf16.gmra.mxu2 %v9148_v57  ;;  %4604 = vmatmul.bf16.gmra.mxu3 %v9151_v15  ;;  %v9799_v42 = vld [vmem:[#allocation30_spill] sm:$0xff]  ;;  %v7731_v58 = vor.u32 %v8359_v23, %v7730_v27  ;;  %v7603_v14 = vor.u32 %v8327_v6, %v7602_v41  ;;  %v7658_v39 = vld [vmem:[#allocation3 + $0x10e0] sm:$0xf]  ;;  %v547_v5 = vor.u32 %v546_v60, %v545_v7 }
 0x109   :  { %4654 = vmatpush.bf16.msrb.mxu2 %v7427_v53  ;;  %4616 = vmatpush.bf16.msrb.mxu0 %v7299_v33  ;;  %v4264_v1 = vadd.f32 %v4263_v16, %v4245_v11  ;;  %v9796_v3 = vld [vmem:[#allocation24_spill] sm:$0xff]  ;;  %v9798_v53 = vld [vmem:[#allocation65_spill] sm:$0xff]  ;;  %v567_v59 = vrot.slane %v9799_v42, 4  ;;  %v551_v23 = vor.u32 %v550_v38, %v549_v48  ;;  %v554_v41 = vor.u32 %v553_v8, %v552_v63 }
 0x10a   :  { %4635 = vmatpush.bf16.msrb.mxu1 %v7363_v50  ;;  %4673 = vmatpush.bf16.msrb.mxu3 %v7491_v12  ;;  %v563_v18 = vrot.slane %v9796_v3, 3  ;;  %v566_v33 = vrot.slane %v9798_v53, 3  ;;  %v8357_v16 = vld [vmem:[#allocation3 + $0x1164] sm:$0xf0]  ;;  %v7667_v50 = vor.u32 %v8343_v43, %v7666_v25  ;;  %v7795_v12 = vor.u32 %v8375_v62, %v7794_v10  ;;  %v7594_v11 = vld [vmem:[#allocation3 + $0x1060] sm:$0xf] }
 0x10b   :  { %v8325_v31 = vld [vmem:[#allocation3 + $0x1064] sm:$0xf0]  ;;  %v544_v3 = vor.u32 %v543_v32, %v542_v20  ;;  %v7786_v49 = vld [vmem:[#allocation3 + $0x11e0] sm:$0xf]  ;;  %v4282_v61 = vpop.f32.mrf.mxu2  ;;  %v4301_v53 = vpop.f32.mrf.mxu3  ;;  %v558_v27 = vor.u32 %v557_v19, %v556_v44  ;;  %v7723_v10 = vor.u32 %v8357_v16, %v7722_v37  ;;  %v7714_v20 = vld [vmem:[#allocation3 + $0x1150] sm:$0xf] }
 0x10c   :  { %v8341_v57 = vld [vmem:[#allocation3 + $0x10e4] sm:$0xf0]  ;;  %v4283_v6 = vadd.f32 %v4282_v61, %v4264_v1  ;;  %v8323_v48 = vld [vmem:[#allocation3 + $0x1054] sm:$0xf0]  ;;  %v561_v61 = vor.u32 %v560_v4, %v559_v13  ;;  %v565_v63 = vor.u32 %v564_v52, %v563_v18  ;;  %v568_v8 = vor.u32 %v567_v59, %v566_v33  ;;  %v7650_v44 = vld [vmem:[#allocation3 + $0x10d0] sm:$0xf] }
 0x10d   :  { %4655 = vmatpush.bf16.msrb.mxu2 %v7419_v54  ;;  %4617 = vmatpush.bf16.msrb.mxu0 %v7291_v34  ;;  %v8373_v15 = vld [vmem:[#allocation3 + $0x11e4] sm:$0xf0]  ;;  %v4265_v62 = vpop.f32.mrf.mxu1  ;;  %v7595_v54 = vor.u32 %v8325_v31, %v7594_v11  ;;  %v7659_v7 = vor.u32 %v8341_v57, %v7658_v39  ;;  %v8355_v34 = vld [vmem:[#allocation3 + $0x1154] sm:$0xf0]  ;;  %v7778_v37 = vld [vmem:[#allocation3 + $0x11d0] sm:$0xf]  ;;  %v9205_v57 = vsel %vm541_vm9, %v551_v23, %v554_v41 }
 0x10e   :  { %4636 = vmatpush.bf16.msrb.mxu1 %v7355_v9  ;;  %4674 = vmatpush.bf16.msrb.mxu3 %v7483_v35  ;;  %v4246_v25 = vpop.f32.mrf.mxu0  ;;  %v7787_v60 = vor.u32 %v8373_v15, %v7786_v49  ;;  %v7586_v9 = vld [vmem:[#allocation3 + $0x1050] sm:$0xf]  ;;  %v9199_v38 = vadd.f32 %v4301_v53, %v4283_v6  ;;  %v8339_v35 = vld [vmem:[#allocation3 + $0x10d4] sm:$0xf0]  ;;  %v7706_v42 = vld [vmem:[#allocation3 + $0x1140] sm:$0xf]  ;;  %v9202_v49 = vsel %vm541_vm9, %v544_v3, %v547_v5 }
 0x10f   :  { %v4247_v32 = vadd.f32 %v4246_v25, %v9124_v56  ;;  %v8371_v43 = vld [vmem:[#allocation3 + $0x11d4] sm:$0xf0]  ;;  %v7715_v56 = vor.u32 %v8355_v34, %v7714_v20  ;;  %v7587_v1 = vor.u32 %v8323_v48, %v7586_v9  ;;  %v8353_v39 = vld [vmem:[#allocation3 + $0x1144] sm:$0xf0]  ;;  %v7578_v18 = vld [vmem:[#allocation3 + $0x1040] sm:$0xf]  ;;  %v9208_v13 = vsel %vm541_vm9, %v558_v27, %v561_v61 }
 0x110   :  { %v8321_v15 = vld [vmem:[#allocation3 + $0x1044] sm:$0xf0]  ;;  %v9211_v4 = vsel %vm541_vm9, %v565_v63, %v568_v8  ;;  %v7651_v52 = vor.u32 %v8339_v35, %v7650_v44  ;;  %v7779_v33 = vor.u32 %v8371_v43, %v7778_v37  ;;  %v7642_v59 = vld [vmem:[#allocation3 + $0x10c0] sm:$0xf]  ;;  %v570_v31 = vrot.slane %v8700_v55, 3  ;;  %v9802_v63 = vld [vmem:[#allocation39_spill] sm:$0xff] }
 0x111   :  { %4724 = vmatpush.bf16.msra.mxu2 %v7731_v58  ;;  %4686 = vmatpush.bf16.msra.mxu0 %v7603_v14  ;;  %v4266_v19 = vadd.f32 %v4265_v62, %v4247_v32  ;;  %v8337_v58 = vld [vmem:[#allocation3 + $0x10c4] sm:$0xf0]  ;;  %v7770_v14 = vld [vmem:[#allocation3 + $0x11c0] sm:$0xf]  ;;  %v571_v3 = vrot.slane %v8684_v28, 4  ;;  %v573_v5 = vrot.slane %v8885_v0, 3  ;;  %v7579_v28 = vor.u32 %v8321_v15, %v7578_v18 }
 0x112   :  { %4705 = vmatpush.bf16.msra.mxu1 %v7667_v50  ;;  %4743 = vmatpush.bf16.msra.mxu3 %v7795_v12  ;;  %v7707_v12 = vor.u32 %v8353_v39, %v7706_v42  ;;  %v8369_v11 = vld [vmem:[#allocation3 + $0x11c4] sm:$0xf0]  ;;  %v574_v27 = vrot.slane %v8733_v40, 4  ;;  %v577_v6 = vrot.slane %v9756_v26, 3  ;;  %v578_v25 = vrot.slane %v9757_v46, 4  ;;  %v9800_v0 = vld [vmem:[#allocation43_spill] sm:$0xff] }
 0x113   :  { %v4284_v16 = vpop.f32.mrf.mxu2  ;;  %v4303_v50 = vpop.f32.mrf.mxu3  ;;  %4618 = vmatmul.bf16.vlgmr.msrb.gmra.mxu0 %v9202_v49  ;;  %v580_v55 = vrot.slane %v9758_v51, 3  ;;  %v8351_v20 = vld [vmem:[#allocation3 + $0x1134] sm:$0xf0]  ;;  %v7643_v40 = vor.u32 %v8337_v58, %v7642_v59  ;;  %v7771_v26 = vor.u32 %v8369_v11, %v7770_v14  ;;  %v7570_v46 = vld [vmem:[#allocation3 + $0x1030] sm:$0xf]  ;;  %v9801_v51 = vld [vmem:[#allocation41_spill] sm:$0xff]  ;;  %v572_v14 = vor.u32 %v571_v3, %v570_v31 }
 0x114   :  { %v4285_v53 = vadd.f32 %v4284_v16, %v4266_v19  ;;  %4637 = vmatmul.bf16.vlgmr.msrb.gmra.mxu1 %v9205_v57  ;;  %v8335_v34 = vld [vmem:[#allocation3 + $0x10b4] sm:$0xf0]  ;;  %v7762_v9 = vld [vmem:[#allocation3 + $0x11b0] sm:$0xf]  ;;  %v584_v61 = vrot.slane %v9801_v51, 3  ;;  %v585_v8 = vrot.slane %v9802_v63, 4  ;;  %v575_v16 = vor.u32 %v574_v27, %v573_v5 }
 0x115   :  { %4725 = vmatpush.bf16.msra.mxu2 %v7723_v10  ;;  %4687 = vmatpush.bf16.msra.mxu0 %v7595_v54  ;;  %v4334_v41 = vpop.f32.mrf.mxu1  ;;  %v581_v10 = vrot.slane %v9800_v0, 4  ;;  %v7698_v54 = vld [vmem:[#allocation3 + $0x1130] sm:$0xf]  ;;  %v8367_v48 = vld [vmem:[#allocation3 + $0x11b4] sm:$0xf0]  ;;  %v591_v0 = vrot.slane %v9764_v17, 3 }
 0x116   :  { %4706 = vmatpush.bf16.msra.mxu1 %v7659_v7  ;;  %4744 = vmatpush.bf16.msra.mxu3 %v7787_v60  ;;  %v4315_v23 = vpop.f32.mrf.mxu0  ;;  %v9224_v32 = vadd.f32 %v4303_v50, %v4285_v53  ;;  %v8319_v7 = vld [vmem:[#allocation3 + $0x1034] sm:$0xf0]  ;;  %v9804_v35 = vld [vmem:[#allocation50_spill] sm:$0xff]  ;;  %v7699_v43 = vor.u32 %v8351_v20, %v7698_v54  ;;  %v7763_v18 = vor.u32 %v8367_v48, %v7762_v9  ;;  %v7562_v15 = vld [vmem:[#allocation3 + $0x1020] sm:$0xf]  ;;  %v592_v54 = vrot.slane %v9765_v24, 4 }
 0x117   :  { %v4316_v62 = vadd.f32 %v4315_v23, %v9137_v36  ;;  %v7634_v36 = vld [vmem:[#allocation3 + $0x10b0] sm:$0xf]  ;;  %v588_v37 = vrot.slane %v9804_v35, 4  ;;  %v8349_v42 = vld [vmem:[#allocation3 + $0x1124] sm:$0xf0]  ;;  %v579_v50 = vor.u32 %v578_v25, %v577_v6  ;;  %v9805_v20 = vld [vmem:[#allocation72_spill] sm:$0xff] }
 0x118   :  { %4656 = vmatmul.bf16.vlgmr.msrb.gmra.mxu2 %v9208_v13  ;;  %4675 = vmatmul.bf16.vlgmr.msrb.gmra.mxu3 %v9211_v4  ;;  %v9803_v44 = vld [vmem:[#allocation71_spill] sm:$0xff]  ;;  %v7635_v39 = vor.u32 %v8335_v34, %v7634_v36  ;;  %v8333_v11 = vld [vmem:[#allocation3 + $0x10a4] sm:$0xf0]  ;;  %v7754_v53 = vld [vmem:[#allocation3 + $0x11a0] sm:$0xf]  ;;  %v593_v63 = vor.u32 %v592_v54, %v591_v0 }
 0x119   :  { %4726 = vmatpush.bf16.msra.mxu2 %v7715_v56  ;;  %4688 = vmatpush.bf16.msra.mxu0 %v7587_v1  ;;  %v4335_v60 = vadd.f32 %v4334_v41, %v4316_v62  ;;  %v587_v19 = vrot.slane %v9803_v44, 3  ;;  %v7571_v56 = vor.u32 %v8319_v7, %v7570_v46  ;;  %v7690_v1 = vld [vmem:[#allocation3 + $0x1120] sm:$0xf]  ;;  %v8365_v23 = vld [vmem:[#allocation3 + $0x11a4] sm:$0xf0]  ;;  %v9806_v46 = vld [vmem:[#allocation51_spill] sm:$0xff] }
 0x11a   :  { %4707 = vmatpush.bf16.msra.mxu1 %v7651_v52  ;;  %4745 = vmatpush.bf16.msra.mxu3 %v7779_v33  ;;  %v8317_v52 = vld [vmem:[#allocation3 + $0x1024] sm:$0xf0]  ;;  %v7626_v33 = vld [vmem:[#allocation3 + $0x10a0] sm:$0xf]  ;;  %v595_v7 = vrot.slane %v9806_v46, 4  ;;  %v7691_v31 = vor.u32 %v8349_v42, %v7690_v1  ;;  %v7755_v6 = vor.u32 %v8365_v23, %v7754_v53 }
 0x11b   :  { %v4353_v59 = vpop.f32.mrf.mxu2  ;;  %v4372_v58 = vpop.f32.mrf.mxu3  ;;  %v7563_v3 = vor.u32 %v8317_v52, %v7562_v15  ;;  %v7627_v27 = vor.u32 %v8333_v11, %v7626_v33  ;;  %v7682_v25 = vld [vmem:[#allocation3 + $0x1110] sm:$0xf]  ;;  %v8347_v17 = vld [vmem:[#allocation3 + $0x1114] sm:$0xf0]  ;;  %v589_v51 = vor.u32 %v588_v37, %v587_v19  ;;  %v7674_v35 = vld [vmem:[#allocation3 + $0x1100] sm:$0xf] }
 0x11c   :  { %v4354_v41 = vadd.f32 %v4353_v59, %v4335_v60  ;;  %v7554_v24 = vld [vmem:[#allocation3 + $0x1010] sm:$0xf]  ;;  %v586_v60 = vor.u32 %v585_v8, %v584_v61  ;;  %v8331_v34 = vld [vmem:[#allocation3 + $0x1094] sm:$0xf0]  ;;  %v8345_v42 = vld [vmem:[#allocation3 + $0x1104] sm:$0xf0] }
 0x11d   :  { %4727 = vmatpush.bf16.msra.mxu2 %v7707_v12  ;;  %4689 = vmatpush.bf16.msra.mxu0 %v7579_v28  ;;  %v582_v12 = vor.u32 %v581_v10, %v580_v55  ;;  %v4336_v28 = vpop.f32.mrf.mxu1  ;;  %v8315_v10 = vld [vmem:[#allocation3 + $0x1014] sm:$0xf0]  ;;  %v7618_v36 = vld [vmem:[#allocation3 + $0x1090] sm:$0xf]  ;;  %v7610_v19 = vld [vmem:[#allocation3 + $0x1080] sm:$0xf]  ;;  %v7675_v54 = vor.u32 %v8345_v42, %v7674_v35 }
 0x11e   :  { %4708 = vmatpush.bf16.msra.mxu1 %v7643_v40  ;;  %4746 = vmatpush.bf16.msra.mxu3 %v7771_v26  ;;  %v4317_v62 = vpop.f32.mrf.mxu0  ;;  %v594_v40 = vrot.slane %v9805_v20, 3  ;;  %v9237_v5 = vadd.f32 %v4372_v58, %v4354_v41  ;;  %v7746_v9 = vld [vmem:[#allocation3 + $0x1190] sm:$0xf]  ;;  %v8363_v48 = vld [vmem:[#allocation3 + $0x1194] sm:$0xf0]  ;;  %v7555_v1 = vor.u32 %v8315_v10, %v7554_v24  ;;  %v7619_v15 = vor.u32 %v8331_v34, %v7618_v36 }
 0x11f   :  { %v4318_v26 = vadd.f32 %v4317_v62, %v9185_v2  ;;  %v9240_v2 = vsel %vm541_vm9, %v572_v14, %v575_v16  ;;  %v7747_v52 = vor.u32 %v8363_v48, %v7746_v9  ;;  %v8329_v37 = vld [vmem:[#allocation3 + $0x1084] sm:$0xf0]  ;;  %v7738_v33 = vld [vmem:[#allocation3 + $0x1180] sm:$0xf]  ;;  %v9249_v53 = vsel %vm541_vm9, %v586_v60, %v589_v51  ;;  %v7814_v41 = vld [vmem:[#allocation3 + $0x74] sm:$0xf] }
 0x120   :  { %v596_v44 = vor.u32 %v595_v7, %v594_v40  ;;  %v8361_v16 = vld [vmem:[#allocation3 + $0x1184] sm:$0xf0]  ;;  %v5556_v62 = vld [vmem:[#allocation3 + $0x78] sm:$0xf0]  ;;  %v7862_v40 = vld [vmem:[#allocation3 + $0x1f4] sm:$0xf]  ;;  %v7611_v7 = vor.u32 %v8329_v37, %v7610_v19 }
 0x121   :  { %4728 = vmatpush.bf16.msra.mxu2 %v7699_v43  ;;  %4690 = vmatpush.bf16.msra.mxu0 %v7571_v56  ;;  %v4337_v55 = vadd.f32 %v4336_v28, %v4318_v26  ;;  %v9243_v43 = vsel %vm541_vm9, %v579_v50, %v582_v12  ;;  %v7683_v56 = vor.u32 %v8347_v17, %v7682_v25  ;;  %v7846_v50 = vld [vmem:[#allocation3 + $0x174] sm:$0xf]  ;;  %v5684_v12 = vld [vmem:[#allocation3 + $0x178] sm:$0xf0]  ;;  %v5676_v25 = vld [vmem:[#allocation3 + $0x168] sm:$0xf0] }
 0x122   :  { %4709 = vmatpush.bf16.msra.mxu1 %v7635_v39  ;;  %4747 = vmatpush.bf16.msra.mxu3 %v7763_v18  ;;  %v7546_v39 = vld [vmem:[#allocation3 + $0x1000] sm:$0xf]  ;;  %v8313_v18 = vld [vmem:[#allocation3 + $0x1004] sm:$0xf0]  ;;  %v9252_v23 = vsel %vm541_vm9, %v593_v63, %v596_v44  ;;  %v7830_v28 = vld [vmem:[#allocation3 + $0xf4] sm:$0xf] }
 0x123   :  { %v4355_v61 = vpop.f32.mrf.mxu2  ;;  %v4374_v8 = vpop.f32.mrf.mxu3  ;;  %4623 = vmatmul.bf16.gmra.mxu0 %v9240_v2  ;;  %v7547_v20 = vor.u32 %v8313_v18, %v7546_v39  ;;  %v5748_v26 = vld [vmem:[#allocation3 + $0x1f8] sm:$0xf0]  ;;  %v7812_v24 = vld [vmem:[#allocation3 + $0x64] sm:$0xf]  ;;  %v5548_v10 = vld [vmem:[#allocation3 + $0x68] sm:$0xf0] }
 0x124   :  { %v4356_v59 = vadd.f32 %v4355_v61, %v4337_v55  ;;  %4642 = vmatmul.bf16.gmra.mxu1 %v9243_v43  ;;  %v5751_v55 = vor.u32 %v7862_v40, %v5748_v26  ;;  %v7828_v36 = vld [vmem:[#allocation3 + $0xe4] sm:$0xf]  ;;  %v5612_v60 = vld [vmem:[#allocation3 + $0xe8] sm:$0xf0]  ;;  %v7842_v42 = vld [vmem:[#allocation3 + $0x154] sm:$0xf] }
 0x125   :  { %4729 = vmatpush.bf16.msra.mxu2 %v7691_v31  ;;  %4691 = vmatpush.bf16.msra.mxu0 %v7563_v3  ;;  %v4339_v14 = vpop.f32.mrf.mxu1  ;;  %v7739_v31 = vor.u32 %v8361_v16, %v7738_v33  ;;  %v5687_v3 = vor.u32 %v7846_v50, %v5684_v12  ;;  %v7860_v34 = vld [vmem:[#allocation3 + $0x1e4] sm:$0xf]  ;;  %v5740_v9 = vld [vmem:[#allocation3 + $0x1e8] sm:$0xf0]  ;;  %v5615_v18 = vor.u32 %v7828_v36, %v5612_v60  ;;  %v7826_v37 = vld [vmem:[#allocation3 + $0xd4] sm:$0xf] }
 0x126   :  { %4710 = vmatpush.bf16.msra.mxu1 %v7627_v27  ;;  %4748 = vmatpush.bf16.msra.mxu3 %v7755_v6  ;;  %v4320_v58 = vpop.f32.mrf.mxu0  ;;  %v9254_v0 = vadd.f32 %v4374_v8, %v4356_v59  ;;  %v5559_v27 = vor.u32 %v7814_v41, %v5556_v62  ;;  %v7844_v6 = vld [vmem:[#allocation3 + $0x164] sm:$0xf]  ;;  %v5743_v61 = vor.u32 %v7860_v34, %v5740_v9  ;;  %v5668_v8 = vld [vmem:[#allocation3 + $0x158] sm:$0xf0]  ;;  %v9812_v36 = vld [vmem:[#allocation10_spill] sm:$0xff] }
 0x127   :  { %v4321_v11 = vadd.f32 %v4320_v58, %v9199_v38  ;;  %v5620_v38 = vld [vmem:[#allocation3 + $0xf8] sm:$0xf0]  ;;  %v7858_v58 = vld [vmem:[#allocation3 + $0x1d4] sm:$0xf]  ;;  %v5671_v16 = vor.u32 %v7842_v42, %v5668_v8  ;;  %v9807_v12 = vld [vmem:[#allocation9_spill] sm:$0xff]  ;;  %v9813_v60 = vunpack.c.l.b16 %v9812_v36 }
 0x128   :  { %4661 = vmatmul.bf16.gmra.mxu2 %v9249_v53  ;;  %4680 = vmatmul.bf16.gmra.mxu3 %v9252_v23  ;;  %v5623_v17 = vor.u32 %v7830_v28, %v5620_v38  ;;  %v5604_v59 = vld [vmem:[#allocation3 + $0xd8] sm:$0xf0]  ;;  %v9810_v62 = vunpack.c.h.b16 %v9807_v12  ;;  %v9811_v28 = vld [vmem:[#allocation23_spill] sm:$0xff]  ;;  %v5660_v38 = vld [vmem:[#allocation3 + $0x148] sm:$0xf0] }
 0x129   :  { %4730 = vmatpush.bf16.msra.mxu2 %v7683_v56  ;;  %4692 = vmatpush.bf16.msra.mxu0 %v7555_v1  ;;  %v4340_v46 = vadd.f32 %v4339_v14, %v4321_v11  ;;  %v5679_v56 = vor.u32 %v7844_v6, %v5676_v25  ;;  %v5551_v1 = vor.u32 %v7812_v24, %v5548_v10  ;;  %v5732_v14 = vld [vmem:[#allocation3 + $0x1d8] sm:$0xf0]  ;;  %v9809_v11 = vld [vmem:[#allocation22_spill] sm:$0xff]  ;;  %v7856_v25 = vld [vmem:[#allocation3 + $0x1c4] sm:$0xf] }
 0x12a   :  { %4711 = vmatpush.bf16.msra.mxu1 %v7619_v15  ;;  %4749 = vmatpush.bf16.msra.mxu3 %v7747_v52  ;;  %v7810_v15 = vld [vmem:[#allocation3 + $0x54] sm:$0xf]  ;;  %v5540_v52 = vld [vmem:[#allocation3 + $0x58] sm:$0xf0]  ;;  %v5607_v40 = vor.u32 %v7826_v37, %v5604_v59  ;;  %v5735_v26 = vor.u32 %v7858_v58, %v5732_v14  ;;  %v5596_v6 = vld [vmem:[#allocation3 + $0xc8] sm:$0xf0] }
 0x12b   :  { %v4358_v48 = vpop.f32.mrf.mxu2  ;;  %v4377_v51 = vpop.f32.mrf.mxu3  ;;  %v5543_v50 = vor.u32 %v7810_v15, %v5540_v52  ;;  %v9814_v34 = vld [vmem:[#allocation25_spill] sm:$0xff]  ;;  %v5652_v42 = vld [vmem:[#allocation3 + $0x138] sm:$0xf0]  ;;  %v7806_v8 = vld [vmem:[#allocation3 + $0x34] sm:$0xf] }
 0x12c   :  { %v4359_v63 = vadd.f32 %v4358_v48, %v4340_v46  ;;  %v7808_v46 = vld [vmem:[#allocation3 + $0x44] sm:$0xf]  ;;  %v9274_v9 = vpack.c.b16 %v9814_v34, %v9813_v60  ;;  %v9815_v48 = vunpack.c.h.b16 %v9812_v36  ;;  %v5524_v15 = vld [vmem:[#allocation3 + $0x38] sm:$0xf0]  ;;  %v7822_v52 = vld [vmem:[#allocation3 + $0xb4] sm:$0xf] }
 0x12d   :  { %4731 = vmatpush.bf16.msra.mxu2 %v7675_v54  ;;  %4693 = vmatpush.bf16.msra.mxu0 %v7547_v20  ;;  %v4341_v35 = vpop.f32.mrf.mxu1  ;;  %v9269_v54 = vpack.c.b16 %v9811_v28, %v9810_v62  ;;  %v7840_v20 = vld [vmem:[#allocation3 + $0x144] sm:$0xf]  ;;  %v5716_v59 = vld [vmem:[#allocation3 + $0x1b8] sm:$0xf0]  ;;  %v5527_v14 = vor.u32 %v7806_v8, %v5524_v15  ;;  %v5516_v62 = vld [vmem:[#allocation3 + $0x28] sm:$0xf0] }
 0x12e   :  { %4712 = vmatpush.bf16.msra.mxu1 %v7611_v7  ;;  %4750 = vmatpush.bf16.msra.mxu3 %v7739_v31  ;;  %v4322_v44 = vpop.f32.mrf.mxu0  ;;  %v9259_v19 = vadd.f32 %v4377_v51, %v4359_v63  ;;  %v5532_v7 = vld [vmem:[#allocation3 + $0x48] sm:$0xf0]  ;;  %v7824_v31 = vld [vmem:[#allocation3 + $0xc4] sm:$0xf]  ;;  %v5636_v36 = vld [vmem:[#allocation3 + $0x118] sm:$0xf0] }
 0x12f   :  { %v4323_v39 = vadd.f32 %v4322_v44, %v9224_v32  ;;  %v9808_v32 = vunpack.c.l.b16 %v9807_v12  ;;  %v9816_v51 = vld [vmem:[#allocation26_spill] sm:$0xff]  ;;  %v7820_v28 = vld [vmem:[#allocation3 + $0xa4] sm:$0xf]  ;;  %v7802_v34 = vld [vmem:[#allocation3 + $0x14] sm:$0xf] }
 0x130   :  { %v9279_v63 = vpack.c.b16 %v9816_v51, %v9815_v48  ;;  %v5508_v48 = vld [vmem:[#allocation3 + $0x18] sm:$0xf0]  ;;  %v7818_v51 = vld [vmem:[#allocation3 + $0x94] sm:$0xf]  ;;  %v9821_v8 = vld [vmem:[#allocation37_spill] sm:$0xff] }
 0x131   :  { %4800 = vmatpush.bf16.msrb.mxu2 %v5687_v3  ;;  %4762 = vmatpush.bf16.msrb.mxu0 %v5559_v27  ;;  %v4342_v33 = vadd.f32 %v4341_v35, %v4323_v39  ;;  %v9264_v41 = vpack.c.b16 %v9809_v11, %v9808_v32  ;;  %v5663_v35 = vor.u32 %v7840_v20, %v5660_v38  ;;  %v7804_v11 = vld [vmem:[#allocation3 + $0x24] sm:$0xf] }
 0x132   :  { %4781 = vmatpush.bf16.msrb.mxu1 %v5623_v17  ;;  %4819 = vmatpush.bf16.msrb.mxu3 %v5751_v55  ;;  %v5724_v17 = vld [vmem:[#allocation3 + $0x1c8] sm:$0xf0] }
 0x133   :  { %v4360_v3 = vpop.f32.mrf.mxu2  ;;  %v4379_v27 = vpop.f32.mrf.mxu3  ;;  %4694 = vmatmul.bf16.vlgmr.msra.gmra.mxu0 %v9264_v41 }
 0x134   :  { %v4361_v55 = vadd.f32 %v4360_v3, %v4342_v33  ;;  %4713 = vmatmul.bf16.vlgmr.msra.gmra.mxu1 %v9269_v54  ;;  %v5588_v33 = vld [vmem:[#allocation3 + $0xb8] sm:$0xf0] }
 0x135   :  { %4801 = vmatpush.bf16.msrb.mxu2 %v5679_v56  ;;  %4763 = vmatpush.bf16.msrb.mxu0 %v5551_v1  ;;  %v4410_v10 = vpop.f32.mrf.mxu1  ;;  %v5535_v56 = vor.u32 %v7808_v46, %v5532_v7  ;;  %v7838_v1 = vld [vmem:[#allocation3 + $0x134] sm:$0xf]  ;;  %v5591_v12 = vor.u32 %v7822_v52, %v5588_v33  ;;  %v5708_v46 = vld [vmem:[#allocation3 + $0x1a8] sm:$0xf0]  ;;  %v7832_v52 = vld [vmem:[#allocation3 + $0x104] sm:$0xf]  ;;  %v5511_v33 = vor.u32 %v7802_v34, %v5508_v48 }
 0x136   :  { %4782 = vmatpush.bf16.msrb.mxu1 %v5615_v18  ;;  %4820 = vmatpush.bf16.msrb.mxu3 %v5743_v61  ;;  %v4391_v24 = vpop.f32.mrf.mxu0  ;;  %v9284_v39 = vadd.f32 %v4379_v27, %v4361_v55  ;;  %v5599_v18 = vor.u32 %v7824_v31, %v5596_v6  ;;  %v5727_v61 = vor.u32 %v7856_v25, %v5724_v17 }
 0x137   :  { %v4392_v44 = vadd.f32 %v4391_v24, %v9237_v5  ;;  %v7854_v5 = vld [vmem:[#allocation3 + $0x1b4] sm:$0xf]  ;;  %v5655_v58 = vor.u32 %v7838_v1, %v5652_v42  ;;  %v5519_v25 = vor.u32 %v7804_v11, %v5516_v62  ;;  %v9819_v42 = vld [vmem:[#allocation36_spill] sm:$0xff]  ;;  %v5564_v11 = vld [vmem:[#allocation3 + $0x88] sm:$0xf0] }
 0x138   :  { %4732 = vmatmul.bf16.vlgmr.msra.gmra.mxu2 %v9274_v9  ;;  %4751 = vmatmul.bf16.vlgmr.msra.gmra.mxu3 %v9279_v63  ;;  %v5719_v32 = vor.u32 %v7854_v5, %v5716_v59  ;;  %v5628_v5 = vld [vmem:[#allocation3 + $0x108] sm:$0xf0]  ;;  %v7800_v59 = vld [vmem:[#allocation3 + $0x4] sm:$0xf] }
 0x139   :  { %4802 = vmatpush.bf16.msrb.mxu2 %v5671_v16  ;;  %4764 = vmatpush.bf16.msrb.mxu0 %v5543_v50  ;;  %v4411_v37 = vadd.f32 %v4410_v10, %v4392_v44  ;;  %v7836_v16 = vld [vmem:[#allocation3 + $0x124] sm:$0xf]  ;;  %v5644_v50 = vld [vmem:[#allocation3 + $0x128] sm:$0xf0]  ;;  %v7834_v10 = vld [vmem:[#allocation3 + $0x114] sm:$0xf]  ;;  %v5631_v48 = vor.u32 %v7832_v52, %v5628_v5 }
 0x13a   :  { %4783 = vmatpush.bf16.msrb.mxu1 %v5607_v40  ;;  %4821 = vmatpush.bf16.msrb.mxu3 %v5735_v26  ;;  %v5580_v40 = vld [vmem:[#allocation3 + $0xa8] sm:$0xf0]  ;;  %v7852_v26 = vld [vmem:[#allocation3 + $0x1a4] sm:$0xf]  ;;  %v5647_v6 = vor.u32 %v7836_v16, %v5644_v50  ;;  %v5572_v44 = vld [vmem:[#allocation3 + $0x98] sm:$0xf0] }
 0x13b   :  { %v4429_v20 = vpop.f32.mrf.mxu2  ;;  %v4448_v38 = vpop.f32.mrf.mxu3  ;;  %v5583_v55 = vor.u32 %v7820_v28, %v5580_v40  ;;  %v5711_v24 = vor.u32 %v7852_v26, %v5708_v46  ;;  %v5575_v50 = vor.u32 %v7818_v51, %v5572_v44  ;;  %v7848_v62 = vld [vmem:[#allocation3 + $0x184] sm:$0xf]  ;;  %v9822_v40 = vld [vmem:[#allocation12_spill] sm:$0xff]  ;;  %v5804_v5 = vld [vmem:[#allocation3 + $0x268] sm:$0xf0] }
 0x13c   :  { %v4430_v7 = vadd.f32 %v4429_v20, %v4411_v37  ;;  %v5639_v37 = vor.u32 %v7834_v10, %v5636_v36  ;;  %v9823_v26 = vunpack.c.l.b16 %v9822_v40  ;;  %v9824_v46 = vld [vmem:[#allocation44_spill] sm:$0xff]  ;;  %v7878_v10 = vld [vmem:[#allocation3 + $0x274] sm:$0xf]  ;;  %v7876_v52 = vld [vmem:[#allocation3 + $0x264] sm:$0xf] }
 0x13d   :  { %4803 = vmatpush.bf16.msrb.mxu2 %v5663_v35  ;;  %4765 = vmatpush.bf16.msrb.mxu0 %v5535_v56  ;;  %v4412_v3 = vpop.f32.mrf.mxu1  ;;  %v7850_v35 = vld [vmem:[#allocation3 + $0x194] sm:$0xf]  ;;  %v5700_v56 = vld [vmem:[#allocation3 + $0x198] sm:$0xf0] }
 0x13e   :  { %4784 = vmatpush.bf16.msrb.mxu1 %v5599_v18  ;;  %4822 = vmatpush.bf16.msrb.mxu3 %v5727_v61  ;;  %v4393_v31 = vpop.f32.mrf.mxu0  ;;  %v9289_v17 = vadd.f32 %v4448_v38, %v4430_v7  ;;  %v9304_v7 = vpack.c.b16 %v9824_v46, %v9823_v26  ;;  %v5812_v36 = vld [vmem:[#allocation3 + $0x278] sm:$0xf0] }
 0x13f   :  { %v4394_v27 = vadd.f32 %v4393_v31, %v9254_v0  ;;  %v9817_v0 = vld [vmem:[#allocation11_spill] sm:$0xff]  ;;  %v9825_v31 = vunpack.c.h.b16 %v9822_v40  ;;  %v5876_v44 = vld [vmem:[#allocation3 + $0x2f8] sm:$0xf0] }
 0x140   :  { %v9818_v1 = vunpack.c.l.b16 %v9817_v0  ;;  %v9820_v61 = vunpack.c.h.b16 %v9817_v0  ;;  %v7906_v40 = vld [vmem:[#allocation3 + $0x354] sm:$0xf] }
 0x141   :  { %4804 = vmatpush.bf16.msrb.mxu2 %v5655_v58  ;;  %4766 = vmatpush.bf16.msrb.mxu0 %v5527_v14  ;;  %v4413_v60 = vadd.f32 %v4412_v3, %v4394_v27  ;;  %v5500_v58 = vld [vmem:[#allocation3 + $0x8] sm:$0xf0]  ;;  %v9826_v3 = vld [vmem:[#allocation45_spill] sm:$0xff] }
 0x142   :  { %4785 = vmatpush.bf16.msrb.mxu1 %v5591_v12  ;;  %4823 = vmatpush.bf16.msrb.mxu3 %v5719_v32  ;;  %v9294_v18 = vpack.c.b16 %v9819_v42, %v9818_v1  ;;  %v9299_v15 = vpack.c.b16 %v9821_v8, %v9820_v61  ;;  %v5703_v12 = vor.u32 %v7850_v35, %v5700_v56  ;;  %v7816_v32 = vld [vmem:[#allocation3 + $0x84] sm:$0xf]  ;;  %v7926_v35 = vld [vmem:[#allocation3 + $0x3f4] sm:$0xf]  ;;  %v6004_v56 = vld [vmem:[#allocation3 + $0x3f8] sm:$0xf0] }
 0x143   :  { %v4431_v14 = vpop.f32.mrf.mxu2  ;;  %v4450_v16 = vpop.f32.mrf.mxu3  ;;  %v9309_v27 = vpack.c.b16 %v9826_v3, %v9825_v31  ;;  %v5503_v51 = vor.u32 %v7800_v59, %v5500_v58  ;;  %v5815_v61 = vor.u32 %v7878_v10, %v5812_v36  ;;  %v7908_v8 = vld [vmem:[#allocation3 + $0x364] sm:$0xf]  ;;  %v5868_v58 = vld [vmem:[#allocation3 + $0x2e8] sm:$0xf0]  ;;  %v5924_v3 = vld [vmem:[#allocation3 + $0x358] sm:$0xf0] }
 0x144   :  { %v4432_v28 = vadd.f32 %v4431_v14, %v4413_v60  ;;  %4699 = vmatmul.bf16.gmra.mxu0 %v9294_v18  ;;  %4718 = vmatmul.bf16.gmra.mxu1 %v9299_v15  ;;  %v7894_v60 = vld [vmem:[#allocation3 + $0x2f4] sm:$0xf]  ;;  %v5932_v14 = vld [vmem:[#allocation3 + $0x368] sm:$0xf0]  ;;  %v7892_v59 = vld [vmem:[#allocation3 + $0x2e4] sm:$0xf] }
 0x145   :  { %4805 = vmatpush.bf16.msrb.mxu2 %v5647_v6  ;;  %4767 = vmatpush.bf16.msrb.mxu0 %v5519_v25  ;;  %v4415_v38 = vpop.f32.mrf.mxu1  ;;  %v5692_v6 = vld [vmem:[#allocation3 + $0x188] sm:$0xf0]  ;;  %v7910_v25 = vld [vmem:[#allocation3 + $0x374] sm:$0xf]  ;;  %v5871_v46 = vor.u32 %v7892_v59, %v5868_v58  ;;  %v5860_v36 = vld [vmem:[#allocation3 + $0x2d8] sm:$0xf0] }
 0x146   :  { %4786 = vmatpush.bf16.msrb.mxu1 %v5583_v55  ;;  %4824 = vmatpush.bf16.msrb.mxu3 %v5711_v24  ;;  %v4396_v20 = vpop.f32.mrf.mxu0  ;;  %v5940_v55 = vld [vmem:[#allocation3 + $0x378] sm:$0xf0]  ;;  %v9314_v34 = vadd.f32 %v4450_v16, %v4432_v28  ;;  %v5695_v1 = vor.u32 %v7848_v62, %v5692_v6  ;;  %v7924_v16 = vld [vmem:[#allocation3 + $0x3e4] sm:$0xf]  ;;  %v7874_v6 = vld [vmem:[#allocation3 + $0x254] sm:$0xf] }
 0x147   :  { %v4397_v24 = vadd.f32 %v4396_v20, %v9259_v19  ;;  %v5567_v19 = vor.u32 %v7816_v32, %v5564_v11  ;;  %v5943_v42 = vor.u32 %v7910_v25, %v5940_v55  ;;  %v5935_v20 = vor.u32 %v7908_v8, %v5932_v14  ;;  %v5796_v25 = vld [vmem:[#allocation3 + $0x258] sm:$0xf0]  ;;  %v5852_v14 = vld [vmem:[#allocation3 + $0x2c8] sm:$0xf0] }
 0x148   :  { %4737 = vmatmul.bf16.gmra.mxu2 %v9304_v7  ;;  %4756 = vmatmul.bf16.gmra.mxu3 %v9309_v27 }
 0x149   :  { %4806 = vmatpush.bf16.msrb.mxu2 %v5639_v37  ;;  %4768 = vmatpush.bf16.msrb.mxu0 %v5511_v33  ;;  %v4416_v0 = vadd.f32 %v4415_v38, %v4397_v24  ;;  %v5879_v37 = vor.u32 %v7894_v60, %v5876_v44  ;;  %v6007_v33 = vor.u32 %v7926_v35, %v6004_v56  ;;  %v7890_v24 = vld [vmem:[#allocation3 + $0x2d4] sm:$0xf]  ;;  %v5916_v35 = vld [vmem:[#allocation3 + $0x348] sm:$0xf0] }
 0x14a   :  { %4787 = vmatpush.bf16.msrb.mxu1 %v5575_v50  ;;  %4825 = vmatpush.bf16.msrb.mxu3 %v5703_v12  ;;  %v5996_v50 = vld [vmem:[#allocation3 + $0x3e8] sm:$0xf0]  ;;  %v5807_v38 = vor.u32 %v7876_v52, %v5804_v5  ;;  %v7922_v60 = vld [vmem:[#allocation3 + $0x3d4] sm:$0xf]  ;;  %v5799_v44 = vor.u32 %v7874_v6, %v5796_v25  ;;  %v5863_v56 = vor.u32 %v7890_v24, %v5860_v36 }
 0x14b   :  { %v4434_v12 = vpop.f32.mrf.mxu2  ;;  %v4453_v32 = vpop.f32.mrf.mxu3  ;;  %v5999_v31 = vor.u32 %v7924_v16, %v5996_v50  ;;  %v5900_v6 = vld [vmem:[#allocation3 + $0x328] sm:$0xf0] }
 0x14c   :  { %v4435_v11 = vadd.f32 %v4434_v12, %v4416_v0  ;;  %v7902_v12 = vld [vmem:[#allocation3 + $0x334] sm:$0xf]  ;;  %v5772_v36 = vld [vmem:[#allocation3 + $0x228] sm:$0xf0] }
 0x14d   :  { %4807 = vmatpush.bf16.msrb.mxu2 %v5631_v48  ;;  %4769 = vmatpush.bf16.msrb.mxu0 %v5503_v51  ;;  %v4417_v28 = vpop.f32.mrf.mxu1  ;;  %v5988_v48 = vld [vmem:[#allocation3 + $0x3d8] sm:$0xf0]  ;;  %v5927_v51 = vor.u32 %v7906_v40, %v5924_v3  ;;  %v7886_v40 = vld [vmem:[#allocation3 + $0x2b4] sm:$0xf]  ;;  %v7900_v3 = vld [vmem:[#allocation3 + $0x324] sm:$0xf] }
 0x14e   :  { %4788 = vmatpush.bf16.msrb.mxu1 %v5567_v19  ;;  %4826 = vmatpush.bf16.msrb.mxu3 %v5695_v1  ;;  %v4398_v62 = vpop.f32.mrf.mxu0  ;;  %v9319_v55 = vadd.f32 %v4453_v32, %v4435_v11  ;;  %v5991_v0 = vor.u32 %v7922_v60, %v5988_v48  ;;  %v7872_v19 = vld [vmem:[#allocation3 + $0x244] sm:$0xf]  ;;  %v5788_v1 = vld [vmem:[#allocation3 + $0x248] sm:$0xf0]  ;;  %v5908_v32 = vld [vmem:[#allocation3 + $0x338] sm:$0xf0] }
 0x14f   :  { %v4399_v26 = vadd.f32 %v4398_v62, %v9284_v39  ;;  %v7904_v39 = vld [vmem:[#allocation3 + $0x344] sm:$0xf]  ;;  %v5791_v50 = vor.u32 %v7872_v19, %v5788_v1  ;;  %v5903_v19 = vor.u32 %v7900_v3, %v5900_v6 }
 0x150   :  { %v5919_v16 = vor.u32 %v7904_v39, %v5916_v35  ;;  %v7884_v60 = vld [vmem:[#allocation3 + $0x2a4] sm:$0xf] }
 0x151   :  { %4876 = vmatpush.bf16.msra.mxu2 %v5943_v42  ;;  %4838 = vmatpush.bf16.msra.mxu0 %v5815_v61  ;;  %v4418_v10 = vadd.f32 %v4417_v28, %v4399_v26  ;;  %v7888_v42 = vld [vmem:[#allocation3 + $0x2c4] sm:$0xf] }
 0x152   :  { %4857 = vmatpush.bf16.msra.mxu1 %v5879_v37  ;;  %4895 = vmatpush.bf16.msra.mxu3 %v6007_v33  ;;  %v7920_v37 = vld [vmem:[#allocation3 + $0x3c4] sm:$0xf]  ;;  %v5980_v33 = vld [vmem:[#allocation3 + $0x3c8] sm:$0xf0]  ;;  %v5855_v62 = vor.u32 %v7888_v42, %v5852_v14  ;;  %v7898_v14 = vld [vmem:[#allocation3 + $0x314] sm:$0xf] }
 0x153   :  { %v4436_v61 = vpop.f32.mrf.mxu2  ;;  %v4455_v8 = vpop.f32.mrf.mxu3  ;;  %v5983_v28 = vor.u32 %v7920_v37, %v5980_v33  ;;  %v7916_v39 = vld [vmem:[#allocation3 + $0x3a4] sm:$0xf]  ;;  %v5892_v37 = vld [vmem:[#allocation3 + $0x318] sm:$0xf0] }
 0x154   :  { %v4437_v52 = vadd.f32 %v4436_v61, %v4418_v10  ;;  %4770 = vmatmul.bf16.vlgmr.msrb.gmra.mxu0 %v8534_v21  ;;  %4789 = vmatmul.bf16.vlgmr.msrb.gmra.mxu1 %v8538_v22  ;;  %v5911_v21 = vor.u32 %v7902_v12, %v5908_v32  ;;  %v7868_v10 = vld [vmem:[#allocation3 + $0x224] sm:$0xf]  ;;  %v5895_v12 = vor.u32 %v7898_v14, %v5892_v37  ;;  %v6188_v14 = vld [vmem:[#allocation3 + $0x568] sm:$0xf0] }
 0x155   :  { %4877 = vmatpush.bf16.msra.mxu2 %v5935_v20  ;;  %4839 = vmatpush.bf16.msra.mxu0 %v5807_v38  ;;  %v4486_v59 = vpop.f32.mrf.mxu1  ;;  %v7870_v20 = vld [vmem:[#allocation3 + $0x234] sm:$0xf]  ;;  %v5780_v38 = vld [vmem:[#allocation3 + $0x238] sm:$0xf0]  ;;  %v5775_v1 = vor.u32 %v7868_v10, %v5772_v36 }
 0x156   :  { %4858 = vmatpush.bf16.msra.mxu1 %v5871_v46  ;;  %4896 = vmatpush.bf16.msra.mxu3 %v5999_v31  ;;  %v4467_v5 = vpop.f32.mrf.mxu0  ;;  %v9324_v11 = vadd.f32 %v4455_v8, %v4437_v52  ;;  %v5844_v46 = vld [vmem:[#allocation3 + $0x2b8] sm:$0xf0]  ;;  %v5783_v22 = vor.u32 %v7870_v20, %v5780_v38  ;;  %v7866_v52 = vld [vmem:[#allocation3 + $0x214] sm:$0xf]  ;;  %v5756_v20 = vld [vmem:[#allocation3 + $0x208] sm:$0xf0] }
 0x157   :  { %v4468_v58 = vadd.f32 %v4467_v5, %v9289_v17  ;;  %v7918_v17 = vld [vmem:[#allocation3 + $0x3b4] sm:$0xf]  ;;  %v5972_v31 = vld [vmem:[#allocation3 + $0x3b8] sm:$0xf0]  ;;  %v5847_v25 = vor.u32 %v7886_v40, %v5844_v46 }
 0x158   :  { %4808 = vmatmul.bf16.vlgmr.msrb.gmra.mxu2 %v8542_v29  ;;  %4827 = vmatmul.bf16.vlgmr.msrb.gmra.mxu3 %v8546_v30  ;;  %v5975_v24 = vor.u32 %v7918_v17, %v5972_v31  ;;  %v5964_v29 = vld [vmem:[#allocation3 + $0x3a8] sm:$0xf0]  ;;  %v5764_v5 = vld [vmem:[#allocation3 + $0x218] sm:$0xf0]  ;;  %v7880_v17 = vld [vmem:[#allocation3 + $0x284] sm:$0xf] }
 0x159   :  { %4878 = vmatpush.bf16.msra.mxu2 %v5927_v51  ;;  %4840 = vmatpush.bf16.msra.mxu0 %v5799_v44  ;;  %v4487_v26 = vadd.f32 %v4486_v59, %v4468_v58  ;;  %v5836_v44 = vld [vmem:[#allocation3 + $0x2a8] sm:$0xf0]  ;;  %v5967_v8 = vor.u32 %v7916_v39, %v5964_v29  ;;  %v7882_v59 = vld [vmem:[#allocation3 + $0x294] sm:$0xf]  ;;  %v5828_v58 = vld [vmem:[#allocation3 + $0x298] sm:$0xf0]  ;;  %v5767_v32 = vor.u32 %v7866_v52, %v5764_v5 }
 0x15a   :  { %4859 = vmatpush.bf16.msra.mxu1 %v5863_v56  ;;  %4897 = vmatpush.bf16.msra.mxu3 %v5991_v0  ;;  %v5839_v61 = vor.u32 %v7884_v60, %v5836_v44  ;;  %v5820_v31 = vld [vmem:[#allocation3 + $0x288] sm:$0xf0]  ;;  %v6196_v10 = vld [vmem:[#allocation3 + $0x578] sm:$0xf0]  ;;  %v7942_v60 = vld [vmem:[#allocation3 + $0x474] sm:$0xf] }
 0x15b   :  { %v4505_v48 = vpop.f32.mrf.mxu2  ;;  %v4524_v51 = vpop.f32.mrf.mxu3  ;;  %v7940_v52 = vld [vmem:[#allocation3 + $0x464] sm:$0xf]  ;;  %v6060_v5 = vld [vmem:[#allocation3 + $0x468] sm:$0xf0] }
 0x15c   :  { %v4506_v35 = vadd.f32 %v4505_v48, %v4487_v26  ;;  %v5831_v26 = vor.u32 %v7882_v59, %v5828_v58  ;;  %v6068_v48 = vld [vmem:[#allocation3 + $0x478] sm:$0xf0]  ;;  %v7956_v59 = vld [vmem:[#allocation3 + $0x4e4] sm:$0xf]  ;;  %v6124_v58 = vld [vmem:[#allocation3 + $0x4e8] sm:$0xf0] }
 0x15d   :  { %4879 = vmatpush.bf16.msra.mxu2 %v5919_v16  ;;  %4841 = vmatpush.bf16.msra.mxu0 %v5791_v50  ;;  %v4488_v56 = vpop.f32.mrf.mxu1  ;;  %v7914_v16 = vld [vmem:[#allocation3 + $0x394] sm:$0xf]  ;;  %v5956_v50 = vld [vmem:[#allocation3 + $0x398] sm:$0xf0] }
 0x15e   :  { %4860 = vmatpush.bf16.msra.mxu1 %v5855_v62  ;;  %4898 = vmatpush.bf16.msra.mxu3 %v5983_v28  ;;  %v4469_v30 = vpop.f32.mrf.mxu0  ;;  %v9329_v42 = vadd.f32 %v4524_v51, %v4506_v35  ;;  %v5884_v62 = vld [vmem:[#allocation3 + $0x308] sm:$0xf0]  ;;  %v7864_v28 = vld [vmem:[#allocation3 + $0x204] sm:$0xf]  ;;  %v5959_v46 = vor.u32 %v7914_v16, %v5956_v50  ;;  %v7958_v51 = vld [vmem:[#allocation3 + $0x4f4] sm:$0xf] }
 0x15f   :  { %v4470_v0 = vadd.f32 %v4469_v30, %v9314_v34  ;;  %v7896_v34 = vld [vmem:[#allocation3 + $0x304] sm:$0xf]  ;;  %v5759_v29 = vor.u32 %v7864_v28, %v5756_v20  ;;  %v6132_v35 = vld [vmem:[#allocation3 + $0x4f8] sm:$0xf0]  ;;  %v7990_v30 = vld [vmem:[#allocation3 + $0x5f4] sm:$0xf] }
 0x160   :  { %v5887_v39 = vor.u32 %v7896_v34, %v5884_v62  ;;  %v6135_v37 = vor.u32 %v7958_v51, %v6132_v35  ;;  %v7988_v16 = vld [vmem:[#allocation3 + $0x5e4] sm:$0xf]  ;;  %v6252_v50 = vld [vmem:[#allocation3 + $0x5e8] sm:$0xf0] }
 0x161   :  { %4880 = vmatpush.bf16.msra.mxu2 %v5911_v21  ;;  %4842 = vmatpush.bf16.msra.mxu0 %v5783_v22  ;;  %v4489_v33 = vadd.f32 %v4488_v56, %v4470_v0  ;;  %v7912_v21 = vld [vmem:[#allocation3 + $0x384] sm:$0xf]  ;;  %v6260_v56 = vld [vmem:[#allocation3 + $0x5f8] sm:$0xf0]  ;;  %v6172_v51 = vld [vmem:[#allocation3 + $0x548] sm:$0xf0] }
 0x162   :  { %4861 = vmatpush.bf16.msra.mxu1 %v5847_v25  ;;  %4899 = vmatpush.bf16.msra.mxu3 %v5975_v24  ;;  %v5948_v25 = vld [vmem:[#allocation3 + $0x388] sm:$0xf0]  ;;  %v7974_v24 = vld [vmem:[#allocation3 + $0x574] sm:$0xf]  ;;  %v7936_v35 = vld [vmem:[#allocation3 + $0x444] sm:$0xf] }
 0x163   :  { %v4507_v38 = vpop.f32.mrf.mxu2  ;;  %v4526_v40 = vpop.f32.mrf.mxu3 }
 0x164   :  { %v4508_v22 = vadd.f32 %v4507_v38, %v4489_v33  ;;  %4775 = vmatmul.bf16.gmra.mxu0 %v8578_v45  ;;  %4794 = vmatmul.bf16.gmra.mxu1 %v8582_v47  ;;  %v9827_v45 = vld [vmem:[#allocation14_spill] sm:$0xff]  ;;  %v9828_v47 = vld [vmem:[#allocation15_spill] sm:$0xff]  ;;  %v6263_v33 = vor.u32 %v7990_v30, %v6260_v56  ;;  %v6063_v38 = vor.u32 %v7940_v52, %v6060_v5  ;;  %v7952_v56 = vld [vmem:[#allocation3 + $0x4c4] sm:$0xf] }
 0x165   :  { %4881 = vmatpush.bf16.msra.mxu2 %v5903_v19  ;;  %4843 = vmatpush.bf16.msra.mxu0 %v5775_v1  ;;  %v4491_v6 = vpop.f32.mrf.mxu1  ;;  %v5951_v19 = vor.u32 %v7912_v21, %v5948_v25  ;;  %v6199_v1 = vor.u32 %v7974_v24, %v6196_v10  ;;  %v7938_v21 = vld [vmem:[#allocation3 + $0x454] sm:$0xf]  ;;  %v6116_v24 = vld [vmem:[#allocation3 + $0x4d8] sm:$0xf0]  ;;  %v6044_v30 = vld [vmem:[#allocation3 + $0x448] sm:$0xf0] }
 0x166   :  { %4862 = vmatpush.bf16.msra.mxu1 %v5839_v61  ;;  %4900 = vmatpush.bf16.msra.mxu3 %v5967_v8  ;;  %v4472_v3 = vpop.f32.mrf.mxu0  ;;  %v9334_v44 = vadd.f32 %v4526_v40, %v4508_v22  ;;  %v6071_v61 = vor.u32 %v7942_v60, %v6068_v48  ;;  %v7972_v8 = vld [vmem:[#allocation3 + $0x564] sm:$0xf]  ;;  %v7970_v40 = vld [vmem:[#allocation3 + $0x554] sm:$0xf]  ;;  %v6052_v22 = vld [vmem:[#allocation3 + $0x458] sm:$0xf0]  ;;  %v6047_v5 = vor.u32 %v7936_v35, %v6044_v30 }
 0x167   :  { %v4473_v36 = vadd.f32 %v4472_v3, %v9319_v55  ;;  %v5823_v55 = vor.u32 %v7880_v17, %v5820_v31  ;;  %v6191_v20 = vor.u32 %v7972_v8, %v6188_v14  ;;  %v6255_v17 = vor.u32 %v7988_v16, %v6252_v50  ;;  %v6180_v31 = vld [vmem:[#allocation3 + $0x558] sm:$0xf0]  ;;  %v7986_v10 = vld [vmem:[#allocation3 + $0x5d4] sm:$0xf] }
 0x168   :  { %4813 = vmatmul.bf16.gmra.mxu2 %v9827_v45  ;;  %4832 = vmatmul.bf16.gmra.mxu3 %v9828_v47  ;;  %v6183_v60 = vor.u32 %v7970_v40, %v6180_v31  ;;  %v6055_v48 = vor.u32 %v7938_v21, %v6052_v22  ;;  %v7984_v45 = vld [vmem:[#allocation3 + $0x5c4] sm:$0xf]  ;;  %v6236_v47 = vld [vmem:[#allocation3 + $0x5c8] sm:$0xf0] }
 0x169   :  { %4882 = vmatpush.bf16.msra.mxu2 %v5895_v12  ;;  %4844 = vmatpush.bf16.msra.mxu0 %v5767_v32  ;;  %v4492_v0 = vadd.f32 %v4491_v6, %v4473_v36  ;;  %v7954_v6 = vld [vmem:[#allocation3 + $0x4d4] sm:$0xf]  ;;  %v6244_v36 = vld [vmem:[#allocation3 + $0x5d8] sm:$0xf0]  ;;  %v9831_v40 = vld [vmem:[#allocation33_spill] sm:$0xff] }
 0x16a   :  { %4863 = vmatpush.bf16.msra.mxu1 %v5831_v26  ;;  %4901 = vmatpush.bf16.msra.mxu3 %v5959_v46  ;;  %v6127_v46 = vor.u32 %v7956_v59, %v6124_v58  ;;  %v7966_v59 = vld [vmem:[#allocation3 + $0x534] sm:$0xf]  ;;  %v6164_v58 = vld [vmem:[#allocation3 + $0x538] sm:$0xf0]  ;;  %v7964_v31 = vld [vmem:[#allocation3 + $0x524] sm:$0xf] }
 0x16b   :  { %v4510_v34 = vpop.f32.mrf.mxu2  ;;  %v4529_v12 = vpop.f32.mrf.mxu3  ;;  %v6156_v21 = vld [vmem:[#allocation3 + $0x528] sm:$0xf0] }
 0x16c   :  { %v4511_v32 = vadd.f32 %v4510_v34, %v4492_v0  ;;  %v6239_v34 = vor.u32 %v7984_v45, %v6236_v47  ;;  %v7962_v47 = vld [vmem:[#allocation3 + $0x514] sm:$0xf] }
 0x16d   :  { %4883 = vmatpush.bf16.msra.mxu2 %v5887_v39  ;;  %4845 = vmatpush.bf16.msra.mxu0 %v5759_v29  ;;  %v4493_v28 = vpop.f32.mrf.mxu1  ;;  %v6119_v39 = vor.u32 %v7954_v6, %v6116_v24  ;;  %v6247_v29 = vor.u32 %v7986_v10, %v6244_v36  ;;  %v6028_v24 = vld [vmem:[#allocation3 + $0x428] sm:$0xf0]  ;;  %v7948_v10 = vld [vmem:[#allocation3 + $0x4a4] sm:$0xf] }
 0x16e   :  { %4864 = vmatpush.bf16.msra.mxu1 %v5823_v55  ;;  %4902 = vmatpush.bf16.msra.mxu3 %v5951_v19  ;;  %v4474_v62 = vpop.f32.mrf.mxu0  ;;  %v9339_v3 = vadd.f32 %v4529_v12, %v4511_v32  ;;  %v6108_v19 = vld [vmem:[#allocation3 + $0x4c8] sm:$0xf0]  ;;  %v7934_v12 = vld [vmem:[#allocation3 + $0x434] sm:$0xf]  ;;  %v6036_v32 = vld [vmem:[#allocation3 + $0x438] sm:$0xf0] }
 0x16f   :  { %v4475_v26 = vadd.f32 %v4474_v62, %v9324_v11  ;;  %v7968_v11 = vld [vmem:[#allocation3 + $0x544] sm:$0xf]  ;;  %v6111_v50 = vor.u32 %v7952_v56, %v6108_v19  ;;  %v7950_v62 = vld [vmem:[#allocation3 + $0x4b4] sm:$0xf]  ;;  %v6159_v56 = vor.u32 %v7964_v31, %v6156_v21  ;;  %v6204_v31 = vld [vmem:[#allocation3 + $0x588] sm:$0xf0] }
 0x170   :  { %v6175_v52 = vor.u32 %v7968_v11, %v6172_v51  ;;  %v7980_v11 = vld [vmem:[#allocation3 + $0x5a4] sm:$0xf]  ;;  %v6220_v51 = vld [vmem:[#allocation3 + $0x5a8] sm:$0xf0]  ;;  %v8038_v21 = vld [vmem:[#allocation3 + $0x774] sm:$0xf] }
 0x171   :  { %4952 = vmatpush.bf16.msrb.mxu2 %v6199_v1  ;;  %4914 = vmatpush.bf16.msrb.mxu0 %v6071_v61  ;;  %v4494_v25 = vadd.f32 %v4493_v28, %v4475_v26  ;;  %v9832_v26 = vld [vmem:[#allocation34_spill] sm:$0xff]  ;;  %v6223_v45 = vor.u32 %v7980_v11, %v6220_v51 }
 0x172   :  { %4933 = vmatpush.bf16.msrb.mxu1 %v6135_v37  ;;  %4971 = vmatpush.bf16.msrb.mxu3 %v6263_v33  ;;  %v9829_v37 = vld [vmem:[#allocation31_spill] sm:$0xff]  ;;  %v9830_v33 = vld [vmem:[#allocation32_spill] sm:$0xff] }
 0x173   :  { %v4512_v0 = vpop.f32.mrf.mxu2  ;;  %v4531_v55 = vpop.f32.mrf.mxu3 }
 0x174   :  { %v4513_v1 = vadd.f32 %v4512_v0, %v4494_v25  ;;  %4846 = vmatmul.bf16.vlgmr.msra.gmra.mxu0 %v9829_v37  ;;  %4865 = vmatmul.bf16.vlgmr.msra.gmra.mxu1 %v9830_v33  ;;  %v7932_v25 = vld [vmem:[#allocation3 + $0x424] sm:$0xf]  ;;  %v7946_v37 = vld [vmem:[#allocation3 + $0x494] sm:$0xf]  ;;  %v6084_v33 = vld [vmem:[#allocation3 + $0x498] sm:$0xf0] }
 0x175   :  { %4953 = vmatpush.bf16.msrb.mxu2 %v6191_v20  ;;  %4915 = vmatpush.bf16.msrb.mxu0 %v6063_v38  ;;  %v4562_v8 = vpop.f32.mrf.mxu1  ;;  %v6100_v20 = vld [vmem:[#allocation3 + $0x4b8] sm:$0xf0]  ;;  %v6031_v0 = vor.u32 %v7932_v25, %v6028_v24  ;;  %v9834_v24 = vld [vmem:[#allocation49_spill] sm:$0xff] }
 0x176   :  { %4934 = vmatpush.bf16.msrb.mxu1 %v6127_v46  ;;  %4972 = vmatpush.bf16.msrb.mxu3 %v6255_v17  ;;  %v4543_v61 = vpop.f32.mrf.mxu0  ;;  %v9344_v16 = vadd.f32 %v4531_v55, %v4513_v1  ;;  %v6228_v38 = vld [vmem:[#allocation3 + $0x5b8] sm:$0xf0]  ;;  %v6167_v46 = vor.u32 %v7966_v59, %v6164_v58  ;;  %v6039_v17 = vor.u32 %v7934_v12, %v6036_v32  ;;  %v6012_v12 = vld [vmem:[#allocation3 + $0x408] sm:$0xf0] }
 0x177   :  { %v4544_v14 = vadd.f32 %v4543_v61, %v9329_v42  ;;  %v7982_v42 = vld [vmem:[#allocation3 + $0x5b4] sm:$0xf]  ;;  %v6103_v22 = vor.u32 %v7950_v62, %v6100_v20  ;;  %v6148_v1 = vld [vmem:[#allocation3 + $0x518] sm:$0xf0] }
 0x178   :  { %4884 = vmatmul.bf16.vlgmr.msra.gmra.mxu2 %v9831_v40  ;;  %4903 = vmatmul.bf16.vlgmr.msra.gmra.mxu3 %v9832_v26  ;;  %v6231_v6 = vor.u32 %v7982_v42, %v6228_v38  ;;  %v6151_v59 = vor.u32 %v7962_v47, %v6148_v1  ;;  %v7944_v42 = vld [vmem:[#allocation3 + $0x484] sm:$0xf]  ;;  %v6076_v38 = vld [vmem:[#allocation3 + $0x488] sm:$0xf0]  ;;  %v9833_v25 = vld [vmem:[#allocation48_spill] sm:$0xff] }
 0x179   :  { %4954 = vmatpush.bf16.msrb.mxu2 %v6183_v60  ;;  %4916 = vmatpush.bf16.msrb.mxu0 %v6055_v48  ;;  %v4563_v28 = vadd.f32 %v4562_v8, %v4544_v14  ;;  %v6092_v48 = vld [vmem:[#allocation3 + $0x4a8] sm:$0xf0]  ;;  %v7930_v8 = vld [vmem:[#allocation3 + $0x414] sm:$0xf]  ;;  %v6020_v14 = vld [vmem:[#allocation3 + $0x418] sm:$0xf0] }
 0x17a   :  { %4935 = vmatpush.bf16.msrb.mxu1 %v6119_v39  ;;  %4973 = vmatpush.bf16.msrb.mxu3 %v6247_v29  ;;  %v6095_v19 = vor.u32 %v7948_v10, %v6092_v48  ;;  %v6023_v58 = vor.u32 %v7930_v8, %v6020_v14  ;;  %v7976_v40 = vld [vmem:[#allocation3 + $0x584] sm:$0xf]  ;;  %v8006_v10 = vld [vmem:[#allocation3 + $0x674] sm:$0xf] }
 0x17b   :  { %v4581_v36 = vpop.f32.mrf.mxu2  ;;  %v4600_v60 = vpop.f32.mrf.mxu3  ;;  %v8036_v1 = vld [vmem:[#allocation3 + $0x764] sm:$0xf] }
 0x17c   :  { %v4582_v39 = vadd.f32 %v4581_v36, %v4563_v28  ;;  %v6087_v28 = vor.u32 %v7946_v37, %v6084_v33  ;;  %v6324_v36 = vld [vmem:[#allocation3 + $0x678] sm:$0xf0]  ;;  %v8004_v37 = vld [vmem:[#allocation3 + $0x664] sm:$0xf]  ;;  %v6316_v33 = vld [vmem:[#allocation3 + $0x668] sm:$0xf0] }
 0x17d   :  { %4955 = vmatpush.bf16.msrb.mxu2 %v6175_v52  ;;  %4917 = vmatpush.bf16.msrb.mxu0 %v6047_v5  ;;  %v4564_v35 = vpop.f32.mrf.mxu1  ;;  %v7978_v52 = vld [vmem:[#allocation3 + $0x594] sm:$0xf]  ;;  %v6212_v5 = vld [vmem:[#allocation3 + $0x598] sm:$0xf0]  ;;  %v6327_v47 = vor.u32 %v8006_v10, %v6324_v36 }
 0x17e   :  { %4936 = vmatpush.bf16.msrb.mxu1 %v6111_v50  ;;  %4974 = vmatpush.bf16.msrb.mxu3 %v6239_v34  ;;  %v4545_v29 = vpop.f32.mrf.mxu0  ;;  %v9349_v55 = vadd.f32 %v4600_v60, %v4582_v39  ;;  %v6140_v50 = vld [vmem:[#allocation3 + $0x508] sm:$0xf0]  ;;  %v7928_v34 = vld [vmem:[#allocation3 + $0x404] sm:$0xf]  ;;  %v6215_v20 = vor.u32 %v7978_v52, %v6212_v5  ;;  %v8022_v60 = vld [vmem:[#allocation3 + $0x6f4] sm:$0xf] }
 0x17f   :  { %v4546_v30 = vadd.f32 %v4545_v29, %v9334_v44  ;;  %v7960_v44 = vld [vmem:[#allocation3 + $0x504] sm:$0xf]  ;;  %v6015_v51 = vor.u32 %v7928_v34, %v6012_v12  ;;  %v6388_v39 = vld [vmem:[#allocation3 + $0x6f8] sm:$0xf0]  ;;  %v8054_v29 = vld [vmem:[#allocation3 + $0x7f4] sm:$0xf] }
 0x180   :  { %v6143_v11 = vor.u32 %v7960_v44, %v6140_v50  ;;  %v6391_v8 = vor.u32 %v8022_v60, %v6388_v39  ;;  %v8020_v52 = vld [vmem:[#allocation3 + $0x6e4] sm:$0xf]  ;;  %v6380_v5 = vld [vmem:[#allocation3 + $0x6e8] sm:$0xf0] }
 0x181   :  { %4956 = vmatpush.bf16.msrb.mxu2 %v6167_v46  ;;  %4918 = vmatpush.bf16.msrb.mxu0 %v6039_v17  ;;  %v4565_v61 = vadd.f32 %v4564_v35, %v4546_v30  ;;  %v6516_v35 = vld [vmem:[#allocation3 + $0x7f8] sm:$0xf0]  ;;  %v8052_v44 = vld [vmem:[#allocation3 + $0x7e4] sm:$0xf]  ;;  %v6428_v60 = vld [vmem:[#allocation3 + $0x748] sm:$0xf0] }
 0x182   :  { %4937 = vmatpush.bf16.msrb.mxu1 %v6103_v22  ;;  %4975 = vmatpush.bf16.msrb.mxu3 %v6231_v6  ;;  %v6452_v22 = vld [vmem:[#allocation3 + $0x778] sm:$0xf0]  ;;  %v6519_v14 = vor.u32 %v8054_v29, %v6516_v35  ;;  %v8000_v39 = vld [vmem:[#allocation3 + $0x644] sm:$0xf]  ;;  %v6300_v29 = vld [vmem:[#allocation3 + $0x648] sm:$0xf0] }
 0x183   :  { %v4583_v32 = vpop.f32.mrf.mxu2  ;;  %v4602_v62 = vpop.f32.mrf.mxu3  ;;  %v8016_v35 = vld [vmem:[#allocation3 + $0x6c4] sm:$0xf] }
 0x184   :  { %v4584_v26 = vadd.f32 %v4583_v32, %v4565_v61  ;;  %4851 = vmatmul.bf16.gmra.mxu0 %v9833_v25  ;;  %4870 = vmatmul.bf16.gmra.mxu1 %v9834_v24  ;;  %v6444_v61 = vld [vmem:[#allocation3 + $0x768] sm:$0xf0]  ;;  %v8050_v25 = vld [vmem:[#allocation3 + $0x7d4] sm:$0xf]  ;;  %v6500_v24 = vld [vmem:[#allocation3 + $0x7d8] sm:$0xf0] }
 0x185   :  { %4957 = vmatpush.bf16.msrb.mxu2 %v6159_v56  ;;  %4919 = vmatpush.bf16.msrb.mxu0 %v6031_v0  ;;  %v4567_v17 = vpop.f32.mrf.mxu1  ;;  %v6207_v56 = vor.u32 %v7976_v40, %v6204_v31  ;;  %v9835_v0 = vld [vmem:[#allocation52_spill] sm:$0xff] }
 0x186   :  { %4938 = vmatpush.bf16.msrb.mxu1 %v6095_v19  ;;  %4976 = vmatpush.bf16.msrb.mxu3 %v6223_v45  ;;  %v4548_v46 = vpop.f32.mrf.mxu0  ;;  %v9354_v48 = vadd.f32 %v4602_v62, %v4584_v26  ;;  %v9836_v19 = vld [vmem:[#allocation53_spill] sm:$0xff]  ;;  %v6455_v45 = vor.u32 %v8038_v21, %v6452_v22  ;;  %v6447_v62 = vor.u32 %v8036_v1, %v6444_v61  ;;  %v6436_v26 = vld [vmem:[#allocation3 + $0x758] sm:$0xf0]  ;;  %v8018_v21 = vld [vmem:[#allocation3 + $0x6d4] sm:$0xf] }
 0x187   :  { %v4549_v6 = vadd.f32 %v4548_v46, %v9339_v3  ;;  %v6079_v3 = vor.u32 %v7944_v42, %v6076_v38  ;;  %v6383_v38 = vor.u32 %v8020_v52, %v6380_v5  ;;  %v8002_v46 = vld [vmem:[#allocation3 + $0x654] sm:$0xf]  ;;  %v6420_v5 = vld [vmem:[#allocation3 + $0x738] sm:$0xf0] }
 0x188   :  { %4889 = vmatmul.bf16.gmra.mxu2 %v9835_v0  ;;  %4908 = vmatmul.bf16.gmra.mxu3 %v9836_v19  ;;  %v8048_v0 = vld [vmem:[#allocation3 + $0x7c4] sm:$0xf]  ;;  %v6492_v19 = vld [vmem:[#allocation3 + $0x7c8] sm:$0xf0]  ;;  %v8030_v52 = vld [vmem:[#allocation3 + $0x734] sm:$0xf] }
 0x189   :  { %4958 = vmatpush.bf16.msrb.mxu2 %v6151_v59  ;;  %4920 = vmatpush.bf16.msrb.mxu0 %v6023_v58  ;;  %v4568_v30 = vadd.f32 %v4567_v17, %v4549_v6  ;;  %v6508_v59 = vld [vmem:[#allocation3 + $0x7e8] sm:$0xf0]  ;;  %v6308_v17 = vld [vmem:[#allocation3 + $0x658] sm:$0xf0] }
 0x18a   :  { %4939 = vmatpush.bf16.msrb.mxu1 %v6087_v28  ;;  %4977 = vmatpush.bf16.msrb.mxu3 %v6215_v20  ;;  %v6319_v28 = vor.u32 %v8004_v37, %v6316_v33  ;;  %v8034_v20 = vld [vmem:[#allocation3 + $0x754] sm:$0xf]  ;;  %v6511_v40 = vor.u32 %v8052_v44, %v6508_v59  ;;  %v6372_v6 = vld [vmem:[#allocation3 + $0x6d8] sm:$0xf0]  ;;  %v6311_v36 = vor.u32 %v8002_v46, %v6308_v17  ;;  %v6412_v46 = vld [vmem:[#allocation3 + $0x728] sm:$0xf0] }
 0x18b   :  { %v4586_v58 = vpop.f32.mrf.mxu2  ;;  %v4605_v50 = vpop.f32.mrf.mxu3  ;;  %v6439_v10 = vor.u32 %v8034_v20, %v6436_v26  ;;  %v6303_v33 = vor.u32 %v8000_v39, %v6300_v29  ;;  %v9839_v20 = vld [vmem:[#allocation56_spill] sm:$0xff]  ;;  %v8028_v26 = vld [vmem:[#allocation3 + $0x724] sm:$0xf] }
 0x18c   :  { %v4587_v34 = vadd.f32 %v4586_v58, %v4568_v30  ;;  %v6495_v58 = vor.u32 %v8048_v0, %v6492_v19  ;;  %v8026_v19 = vld [vmem:[#allocation3 + $0x714] sm:$0xf] }
 0x18d   :  { %4959 = vmatpush.bf16.msrb.mxu2 %v6143_v11  ;;  %4921 = vmatpush.bf16.msrb.mxu0 %v6015_v51  ;;  %v4569_v32 = vpop.f32.mrf.mxu1  ;;  %v6375_v11 = vor.u32 %v8018_v21, %v6372_v6  ;;  %v6503_v51 = vor.u32 %v8050_v25, %v6500_v24  ;;  %v6284_v6 = vld [vmem:[#allocation3 + $0x628] sm:$0xf0]  ;;  %v8012_v25 = vld [vmem:[#allocation3 + $0x6a4] sm:$0xf] }
 0x18e   :  { %4940 = vmatpush.bf16.msrb.mxu1 %v6079_v3  ;;  %4978 = vmatpush.bf16.msrb.mxu3 %v6207_v56  ;;  %v4550_v12 = vpop.f32.mrf.mxu0  ;;  %v9359_v31 = vadd.f32 %v4605_v50, %v4587_v34  ;;  %v6364_v56 = vld [vmem:[#allocation3 + $0x6c8] sm:$0xf0]  ;;  %v7998_v50 = vld [vmem:[#allocation3 + $0x634] sm:$0xf]  ;;  %v6292_v34 = vld [vmem:[#allocation3 + $0x638] sm:$0xf0] }
 0x18f   :  { %v4551_v42 = vadd.f32 %v4550_v12, %v9344_v16  ;;  %v8032_v16 = vld [vmem:[#allocation3 + $0x744] sm:$0xf]  ;;  %v6367_v59 = vor.u32 %v8016_v35, %v6364_v56  ;;  %v8014_v12 = vld [vmem:[#allocation3 + $0x6b4] sm:$0xf]  ;;  %v6415_v35 = vor.u32 %v8028_v26, %v6412_v46  ;;  %v6460_v26 = vld [vmem:[#allocation3 + $0x788] sm:$0xf0] }
 0x190   :  { %v6431_v37 = vor.u32 %v8032_v16, %v6428_v60  ;;  %v8044_v16 = vld [vmem:[#allocation3 + $0x7a4] sm:$0xf]  ;;  %v6476_v60 = vld [vmem:[#allocation3 + $0x7a8] sm:$0xf0]  ;;  %v8102_v46 = vld [vmem:[#allocation3 + $0x974] sm:$0xf] }
 0x191   :  { %5028 = vmatpush.bf16.msra.mxu2 %v6455_v45  ;;  %4990 = vmatpush.bf16.msra.mxu0 %v6327_v47  ;;  %v4570_v22 = vadd.f32 %v4569_v32, %v4551_v42  ;;  %v9840_v42 = vld [vmem:[#allocation57_spill] sm:$0xff]  ;;  %v6479_v0 = vor.u32 %v8044_v16, %v6476_v60 }
 0x192   :  { %5009 = vmatpush.bf16.msra.mxu1 %v6391_v8  ;;  %5047 = vmatpush.bf16.msra.mxu3 %v6519_v14  ;;  %v9837_v8 = vld [vmem:[#allocation54_spill] sm:$0xff]  ;;  %v9838_v14 = vld [vmem:[#allocation55_spill] sm:$0xff] }
 0x193   :  { %v4588_v30 = vpop.f32.mrf.mxu2  ;;  %v4607_v3 = vpop.f32.mrf.mxu3 }
 0x194   :  { %v4589_v45 = vadd.f32 %v4588_v30, %v4570_v22  ;;  %4922 = vmatmul.bf16.vlgmr.msrb.gmra.mxu0 %v9837_v8  ;;  %4941 = vmatmul.bf16.vlgmr.msrb.gmra.mxu1 %v9838_v14  ;;  %v7996_v22 = vld [vmem:[#allocation3 + $0x624] sm:$0xf]  ;;  %v8010_v8 = vld [vmem:[#allocation3 + $0x694] sm:$0xf]  ;;  %v6340_v14 = vld [vmem:[#allocation3 + $0x698] sm:$0xf0] }
 0x195   :  { %5029 = vmatpush.bf16.msra.mxu2 %v6447_v62  ;;  %4991 = vmatpush.bf16.msra.mxu0 %v6319_v28  ;;  %v4638_v1 = vpop.f32.mrf.mxu1  ;;  %v6356_v62 = vld [vmem:[#allocation3 + $0x6b8] sm:$0xf0]  ;;  %v6287_v30 = vor.u32 %v7996_v22, %v6284_v6  ;;  %v9841_v22 = vld [vmem:[#allocation58_spill] sm:$0xff]  ;;  %v9842_v6 = vld [vmem:[#allocation59_spill] sm:$0xff] }
 0x196   :  { %5010 = vmatpush.bf16.msra.mxu1 %v6383_v38  ;;  %5048 = vmatpush.bf16.msra.mxu3 %v6511_v40  ;;  %v4619_v47 = vpop.f32.mrf.mxu0  ;;  %v9364_v44 = vadd.f32 %v4607_v3, %v4589_v45  ;;  %v6484_v28 = vld [vmem:[#allocation3 + $0x7b8] sm:$0xf0]  ;;  %v6423_v38 = vor.u32 %v8030_v52, %v6420_v5  ;;  %v6295_v40 = vor.u32 %v7998_v50, %v6292_v34  ;;  %v6268_v50 = vld [vmem:[#allocation3 + $0x608] sm:$0xf0] }
 0x197   :  { %v4620_v61 = vadd.f32 %v4619_v47, %v9349_v55  ;;  %v8046_v55 = vld [vmem:[#allocation3 + $0x7b4] sm:$0xf]  ;;  %v6359_v17 = vor.u32 %v8014_v12, %v6356_v62  ;;  %v6404_v45 = vld [vmem:[#allocation3 + $0x718] sm:$0xf0] }
 0x198   :  { %4960 = vmatmul.bf16.vlgmr.msrb.gmra.mxu2 %v9839_v20  ;;  %4979 = vmatmul.bf16.vlgmr.msrb.gmra.mxu3 %v9840_v42  ;;  %v6487_v21 = vor.u32 %v8046_v55, %v6484_v28  ;;  %v6407_v52 = vor.u32 %v8026_v19, %v6404_v45  ;;  %v8008_v55 = vld [vmem:[#allocation3 + $0x684] sm:$0xf]  ;;  %v6332_v28 = vld [vmem:[#allocation3 + $0x688] sm:$0xf0] }
 0x199   :  { %5030 = vmatpush.bf16.msra.mxu2 %v6439_v10  ;;  %4992 = vmatpush.bf16.msra.mxu0 %v6311_v36  ;;  %v4639_v32 = vadd.f32 %v4638_v1, %v4620_v61  ;;  %v6348_v36 = vld [vmem:[#allocation3 + $0x6a8] sm:$0xf0]  ;;  %v7994_v1 = vld [vmem:[#allocation3 + $0x614] sm:$0xf]  ;;  %v6276_v61 = vld [vmem:[#allocation3 + $0x618] sm:$0xf0] }
 0x19a   :  { %5011 = vmatpush.bf16.msra.mxu1 %v6375_v11  ;;  %5049 = vmatpush.bf16.msra.mxu3 %v6503_v51  ;;  %v6351_v56 = vor.u32 %v8012_v25, %v6348_v36  ;;  %v6279_v5 = vor.u32 %v7994_v1, %v6276_v61  ;;  %v8040_v20 = vld [vmem:[#allocation3 + $0x784] sm:$0xf]  ;;  %v8070_v25 = vld [vmem:[#allocation3 + $0x874] sm:$0xf] }
 0x19b   :  { %v4657_v24 = vpop.f32.mrf.mxu2  ;;  %v4676_v10 = vpop.f32.mrf.mxu3  ;;  %v8100_v45 = vld [vmem:[#allocation3 + $0x964] sm:$0xf] }
 0x19c   :  { %v4658_v11 = vadd.f32 %v4657_v24, %v4639_v32  ;;  %v6343_v32 = vor.u32 %v8010_v8, %v6340_v14  ;;  %v6580_v24 = vld [vmem:[#allocation3 + $0x878] sm:$0xf0]  ;;  %v8068_v8 = vld [vmem:[#allocation3 + $0x864] sm:$0xf]  ;;  %v6572_v14 = vld [vmem:[#allocation3 + $0x868] sm:$0xf0] }
 0x19d   :  { %5031 = vmatpush.bf16.msra.mxu2 %v6431_v37  ;;  %4993 = vmatpush.bf16.msra.mxu0 %v6303_v33  ;;  %v4640_v39 = vpop.f32.mrf.mxu1  ;;  %v8042_v37 = vld [vmem:[#allocation3 + $0x794] sm:$0xf]  ;;  %v6468_v33 = vld [vmem:[#allocation3 + $0x798] sm:$0xf0]  ;;  %v6583_v19 = vor.u32 %v8070_v25, %v6580_v24 }
 0x19e   :  { %5012 = vmatpush.bf16.msra.mxu1 %v6367_v59  ;;  %5050 = vmatpush.bf16.msra.mxu3 %v6495_v58  ;;  %v4621_v51 = vpop.f32.mrf.mxu0  ;;  %v9369_v3 = vadd.f32 %v4676_v10, %v4658_v11  ;;  %v6396_v59 = vld [vmem:[#allocation3 + $0x708] sm:$0xf0]  ;;  %v7992_v58 = vld [vmem:[#allocation3 + $0x604] sm:$0xf]  ;;  %v6471_v62 = vor.u32 %v8042_v37, %v6468_v33  ;;  %v8086_v10 = vld [vmem:[#allocation3 + $0x8f4] sm:$0xf] }
 0x19f   :  { %v4622_v29 = vadd.f32 %v4621_v51, %v9354_v48  ;;  %v8024_v48 = vld [vmem:[#allocation3 + $0x704] sm:$0xf]  ;;  %v6271_v60 = vor.u32 %v7992_v58, %v6268_v50  ;;  %v6644_v11 = vld [vmem:[#allocation3 + $0x8f8] sm:$0xf0]  ;;  %v8118_v51 = vld [vmem:[#allocation3 + $0x9f4] sm:$0xf] }
 0x1a0   :  { %v6399_v16 = vor.u32 %v8024_v48, %v6396_v59  ;;  %v6647_v1 = vor.u32 %v8086_v10, %v6644_v11  ;;  %v8084_v37 = vld [vmem:[#allocation3 + $0x8e4] sm:$0xf]  ;;  %v6636_v33 = vld [vmem:[#allocation3 + $0x8e8] sm:$0xf0] }
 0x1a1   :  { %5032 = vmatpush.bf16.msra.mxu2 %v6423_v38  ;;  %4994 = vmatpush.bf16.msra.mxu0 %v6295_v40  ;;  %v4641_v47 = vadd.f32 %v4640_v39, %v4622_v29  ;;  %v6772_v39 = vld [vmem:[#allocation3 + $0x9f8] sm:$0xf0]  ;;  %v8116_v48 = vld [vmem:[#allocation3 + $0x9e4] sm:$0xf]  ;;  %v6684_v10 = vld [vmem:[#allocation3 + $0x948] sm:$0xf0] }
 0x1a2   :  { %5013 = vmatpush.bf16.msra.mxu1 %v6359_v17  ;;  %5051 = vmatpush.bf16.msra.mxu3 %v6487_v21  ;;  %v6708_v17 = vld [vmem:[#allocation3 + $0x978] sm:$0xf0]  ;;  %v6775_v61 = vor.u32 %v8118_v51, %v6772_v39  ;;  %v8064_v11 = vld [vmem:[#allocation3 + $0x844] sm:$0xf]  ;;  %v6556_v51 = vld [vmem:[#allocation3 + $0x848] sm:$0xf0] }
 0x1a3   :  { %v4659_v34 = vpop.f32.mrf.mxu2  ;;  %v4678_v12 = vpop.f32.mrf.mxu3  ;;  %v8080_v39 = vld [vmem:[#allocation3 + $0x8c4] sm:$0xf] }
 0x1a4   :  { %v4660_v42 = vadd.f32 %v4659_v34, %v4641_v47  ;;  %4927 = vmatmul.bf16.gmra.mxu0 %v9841_v22  ;;  %4946 = vmatmul.bf16.gmra.mxu1 %v9842_v6  ;;  %v6700_v47 = vld [vmem:[#allocation3 + $0x968] sm:$0xf0]  ;;  %v8114_v22 = vld [vmem:[#allocation3 + $0x9d4] sm:$0xf]  ;;  %v6756_v6 = vld [vmem:[#allocation3 + $0x9d8] sm:$0xf0] }
 0x1a5   :  { %5033 = vmatpush.bf16.msra.mxu2 %v6415_v35  ;;  %4995 = vmatpush.bf16.msra.mxu0 %v6287_v30  ;;  %v4643_v40 = vpop.f32.mrf.mxu1  ;;  %v6463_v35 = vor.u32 %v8040_v20, %v6460_v26  ;;  %v9843_v30 = vld [vmem:[#allocation60_spill] sm:$0xff] }
 0x1a6   :  { %5014 = vmatpush.bf16.msra.mxu1 %v6351_v56  ;;  %5052 = vmatpush.bf16.msra.mxu3 %v6479_v0  ;;  %v4624_v38 = vpop.f32.mrf.mxu0  ;;  %v9374_v36 = vadd.f32 %v4678_v12, %v4660_v42  ;;  %v9844_v56 = vld [vmem:[#allocation62_spill] sm:$0xff]  ;;  %v6711_v0 = vor.u32 %v8102_v46, %v6708_v17  ;;  %v6703_v12 = vor.u32 %v8100_v45, %v6700_v47  ;;  %v6692_v42 = vld [vmem:[#allocation3 + $0x958] sm:$0xf0]  ;;  %v8082_v46 = vld [vmem:[#allocation3 + $0x8d4] sm:$0xf] }
 0x1a7   :  { %v4625_v21 = vadd.f32 %v4624_v38, %v9359_v31  ;;  %v6335_v31 = vor.u32 %v8008_v55, %v6332_v28  ;;  %v6639_v28 = vor.u32 %v8084_v37, %v6636_v33  ;;  %v8066_v38 = vld [vmem:[#allocation3 + $0x854] sm:$0xf]  ;;  %v6676_v33 = vld [vmem:[#allocation3 + $0x938] sm:$0xf0] }
 0x1a8   :  { %4965 = vmatmul.bf16.gmra.mxu2 %v9843_v30  ;;  %4984 = vmatmul.bf16.gmra.mxu3 %v9844_v56  ;;  %v8112_v30 = vld [vmem:[#allocation3 + $0x9c4] sm:$0xf]  ;;  %v6748_v56 = vld [vmem:[#allocation3 + $0x9c8] sm:$0xf0]  ;;  %v8094_v37 = vld [vmem:[#allocation3 + $0x934] sm:$0xf] }
 0x1a9   :  { %5034 = vmatpush.bf16.msra.mxu2 %v6407_v52  ;;  %4996 = vmatpush.bf16.msra.mxu0 %v6279_v5  ;;  %v4644_v29 = vadd.f32 %v4643_v40, %v4625_v21  ;;  %v6764_v52 = vld [vmem:[#allocation3 + $0x9e8] sm:$0xf0]  ;;  %v6564_v40 = vld [vmem:[#allocation3 + $0x858] sm:$0xf0] }
 0x1aa   :  { %5015 = vmatpush.bf16.msra.mxu1 %v6343_v32  ;;  %5053 = vmatpush.bf16.msra.mxu3 %v6471_v62  ;;  %v6575_v32 = vor.u32 %v8068_v8, %v6572_v14  ;;  %v8098_v62 = vld [vmem:[#allocation3 + $0x954] sm:$0xf]  ;;  %v6767_v20 = vor.u32 %v8116_v48, %v6764_v52  ;;  %v6628_v21 = vld [vmem:[#allocation3 + $0x8d8] sm:$0xf0]  ;;  %v6567_v24 = vor.u32 %v8066_v38, %v6564_v40  ;;  %v6668_v38 = vld [vmem:[#allocation3 + $0x928] sm:$0xf0] }
 0x1ab   :  { %v4662_v5 = vpop.f32.mrf.mxu2  ;;  %v4681_v59 = vpop.f32.mrf.mxu3  ;;  %v6695_v25 = vor.u32 %v8098_v62, %v6692_v42  ;;  %v6559_v14 = vor.u32 %v8064_v11, %v6556_v51  ;;  %v9847_v62 = vld [vmem:[#allocation68_spill] sm:$0xff]  ;;  %v8092_v42 = vld [vmem:[#allocation3 + $0x924] sm:$0xf] }
 0x1ac   :  { %v4663_v58 = vadd.f32 %v4662_v5, %v4644_v29  ;;  %v6751_v5 = vor.u32 %v8112_v30, %v6748_v56  ;;  %v8090_v56 = vld [vmem:[#allocation3 + $0x914] sm:$0xf] }
 0x1ad   :  { %5035 = vmatpush.bf16.msra.mxu2 %v6399_v16  ;;  %4997 = vmatpush.bf16.msra.mxu0 %v6271_v60  ;;  %v4645_v34 = vpop.f32.mrf.mxu1  ;;  %v6631_v16 = vor.u32 %v8082_v46, %v6628_v21  ;;  %v6759_v60 = vor.u32 %v8114_v22, %v6756_v6  ;;  %v6540_v21 = vld [vmem:[#allocation3 + $0x828] sm:$0xf0]  ;;  %v8076_v22 = vld [vmem:[#allocation3 + $0x8a4] sm:$0xf] }
 0x1ae   :  { %5016 = vmatpush.bf16.msra.mxu1 %v6335_v31  ;;  %5054 = vmatpush.bf16.msra.mxu3 %v6463_v35  ;;  %v4626_v50 = vpop.f32.mrf.mxu0  ;;  %v9379_v26 = vadd.f32 %v4681_v59, %v4663_v58  ;;  %v6620_v35 = vld [vmem:[#allocation3 + $0x8c8] sm:$0xf0]  ;;  %v8062_v59 = vld [vmem:[#allocation3 + $0x834] sm:$0xf]  ;;  %v6548_v58 = vld [vmem:[#allocation3 + $0x838] sm:$0xf0] }
 0x1af   :  { %v4627_v55 = vadd.f32 %v4626_v50, %v9364_v44  ;;  %v8096_v44 = vld [vmem:[#allocation3 + $0x944] sm:$0xf]  ;;  %v6623_v52 = vor.u32 %v8080_v39, %v6620_v35  ;;  %v8078_v50 = vld [vmem:[#allocation3 + $0x8b4] sm:$0xf]  ;;  %v6671_v39 = vor.u32 %v8092_v42, %v6668_v38  ;;  %v6716_v42 = vld [vmem:[#allocation3 + $0x988] sm:$0xf0] }
 0x1b0   :  { %v6687_v8 = vor.u32 %v8096_v44, %v6684_v10  ;;  %v8108_v44 = vld [vmem:[#allocation3 + $0x9a4] sm:$0xf]  ;;  %v6732_v10 = vld [vmem:[#allocation3 + $0x9a8] sm:$0xf0]  ;;  %v8166_v38 = vld [vmem:[#allocation3 + $0xb74] sm:$0xf] }
 0x1b1   :  { %5104 = vmatpush.bf16.msrb.mxu2 %v6711_v0  ;;  %5066 = vmatpush.bf16.msrb.mxu0 %v6583_v19  ;;  %v4646_v17 = vadd.f32 %v4645_v34, %v4627_v55  ;;  %v9848_v55 = vld [vmem:[#allocation69_spill] sm:$0xff]  ;;  %v6735_v30 = vor.u32 %v8108_v44, %v6732_v10 }
 0x1b2   :  { %5085 = vmatpush.bf16.msrb.mxu1 %v6647_v1  ;;  %5123 = vmatpush.bf16.msrb.mxu3 %v6775_v61  ;;  %v9845_v1 = vld [vmem:[#allocation66_spill] sm:$0xff]  ;;  %v9846_v61 = vld [vmem:[#allocation67_spill] sm:$0xff] }
 0x1b3   :  { %v4664_v29 = vpop.f32.mrf.mxu2  ;;  %v4683_v31 = vpop.f32.mrf.mxu3 }
 0x1b4   :  { %v4665_v0 = vadd.f32 %v4664_v29, %v4646_v17  ;;  %4998 = vmatmul.bf16.vlgmr.msra.gmra.mxu0 %v9845_v1  ;;  %5017 = vmatmul.bf16.vlgmr.msra.gmra.mxu1 %v9846_v61  ;;  %v8060_v17 = vld [vmem:[#allocation3 + $0x824] sm:$0xf]  ;;  %v8074_v1 = vld [vmem:[#allocation3 + $0x894] sm:$0xf]  ;;  %v6596_v61 = vld [vmem:[#allocation3 + $0x898] sm:$0xf0] }
 0x1b5   :  { %5105 = vmatpush.bf16.msrb.mxu2 %v6703_v12  ;;  %5067 = vmatpush.bf16.msrb.mxu0 %v6575_v32  ;;  %v4714_v45 = vpop.f32.mrf.mxu1  ;;  %v6612_v12 = vld [vmem:[#allocation3 + $0x8b8] sm:$0xf0]  ;;  %v6543_v29 = vor.u32 %v8060_v17, %v6540_v21  ;;  %v9849_v17 = vld [vmem:[#allocation73_spill] sm:$0xff]  ;;  %v9850_v21 = vld [vmem:[#allocation74_spill] sm:$0xff] }
 0x1b6   :  { %5086 = vmatpush.bf16.msrb.mxu1 %v6639_v28  ;;  %5124 = vmatpush.bf16.msrb.mxu3 %v6767_v20  ;;  %v4695_v19 = vpop.f32.mrf.mxu0  ;;  %v9384_v48 = vadd.f32 %v4683_v31, %v4665_v0  ;;  %v6740_v32 = vld [vmem:[#allocation3 + $0x9b8] sm:$0xf0]  ;;  %v6679_v28 = vor.u32 %v8094_v37, %v6676_v33  ;;  %v6551_v20 = vor.u32 %v8062_v59, %v6548_v58  ;;  %v6524_v59 = vld [vmem:[#allocation3 + $0x808] sm:$0xf0] }
 0x1b7   :  { %v4696_v47 = vadd.f32 %v4695_v19, %v9369_v3  ;;  %v8110_v3 = vld [vmem:[#allocation3 + $0x9b4] sm:$0xf]  ;;  %v6615_v40 = vor.u32 %v8078_v50, %v6612_v12  ;;  %v6660_v0 = vld [vmem:[#allocation3 + $0x918] sm:$0xf0] }
 0x1b8   :  { %5036 = vmatmul.bf16.vlgmr.msra.gmra.mxu2 %v9847_v62  ;;  %5055 = vmatmul.bf16.vlgmr.msra.gmra.mxu3 %v9848_v55  ;;  %v6743_v46 = vor.u32 %v8110_v3, %v6740_v32  ;;  %v6663_v37 = vor.u32 %v8090_v56, %v6660_v0  ;;  %v8072_v3 = vld [vmem:[#allocation3 + $0x884] sm:$0xf]  ;;  %v6588_v32 = vld [vmem:[#allocation3 + $0x888] sm:$0xf0] }
 0x1b9   :  { %5106 = vmatpush.bf16.msrb.mxu2 %v6695_v25  ;;  %5068 = vmatpush.bf16.msrb.mxu0 %v6567_v24  ;;  %v4715_v34 = vadd.f32 %v4714_v45, %v4696_v47  ;;  %v6604_v24 = vld [vmem:[#allocation3 + $0x8a8] sm:$0xf0]  ;;  %v8058_v45 = vld [vmem:[#allocation3 + $0x814] sm:$0xf]  ;;  %v6532_v47 = vld [vmem:[#allocation3 + $0x818] sm:$0xf0] }
 0x1ba   :  { %5087 = vmatpush.bf16.msrb.mxu1 %v6631_v16  ;;  %5125 = vmatpush.bf16.msrb.mxu3 %v6759_v60  ;;  %v6607_v35 = vor.u32 %v8076_v22, %v6604_v24  ;;  %v6535_v33 = vor.u32 %v8058_v45, %v6532_v47  ;;  %v8104_v62 = vld [vmem:[#allocation3 + $0x984] sm:$0xf]  ;;  %v8134_v22 = vld [vmem:[#allocation3 + $0xa74] sm:$0xf] }
 0x1bb   :  { %v4733_v6 = vpop.f32.mrf.mxu2  ;;  %v4752_v25 = vpop.f32.mrf.mxu3  ;;  %v8164_v0 = vld [vmem:[#allocation3 + $0xb64] sm:$0xf] }
 0x1bc   :  { %v4734_v16 = vadd.f32 %v4733_v6, %v4715_v34  ;;  %v6599_v34 = vor.u32 %v8074_v1, %v6596_v61  ;;  %v6836_v6 = vld [vmem:[#allocation3 + $0xa78] sm:$0xf0]  ;;  %v8132_v1 = vld [vmem:[#allocation3 + $0xa64] sm:$0xf]  ;;  %v6828_v61 = vld [vmem:[#allocation3 + $0xa68] sm:$0xf0] }
 0x1bd   :  { %5107 = vmatpush.bf16.msrb.mxu2 %v6687_v8  ;;  %5069 = vmatpush.bf16.msrb.mxu0 %v6559_v14  ;;  %v4716_v11 = vpop.f32.mrf.mxu1  ;;  %v8106_v8 = vld [vmem:[#allocation3 + $0x994] sm:$0xf]  ;;  %v6724_v14 = vld [vmem:[#allocation3 + $0x998] sm:$0xf0]  ;;  %v6839_v56 = vor.u32 %v8134_v22, %v6836_v6 }
 0x1be   :  { %5088 = vmatpush.bf16.msrb.mxu1 %v6623_v52  ;;  %5126 = vmatpush.bf16.msrb.mxu3 %v6751_v5  ;;  %v4697_v60 = vpop.f32.mrf.mxu0  ;;  %v9389_v31 = vadd.f32 %v4752_v25, %v4734_v16  ;;  %v6652_v52 = vld [vmem:[#allocation3 + $0x908] sm:$0xf0]  ;;  %v8056_v5 = vld [vmem:[#allocation3 + $0x804] sm:$0xf]  ;;  %v6727_v12 = vor.u32 %v8106_v8, %v6724_v14  ;;  %v8150_v25 = vld [vmem:[#allocation3 + $0xaf4] sm:$0xf] }
 0x1bf   :  { %v4698_v51 = vadd.f32 %v4697_v60, %v9374_v36  ;;  %v8088_v36 = vld [vmem:[#allocation3 + $0x904] sm:$0xf]  ;;  %v6527_v10 = vor.u32 %v8056_v5, %v6524_v59  ;;  %v6900_v16 = vld [vmem:[#allocation3 + $0xaf8] sm:$0xf0]  ;;  %v8182_v60 = vld [vmem:[#allocation3 + $0xbf4] sm:$0xf] }
 0x1c0   :  { %v6655_v44 = vor.u32 %v8088_v36, %v6652_v52  ;;  %v6903_v45 = vor.u32 %v8150_v25, %v6900_v16  ;;  %v8148_v8 = vld [vmem:[#allocation3 + $0xae4] sm:$0xf]  ;;  %v6892_v14 = vld [vmem:[#allocation3 + $0xae8] sm:$0xf0] }
 0x1c1   :  { %5108 = vmatpush.bf16.msrb.mxu2 %v6679_v28  ;;  %5070 = vmatpush.bf16.msrb.mxu0 %v6551_v20  ;;  %v4717_v19 = vadd.f32 %v4716_v11, %v4698_v51  ;;  %v7028_v11 = vld [vmem:[#allocation3 + $0xbf8] sm:$0xf0]  ;;  %v8180_v36 = vld [vmem:[#allocation3 + $0xbe4] sm:$0xf]  ;;  %v6940_v25 = vld [vmem:[#allocation3 + $0xb48] sm:$0xf0] }
 0x1c2   :  { %5089 = vmatpush.bf16.msrb.mxu1 %v6615_v40  ;;  %5127 = vmatpush.bf16.msrb.mxu3 %v6743_v46  ;;  %v6964_v40 = vld [vmem:[#allocation3 + $0xb78] sm:$0xf0]  ;;  %v7031_v47 = vor.u32 %v8182_v60, %v7028_v11  ;;  %v8128_v16 = vld [vmem:[#allocation3 + $0xa44] sm:$0xf]  ;;  %v6812_v60 = vld [vmem:[#allocation3 + $0xa48] sm:$0xf0] }
 0x1c3   :  { %v4735_v58 = vpop.f32.mrf.mxu2  ;;  %v4754_v50 = vpop.f32.mrf.mxu3  ;;  %v8144_v11 = vld [vmem:[#allocation3 + $0xac4] sm:$0xf] }
 0x1c4   :  { %v4736_v55 = vadd.f32 %v4735_v58, %v4717_v19  ;;  %5003 = vmatmul.bf16.gmra.mxu0 %v9849_v17  ;;  %5022 = vmatmul.bf16.gmra.mxu1 %v9850_v21  ;;  %v6956_v19 = vld [vmem:[#allocation3 + $0xb68] sm:$0xf0]  ;;  %v8178_v17 = vld [vmem:[#allocation3 + $0xbd4] sm:$0xf]  ;;  %v7012_v21 = vld [vmem:[#allocation3 + $0xbd8] sm:$0xf0] }
 0x1c5   :  { %5109 = vmatpush.bf16.msrb.mxu2 %v6671_v39  ;;  %5071 = vmatpush.bf16.msrb.mxu0 %v6543_v29  ;;  %v4719_v20 = vpop.f32.mrf.mxu1  ;;  %v6719_v39 = vor.u32 %v8104_v62, %v6716_v42  ;;  %v9851_v29 = vld [vmem:[#allocation75_spill] sm:$0xff] }
 0x1c6   :  { %5090 = vmatpush.bf16.msrb.mxu1 %v6607_v35  ;;  %5128 = vmatpush.bf16.msrb.mxu3 %v6735_v30  ;;  %v4700_v28 = vpop.f32.mrf.mxu0  ;;  %v9394_v24 = vadd.f32 %v4754_v50, %v4736_v55  ;;  %v9852_v35 = vld [vmem:[#allocation76_spill] sm:$0xff]  ;;  %v6967_v30 = vor.u32 %v8166_v38, %v6964_v40  ;;  %v6959_v50 = vor.u32 %v8164_v0, %v6956_v19  ;;  %v8146_v38 = vld [vmem:[#allocation3 + $0xad4] sm:$0xf] }
 0x1c7   :  { %v4701_v46 = vadd.f32 %v4700_v28, %v9379_v26  ;;  %v6591_v26 = vor.u32 %v8072_v3, %v6588_v32  ;;  %v6895_v32 = vor.u32 %v8148_v8, %v6892_v14  ;;  %v6948_v55 = vld [vmem:[#allocation3 + $0xb58] sm:$0xf0]  ;;  %v8130_v28 = vld [vmem:[#allocation3 + $0xa54] sm:$0xf] }
 0x1c8   :  { %5041 = vmatmul.bf16.gmra.mxu2 %v9851_v29  ;;  %5060 = vmatmul.bf16.gmra.mxu3 %v9852_v35  ;;  %v8176_v29 = vld [vmem:[#allocation3 + $0xbc4] sm:$0xf]  ;;  %v7004_v35 = vld [vmem:[#allocation3 + $0xbc8] sm:$0xf0]  ;;  %v8158_v8 = vld [vmem:[#allocation3 + $0xb34] sm:$0xf] }
 0x1c9   :  { %5110 = vmatpush.bf16.msrb.mxu2 %v6663_v37  ;;  %5072 = vmatpush.bf16.msrb.mxu0 %v6535_v33  ;;  %v4720_v51 = vadd.f32 %v4719_v20, %v4701_v46  ;;  %v7020_v37 = vld [vmem:[#allocation3 + $0xbe8] sm:$0xf0]  ;;  %v6820_v20 = vld [vmem:[#allocation3 + $0xa58] sm:$0xf0] }
 0x1ca   :  { %5091 = vmatpush.bf16.msrb.mxu1 %v6599_v34  ;;  %5129 = vmatpush.bf16.msrb.mxu3 %v6727_v12  ;;  %v6831_v34 = vor.u32 %v8132_v1, %v6828_v61  ;;  %v8162_v12 = vld [vmem:[#allocation3 + $0xb54] sm:$0xf]  ;;  %v7023_v62 = vor.u32 %v8180_v36, %v7020_v37  ;;  %v6884_v46 = vld [vmem:[#allocation3 + $0xad8] sm:$0xf0]  ;;  %v6823_v6 = vor.u32 %v8130_v28, %v6820_v20  ;;  %v6924_v28 = vld [vmem:[#allocation3 + $0xb28] sm:$0xf0] }
 0x1cb   :  { %v4738_v33 = vpop.f32.mrf.mxu2  ;;  %v4757_v52 = vpop.f32.mrf.mxu3  ;;  %v6951_v22 = vor.u32 %v8162_v12, %v6948_v55  ;;  %v6815_v61 = vor.u32 %v8128_v16, %v6812_v60  ;;  %v6932_v14 = vld [vmem:[#allocation3 + $0xb38] sm:$0xf0]  ;;  %v9855_v12 = vld [vmem:[#allocation79_spill] sm:$0xff]  ;;  %v8156_v55 = vld [vmem:[#allocation3 + $0xb24] sm:$0xf] }
 0x1cc   :  { %v4739_v5 = vadd.f32 %v4738_v33, %v4720_v51  ;;  %v7007_v33 = vor.u32 %v8176_v29, %v7004_v35  ;;  %v8154_v35 = vld [vmem:[#allocation3 + $0xb14] sm:$0xf] }
 0x1cd   :  { %5111 = vmatpush.bf16.msrb.mxu2 %v6655_v44  ;;  %5073 = vmatpush.bf16.msrb.mxu0 %v6527_v10  ;;  %v4721_v58 = vpop.f32.mrf.mxu1  ;;  %v6887_v44 = vor.u32 %v8146_v38, %v6884_v46  ;;  %v7015_v10 = vor.u32 %v8178_v17, %v7012_v21  ;;  %v6796_v46 = vld [vmem:[#allocation3 + $0xa28] sm:$0xf0]  ;;  %v8140_v17 = vld [vmem:[#allocation3 + $0xaa4] sm:$0xf] }
 0x1ce   :  { %5092 = vmatpush.bf16.msrb.mxu1 %v6591_v26  ;;  %5130 = vmatpush.bf16.msrb.mxu3 %v6719_v39  ;;  %v4702_v59 = vpop.f32.mrf.mxu0  ;;  %v9399_v42 = vadd.f32 %v4757_v52, %v4739_v5  ;;  %v6876_v39 = vld [vmem:[#allocation3 + $0xac8] sm:$0xf0]  ;;  %v8126_v52 = vld [vmem:[#allocation3 + $0xa34] sm:$0xf]  ;;  %v6804_v5 = vld [vmem:[#allocation3 + $0xa38] sm:$0xf0] }
 0x1cf   :  { %v4703_v3 = vadd.f32 %v4702_v59, %v9384_v48  ;;  %v8160_v48 = vld [vmem:[#allocation3 + $0xb44] sm:$0xf]  ;;  %v6879_v37 = vor.u32 %v8144_v11, %v6876_v39  ;;  %v8142_v59 = vld [vmem:[#allocation3 + $0xab4] sm:$0xf]  ;;  %v6927_v11 = vor.u32 %v8156_v55, %v6924_v28  ;;  %v6972_v28 = vld [vmem:[#allocation3 + $0xb88] sm:$0xf0] }
 0x1d0   :  { %v6943_v1 = vor.u32 %v8160_v48, %v6940_v25  ;;  %v8172_v48 = vld [vmem:[#allocation3 + $0xba4] sm:$0xf]  ;;  %v6988_v25 = vld [vmem:[#allocation3 + $0xba8] sm:$0xf0] }
 0x1d1   :  { %5180 = vmatpush.bf16.msra.mxu2 %v6967_v30  ;;  %5142 = vmatpush.bf16.msra.mxu0 %v6839_v56  ;;  %v4722_v40 = vadd.f32 %v4721_v58, %v4703_v3  ;;  %v6868_v58 = vld [vmem:[#allocation3 + $0xab8] sm:$0xf0]  ;;  %v6991_v29 = vor.u32 %v8172_v48, %v6988_v25 }
 0x1d2   :  { %5161 = vmatpush.bf16.msra.mxu1 %v6903_v45  ;;  %5199 = vmatpush.bf16.msra.mxu3 %v7031_v47  ;;  %v9853_v45 = vld [vmem:[#allocation77_spill] sm:$0xff]  ;;  %v9854_v47 = vld [vmem:[#allocation78_spill] sm:$0xff]  ;;  %v9856_v3 = vld [vmem:[#allocation80_spill] sm:$0xff]  ;;  %v6871_v20 = vor.u32 %v8142_v59, %v6868_v58 }
 0x1d3   :  { %v4740_v51 = vpop.f32.mrf.mxu2  ;;  %v4759_v26 = vpop.f32.mrf.mxu3 }
 0x1d4   :  { %v4741_v30 = vadd.f32 %v4740_v51, %v4722_v40  ;;  %5074 = vmatmul.bf16.vlgmr.msrb.gmra.mxu0 %v9853_v45  ;;  %5093 = vmatmul.bf16.vlgmr.msrb.gmra.mxu1 %v9854_v47  ;;  %v8124_v40 = vld [vmem:[#allocation3 + $0xa24] sm:$0xf]  ;;  %v8138_v45 = vld [vmem:[#allocation3 + $0xa94] sm:$0xf]  ;;  %v6852_v47 = vld [vmem:[#allocation3 + $0xa98] sm:$0xf0] }
 0x1d5   :  { %5181 = vmatpush.bf16.msra.mxu2 %v6959_v50  ;;  %5143 = vmatpush.bf16.msra.mxu0 %v6831_v34  ;;  %v4790_v0 = vpop.f32.mrf.mxu1  ;;  %v8174_v50 = vld [vmem:[#allocation3 + $0xbb4] sm:$0xf]  ;;  %v6996_v34 = vld [vmem:[#allocation3 + $0xbb8] sm:$0xf0]  ;;  %v6799_v51 = vor.u32 %v8124_v40, %v6796_v46  ;;  %v6855_v58 = vor.u32 %v8138_v45, %v6852_v47  ;;  %v9857_v46 = vld [vmem:[#allocation81_spill] sm:$0xff] }
 0x1d6   :  { %5162 = vmatpush.bf16.msra.mxu1 %v6895_v32  ;;  %5200 = vmatpush.bf16.msra.mxu3 %v7023_v62  ;;  %v4771_v56 = vpop.f32.mrf.mxu0  ;;  %v9403_v36 = vadd.f32 %v4759_v26, %v4741_v30  ;;  %v6935_v32 = vor.u32 %v8158_v8, %v6932_v14  ;;  %v6807_v62 = vor.u32 %v8126_v52, %v6804_v5  ;;  %v6916_v30 = vld [vmem:[#allocation3 + $0xb18] sm:$0xf0]  ;;  %v6780_v52 = vld [vmem:[#allocation3 + $0xa08] sm:$0xf0] }
 0x1d7   :  { %v4791_v19 = vadd.f32 %v4790_v0, %v4771_v56  ;;  %v6999_v38 = vor.u32 %v8174_v50, %v6996_v34  ;;  %v8122_v56 = vld [vmem:[#allocation3 + $0xa14] sm:$0xf]  ;;  %v6788_v0 = vld [vmem:[#allocation3 + $0xa18] sm:$0xf0]  ;;  %v6919_v8 = vor.u32 %v8154_v35, %v6916_v30  ;;  %v8136_v34 = vld [vmem:[#allocation3 + $0xa84] sm:$0xf] }
 0x1d8   :  { %5112 = vmatmul.bf16.vlgmr.msrb.gmra.mxu2 %v9855_v12  ;;  %5131 = vmatmul.bf16.vlgmr.msrb.gmra.mxu3 %v9856_v3  ;;  %v6791_v14 = vor.u32 %v8122_v56, %v6788_v0  ;;  %v6844_v12 = vld [vmem:[#allocation3 + $0xa88] sm:$0xf0]  ;;  %v8168_v3 = vld [vmem:[#allocation3 + $0xb84] sm:$0xf] }
 0x1d9   :  { %5182 = vmatpush.bf16.msra.mxu2 %v6951_v22  ;;  %5144 = vmatpush.bf16.msra.mxu0 %v6823_v6  ;;  %v6860_v6 = vld [vmem:[#allocation3 + $0xaa8] sm:$0xf0]  ;;  %v8228_v56 = vld [vmem:[#allocation3 + $0xd64] sm:$0xf] }
 0x1da   :  { %5163 = vmatpush.bf16.msra.mxu1 %v6887_v44  ;;  %5201 = vmatpush.bf16.msra.mxu3 %v7015_v10  ;;  %v6863_v39 = vor.u32 %v8140_v17, %v6860_v6  ;;  %v9858_v17 = vld [vmem:[#allocation82_spill] sm:$0xff]  ;;  %v8214_v6 = vld [vmem:[#allocation3 + $0xcf4] sm:$0xf] }
 0x1db   :  { %v4809_v21 = vpop.f32.mrf.mxu2  ;;  %v4828_v22 = vpop.f32.mrf.mxu3  ;;  %v7212_v0 = vld [vmem:[#allocation3 + $0xd68] sm:$0xf0] }
 0x1dc   :  { %v4810_v44 = vadd.f32 %v4809_v21, %v4791_v19  ;;  %v8170_v19 = vld [vmem:[#allocation3 + $0xb94] sm:$0xf] }
 0x1dd   :  { %5183 = vmatpush.bf16.msra.mxu2 %v6943_v1  ;;  %5145 = vmatpush.bf16.msra.mxu0 %v6815_v61  ;;  %v4792_v16 = vpop.f32.mrf.mxu1  ;;  %v6980_v1 = vld [vmem:[#allocation3 + $0xb98] sm:$0xf0]  ;;  %v8152_v61 = vld [vmem:[#allocation3 + $0xb04] sm:$0xf]  ;;  %v8198_v21 = vld [vmem:[#allocation3 + $0xc74] sm:$0xf] }
 0x1de   :  { %5164 = vmatpush.bf16.msra.mxu1 %v6879_v37  ;;  %5202 = vmatpush.bf16.msra.mxu3 %v7007_v33  ;;  %v4773_v10 = vpop.f32.mrf.mxu0  ;;  %v9407_v26 = vadd.f32 %v4828_v22, %v4810_v44  ;;  %v6908_v37 = vld [vmem:[#allocation3 + $0xb08] sm:$0xf0]  ;;  %v8120_v33 = vld [vmem:[#allocation3 + $0xa04] sm:$0xf]  ;;  %v6983_v50 = vor.u32 %v8170_v19, %v6980_v1  ;;  %v7092_v22 = vld [vmem:[#allocation3 + $0xc78] sm:$0xf0] }
 0x1df   :  { %v4793_v60 = vadd.f32 %v4792_v16, %v4773_v10  ;;  %v6911_v25 = vor.u32 %v8152_v61, %v6908_v37  ;;  %v6783_v44 = vor.u32 %v8120_v33, %v6780_v52  ;;  %v7156_v10 = vld [vmem:[#allocation3 + $0xcf8] sm:$0xf0]  ;;  %v8246_v16 = vld [vmem:[#allocation3 + $0xdf4] sm:$0xf]  ;;  %v7095_v30 = vor.u32 %v8198_v21, %v7092_v22  ;;  %v8196_v19 = vld [vmem:[#allocation3 + $0xc64] sm:$0xf] }
 0x1e0   :  { %v7159_v45 = vor.u32 %v8214_v6, %v7156_v10  ;;  %v7084_v1 = vld [vmem:[#allocation3 + $0xc68] sm:$0xf0]  ;;  %v8212_v61 = vld [vmem:[#allocation3 + $0xce4] sm:$0xf]  ;;  %v7268_v21 = vld [vmem:[#allocation3 + $0xdd8] sm:$0xf0] }
 0x1e1   :  { %5184 = vmatpush.bf16.msra.mxu2 %v6935_v32  ;;  %5146 = vmatpush.bf16.msra.mxu0 %v6807_v62  ;;  %v7276_v37 = vld [vmem:[#allocation3 + $0xde8] sm:$0xf0] }
 0x1e2   :  { %5165 = vmatpush.bf16.msra.mxu1 %v6871_v20  ;;  %5203 = vmatpush.bf16.msra.mxu3 %v6999_v38  ;;  %v8230_v20 = vld [vmem:[#allocation3 + $0xd74] sm:$0xf]  ;;  %v7220_v38 = vld [vmem:[#allocation3 + $0xd78] sm:$0xf0] }
 0x1e3   :  { %v4811_v5 = vpop.f32.mrf.mxu2  ;;  %v4830_v59 = vpop.f32.mrf.mxu3  ;;  %v7223_v35 = vor.u32 %v8230_v20, %v7220_v38  ;;  %v7076_v20 = vld [vmem:[#allocation3 + $0xc58] sm:$0xf0] }
 0x1e4   :  { %v4812_v32 = vadd.f32 %v4811_v5, %v4793_v60  ;;  %5079 = vmatmul.bf16.gmra.mxu0 %v9857_v46  ;;  %5098 = vmatmul.bf16.gmra.mxu1 %v9858_v17  ;;  %v7284_v60 = vld [vmem:[#allocation3 + $0xdf8] sm:$0xf0]  ;;  %v8210_v46 = vld [vmem:[#allocation3 + $0xcd4] sm:$0xf] }
 0x1e5   :  { %5185 = vmatpush.bf16.msra.mxu2 %v6927_v11  ;;  %5147 = vmatpush.bf16.msra.mxu0 %v6799_v51  ;;  %v4795_v55 = vpop.f32.mrf.mxu1  ;;  %v6847_v11 = vor.u32 %v8136_v34, %v6844_v12  ;;  %v6975_v51 = vor.u32 %v8168_v3, %v6972_v28  ;;  %v7287_v47 = vor.u32 %v8246_v16, %v7284_v60  ;;  %v8226_v12 = vld [vmem:[#allocation3 + $0xd54] sm:$0xf]  ;;  %v7140_v17 = vld [vmem:[#allocation3 + $0xcd8] sm:$0xf0]  ;;  %v8192_v60 = vld [vmem:[#allocation3 + $0xc44] sm:$0xf] }
 0x1e6   :  { %5166 = vmatpush.bf16.msra.mxu1 %v6863_v39  ;;  %5204 = vmatpush.bf16.msra.mxu3 %v6991_v29  ;;  %v4776_v62 = vpop.f32.mrf.mxu0  ;;  %v9411_v48 = vadd.f32 %v4830_v59, %v4812_v32  ;;  %v9859_v39 = vld [vmem:[#allocation83_spill] sm:$0xff]  ;;  %v9860_v29 = vld [vmem:[#allocation84_spill] sm:$0xff]  ;;  %v7087_v34 = vor.u32 %v8196_v19, %v7084_v1  ;;  %v7143_v10 = vor.u32 %v8210_v46, %v7140_v17  ;;  %v9861_v1 = vld [vmem:[#allocation85_spill] sm:$0xff] }
 0x1e7   :  { %v4796_v40 = vadd.f32 %v4795_v55, %v4776_v62  ;;  %v7204_v55 = vld [vmem:[#allocation3 + $0xd58] sm:$0xf0]  ;;  %v8194_v28 = vld [vmem:[#allocation3 + $0xc54] sm:$0xf]  ;;  %v8220_v46 = vld [vmem:[#allocation3 + $0xd24] sm:$0xf] }
 0x1e8   :  { %5117 = vmatmul.bf16.gmra.mxu2 %v9859_v39  ;;  %5136 = vmatmul.bf16.gmra.mxu3 %v9860_v29  ;;  %v7207_v22 = vor.u32 %v8226_v12, %v7204_v55  ;;  %v7079_v6 = vor.u32 %v8194_v28, %v7076_v20  ;;  %v9864_v55 = vld [vmem:[#allocation88_spill] sm:$0xff]  ;;  %v7180_v17 = vld [vmem:[#allocation3 + $0xd28] sm:$0xf0] }
 0x1e9   :  { %5186 = vmatpush.bf16.msra.mxu2 %v6919_v8  ;;  %5148 = vmatpush.bf16.msra.mxu0 %v6791_v14  ;;  %v7148_v8 = vld [vmem:[#allocation3 + $0xce8] sm:$0xf0]  ;;  %v8244_v14 = vld [vmem:[#allocation3 + $0xde4] sm:$0xf] }
 0x1ea   :  { %5167 = vmatpush.bf16.msra.mxu1 %v6855_v58  ;;  %5205 = vmatpush.bf16.msra.mxu3 %v6983_v50  ;;  %v7215_v50 = vor.u32 %v8228_v56, %v7212_v0  ;;  %v7151_v32 = vor.u32 %v8212_v61, %v7148_v8  ;;  %v7279_v62 = vor.u32 %v8244_v14, %v7276_v37  ;;  %v7260_v56 = vld [vmem:[#allocation3 + $0xdc8] sm:$0xf0]  ;;  %v8222_v37 = vld [vmem:[#allocation3 + $0xd34] sm:$0xf] }
 0x1eb   :  { %v4814_v33 = vpop.f32.mrf.mxu2  ;;  %v4833_v52 = vpop.f32.mrf.mxu3  ;;  %v9862_v61 = vld [vmem:[#allocation86_spill] sm:$0xff] }
 0x1ec   :  { %v4815_v5 = vadd.f32 %v4814_v33, %v4796_v40  ;;  %v8242_v40 = vld [vmem:[#allocation3 + $0xdd4] sm:$0xf]  ;;  %v7188_v33 = vld [vmem:[#allocation3 + $0xd38] sm:$0xf0] }
 0x1ed   :  { %5187 = vmatpush.bf16.msra.mxu2 %v6911_v25  ;;  %5149 = vmatpush.bf16.msra.mxu0 %v6783_v44  ;;  %v4797_v58 = vpop.f32.mrf.mxu1  ;;  %v8224_v25 = vld [vmem:[#allocation3 + $0xd44] sm:$0xf]  ;;  %v7196_v44 = vld [vmem:[#allocation3 + $0xd48] sm:$0xf0]  ;;  %v7271_v16 = vor.u32 %v8242_v40, %v7268_v21  ;;  %v7191_v28 = vor.u32 %v8222_v37, %v7188_v33  ;;  %v8202_v37 = vld [vmem:[#allocation3 + $0xc94] sm:$0xf] }
 0x1ee   :  { %5168 = vmatpush.bf16.msra.mxu1 %v6847_v11  ;;  %5206 = vmatpush.bf16.msra.mxu3 %v6975_v51  ;;  %v4778_v59 = vpop.f32.mrf.mxu0  ;;  %v9415_v38 = vadd.f32 %v4833_v52, %v4815_v5  ;;  %v7068_v11 = vld [vmem:[#allocation3 + $0xc48] sm:$0xf0]  ;;  %v8208_v51 = vld [vmem:[#allocation3 + $0xcc4] sm:$0xf]  ;;  %v7199_v8 = vor.u32 %v8224_v25, %v7196_v44  ;;  %v7108_v33 = vld [vmem:[#allocation3 + $0xc98] sm:$0xf0] }
 0x1ef   :  { %v4798_v3 = vadd.f32 %v4797_v58, %v4778_v59  ;;  %v7071_v14 = vor.u32 %v8192_v60, %v7068_v11  ;;  %v8190_v58 = vld [vmem:[#allocation3 + $0xc34] sm:$0xf]  ;;  %v8204_v25 = vld [vmem:[#allocation3 + $0xca4] sm:$0xf]  ;;  %v7244_v11 = vld [vmem:[#allocation3 + $0xda8] sm:$0xf0] }
 0x1f0   :  { %v8236_v60 = vld [vmem:[#allocation3 + $0xda4] sm:$0xf] }
 0x1f1   :  { %5256 = vmatpush.bf16.msrb.mxu2 %v7223_v35  ;;  %5218 = vmatpush.bf16.msrb.mxu0 %v7095_v30  ;;  %v7132_v35 = vld [vmem:[#allocation3 + $0xcc8] sm:$0xf0]  ;;  %v8240_v30 = vld [vmem:[#allocation3 + $0xdc4] sm:$0xf] }
 0x1f2   :  { %5237 = vmatpush.bf16.msrb.mxu1 %v7159_v45  ;;  %5275 = vmatpush.bf16.msrb.mxu3 %v7287_v47  ;;  %v7135_v5 = vor.u32 %v8208_v51, %v7132_v35  ;;  %v7263_v59 = vor.u32 %v8240_v30, %v7260_v56  ;;  %v7183_v30 = vor.u32 %v8220_v46, %v7180_v17  ;;  %v8232_v46 = vld [vmem:[#allocation3 + $0xd84] sm:$0xf] }
 0x1f3   :  { %v4816_v39 = vpop.f32.mrf.mxu2  ;;  %v4835_v29 = vpop.f32.mrf.mxu3 }
 0x1f4   :  { %v4817_v0 = vadd.f32 %v4816_v39, %v4798_v3  ;;  %5150 = vmatmul.bf16.vlgmr.msra.gmra.mxu0 %v9861_v1  ;;  %5169 = vmatmul.bf16.vlgmr.msra.gmra.mxu1 %v9862_v61  ;;  %v7124_v3 = vld [vmem:[#allocation3 + $0xcb8] sm:$0xf0] }
 0x1f5   :  { %5257 = vmatpush.bf16.msrb.mxu2 %v7215_v50  ;;  %5219 = vmatpush.bf16.msrb.mxu0 %v7087_v34  ;;  %v4866_v47 = vpop.f32.mrf.mxu1  ;;  %v7060_v50 = vld [vmem:[#allocation3 + $0xc38] sm:$0xf0]  ;;  %v8206_v34 = vld [vmem:[#allocation3 + $0xcb4] sm:$0xf] }
 0x1f6   :  { %5238 = vmatpush.bf16.msrb.mxu1 %v7151_v32  ;;  %5276 = vmatpush.bf16.msrb.mxu3 %v7279_v62  ;;  %v4847_v45 = vpop.f32.mrf.mxu0  ;;  %v9420_v52 = vadd.f32 %v4835_v29, %v4817_v0  ;;  %v7252_v32 = vld [vmem:[#allocation3 + $0xdb8] sm:$0xf0]  ;;  %v9863_v62 = vld [vmem:[#allocation87_spill] sm:$0xff]  ;;  %v7063_v20 = vor.u32 %v8190_v58, %v7060_v50  ;;  %v7127_v40 = vor.u32 %v8206_v34, %v7124_v3  ;;  %v7164_v34 = vld [vmem:[#allocation3 + $0xd08] sm:$0xf0] }
 0x1f7   :  { %v4848_v19 = vadd.f32 %v4847_v45, %v9407_v26  ;;  %v8238_v26 = vld [vmem:[#allocation3 + $0xdb4] sm:$0xf]  ;;  %v7172_v1 = vld [vmem:[#allocation3 + $0xd18] sm:$0xf0]  ;;  %v7036_v3 = vld [vmem:[#allocation3 + $0xc08] sm:$0xf0] }
 0x1f8   :  { %5188 = vmatmul.bf16.vlgmr.msra.gmra.mxu2 %v9863_v62  ;;  %5207 = vmatmul.bf16.vlgmr.msra.gmra.mxu3 %v9864_v55  ;;  %v7255_v21 = vor.u32 %v8238_v26, %v7252_v32  ;;  %v7111_v62 = vor.u32 %v8202_v37, %v7108_v33  ;;  %v8292_v37 = vld [vmem:[#allocation3 + $0xf64] sm:$0xf]  ;;  %v7468_v33 = vld [vmem:[#allocation3 + $0xf68] sm:$0xf0] }
 0x1f9   :  { %5258 = vmatpush.bf16.msrb.mxu2 %v7207_v22  ;;  %5220 = vmatpush.bf16.msrb.mxu0 %v7079_v6  ;;  %v4867_v12 = vadd.f32 %v4866_v47, %v4848_v19  ;;  %v8188_v22 = vld [vmem:[#allocation3 + $0xc24] sm:$0xf]  ;;  %v7052_v6 = vld [vmem:[#allocation3 + $0xc28] sm:$0xf0]  ;;  %v7247_v47 = vor.u32 %v8236_v60, %v7244_v11  ;;  %v8218_v19 = vld [vmem:[#allocation3 + $0xd14] sm:$0xf] }
 0x1fa   :  { %5239 = vmatpush.bf16.msrb.mxu1 %v7143_v10  ;;  %5277 = vmatpush.bf16.msrb.mxu3 %v7271_v16  ;;  %v7116_v16 = vld [vmem:[#allocation3 + $0xca8] sm:$0xf0]  ;;  %v7055_v56 = vor.u32 %v8188_v22, %v7052_v6  ;;  %v7175_v58 = vor.u32 %v8218_v19, %v7172_v1  ;;  %v8294_v6 = vld [vmem:[#allocation3 + $0xf74] sm:$0xf]  ;;  %v7348_v11 = vld [vmem:[#allocation3 + $0xe78] sm:$0xf0] }
 0x1fb   :  { %v4885_v44 = vpop.f32.mrf.mxu2  ;;  %v4904_v10 = vpop.f32.mrf.mxu3  ;;  %v7119_v45 = vor.u32 %v8204_v25, %v7116_v16  ;;  %v7228_v22 = vld [vmem:[#allocation3 + $0xd88] sm:$0xf0]  ;;  %v7476_v25 = vld [vmem:[#allocation3 + $0xf78] sm:$0xf0]  ;;  %v9866_v16 = vld [vmem:[#allocation35_spill] sm:$0xff] }
 0x1fc   :  { %v4886_v51 = vadd.f32 %v4885_v44, %v4867_v12  ;;  %v8184_v12 = vld [vmem:[#allocation3 + $0xc04] sm:$0xf]  ;;  %v8262_v60 = vld [vmem:[#allocation3 + $0xe74] sm:$0xf]  ;;  %v7231_v19 = vor.u32 %v8232_v46, %v7228_v22  ;;  %v9867_v1 = vld [vmem:[#allocation70_spill] sm:$0xff] }
 0x1fd   :  { %5259 = vmatpush.bf16.msrb.mxu2 %v7199_v8  ;;  %5221 = vmatpush.bf16.msrb.mxu0 %v7071_v14  ;;  %v4868_v29 = vpop.f32.mrf.mxu1  ;;  %v8186_v8 = vld [vmem:[#allocation3 + $0xc14] sm:$0xf]  ;;  %v7044_v14 = vld [vmem:[#allocation3 + $0xc18] sm:$0xf0] }
 0x1fe   :  { %5240 = vmatpush.bf16.msrb.mxu1 %v7135_v5  ;;  %5278 = vmatpush.bf16.msrb.mxu3 %v7263_v59  ;;  %v4849_v39 = vpop.f32.mrf.mxu0  ;;  %v9425_v0 = vadd.f32 %v4904_v10, %v4886_v51  ;;  %v8234_v5 = vld [vmem:[#allocation3 + $0xd94] sm:$0xf]  ;;  %v7236_v59 = vld [vmem:[#allocation3 + $0xd98] sm:$0xf0]  ;;  %v7047_v50 = vor.u32 %v8186_v8, %v7044_v14  ;;  %v9865_v10 = vld [vmem:[#allocation38_spill] sm:$0xff]  ;;  %v7479_v8 = vor.u32 %v8294_v6, %v7476_v25 }
 0x1ff   :  { %v4850_v35 = vadd.f32 %v4849_v39, %v9411_v48  ;;  %v8216_v48 = vld [vmem:[#allocation3 + $0xd04] sm:$0xf]  ;;  %v7239_v55 = vor.u32 %v8234_v5, %v7236_v59  ;;  %v8278_v51 = vld [vmem:[#allocation3 + $0xef4] sm:$0xf]  ;;  %v7351_v14 = vor.u32 %v8262_v60, %v7348_v11  ;;  %v7460_v6 = vld [vmem:[#allocation3 + $0xf58] sm:$0xf0] }
 0x200   :  { %v8258_v25 = vld [vmem:[#allocation3 + $0xe54] sm:$0xf]  ;;  %v7396_v11 = vld [vmem:[#allocation3 + $0xed8] sm:$0xf0] }
 0x201   :  { %5260 = vmatpush.bf16.msrb.mxu2 %v7191_v28  ;;  %5222 = vmatpush.bf16.msrb.mxu0 %v7063_v20  ;;  %v4869_v61 = vadd.f32 %v4868_v29, %v4850_v35  ;;  %v8200_v28 = vld [vmem:[#allocation3 + $0xc84] sm:$0xf]  ;;  %v7100_v20 = vld [vmem:[#allocation3 + $0xc88] sm:$0xf0]  ;;  %v7167_v29 = vor.u32 %v8216_v48, %v7164_v34  ;;  %v7039_v35 = vor.u32 %v8184_v12, %v7036_v3 }
 0x202   :  { %5241 = vmatpush.bf16.msrb.mxu1 %v7127_v40  ;;  %5279 = vmatpush.bf16.msrb.mxu3 %v7255_v21  ;;  %v8260_v48 = vld [vmem:[#allocation3 + $0xe64] sm:$0xf]  ;;  %v7404_v34 = vld [vmem:[#allocation3 + $0xee8] sm:$0xf0] }
 0x203   :  { %v4887_v26 = vpop.f32.mrf.mxu2  ;;  %v4906_v32 = vpop.f32.mrf.mxu3  ;;  %v8308_v12 = vld [vmem:[#allocation3 + $0xfe4] sm:$0xf]  ;;  %v7532_v3 = vld [vmem:[#allocation3 + $0xfe8] sm:$0xf0] }
 0x204   :  { %v4888_v17 = vadd.f32 %v4887_v26, %v4869_v61  ;;  %5155 = vmatmul.bf16.gmra.mxu0 %v9865_v10  ;;  %5174 = vmatmul.bf16.gmra.mxu1 %v9866_v16  ;;  %v9868_v61 = vld [vmem:[#allocation42_spill] sm:$0xff]  ;;  %v7535_v22 = vor.u32 %v8308_v12, %v7532_v3  ;;  %v8274_v16 = vld [vmem:[#allocation3 + $0xed4] sm:$0xf] }
 0x205   :  { %5261 = vmatpush.bf16.msrb.mxu2 %v7183_v30  ;;  %5223 = vmatpush.bf16.msrb.mxu0 %v7055_v56  ;;  %v4871_v21 = vpop.f32.mrf.mxu1  ;;  %v7412_v30 = vld [vmem:[#allocation3 + $0xef8] sm:$0xf0]  ;;  %v8310_v56 = vld [vmem:[#allocation3 + $0xff4] sm:$0xf] }
 0x206   :  { %5242 = vmatpush.bf16.msrb.mxu1 %v7119_v45  ;;  %5280 = vmatpush.bf16.msrb.mxu3 %v7247_v47  ;;  %v4852_v40 = vpop.f32.mrf.mxu0  ;;  %v9430_v39 = vadd.f32 %v4906_v32, %v4888_v17  ;;  %v7540_v45 = vld [vmem:[#allocation3 + $0xff8] sm:$0xf0]  ;;  %v7415_v5 = vor.u32 %v8278_v51, %v7412_v30  ;;  %v8290_v17 = vld [vmem:[#allocation3 + $0xf54] sm:$0xf] }
 0x207   :  { %v4853_v44 = vadd.f32 %v4852_v40, %v9415_v38  ;;  %v7103_v38 = vor.u32 %v8200_v28, %v7100_v20  ;;  %v7543_v59 = vor.u32 %v8310_v56, %v7540_v45  ;;  %v7471_v20 = vor.u32 %v8292_v37, %v7468_v33  ;;  %v8306_v51 = vld [vmem:[#allocation3 + $0xfd4] sm:$0xf]  ;;  %v7452_v56 = vld [vmem:[#allocation3 + $0xf48] sm:$0xf0]  ;;  %v8304_v37 = vld [vmem:[#allocation3 + $0xfc4] sm:$0xf] }
 0x208   :  { %5193 = vmatmul.bf16.gmra.mxu2 %v9867_v1  ;;  %5212 = vmatmul.bf16.gmra.mxu3 %v9868_v61  ;;  %v7399_v45 = vor.u32 %v8274_v16, %v7396_v11  ;;  %v8272_v1 = vld [vmem:[#allocation3 + $0xec4] sm:$0xf]  ;;  %v7516_v33 = vld [vmem:[#allocation3 + $0xfc8] sm:$0xf0] }
 0x209   :  { %5262 = vmatpush.bf16.msrb.mxu2 %v7175_v58  ;;  %5224 = vmatpush.bf16.msrb.mxu0 %v7047_v50  ;;  %v4872_v47 = vadd.f32 %v4871_v21, %v4853_v44  ;;  %v7340_v58 = vld [vmem:[#allocation3 + $0xe68] sm:$0xf0]  ;;  %v8276_v50 = vld [vmem:[#allocation3 + $0xee4] sm:$0xf]  ;;  %v7332_v44 = vld [vmem:[#allocation3 + $0xe58] sm:$0xf0] }
 0x20a   :  { %5243 = vmatpush.bf16.msrb.mxu1 %v7111_v62  ;;  %5281 = vmatpush.bf16.msrb.mxu3 %v7239_v55  ;;  %v7343_v46 = vor.u32 %v8260_v48, %v7340_v58  ;;  %v7407_v21 = vor.u32 %v8276_v50, %v7404_v34  ;;  %v7335_v30 = vor.u32 %v8258_v25, %v7332_v44  ;;  %v9869_v50 = vld [vmem:[#allocation40_spill] sm:$0xff]  ;;  %v9870_v34 = vld [vmem:[#allocation89_spill] sm:$0xff]  ;;  %v9872_v25 = vld [vmem:[#allocation91_spill] sm:$0xff] }
 0x20b   :  { %v4890_v26 = vpop.f32.mrf.mxu2  ;;  %v4909_v32 = vpop.f32.mrf.mxu3  ;;  %v7436_v11 = vld [vmem:[#allocation3 + $0xf28] sm:$0xf0] }
 0x20c   :  { %v4891_v62 = vadd.f32 %v4890_v26, %v4872_v47  ;;  %v8286_v26 = vld [vmem:[#allocation3 + $0xf34] sm:$0xf] }
 0x20d   :  { %5263 = vmatpush.bf16.msrb.mxu2 %v7167_v29  ;;  %5225 = vmatpush.bf16.msrb.mxu0 %v7039_v35  ;;  %v4873_v28 = vpop.f32.mrf.mxu1  ;;  %v7524_v29 = vld [vmem:[#allocation3 + $0xfd8] sm:$0xf0]  ;;  %v7463_v35 = vor.u32 %v8290_v17, %v7460_v6  ;;  %v8270_v17 = vld [vmem:[#allocation3 + $0xeb4] sm:$0xf]  ;;  %v9871_v6 = vld [vmem:[#allocation90_spill] sm:$0xff] }
 0x20e   :  { %5244 = vmatpush.bf16.msrb.mxu1 %v7103_v38  ;;  %5282 = vmatpush.bf16.msrb.mxu3 %v7231_v19  ;;  %v4854_v55 = vpop.f32.mrf.mxu0  ;;  %v9435_v10 = vadd.f32 %v4909_v32, %v4891_v62  ;;  %v7527_v47 = vor.u32 %v8306_v51, %v7524_v29  ;;  %v8256_v38 = vld [vmem:[#allocation3 + $0xe44] sm:$0xf]  ;;  %v7324_v19 = vld [vmem:[#allocation3 + $0xe48] sm:$0xf0]  ;;  %v7444_v32 = vld [vmem:[#allocation3 + $0xf38] sm:$0xf0] }
 0x20f   :  { %v4855_v40 = vadd.f32 %v4854_v55, %v9420_v52  ;;  %v8288_v52 = vld [vmem:[#allocation3 + $0xf44] sm:$0xf]  ;;  %v7327_v3 = vor.u32 %v8256_v38, %v7324_v19  ;;  %v7447_v44 = vor.u32 %v8286_v26, %v7444_v32  ;;  %v7500_v19 = vld [vmem:[#allocation3 + $0xfa8] sm:$0xf0]  ;;  %v8266_v26 = vld [vmem:[#allocation3 + $0xe94] sm:$0xf] }
 0x210   :  { %v7455_v12 = vor.u32 %v8288_v52, %v7452_v56  ;;  %v8268_v52 = vld [vmem:[#allocation3 + $0xea4] sm:$0xf]  ;;  %v7364_v32 = vld [vmem:[#allocation3 + $0xe98] sm:$0xf0] }
 0x211   :  { %5332 = vmatpush.bf16.msra.mxu2 %v7479_v8  ;;  %5294 = vmatpush.bf16.msra.mxu0 %v7351_v14  ;;  %v4874_v60 = vadd.f32 %v4873_v28, %v4855_v40  ;;  %v7388_v14 = vld [vmem:[#allocation3 + $0xec8] sm:$0xf0]  ;;  %v7519_v28 = vor.u32 %v8304_v37, %v7516_v33  ;;  %v8300_v38 = vld [vmem:[#allocation3 + $0xfa4] sm:$0xf] }
 0x212   :  { %5313 = vmatpush.bf16.msra.mxu1 %v7415_v5  ;;  %5351 = vmatpush.bf16.msra.mxu3 %v7543_v59  ;;  %v7391_v55 = vor.u32 %v8272_v1, %v7388_v14 }
 0x213   :  { %v4892_v61 = vpop.f32.mrf.mxu2  ;;  %v4911_v8 = vpop.f32.mrf.mxu3 }
 0x214   :  { %v4893_v5 = vadd.f32 %v4892_v61, %v4874_v60  ;;  %5226 = vmatmul.bf16.vlgmr.msrb.gmra.mxu0 %v9869_v50  ;;  %5245 = vmatmul.bf16.vlgmr.msrb.gmra.mxu1 %v9870_v34  ;;  %v8284_v60 = vld [vmem:[#allocation3 + $0xf24] sm:$0xf]  ;;  %v7428_v50 = vld [vmem:[#allocation3 + $0xf18] sm:$0xf0] }
 0x215   :  { %5333 = vmatpush.bf16.msra.mxu2 %v7471_v20  ;;  %5295 = vmatpush.bf16.msra.mxu0 %v7343_v46  ;;  %v4942_v48 = vpop.f32.mrf.mxu1  ;;  %v8254_v20 = vld [vmem:[#allocation3 + $0xe34] sm:$0xf]  ;;  %v7316_v46 = vld [vmem:[#allocation3 + $0xe38] sm:$0xf0]  ;;  %v7439_v37 = vor.u32 %v8284_v60, %v7436_v11  ;;  %v8296_v60 = vld [vmem:[#allocation3 + $0xf84] sm:$0xf] }
 0x216   :  { %5314 = vmatpush.bf16.msra.mxu1 %v7407_v21  ;;  %5352 = vmatpush.bf16.msra.mxu3 %v7535_v22  ;;  %v4923_v59 = vpop.f32.mrf.mxu0  ;;  %v9440_v62 = vadd.f32 %v4911_v8, %v4893_v5  ;;  %v7380_v21 = vld [vmem:[#allocation3 + $0xeb8] sm:$0xf0]  ;;  %v7319_v16 = vor.u32 %v8254_v20, %v7316_v46 }
 0x217   :  { %v4924_v58 = vadd.f32 %v4923_v59, %v9425_v0  ;;  %v8302_v0 = vld [vmem:[#allocation3 + $0xfb4] sm:$0xf]  ;;  %v7508_v22 = vld [vmem:[#allocation3 + $0xfb8] sm:$0xf0]  ;;  %v7383_v51 = vor.u32 %v8270_v17, %v7380_v21  ;;  %v7420_v17 = vld [vmem:[#allocation3 + $0xf08] sm:$0xf0] }
 0x218   :  { %5264 = vmatmul.bf16.vlgmr.msrb.gmra.mxu2 %v9871_v6  ;;  %5283 = vmatmul.bf16.vlgmr.msrb.gmra.mxu3 %v9872_v25  ;;  %v7511_v29 = vor.u32 %v8302_v0, %v7508_v22  ;;  %v7292_v21 = vld [vmem:[#allocation3 + $0xe08] sm:$0xf0]  ;;  %v7367_v6 = vor.u32 %v8266_v26, %v7364_v32  ;;  %v8356_v26 = vld [vmem:[#allocation3 + $0x1164] sm:$0xf] }
 0x219   :  { %5334 = vmatpush.bf16.msra.mxu2 %v7463_v35  ;;  %5296 = vmatpush.bf16.msra.mxu0 %v7335_v30  ;;  %v4943_v40 = vadd.f32 %v4942_v48, %v4924_v58  ;;  %v8252_v35 = vld [vmem:[#allocation3 + $0xe24] sm:$0xf]  ;;  %v7308_v30 = vld [vmem:[#allocation3 + $0xe28] sm:$0xf0]  ;;  %v7503_v48 = vor.u32 %v8300_v38, %v7500_v19  ;;  %v8282_v58 = vld [vmem:[#allocation3 + $0xf14] sm:$0xf] }
 0x21a   :  { %5315 = vmatpush.bf16.msra.mxu1 %v7399_v45  ;;  %5353 = vmatpush.bf16.msra.mxu3 %v7527_v47  ;;  %v7372_v47 = vld [vmem:[#allocation3 + $0xea8] sm:$0xf0]  ;;  %v7311_v33 = vor.u32 %v8252_v35, %v7308_v30  ;;  %v7431_v20 = vor.u32 %v8282_v58, %v7428_v50  ;;  %v8358_v30 = vld [vmem:[#allocation3 + $0x1174] sm:$0xf]  ;;  %v7604_v19 = vld [vmem:[#allocation3 + $0x1078] sm:$0xf0] }
 0x21b   :  { %v4961_v56 = vpop.f32.mrf.mxu2  ;;  %v4980_v45 = vpop.f32.mrf.mxu3  ;;  %v7375_v59 = vor.u32 %v8268_v52, %v7372_v47  ;;  %v7484_v35 = vld [vmem:[#allocation3 + $0xf88] sm:$0xf0]  ;;  %v7732_v52 = vld [vmem:[#allocation3 + $0x1178] sm:$0xf0]  ;;  %v9874_v47 = vld [vmem:[#allocation47_spill] sm:$0xff] }
 0x21c   :  { %v4962_v1 = vadd.f32 %v4961_v56, %v4943_v40  ;;  %v8248_v40 = vld [vmem:[#allocation3 + $0xe04] sm:$0xf]  ;;  %v8326_v38 = vld [vmem:[#allocation3 + $0x1074] sm:$0xf]  ;;  %v7487_v58 = vor.u32 %v8296_v60, %v7484_v35  ;;  %v9875_v50 = vld [vmem:[#allocation92_spill] sm:$0xff] }
 0x21d   :  { %5335 = vmatpush.bf16.msra.mxu2 %v7455_v12  ;;  %5297 = vmatpush.bf16.msra.mxu0 %v7327_v3  ;;  %v4944_v8 = vpop.f32.mrf.mxu1  ;;  %v8250_v12 = vld [vmem:[#allocation3 + $0xe14] sm:$0xf]  ;;  %v7300_v3 = vld [vmem:[#allocation3 + $0xe18] sm:$0xf0]  ;;  %v7724_v32 = vld [vmem:[#allocation3 + $0x1168] sm:$0xf0] }
 0x21e   :  { %5316 = vmatpush.bf16.msra.mxu1 %v7391_v55  ;;  %5354 = vmatpush.bf16.msra.mxu3 %v7519_v28  ;;  %v4925_v61 = vpop.f32.mrf.mxu0  ;;  %v9445_v5 = vadd.f32 %v4980_v45, %v4962_v1  ;;  %v8298_v55 = vld [vmem:[#allocation3 + $0xf94] sm:$0xf]  ;;  %v7492_v28 = vld [vmem:[#allocation3 + $0xf98] sm:$0xf0]  ;;  %v7303_v46 = vor.u32 %v8250_v12, %v7300_v3  ;;  %v9873_v45 = vld [vmem:[#allocation46_spill] sm:$0xff]  ;;  %v7735_v12 = vor.u32 %v8358_v30, %v7732_v52 }
 0x21f   :  { %v4926_v14 = vadd.f32 %v4925_v61, %v9430_v39  ;;  %v8280_v39 = vld [vmem:[#allocation3 + $0xf04] sm:$0xf]  ;;  %v7495_v25 = vor.u32 %v8298_v55, %v7492_v28  ;;  %v8342_v1 = vld [vmem:[#allocation3 + $0x10f4] sm:$0xf]  ;;  %v7607_v3 = vor.u32 %v8326_v38, %v7604_v19  ;;  %v7716_v30 = vld [vmem:[#allocation3 + $0x1158] sm:$0xf0] }
 0x220   :  { %v8322_v52 = vld [vmem:[#allocation3 + $0x1054] sm:$0xf]  ;;  %v7652_v19 = vld [vmem:[#allocation3 + $0x10d8] sm:$0xf0] }
 0x221   :  { %5336 = vmatpush.bf16.msra.mxu2 %v7447_v44  ;;  %5298 = vmatpush.bf16.msra.mxu0 %v7319_v16  ;;  %v4945_v34 = vadd.f32 %v4944_v8, %v4926_v14  ;;  %v8264_v44 = vld [vmem:[#allocation3 + $0xe84] sm:$0xf]  ;;  %v7356_v16 = vld [vmem:[#allocation3 + $0xe88] sm:$0xf0]  ;;  %v7423_v8 = vor.u32 %v8280_v39, %v7420_v17  ;;  %v7295_v14 = vor.u32 %v8248_v40, %v7292_v21 }
 0x222   :  { %5317 = vmatpush.bf16.msra.mxu1 %v7383_v51  ;;  %5355 = vmatpush.bf16.msra.mxu3 %v7511_v29  ;;  %v8324_v39 = vld [vmem:[#allocation3 + $0x1064] sm:$0xf]  ;;  %v7660_v17 = vld [vmem:[#allocation3 + $0x10e8] sm:$0xf0] }
 0x223   :  { %v4963_v0 = vpop.f32.mrf.mxu2  ;;  %v4982_v22 = vpop.f32.mrf.mxu3  ;;  %v8372_v40 = vld [vmem:[#allocation3 + $0x11e4] sm:$0xf]  ;;  %v7788_v21 = vld [vmem:[#allocation3 + $0x11e8] sm:$0xf0] }
 0x224   :  { %v4964_v11 = vadd.f32 %v4963_v0, %v4945_v34  ;;  %5231 = vmatmul.bf16.gmra.mxu0 %v9873_v45  ;;  %5250 = vmatmul.bf16.gmra.mxu1 %v9874_v47  ;;  %v9876_v34 = vld [vmem:[#allocation93_spill] sm:$0xff]  ;;  %v7791_v35 = vor.u32 %v8372_v40, %v7788_v21  ;;  %v8338_v47 = vld [vmem:[#allocation3 + $0x10d4] sm:$0xf]  ;;  %v7700_v21 = vld [vmem:[#allocation3 + $0x1138] sm:$0xf0] }
 0x225   :  { %5337 = vmatpush.bf16.msra.mxu2 %v7439_v37  ;;  %5299 = vmatpush.bf16.msra.mxu0 %v7311_v33  ;;  %v4947_v29 = vpop.f32.mrf.mxu1  ;;  %v7668_v37 = vld [vmem:[#allocation3 + $0x10f8] sm:$0xf0]  ;;  %v8374_v33 = vld [vmem:[#allocation3 + $0x11f4] sm:$0xf] }
 0x226   :  { %5318 = vmatpush.bf16.msra.mxu1 %v7375_v59  ;;  %5356 = vmatpush.bf16.msra.mxu3 %v7503_v48  ;;  %v4928_v51 = vpop.f32.mrf.mxu0  ;;  %v9450_v61 = vadd.f32 %v4982_v22, %v4964_v11  ;;  %v7796_v59 = vld [vmem:[#allocation3 + $0x11f8] sm:$0xf0]  ;;  %v7671_v55 = vor.u32 %v8342_v1, %v7668_v37  ;;  %v8354_v11 = vld [vmem:[#allocation3 + $0x1154] sm:$0xf] }
 0x227   :  { %v4929_v56 = vadd.f32 %v4928_v51, %v9435_v10  ;;  %v7359_v10 = vor.u32 %v8264_v44, %v7356_v16  ;;  %v7799_v28 = vor.u32 %v8374_v33, %v7796_v59  ;;  %v7727_v16 = vor.u32 %v8356_v26, %v7724_v32  ;;  %v8370_v1 = vld [vmem:[#allocation3 + $0x11d4] sm:$0xf]  ;;  %v7708_v33 = vld [vmem:[#allocation3 + $0x1148] sm:$0xf0]  ;;  %v8368_v26 = vld [vmem:[#allocation3 + $0x11c4] sm:$0xf] }
 0x228   :  { %5269 = vmatmul.bf16.gmra.mxu2 %v9875_v50  ;;  %5288 = vmatmul.bf16.gmra.mxu3 %v9876_v34  ;;  %v7655_v59 = vor.u32 %v8338_v47, %v7652_v19  ;;  %v8336_v50 = vld [vmem:[#allocation3 + $0x10c4] sm:$0xf]  ;;  %v7772_v32 = vld [vmem:[#allocation3 + $0x11c8] sm:$0xf0]  ;;  %v8350_v40 = vld [vmem:[#allocation3 + $0x1134] sm:$0xf] }
 0x229   :  { %5338 = vmatpush.bf16.msra.mxu2 %v7431_v20  ;;  %5300 = vmatpush.bf16.msra.mxu0 %v7303_v46  ;;  %v4948_v48 = vadd.f32 %v4947_v29, %v4929_v56  ;;  %v7596_v20 = vld [vmem:[#allocation3 + $0x1068] sm:$0xf0]  ;;  %v8340_v46 = vld [vmem:[#allocation3 + $0x10e4] sm:$0xf]  ;;  %v7588_v56 = vld [vmem:[#allocation3 + $0x1058] sm:$0xf0] }
 0x22a   :  { %5319 = vmatpush.bf16.msra.mxu1 %v7367_v6  ;;  %5357 = vmatpush.bf16.msra.mxu3 %v7495_v25  ;;  %v7599_v60 = vor.u32 %v8324_v39, %v7596_v20  ;;  %v7663_v29 = vor.u32 %v8340_v46, %v7660_v17  ;;  %v7591_v37 = vor.u32 %v8322_v52, %v7588_v56  ;;  %v8316_v56 = vld [vmem:[#allocation3 + $0x1024] sm:$0xf]  ;;  %v7564_v47 = vld [vmem:[#allocation3 + $0x1028] sm:$0xf0] }
 0x22b   :  { %v4966_v0 = vpop.f32.mrf.mxu2  ;;  %v4985_v22 = vpop.f32.mrf.mxu3 }
 0x22c   :  { %v4967_v6 = vadd.f32 %v4966_v0, %v4948_v48 }
 0x22d   :  { %5339 = vmatpush.bf16.msra.mxu2 %v7423_v8  ;;  %5301 = vmatpush.bf16.msra.mxu0 %v7295_v14  ;;  %v4949_v44 = vpop.f32.mrf.mxu1  ;;  %v7780_v8 = vld [vmem:[#allocation3 + $0x11d8] sm:$0xf0]  ;;  %v7719_v14 = vor.u32 %v8354_v11, %v7716_v30 }
 0x22e   :  { %5320 = vmatpush.bf16.msra.mxu1 %v7359_v10  ;;  %5358 = vmatpush.bf16.msra.mxu3 %v7487_v58  ;;  %v4930_v25 = vpop.f32.mrf.mxu0  ;;  %v9455_v45 = vadd.f32 %v4985_v22, %v4967_v6  ;;  %v7783_v48 = vor.u32 %v8370_v1, %v7780_v8  ;;  %v8320_v10 = vld [vmem:[#allocation3 + $0x1044] sm:$0xf]  ;;  %v7580_v58 = vld [vmem:[#allocation3 + $0x1048] sm:$0xf0]  ;;  %v7775_v6 = vor.u32 %v8368_v26, %v7772_v32  ;;  %v7636_v11 = vld [vmem:[#allocation3 + $0x10b8] sm:$0xf0] }
 0x22f   :  { %v4931_v51 = vadd.f32 %v4930_v25, %v9440_v62  ;;  %v8352_v62 = vld [vmem:[#allocation3 + $0x1144] sm:$0xf]  ;;  %v7583_v17 = vor.u32 %v8320_v10, %v7580_v58  ;;  %v8318_v25 = vld [vmem:[#allocation3 + $0x1034] sm:$0xf]  ;;  %v7628_v8 = vld [vmem:[#allocation3 + $0x10a8] sm:$0xf0] }
 0x230   :  { %v7711_v46 = vor.u32 %v8352_v62, %v7708_v33  ;;  %v8314_v26 = vld [vmem:[#allocation3 + $0x1014] sm:$0xf]  ;;  %v7556_v32 = vld [vmem:[#allocation3 + $0x1018] sm:$0xf0] }
 0x231   :  { %5408 = vmatpush.bf16.msrb.mxu2 %v7735_v12  ;;  %5370 = vmatpush.bf16.msrb.mxu0 %v7607_v3  ;;  %v4950_v38 = vadd.f32 %v4949_v44, %v4931_v51  ;;  %v7644_v3 = vld [vmem:[#allocation3 + $0x10c8] sm:$0xf0]  ;;  %v7572_v44 = vld [vmem:[#allocation3 + $0x1038] sm:$0xf0] }
 0x232   :  { %5389 = vmatpush.bf16.msrb.mxu1 %v7671_v55  ;;  %5427 = vmatpush.bf16.msrb.mxu3 %v7799_v28  ;;  %v7647_v22 = vor.u32 %v8336_v50, %v7644_v3  ;;  %v7764_v51 = vld [vmem:[#allocation3 + $0x11b8] sm:$0xf0] }
 0x233   :  { %v4968_v34 = vpop.f32.mrf.mxu2  ;;  %v4987_v12 = vpop.f32.mrf.mxu3 }
 0x234   :  { %v4969_v55 = vadd.f32 %v4968_v34, %v4950_v38  ;;  %5302 = vmatmul.bf16.vlgmr.msra.gmra.mxu0 %v9202_v49  ;;  %5321 = vmatmul.bf16.vlgmr.msra.gmra.mxu1 %v9205_v57  ;;  %v7703_v49 = vor.u32 %v8350_v40, %v7700_v21  ;;  %v7575_v57 = vor.u32 %v8318_v25, %v7572_v44  ;;  %v8332_v38 = vld [vmem:[#allocation3 + $0x10a4] sm:$0xf]  ;;  %v8346_v34 = vld [vmem:[#allocation3 + $0x1114] sm:$0xf]  ;;  %v7676_v40 = vld [vmem:[#allocation3 + $0x1108] sm:$0xf0] }
 0x235   :  { %5409 = vmatpush.bf16.msrb.mxu2 %v7727_v16  ;;  %5371 = vmatpush.bf16.msrb.mxu0 %v7599_v60  ;;  %v5018_v39 = vpop.f32.mrf.mxu1  ;;  %v8334_v16 = vld [vmem:[#allocation3 + $0x10b4] sm:$0xf]  ;;  %v7631_v58 = vor.u32 %v8332_v38, %v7628_v8  ;;  %v8312_v44 = vld [vmem:[#allocation3 + $0x1004] sm:$0xf] }
 0x236   :  { %5390 = vmatpush.bf16.msrb.mxu1 %v7663_v29  ;;  %5428 = vmatpush.bf16.msrb.mxu3 %v7791_v35  ;;  %v4999_v28 = vpop.f32.mrf.mxu0  ;;  %v9460_v0 = vadd.f32 %v4987_v12, %v4969_v55  ;;  %v8348_v29 = vld [vmem:[#allocation3 + $0x1124] sm:$0xf]  ;;  %v7692_v35 = vld [vmem:[#allocation3 + $0x1128] sm:$0xf0]  ;;  %v7639_v30 = vor.u32 %v8334_v16, %v7636_v11  ;;  %v7684_v12 = vld [vmem:[#allocation3 + $0x1118] sm:$0xf0] }
 0x237   :  { %v5000_v20 = vadd.f32 %v4999_v28, %v9445_v5  ;;  %v8366_v5 = vld [vmem:[#allocation3 + $0x11b4] sm:$0xf]  ;;  %v7620_v28 = vld [vmem:[#allocation3 + $0x1098] sm:$0xf0]  ;;  %v7548_v16 = vld [vmem:[#allocation3 + $0x1008] sm:$0xf0] }
 0x238   :  { %5340 = vmatmul.bf16.vlgmr.msra.gmra.mxu2 %v9208_v13  ;;  %5359 = vmatmul.bf16.vlgmr.msra.gmra.mxu3 %v9211_v4  ;;  %v7767_v52 = vor.u32 %v8366_v5, %v7764_v51  ;;  %v7756_v13 = vld [vmem:[#allocation3 + $0x11a8] sm:$0xf0]  ;;  %v8330_v55 = vld [vmem:[#allocation3 + $0x1094] sm:$0xf] }
 0x239   :  { %5410 = vmatpush.bf16.msrb.mxu2 %v7719_v14  ;;  %5372 = vmatpush.bf16.msrb.mxu0 %v7591_v37  ;;  %v5019_v60 = vadd.f32 %v5018_v39, %v5000_v20  ;;  %v8364_v14 = vld [vmem:[#allocation3 + $0x11a4] sm:$0xf]  ;;  %v8362_v39 = vld [vmem:[#allocation3 + $0x1194] sm:$0xf]  ;;  %v7748_v20 = vld [vmem:[#allocation3 + $0x1198] sm:$0xf0] }
 0x23a   :  { %5391 = vmatpush.bf16.msrb.mxu1 %v7655_v59  ;;  %5429 = vmatpush.bf16.msrb.mxu3 %v7783_v48  ;;  %v7695_v59 = vor.u32 %v8348_v29, %v7692_v35  ;;  %v7567_v48 = vor.u32 %v8316_v56, %v7564_v47  ;;  %v7759_v50 = vor.u32 %v8364_v14, %v7756_v13  ;;  %v7740_v29 = vld [vmem:[#allocation3 + $0x1188] sm:$0xf0] }
 0x23b   :  { %v5037_v19 = vpop.f32.mrf.mxu2  ;;  %v5056_v1 = vpop.f32.mrf.mxu3  ;;  %v7751_v25 = vor.u32 %v8362_v39, %v7748_v20  ;;  %v7551_v56 = vor.u32 %v8312_v44, %v7548_v16 }
 0x23c   :  { %v5038_v37 = vadd.f32 %v5037_v19, %v5019_v60  ;;  %v8328_v60 = vld [vmem:[#allocation3 + $0x1084] sm:$0xf] }
 0x23d   :  { %5411 = vmatpush.bf16.msrb.mxu2 %v7711_v46  ;;  %5373 = vmatpush.bf16.msrb.mxu0 %v7583_v17  ;;  %v5020_v62 = vpop.f32.mrf.mxu1  ;;  %v7559_v46 = vor.u32 %v8314_v26, %v7556_v32  ;;  %v8344_v17 = vld [vmem:[#allocation3 + $0x1104] sm:$0xf] }
 0x23e   :  { %5392 = vmatpush.bf16.msrb.mxu1 %v7647_v22  ;;  %5430 = vmatpush.bf16.msrb.mxu3 %v7775_v6  ;;  %v5001_v4 = vpop.f32.mrf.mxu0  ;;  %v9465_v10 = vadd.f32 %v5056_v1, %v5038_v37  ;;  %v7623_v6 = vor.u32 %v8330_v55, %v7620_v28 }
 0x23f   :  { %v5002_v33 = vadd.f32 %v5001_v4, %v9450_v61  ;;  %v7687_v61 = vor.u32 %v8346_v34, %v7684_v12 }
 0x241   :  { %5412 = vmatpush.bf16.msrb.mxu2 %v7703_v49  ;;  %5374 = vmatpush.bf16.msrb.mxu0 %v7575_v57  ;;  %v5021_v3 = vadd.f32 %v5020_v62, %v5002_v33  ;;  %v7612_v49 = vld [vmem:[#allocation3 + $0x1088] sm:$0xf0]  ;;  %v8360_v57 = vld [vmem:[#allocation3 + $0x1184] sm:$0xf] }
 0x242   :  { %5393 = vmatpush.bf16.msrb.mxu1 %v7639_v30  ;;  %5431 = vmatpush.bf16.msrb.mxu3 %v7767_v52  ;;  %v7679_v52 = vor.u32 %v8344_v17, %v7676_v40  ;;  %v7615_v38 = vor.u32 %v8328_v60, %v7612_v49  ;;  %v7743_v19 = vor.u32 %v8360_v57, %v7740_v29 }
 0x243   :  { %v5039_v21 = vpop.f32.mrf.mxu2  ;;  %v5058_v22 = vpop.f32.mrf.mxu3 }
 0x244   :  { %v5040_v11 = vadd.f32 %v5039_v21, %v5021_v3  ;;  %5307 = vmatmul.bf16.gmra.mxu0 %v9240_v2  ;;  %5326 = vmatmul.bf16.gmra.mxu1 %v9243_v43 }
 0x245   :  { %5413 = vmatpush.bf16.msrb.mxu2 %v7695_v59  ;;  %5375 = vmatpush.bf16.msrb.mxu0 %v7567_v48  ;;  %v5023_v51 = vpop.f32.mrf.mxu1 }
 0x246   :  { %5394 = vmatpush.bf16.msrb.mxu1 %v7631_v58  ;;  %5432 = vmatpush.bf16.msrb.mxu3 %v7759_v50  ;;  %v5004_v5 = vpop.f32.mrf.mxu0  ;;  %v5059_v30 = vadd.f32 %v5058_v22, %v5040_v11 }
 0x247   :  { %v5005_v35 = vadd.f32 %v5004_v5, %v9455_v45 }
 0x248   :  { %5345 = vmatmul.bf16.gmra.mxu2 %v9249_v53  ;;  %5364 = vmatmul.bf16.gmra.mxu3 %v9252_v23 }
 0x249   :  { %5414 = vmatpush.bf16.msrb.mxu2 %v7687_v61  ;;  %5376 = vmatpush.bf16.msrb.mxu0 %v7559_v46  ;;  %v5024_v47 = vadd.f32 %v5023_v51, %v5005_v35 }
 0x24a   :  { %5395 = vmatpush.bf16.msrb.mxu1 %v7623_v6  ;;  %5433 = vmatpush.bf16.msrb.mxu3 %v7751_v25 }
 0x24b   :  { %v5042_v45 = vpop.f32.mrf.mxu2  ;;  %v5061_v2 = vpop.f32.mrf.mxu3 }
 0x24c   :  { %v5043_v43 = vadd.f32 %v5042_v45, %v5024_v47 }
 0x24d   :  { %5415 = vmatpush.bf16.msrb.mxu2 %v7679_v52  ;;  %5377 = vmatpush.bf16.msrb.mxu0 %v7551_v56  ;;  %v5025_v8 = vpop.f32.mrf.mxu1 }
 0x24e   :  { %5396 = vmatpush.bf16.msrb.mxu1 %v7615_v38  ;;  %5434 = vmatpush.bf16.msrb.mxu3 %v7743_v19  ;;  %v5006_v1 = vpop.f32.mrf.mxu0  ;;  %v5062_v13 = vadd.f32 %v5061_v2, %v5043_v43 }
 0x24f   :  { %v5007_v14 = vadd.f32 %v5006_v1, %v9460_v0 }
 0x251   :  { %v5026_v37 = vadd.f32 %v5025_v8, %v5007_v14 }
 0x253   :  { %v5044_v4 = vpop.f32.mrf.mxu2  ;;  %v5063_v62 = vpop.f32.mrf.mxu3 }
 0x254   :  { %v5045_v33 = vadd.f32 %v5044_v4, %v5026_v37  ;;  %5378 = vmatmul.bf16.vlgmr.msrb.gmra.mxu0 %v9264_v41  ;;  %5397 = vmatmul.bf16.vlgmr.msrb.gmra.mxu1 %v9269_v54 }
 0x255   :  { %v5094_v53 = vpop.f32.mrf.mxu1 }
 0x256   :  { %v5075_v59 = vpop.f32.mrf.mxu0  ;;  %v5064_v48 = vadd.f32 %v5063_v62, %v5045_v33 }
 0x257   :  { %v5076_v23 = vadd.f32 %v5075_v59, %v9465_v10 }
 0x258   :  { %5416 = vmatmul.bf16.vlgmr.msrb.gmra.mxu2 %v9274_v9  ;;  %5435 = vmatmul.bf16.vlgmr.msrb.gmra.mxu3 %v9279_v63 }
 0x259   :  { %v5095_v58 = vadd.f32 %v5094_v53, %v5076_v23 }
 0x25b   :  { %v5113_v0 = vpop.f32.mrf.mxu2  ;;  %v5132_v50 = vpop.f32.mrf.mxu3 }
 0x25c   :  { %v5114_v34 = vadd.f32 %v5113_v0, %v5095_v58 }
 0x25d   :  { %v5096_v3 = vpop.f32.mrf.mxu1 }
 0x25e   :  { %v5077_v12 = vpop.f32.mrf.mxu0  ;;  %v5133_v32 = vadd.f32 %v5132_v50, %v5114_v34 }
 0x25f   :  { %v5078_v26 = vadd.f32 %v5077_v12, %v5059_v30 }
 0x261   :  { %v5097_v55 = vadd.f32 %v5096_v3, %v5078_v26 }
 0x263   :  { %v5115_v28 = vpop.f32.mrf.mxu2  ;;  %v5134_v10 = vpop.f32.mrf.mxu3 }
 0x264   :  { %v5116_v39 = vadd.f32 %v5115_v28, %v5097_v55  ;;  %5383 = vmatmul.bf16.gmra.mxu0 %v9294_v18  ;;  %5402 = vmatmul.bf16.gmra.mxu1 %v9299_v15 }
 0x265   :  { %v5099_v20 = vpop.f32.mrf.mxu1 }
 0x266   :  { %v5080_v41 = vpop.f32.mrf.mxu0  ;;  %v5135_v9 = vadd.f32 %v5134_v10, %v5116_v39 }
 0x267   :  { %v5081_v54 = vadd.f32 %v5080_v41, %v5062_v13 }
 0x268   :  { %5421 = vmatmul.bf16.gmra.mxu2 %v9304_v7  ;;  %5440 = vmatmul.bf16.gmra.mxu3 %v9309_v27 }
 0x269   :  { %v5100_v63 = vadd.f32 %v5099_v20, %v5081_v54 }
 0x26b   :  { %v5118_v61 = vpop.f32.mrf.mxu2  ;;  %v5137_v46 = vpop.f32.mrf.mxu3 }
 0x26c   :  { %v5119_v17 = vadd.f32 %v5118_v61, %v5100_v63 }
 0x26d   :  { %v5101_v21 = vpop.f32.mrf.mxu1 }
 0x26e   :  { %v5082_v40 = vpop.f32.mrf.mxu0  ;;  %v5138_v6 = vadd.f32 %v5137_v46, %v5119_v17 }
 0x26f   :  { %v5083_v22 = vadd.f32 %v5082_v40, %v5064_v48 }
 0x271   :  { %v5102_v25 = vadd.f32 %v5101_v21, %v5083_v22 }
 0x273   :  { %v5120_v44 = vpop.f32.mrf.mxu2  ;;  %v5139_v16 = vpop.f32.mrf.mxu3 }
 0x274   :  { %v5121_v60 = vadd.f32 %v5120_v44, %v5102_v25 }
 0x275   :  { %v5170_v11 = vpop.f32.mrf.mxu1 }
 0x276   :  { %v5151_v18 = vpop.f32.mrf.mxu0  ;;  %v5140_v5 = vadd.f32 %v5139_v16, %v5121_v60 }
 0x277   :  { %v5152_v15 = vadd.f32 %v5151_v18, %v5133_v32 }
 0x279   :  { %v5171_v51 = vadd.f32 %v5170_v11, %v5152_v15 }
 0x27b   :  { %v5189_v49 = vpop.f32.mrf.mxu2  ;;  %v5208_v7 = vpop.f32.mrf.mxu3 }
 0x27c   :  { %v5190_v57 = vadd.f32 %v5189_v49, %v5171_v51 }
 0x27d   :  { %v5172_v29 = vpop.f32.mrf.mxu1 }
 0x27e   :  { %v5153_v27 = vpop.f32.mrf.mxu0  ;;  %v5209_v30 = vadd.f32 %v5208_v7, %v5190_v57 }
 0x27f   :  { %v5154_v35 = vadd.f32 %v5153_v27, %v5135_v9 }
 0x281   :  { %v5173_v52 = vadd.f32 %v5172_v29, %v5154_v35 }
 0x283   :  { %v5191_v56 = vpop.f32.mrf.mxu2  ;;  %v5210_v47 = vpop.f32.mrf.mxu3 }
 0x284   :  { %v5192_v38 = vadd.f32 %v5191_v56, %v5173_v52 }
 0x285   :  { %v5175_v45 = vpop.f32.mrf.mxu1 }
 0x286   :  { %v5156_v19 = vpop.f32.mrf.mxu0  ;;  %v5211_v43 = vadd.f32 %v5210_v47, %v5192_v38 }
 0x287   :  { %v5157_v2 = vadd.f32 %v5156_v19, %v5138_v6 }
 0x289   :  { %v5176_v1 = vadd.f32 %v5175_v45, %v5157_v2 }
 0x28b   :  { %v5194_v8 = vpop.f32.mrf.mxu2  ;;  %v5213_v14 = vpop.f32.mrf.mxu3 }
 0x28c   :  { %v5195_v13 = vadd.f32 %v5194_v8, %v5176_v1 }
 0x28d   :  { %v5177_v4 = vpop.f32.mrf.mxu1 }
 0x28e   :  { %v5158_v37 = vpop.f32.mrf.mxu0  ;;  %v5214_v33 = vadd.f32 %v5213_v14, %v5195_v13 }
 0x28f   :  { %v5159_v62 = vadd.f32 %v5158_v37, %v5140_v5 }
 0x291   :  { %v5178_v59 = vadd.f32 %v5177_v4, %v5159_v62 }
 0x293   :  { %v5196_v53 = vpop.f32.mrf.mxu2  ;;  %v5215_v23 = vpop.f32.mrf.mxu3 }
 0x294   :  { %v5197_v48 = vadd.f32 %v5196_v53, %v5178_v59 }
 0x295   :  { %v5246_v0 = vpop.f32.mrf.mxu1 }
 0x296   :  { %v5227_v58 = vpop.f32.mrf.mxu0  ;;  %v5216_v50 = vadd.f32 %v5215_v23, %v5197_v48 }
 0x297   :  { %v5228_v6 = vadd.f32 %v5227_v58, %v5209_v30 }
 0x299   :  { %v5247_v25 = vadd.f32 %v5246_v0, %v5228_v6 }
 0x29b   :  { %v5265_v34 = vpop.f32.mrf.mxu2  ;;  %v5284_v12 = vpop.f32.mrf.mxu3 }
 0x29c   :  { %v5266_v60 = vadd.f32 %v5265_v34, %v5247_v25 }
 0x29d   :  { %v5248_v26 = vpop.f32.mrf.mxu1 }
 0x29e   :  { %v5229_v3 = vpop.f32.mrf.mxu0  ;;  %v5285_v5 = vadd.f32 %v5284_v12, %v5266_v60 }
 0x29f   :  { %v5230_v15 = vadd.f32 %v5229_v3, %v5211_v43  ;;  %v5446_v43 = vld [vmem:[%s9515_s2] sm:$0x3] }
 0x2a0   :  { %v9485_v59 = vperm.slane %v5446_v43, 0 }
 0x2a1   :  { %v5249_v51 = vadd.f32 %v5248_v26, %v5230_v15 }
 0x2a2   :  { %v5452_v34 = vmul.f32 %v9485_v59, %v9389_v31 }
 0x2a3   :  { %v5267_v32 = vpop.f32.mrf.mxu2  ;;  %v5286_v55 = vpop.f32.mrf.mxu3 }
 0x2a4   :  { %v5268_v27 = vadd.f32 %v5267_v32, %v5249_v51 }
 0x2a5   :  { %v5251_v10 = vpop.f32.mrf.mxu1 }
 0x2a6   :  { %v5232_v28 = vpop.f32.mrf.mxu0  ;;  %v5287_v47 = vadd.f32 %v5286_v55, %v5268_v27 }
 0x2a7   :  { %v5233_v52 = vadd.f32 %v5232_v28, %v5214_v33  ;;  %v5460_v33 = vld [vmem:[#allocation5] sm:$0x3]  ;;  %v5449_v28 = vperm.slane %v5446_v43, 1 }
 0x2a8   :  { %v9489_v12 = vperm.slane %v5460_v33, 0 }
 0x2a9   :  { %v5252_v30 = vadd.f32 %v5251_v10, %v5233_v52 }
 0x2ab   :  { %v5270_v39 = vpop.f32.mrf.mxu2  ;;  %v5289_v41 = vpop.f32.mrf.mxu3 }
 0x2ac   :  { %v5271_v1 = vadd.f32 %v5270_v39, %v5252_v30 }
 0x2ad   :  { %v5253_v54 = vpop.f32.mrf.mxu1 }
 0x2ae   :  { %v5234_v20 = vpop.f32.mrf.mxu0  ;;  %v5290_v53 = vadd.f32 %v5289_v41, %v5271_v1  ;;  %v5463_v41 = vperm.slane %v5460_v33, 1 }
 0x2af   :  { %v5235_v37 = vadd.f32 %v5234_v20, %v5216_v50 }
 0x2b1   :  { %v5254_v48 = vadd.f32 %v5253_v54, %v5235_v37  ;;  %v5466_v54 = vadd.f32 %v9489_v12, %v5452_v34 }
 0x2b3   :  { %v5272_v9 = vpop.f32.mrf.mxu2  ;;  %v5291_v63 = vpop.f32.mrf.mxu3 }
 0x2b4   :  { %v5273_v32 = vadd.f32 %v5272_v9, %v5254_v48  ;;  %v5454_v9 = vmul.f32 %v9485_v59, %v9394_v24 }
 0x2b5   :  { %v5322_v46 = vpop.f32.mrf.mxu1 }
 0x2b6   :  { %v5303_v61 = vpop.f32.mrf.mxu0 }
 0x2b7   :  { %v5304_v49 = vadd.f32 %v5303_v61, %v5285_v5 }
 0x2b9   :  { %v5323_v56 = vadd.f32 %v5322_v46, %v5304_v49 }
 0x2bb   :  { %v5341_v17 = vpop.f32.mrf.mxu2  ;;  %v5360_v40 = vpop.f32.mrf.mxu3 }
 0x2bc   :  { %v5342_v38 = vadd.f32 %v5341_v17, %v5323_v56  ;;  %v5292_v17 = vadd.f32 %v5291_v63, %v5273_v32  ;;  %v5468_v63 = vadd.f32 %v9489_v12, %v5454_v9 }
 0x2bd   :  { %v5324_v22 = vpop.f32.mrf.mxu1 }
 0x2be   :  { %v5305_v21 = vpop.f32.mrf.mxu0  ;;  %v5361_v8 = vadd.f32 %v5360_v40, %v5342_v38 }
 0x2bf   :  { %v5306_v19 = vadd.f32 %v5305_v21, %v5287_v47  ;;  %v5476_v47 = vmax.f32 %v5468_v63, 0.0 }
 0x2c1   :  { %v5325_v4 = vadd.f32 %v5324_v22, %v5306_v19 }
 0x2c3   :  { %v5343_v44 = vpop.f32.mrf.mxu2  ;;  %v5362_v16 = vpop.f32.mrf.mxu3 }
 0x2c4   :  { %v5344_v23 = vadd.f32 %v5343_v44, %v5325_v4 }
 0x2c5   :  { %v5327_v11 = vpop.f32.mrf.mxu1 }
 0x2c6   :  { %v5308_v18 = vpop.f32.mrf.mxu0  ;;  %v5363_v55 = vadd.f32 %v5362_v16, %v5344_v23  ;;  %v5474_v16 = vmax.f32 %v5466_v54, 0.0 }
 0x2c7   :  { %v5309_v58 = vadd.f32 %v5308_v18, %v5290_v53 }
 0x2c9   :  { %v5328_v20 = vadd.f32 %v5327_v11, %v5309_v58 }
 0x2cb   :  { %v5346_v7 = vpop.f32.mrf.mxu2  ;;  %v5365_v57 = vpop.f32.mrf.mxu3 }
 0x2cc   :  { %v5347_v40 = vadd.f32 %v5346_v7, %v5328_v20 }
 0x2cd   :  { %v5329_v35 = vpop.f32.mrf.mxu1 }
 0x2ce   :  { %v5310_v29 = vpop.f32.mrf.mxu0  ;;  %v5366_v60 = vadd.f32 %v5365_v57, %v5347_v40 }
 0x2cf   :  { %v5311_v31 = vadd.f32 %v5310_v29, %v5292_v17 }
 0x2d1   :  { %v5330_v5 = vadd.f32 %v5329_v35, %v5311_v31  ;;  %v5456_v35 = vmul.f32 %v9485_v59, %v9399_v42  ;;  %v5458_v42 = vmul.f32 %v9485_v59, %v9403_v36 }
 0x2d3   :  { %v5348_v45 = vpop.f32.mrf.mxu2  ;;  %v5367_v2 = vpop.f32.mrf.mxu3 }
 0x2d4   :  { %v5349_v29 = vadd.f32 %v5348_v45, %v5330_v5 }
 0x2d5   :  { %v5398_v13 = vpop.f32.mrf.mxu1 }
 0x2d6   :  { %v5379_v14 = vpop.f32.mrf.mxu0  ;;  %v5368_v30 = vadd.f32 %v5367_v2, %v5349_v29 }
 0x2d7   :  { %v5380_v62 = vadd.f32 %v5379_v14, %v5361_v8 }
 0x2d9   :  { %v5399_v0 = vadd.f32 %v5398_v13, %v5380_v62  ;;  %v5470_v13 = vadd.f32 %v9489_v12, %v5456_v35 }
 0x2db   :  { %v5417_v3 = vpop.f32.mrf.mxu2  ;;  %v5436_v26 = vpop.f32.mrf.mxu3  ;;  %v5478_v23 = vmax.f32 %v5470_v13, 0.0 }
 0x2dc   :  { %v5418_v50 = vadd.f32 %v5417_v3, %v5399_v0  ;;  %v5472_v3 = vadd.f32 %v9489_v12, %v5458_v42 }
 0x2dd   :  { %v5400_v39 = vpop.f32.mrf.mxu1 }
 0x2de   :  { %v5381_v10 = vpop.f32.mrf.mxu0  ;;  %v5437_v61 = vadd.f32 %v5436_v26, %v5418_v50 }
 0x2df   :  { %v5382_v46 = vadd.f32 %v5381_v10, %v5363_v55  ;;  %v5480_v55 = vmax.f32 %v5472_v3, 0.0 }
 0x2e0   :  { %v5453_v21 = vmul.f32 %v5449_v28, %v5437_v61 }
 0x2e1   :  { %v5401_v6 = vadd.f32 %v5400_v39, %v5382_v46 }
 0x2e2   :  { %v5467_v22 = vadd.f32 %v5463_v41, %v5453_v21 }
 0x2e3   :  { %v5419_v25 = vpop.f32.mrf.mxu2  ;;  %v5438_v44 = vpop.f32.mrf.mxu3 }
 0x2e4   :  { %v5475_v18 = vmax.f32 %v5467_v22, 0.0  ;;  %v5420_v11 = vadd.f32 %v5419_v25, %v5401_v6 }
 0x2e5   :  { %v5403_v7 = vpop.f32.mrf.mxu1 }
 0x2e6   :  { %v5384_v15 = vpop.f32.mrf.mxu0  ;;  %v5482_v51 = vpack.c.bf16 %v5475_v18, %v5474_v16  ;;  %v5439_v49 = vadd.f32 %v5438_v44, %v5420_v11 }
 0x2e7   :  { %v5385_v27 = vadd.f32 %v5384_v15, %v5366_v60 }
 0x2e8   :  { %5486 = vst [vmem:[%s9517_s4] sm:$0xff] %v5482_v51  ;;  %v5455_v24 = vmul.f32 %v5449_v28, %v5439_v49 }
 0x2e9   :  { %v5404_v56 = vadd.f32 %v5403_v7, %v5385_v27 }
 0x2ea   :  { %v5469_v52 = vadd.f32 %v5463_v41, %v5455_v24 }
 0x2eb   :  { %v5422_v57 = vpop.f32.mrf.mxu2  ;;  %v5441_v38 = vpop.f32.mrf.mxu3 }
 0x2ec   :  { %v5477_v19 = vmax.f32 %v5469_v52, 0.0  ;;  %v5423_v43 = vadd.f32 %v5422_v57, %v5404_v56 }
 0x2ed   :  { %v5405_v4 = vpop.f32.mrf.mxu1 }
 0x2ee   :  { %v5386_v1 = vpop.f32.mrf.mxu0  ;;  %v5483_v8 = vpack.c.bf16 %v5477_v19, %v5476_v47  ;;  %v5442_v14 = vadd.f32 %v5441_v38, %v5423_v43 }
 0x2ef   :  { %v5387_v45 = vadd.f32 %v5386_v1, %v5368_v30 }
 0x2f0   :  { %5487 = vst [vmem:[%s9517_s4 + $0x8] sm:$0xff] %v5483_v8  ;;  %v5457_v37 = vmul.f32 %v5449_v28, %v5442_v14 }
 0x2f1   :  { %v5406_v33 = vadd.f32 %v5405_v4, %v5387_v45 }
 0x2f2   :  { %v5471_v62 = vadd.f32 %v5463_v41, %v5457_v37 }
 0x2f3   :  { %v5424_v53 = vpop.f32.mrf.mxu2  ;;  %v5443_v58 = vpop.f32.mrf.mxu3 }
 0x2f4   :  { %v5479_v2 = vmax.f32 %v5471_v62, 0.0  ;;  %v5425_v48 = vadd.f32 %v5424_v53, %v5406_v33 }
 0x2f6   :  { %v5484_v0 = vpack.c.bf16 %v5479_v2, %v5478_v23  ;;  %v5444_v34 = vadd.f32 %v5443_v58, %v5425_v48 }
 0x2f8   :  { %5488 = vst [vmem:[%s9517_s4 + $0x10] sm:$0xff] %v5484_v0  ;;  %v5459_v26 = vmul.f32 %v5449_v28, %v5444_v34 }
 0x2fa   :  { %v5473_v32 = vadd.f32 %v5463_v41, %v5459_v26 }
 0x2fc   :  { %v5481_v50 = vmax.f32 %v5473_v32, 0.0 }
 0x2fe   :  { %v5485_v10 = vpack.c.bf16 %v5481_v50, %v5480_v55 }
 0x300   :  { %5489 = vst [vmem:[%s9517_s4 + $0x18] sm:$0xff] %v5485_v10 }
 0x301   :  { %5494 = vsyncpa [#allocation4], 1 }
 0x302   :  { %5495 = vsyncpa [#allocation6], 1 }

</bundles_post_ra>
